<compile_context>
chip_gen: v7x
topology: tpu7x:2x2x1
jax: 0.10.0
libtpu: 0.0.40
codegen_flags: <defaults>
</compile_context>

<pallas_src>
import functools

import jax
import jax.numpy as jnp
import numpy as np
from jax import lax
from jax.experimental import pallas as pl
from jax.experimental.pallas import tpu as pltpu

BN_EPS = 1e-5
# f32 keeps the comparison against the HIGHEST-precision reference tight on all
# chips (v5e has no bf16 VPU).  On v6e/v7x flip to jnp.bfloat16 (and cast the
# canonical activations) to halve matmul-operand DMA/VMEM; accumulation stays
# f32 via preferred_element_type and bias/mask/muls stay f32.
MXU_DTYPE = jnp.float32
VMEM_LIMIT_BYTES = 32 * 1024 * 1024


def _round_up(n, m):
    return (n + m - 1) // m * m


# ----------------------------- canonical layout --------------------------------
@functools.lru_cache(maxsize=None)
def _border_mask_np(H, W):
    """(1, LC) f32: 1 on valid output lanes, 0 on padding borders / tail lanes."""
    Wp = W + 2
    body = (H + 2) * Wp
    lc = _round_up(body, 128)
    m = np.zeros((1, lc), np.float32)
    p = np.arange(body)
    r, c = p // Wp, p % Wp
    m[0, :body] = ((r >= 1) & (r <= H) & (c >= 1) & (c <= W)).astype(np.float32)
    return m


def to_canonical(x):
    """NCHW -> canonical flat layout (zero-padded image flattened, 128-multiple)."""
    B, C, H, W = x.shape
    body = (H + 2) * (W + 2)
    lc = _round_up(body, 128)
    xp = jnp.pad(x, ((0, 0), (0, 0), (1, 1), (1, 1))).reshape(B, C, body)
    return jnp.pad(xp, ((0, 0), (0, 0), (0, lc - body)))


def from_canonical(xc, H, W):
    """Canonical flat layout -> NCHW (final output only)."""
    B, C, _ = xc.shape
    Hp, Wp = H + 2, W + 2
    return xc[:, :, :Hp * Wp].reshape(B, C, Hp, Wp)[:, :, 1:H + 1, 1:W + 1]


# ------------------------ matmul-ified bilinear upsample -----------------------
@functools.lru_cache(maxsize=None)
def _interp_matrix_np(n_in, n_out):
    m = np.zeros((n_out, n_in), np.float32)
    if n_in == 1:
        m[:, 0] = 1.0
        return m
    pos = np.arange(n_out, dtype=np.float64) * (n_in - 1) / (n_out - 1)
    i0 = np.clip(np.floor(pos).astype(np.int64), 0, n_in - 1)
    i1 = np.clip(i0 + 1, 0, n_in - 1)
    f = pos - i0
    for r in range(n_out):
        m[r, i0[r]] += 1.0 - f[r]
        m[r, i1[r]] += f[r]
    return m


@functools.lru_cache(maxsize=None)
def _padded_interp_matrices_np(H, W):
    """Interp matrices acting on padded coords (zero border in, zero border out)."""
    Ho, Wo = 2 * H, 2 * W
    Rp = np.zeros((Ho + 2, H + 2), np.float32)
    Cp = np.zeros((Wo + 2, W + 2), np.float32)
    Rp[1:Ho + 1, 1:H + 1] = _interp_matrix_np(H, Ho)
    Cp[1:Wo + 1, 1:W + 1] = _interp_matrix_np(W, Wo)
    return Rp, Cp


def up2x_canonical(xc, H, W):
    """Bilinear x2 (align_corners=True), canonical(H,W) -> canonical(2H,2W).

    Separable interpolation as two small dense matmuls (MXU) instead of XLA
    gathers; the result is written straight into the canonical layout its
    consumer conv reads, so no extra re-layout pass is paid.
    """
    # TODO(synk): fuse these two matmuls into the consuming conv kernel so the
    # 4x-larger map never hits HBM at all.
    B, C, _ = xc.shape
    Hp, Wp = H + 2, W + 2
    body_o = (2 * H + 2) * (2 * W + 2)
    lc_o = _round_up(body_o, 128)
    Rp, Cp = _padded_interp_matrices_np(H, W)
    x4 = xc[:, :, :Hp * Wp].reshape(B, C, Hp, Wp)
    y = jnp.einsum("bchw,rh,sw->bcrs", x4, jnp.asarray(Rp), jnp.asarray(Cp),
                   precision=lax.Precision.HIGHEST)
    return jnp.pad(y.reshape(B, C, body_o), ((0, 0), (0, 0), (0, lc_o - body_o)))


# ------------------------------- Pallas kernel ---------------------------------
def _make_conv_kernel(shifts, group_cins, n_mul, lc):
    """One grid step = one (image, Cout-block): fused-im2col 3x3 conv + BN bias.

    The nine shifted taps of every split-K group are copied with static ref
    slices into one VMEM scratch (K, LC), K = 9*sum(Cin_g); a SINGLE big-K MXU
    matmul with f32 accumulation produces the whole (Cout, LC) tile; folded-BN
    bias, border masking and the neighbor-connection products are fused.
    """
    n_groups = len(group_cins)

    def kernel(*args):
        x_refs = args[:n_groups]
        w_ref = args[n_groups]
        b_ref = args[n_groups + 1]
        mask_ref = args[n_groups + 2]
        mul_refs = args[n_groups + 3:n_groups + 3 + n_mul]
        o_ref = args[n_groups + 3 + n_mul]
        stack_ref = args[n_groups + 4 + n_mul]

        # Assemble the big-K operand once per tile, streaming per-tap slices
        # straight from the input refs (the full (Cin, LC) tile is never
        # materialized as a single traced value).
        row = 0
        for g in range(n_groups):
            cin = group_cins[g]
            for s in shifts:
                if s >= 0:
                    n = lc - s
                    stack_ref[row:row + cin, 0:n] = (
                        x_refs[g][0, :, s:lc].astype(stack_ref.dtype))
                    if s:
                        stack_ref[row:row + cin, n:lc] = jnp.zeros(
                            (cin, s), stack_ref.dtype)
                else:
                    m = -s
                    stack_ref[row:row + cin, m:lc] = (
                        x_refs[g][0, :, 0:lc - m].astype(stack_ref.dtype))
                    stack_ref[row:row + cin, 0:m] = jnp.zeros(
                        (cin, m), stack_ref.dtype)
                row += cin

        # One lane-dense MXU matmul (K = 9*sum(Cin_g)), f32 accumulation.
        y = jnp.dot(w_ref[...], stack_ref[...],
                    preferred_element_type=jnp.float32)
        y = y + b_ref[...]                                 # folded eval-mode BN bias
        # Zero padding-border / tail lanes -> output IS the canonical layout the
        # next conv consumes directly (select, so stray non-finite lanes can't leak).
        y = jnp.where(mask_ref[...] > 0.5, y, 0.0)
        for m_ref in mul_refs:                             # fused neighbor products
            y = y * m_ref[0]
        o_ref[0] = y.astype(o_ref.dtype)

    return kernel


def _cout_block(batch, cout):
    """Cout-block size: guarantee >=2 parallel grid steps for v7x's two TCs."""
    if batch >= 2 or cout < 16:
        return cout
    best = cout
    for d in range(8, cout, 8):          # largest multiple-of-8 proper divisor
        if cout % d == 0:
            best = d
    return best


def conv3x3_canon(xs, w_cat, bias_col, H, W, muls=()):
    """Fused 3x3 conv + folded-BN bias (+ split-K groups + elementwise products).

    xs:       tuple of canonical (B, Cin_g, LC) inputs (split-K groups that
              replace the PyTorch channel concat)
    w_cat:    (Cout, 9*sum(Cin_g)) packed, BN-scale-folded weights
    bias_col: (Cout, 1) folded BN bias
    muls:     tuple of canonical (B, Cout, LC) multipliers (fused in-kernel)
    returns:  canonical (B, Cout, LC) f32
    """
    B = xs[0].shape[0]
    cout = w_cat.shape[0]
    group_cins = tuple(int(x.shape[1]) for x in xs)
    Wp = W + 2
    body = (H + 2) * Wp
    lc = _round_up(body, 128)
    ktot = 9 * sum(group_cins)
    assert w_cat.shape == (cout, ktot)
    for x in xs:
        assert x.shape[-1] == lc
    shifts = tuple((dh - 1) * Wp + (dw - 1) for dh in range(3) for dw in range(3))
    mask = jnp.asarray(_border_mask_np(H, W))
    cob = _cout_block(B, cout)
    n_cb = cout // cob

    kernel = _make_conv_kernel(shifts, group_cins, len(muls), lc)
    in_specs = (
        [pl.BlockSpec((1, c, lc), lambda b, cb: (b, 0, 0)) for c in group_cins]
        + [pl.BlockSpec((cob, ktot), lambda b, cb: (cb, 0)),
           pl.BlockSpec((cob, 1), lambda b, cb: (cb, 0)),
           pl.BlockSpec((1, lc), lambda b, cb: (0, 0))]
        + [pl.BlockSpec((1, cob, lc), lambda b, cb: (b, cb, 0)) for _ in muls])

    return pl.pallas_call(
        kernel,
        out_shape=jax.ShapeDtypeStruct((B, cout, lc), jnp.float32),
        grid=(B, n_cb),
        in_specs=in_specs,
        out_specs=pl.BlockSpec((1, cob, lc), lambda b, cb: (b, cb, 0)),
        scratch_shapes=[pltpu.VMEM((ktot, lc), MXU_DTYPE)],
        compiler_params=pltpu.CompilerParams(
            dimension_semantics=("parallel", "parallel"),
            vmem_limit_bytes=VMEM_LIMIT_BYTES),
    )(*xs, w_cat, bias_col, mask, *muls)


# ------------------------------- parameters ------------------------------------
def init_raw_params(key, channel):
    """Raw (PyTorch-equivalent, eval-mode-BN-folded) parameters."""

    def basic(k, cin, cout):
        kw, kg, kb, km, kv = jax.random.split(k, 5)
        w = 0.1 * jax.random.normal(kw, (3, 3, cin, cout), jnp.float32)  # HWIO
        gamma = 1.0 + 0.1 * jax.random.normal(kg, (cout,), jnp.float32)
        beta = 0.1 * jax.random.normal(kb, (cout,), jnp.float32)
        mean = 0.1 * jax.random.normal(km, (cout,), jnp.float32)
        var = 1.0 + 0.1 * jnp.abs(jax.random.normal(kv, (cout,), jnp.float32))
        scale = gamma / jnp.sqrt(var + BN_EPS)      # eval-mode BN folded
        bias = beta - mean * scale
        return (w, scale, bias)

    keys = jax.random.split(key, 10)
    return {
        "cu1": basic(keys[0], channel, channel),
        "cu2": basic(keys[1], channel, channel),
        "cu3": basic(keys[2], channel, channel),
        "cu4": basic(keys[3], channel, channel),
        "cu5": basic(keys[4], 2 * channel, 2 * channel),
        "cc2": basic(keys[5], 2 * channel, 2 * channel),
        "cc3": basic(keys[6], 3 * channel, 3 * channel),
        "c4": basic(keys[7], 3 * channel, 3 * channel),
        "c5_w": 0.1 * jax.random.normal(keys[8], (3 * channel, 1), jnp.float32),
        "c5_b": 0.1 * jax.random.normal(keys[9], (1,), jnp.float32),
    }


def _pack_weights(w_eff, group_sizes):
    """Scale-folded (3,3,Cin,Cout) HWIO -> (Cout, 9*sum(groups)).

    Column order matches the in-kernel stacking: split-K group outer, tap
    t = dh*3 + dw next, input channel innermost.
    """
    cout = w_eff.shape[-1]
    blocks, c0 = [], 0
    for g in group_sizes:
        wg = w_eff[:, :, c0:c0 + g, :]
        blocks.append(jnp.transpose(wg, (3, 0, 1, 2)).reshape(cout, 9 * g))
        c0 += g
    return jnp.concatenate(blocks, axis=1).astype(MXU_DTYPE)


def prep_kernel_params(raw, channel):
    """Fold BN scale into weights; fuse conv4+conv5; pack big-K weight matrices."""
    C = channel
    groups = {"cu1": (C,), "cu2": (C,), "cu3": (C,), "cu4": (C,), "cu5": (2 * C,),
              "cc2": (C, C), "cc3": (C, 2 * C)}
    kp = {}
    for name, gs in groups.items():
        w, scale, bias = raw[name]
        w_eff = w * scale[None, None, None, :]
        kp[name] = (_pack_weights(w_eff, gs),
                    bias.reshape(-1, 1).astype(jnp.float32))
    # conv4 (3x3, BN) o conv5 (1x1, bias): no nonlinearity between -> exact fuse.
    w4, s4, b4 = raw["c4"]
    w4_eff = w4 * s4[None, None, None, :]
    wf = jnp.einsum("hwio,ok->hwik", w4_eff, raw["c5_w"],
                    precision=lax.Precision.HIGHEST)
    bf = b4 @ raw["c5_w"] + raw["c5_b"]
    kp["c45"] = (_pack_weights(wf, (3 * C,)),
                 bf.reshape(-1, 1).astype(jnp.float32))
    return kp


# ----------------------------- decoder forward ---------------------------------
def ncd_forward(kp, x1, x2, x3):
    """x1: (B,C,H,W) coarsest, x2: 2x, x3: 4x — NCHW f32 in, NCHW f32 out."""
    B, C, H, W = x1.shape
    x1c = to_canonical(x1)
    x2c = to_canonical(x2)
    x3c = to_canonical(x3)
    x1u = up2x_canonical(x1c, H, W)                          # up(x1_1), reused twice
    # x2_1 = conv_upsample1(up(x1)) * x2                      (product fused in-kernel)
    x2_1 = conv3x3_canon((x1u,), *kp["cu1"], 2 * H, 2 * W, muls=(x2c,))
    # x3_1 = conv_upsample2(up(x2_1)) * conv_upsample3(up(x2)) * x3
    a = conv3x3_canon((up2x_canonical(x2_1, 2 * H, 2 * W),), *kp["cu2"],
                      4 * H, 4 * W)
    x3_1 = conv3x3_canon((up2x_canonical(x2c, 2 * H, 2 * W),), *kp["cu3"],
                         4 * H, 4 * W, muls=(a, x3c))
    # x2_2 = conv_concat2(cat(x2_1, conv_upsample4(up(x1_1))))  -- split-K, no concat
    b = conv3x3_canon((x1u,), *kp["cu4"], 2 * H, 2 * W)
    x2_2 = conv3x3_canon((x2_1, b), *kp["cc2"], 2 * H, 2 * W)
    # x3_2 = conv_concat3(cat(x3_1, conv_upsample5(up(x2_2)))) -- split-K, no concat
    c = conv3x3_canon((up2x_canonical(x2_2, 2 * H, 2 * W),), *kp["cu5"],
                      4 * H, 4 * W)
    x3_2 = conv3x3_canon((x3_1, c), *kp["cc3"], 4 * H, 4 * W)
    # out = conv5(conv4(x3_2)) -- algebraically fused single 3x3 conv, Cout=1.
    outc = conv3x3_canon((x3_2,), *kp["c45"], 4 * H, 4 * W)
    return from_canonical(outc, 4 * H, 4 * W)


# ---------------------------- pure-JAX reference --------------------------------
def upsample2x_bilinear_nchw(x):
    """NCHW bilinear x2 upsample, align_corners=True (matches nn.Upsample)."""
    B, C, H, W = x.shape
    Ho, Wo = 2 * H, 2 * W

    def coords(n_in, n_out):
        pos = jnp.arange(n_out, dtype=jnp.float32) * (n_in - 1) / (n_out - 1)
        i0 = jnp.clip(jnp.floor(pos).astype(jnp.int32), 0, n_in - 1)
        i1 = jnp.clip(i0 + 1, 0, n_in - 1)
        return i0, i1, pos - i0.astype(jnp.float32)

    r0, r1, fy = coords(H, Ho)
    c0, c1, fx = coords(W, Wo)
    rows = (x[:, :, r0, :] * (1.0 - fy)[None, None, :, None]
            + x[:, :, r1, :] * fy[None, None, :, None])
    out = (rows[:, :, :, c0] * (1.0 - fx)[None, None, None, :]
           + rows[:, :, :, c1] * fx[None, None, None, :])
    return out


def ref_conv(x, w, scale, bias, muls=()):
    y = lax.conv_general_dilated(
        x, w, window_strides=(1, 1), padding=((1, 1), (1, 1)),
        dimension_numbers=("NCHW", "HWIO", "NCHW"),
        precision=lax.Precision.HIGHEST)
    y = y * scale[None, :, None, None] + bias[None, :, None, None]
    for m in muls:
        y = y * m
    return y


def ref_forward(raw, x1, x2, x3):
    up = upsample2x_bilinear_nchw
    x1u = up(x1)
    x2_1 = ref_conv(x1u, *raw["cu1"], muls=(x2,))
    a = ref_conv(up(x2_1), *raw["cu2"])
    x3_1 = ref_conv(up(x2), *raw["cu3"], muls=(a, x3))
    b = ref_conv(x1u, *raw["cu4"])
    x2_2 = ref_conv(jnp.concatenate([x2_1, b], axis=1), *raw["cc2"])
    c = ref_conv(up(x2_2), *raw["cu5"])
    x3_2 = ref_conv(jnp.concatenate([x3_1, c], axis=1), *raw["cc3"])
    xx = ref_conv(x3_2, *raw["c4"])
    out = jnp.einsum("bchw,ck->bkhw", xx, raw["c5_w"],
                     precision=lax.Precision.HIGHEST)
    return out + raw["c5_b"][None, :, None, None]


# ------------------------------------ main --------------------------------------
if __name__ == "__main__":
    key = jax.random.PRNGKey(0)
    k_p, k1, k2, k3 = jax.random.split(key, 4)
    channel = 4
    B, H = 2, 8

    raw = init_raw_params(k_p, channel)
    kparams = prep_kernel_params(raw, channel)

    # PyTorch-style NCHW inputs (x1 coarsest, x3 finest).
    x1 = jax.random.normal(k1, (B, channel, H, H), jnp.float32)
    x2 = jax.random.normal(k2, (B, channel, 2 * H, 2 * H), jnp.float32)
    x3 = jax.random.normal(k3, (B, channel, 4 * H, 4 * H), jnp.float32)

    fwd = jax.jit(functools.partial(ncd_forward, kparams))
    out = jax.block_until_ready(fwd(x1, x2, x3))
    assert out.shape == (B, 1, 4 * H, 4 * H)

    ref = ref_forward(raw, x1, x2, x3)
    np.testing.assert_allclose(np.asarray(out), np.asarray(ref),
                               rtol=2e-2, atol=2e-2)
    print("KERNEL_OK")
</pallas_src>

<mosaic_0001>
module attributes {stable_mosaic.version = 11 : i64} {
  func.func @kernel(%arg0: i32, %arg1: i32, %arg2: memref<1x4x384xf32, #tpu.memory_space<vmem>>, %arg3: memref<4x36xf32, #tpu.memory_space<vmem>>, %arg4: memref<4x1xf32, #tpu.memory_space<vmem>>, %arg5: memref<1x384xf32, #tpu.memory_space<vmem>>, %arg6: memref<1x4x384xf32, #tpu.memory_space<vmem>>, %arg7: memref<1x4x384xf32, #tpu.memory_space<vmem>>, %arg8: memref<36x384xf32, #tpu.memory_space<vmem>>) attributes {dimension_semantics = [#tpu.dimension_semantics<parallel>, #tpu.dimension_semantics<parallel>], iteration_bounds = array<i64: 2, 1>, scalar_prefetch = 0 : i64, scratch_operands = 1 : i64, tpu.core_type = #tpu.core_type<tc>, window_params = [{transform_indices = @transform_0, window_bounds = array<i64: 1, 4, 384>}, {transform_indices = @transform_1, window_bounds = array<i64: 4, 36>}, {transform_indices = @transform_2, window_bounds = array<i64: 4, 1>}, {pipeline_mode = #tpu.pipeline_mode<synchronous>, transform_indices = @transform_3, window_bounds = array<i64: 1, 384>}, {transform_indices = @transform_4, window_bounds = array<i64: 1, 4, 384>}, {transform_indices = @transform_5, window_bounds = array<i64: 1, 4, 384>}]} {
    %c0 = arith.constant 0 : index
    %c0_0 = arith.constant 0 : index
    %c0_1 = arith.constant 0 : index
    %0 = vector.load %arg2[%c0, %c0_0, %c0_1] : memref<1x4x384xf32, #tpu.memory_space<vmem>>, vector<1x4x365xf32>
    %1 = vector.shape_cast %0 : vector<1x4x365xf32> to vector<4x365xf32>
    %c0_2 = arith.constant 0 : index
    %c19 = arith.constant 19 : index
    %2 = vector.load %arg8[%c0_2, %c19] : memref<36x384xf32, #tpu.memory_space<vmem>>, vector<4x365xf32>
    tpu.vector_store %arg8[%c0_2, %c19], %1 {strides = array<i32>} : memref<36x384xf32, #tpu.memory_space<vmem>>, vector<4x365xf32>,
    %cst = arith.constant 0.000000e+00 : f32
    %3 = vector.broadcast %cst : f32 to vector<4x19xf32>
    %c0_3 = arith.constant 0 : index
    %c0_4 = arith.constant 0 : index
    %4 = vector.load %arg8[%c0_3, %c0_4] : memref<36x384xf32, #tpu.memory_space<vmem>>, vector<4x19xf32>
    tpu.vector_store %arg8[%c0_3, %c0_4], %3 {strides = array<i32>} : memref<36x384xf32, #tpu.memory_space<vmem>>, vector<4x19xf32>,
    %c0_5 = arith.constant 0 : index
    %c0_6 = arith.constant 0 : index
    %c0_7 = arith.constant 0 : index
    %5 = vector.load %arg2[%c0_5, %c0_6, %c0_7] : memref<1x4x384xf32, #tpu.memory_space<vmem>>, vector<1x4x366xf32>
    %6 = vector.shape_cast %5 : vector<1x4x366xf32> to vector<4x366xf32>
    %c4 = arith.constant 4 : index
    %c18 = arith.constant 18 : index
    %7 = vector.load %arg8[%c4, %c18] : memref<36x384xf32, #tpu.memory_space<vmem>>, vector<4x366xf32>
    tpu.vector_store %arg8[%c4, %c18], %6 {strides = array<i32>} : memref<36x384xf32, #tpu.memory_space<vmem>>, vector<4x366xf32>,
    %cst_8 = arith.constant 0.000000e+00 : f32
    %8 = vector.broadcast %cst_8 : f32 to vector<4x18xf32>
    %c4_9 = arith.constant 4 : index
    %c0_10 = arith.constant 0 : index
    %9 = vector.load %arg8[%c4_9, %c0_10] : memref<36x384xf32, #tpu.memory_space<vmem>>, vector<4x18xf32>
    tpu.vector_store %arg8[%c4_9, %c0_10], %8 {strides = array<i32>} : memref<36x384xf32, #tpu.memory_space<vmem>>, vector<4x18xf32>,
    %c0_11 = arith.constant 0 : index
    %c0_12 = arith.constant 0 : index
    %c0_13 = arith.constant 0 : index
    %10 = vector.load %arg2[%c0_11, %c0_12, %c0_13] : memref<1x4x384xf32, #tpu.memory_space<vmem>>, vector<1x4x367xf32>
    %11 = vector.shape_cast %10 : vector<1x4x367xf32> to vector<4x367xf32>
    %c8 = arith.constant 8 : index
    %c17 = arith.constant 17 : index
    %12 = vector.load %arg8[%c8, %c17] : memref<36x384xf32, #tpu.memory_space<vmem>>, vector<4x367xf32>
    tpu.vector_store %arg8[%c8, %c17], %11 {strides = array<i32>} : memref<36x384xf32, #tpu.memory_space<vmem>>, vector<4x367xf32>,
    %cst_14 = arith.constant 0.000000e+00 : f32
    %13 = vector.broadcast %cst_14 : f32 to vector<4x17xf32>
    %c8_15 = arith.constant 8 : index
    %c0_16 = arith.constant 0 : index
    %14 = vector.load %arg8[%c8_15, %c0_16] : memref<36x384xf32, #tpu.memory_space<vmem>>, vector<4x17xf32>
    tpu.vector_store %arg8[%c8_15, %c0_16], %13 {strides = array<i32>} : memref<36x384xf32, #tpu.memory_space<vmem>>, vector<4x17xf32>,
    %c0_17 = arith.constant 0 : index
    %c0_18 = arith.constant 0 : index
    %c0_19 = arith.constant 0 : index
    %15 = vector.load %arg2[%c0_17, %c0_18, %c0_19] : memref<1x4x384xf32, #tpu.memory_space<vmem>>, vector<1x4x383xf32>
    %16 = vector.shape_cast %15 : vector<1x4x383xf32> to vector<4x383xf32>
    %c12 = arith.constant 12 : index
    %c1 = arith.constant 1 : index
    %17 = vector.load %arg8[%c12, %c1] : memref<36x384xf32, #tpu.memory_space<vmem>>, vector<4x383xf32>
    tpu.vector_store %arg8[%c12, %c1], %16 {strides = array<i32>} : memref<36x384xf32, #tpu.memory_space<vmem>>, vector<4x383xf32>,
    %cst_20 = arith.constant 0.000000e+00 : f32
    %18 = vector.broadcast %cst_20 : f32 to vector<4x1xf32>
    %c12_21 = arith.constant 12 : index
    %c0_22 = arith.constant 0 : index
    %19 = vector.load %arg8[%c12_21, %c0_22] : memref<36x384xf32, #tpu.memory_space<vmem>>, vector<4x1xf32>
    tpu.vector_store %arg8[%c12_21, %c0_22], %18 {strides = array<i32>} : memref<36x384xf32, #tpu.memory_space<vmem>>, vector<4x1xf32>,
    %c0_23 = arith.constant 0 : index
    %c0_24 = arith.constant 0 : index
    %c0_25 = arith.constant 0 : index
    %20 = vector.load %arg2[%c0_23, %c0_24, %c0_25] : memref<1x4x384xf32, #tpu.memory_space<vmem>>, vector<1x4x384xf32>
    %21 = vector.shape_cast %20 : vector<1x4x384xf32> to vector<4x384xf32>
    %c16 = arith.constant 16 : index
    %c0_26 = arith.constant 0 : index
    %22 = vector.load %arg8[%c16, %c0_26] : memref<36x384xf32, #tpu.memory_space<vmem>>, vector<4x384xf32>
    tpu.vector_store %arg8[%c16, %c0_26], %21 {strides = array<i32>} : memref<36x384xf32, #tpu.memory_space<vmem>>, vector<4x384xf32>,
    %c0_27 = arith.constant 0 : index
    %c0_28 = arith.constant 0 : index
    %c1_29 = arith.constant 1 : index
    %23 = vector.load %arg2[%c0_27, %c0_28, %c1_29] : memref<1x4x384xf32, #tpu.memory_space<vmem>>, vector<1x4x383xf32>
    %24 = vector.shape_cast %23 : vector<1x4x383xf32> to vector<4x383xf32>
    %c20 = arith.constant 20 : index
    %c0_30 = arith.constant 0 : index
    %25 = vector.load %arg8[%c20, %c0_30] : memref<36x384xf32, #tpu.memory_space<vmem>>, vector<4x383xf32>
    tpu.vector_store %arg8[%c20, %c0_30], %24 {strides = array<i32>} : memref<36x384xf32, #tpu.memory_space<vmem>>, vector<4x383xf32>,
    %cst_31 = arith.constant 0.000000e+00 : f32
    %26 = vector.broadcast %cst_31 : f32 to vector<4x1xf32>
    %c20_32 = arith.constant 20 : index
    %c383 = arith.constant 383 : index
    %27 = vector.load %arg8[%c20_32, %c383] : memref<36x384xf32, #tpu.memory_space<vmem>>, vector<4x1xf32>
    tpu.vector_store %arg8[%c20_32, %c383], %26 {strides = array<i32>} : memref<36x384xf32, #tpu.memory_space<vmem>>, vector<4x1xf32>,
    %c0_33 = arith.constant 0 : index
    %c0_34 = arith.constant 0 : index
    %c17_35 = arith.constant 17 : index
    %28 = vector.load %arg2[%c0_33, %c0_34, %c17_35] : memref<1x4x384xf32, #tpu.memory_space<vmem>>, vector<1x4x367xf32>
    %29 = vector.shape_cast %28 : vector<1x4x367xf32> to vector<4x367xf32>
    %c24 = arith.constant 24 : index
    %c0_36 = arith.constant 0 : index
    %30 = vector.load %arg8[%c24, %c0_36] : memref<36x384xf32, #tpu.memory_space<vmem>>, vector<4x367xf32>
    tpu.vector_store %arg8[%c24, %c0_36], %29 {strides = array<i32>} : memref<36x384xf32, #tpu.memory_space<vmem>>, vector<4x367xf32>,
    %cst_37 = arith.constant 0.000000e+00 : f32
    %31 = vector.broadcast %cst_37 : f32 to vector<4x17xf32>
    %c24_38 = arith.constant 24 : index
    %c367 = arith.constant 367 : index
    %32 = vector.load %arg8[%c24_38, %c367] : memref<36x384xf32, #tpu.memory_space<vmem>>, vector<4x17xf32>
    tpu.vector_store %arg8[%c24_38, %c367], %31 {strides = array<i32>} : memref<36x384xf32, #tpu.memory_space<vmem>>, vector<4x17xf32>,
    %c0_39 = arith.constant 0 : index
    %c0_40 = arith.constant 0 : index
    %c18_41 = arith.constant 18 : index
    %33 = vector.load %arg2[%c0_39, %c0_40, %c18_41] : memref<1x4x384xf32, #tpu.memory_space<vmem>>, vector<1x4x366xf32>
    %34 = vector.shape_cast %33 : vector<1x4x366xf32> to vector<4x366xf32>
    %c28 = arith.constant 28 : index
    %c0_42 = arith.constant 0 : index
    %35 = vector.load %arg8[%c28, %c0_42] : memref<36x384xf32, #tpu.memory_space<vmem>>, vector<4x366xf32>
    tpu.vector_store %arg8[%c28, %c0_42], %34 {strides = array<i32>} : memref<36x384xf32, #tpu.memory_space<vmem>>, vector<4x366xf32>,
    %cst_43 = arith.constant 0.000000e+00 : f32
    %36 = vector.broadcast %cst_43 : f32 to vector<4x18xf32>
    %c28_44 = arith.constant 28 : index
    %c366 = arith.constant 366 : index
    %37 = vector.load %arg8[%c28_44, %c366] : memref<36x384xf32, #tpu.memory_space<vmem>>, vector<4x18xf32>
    tpu.vector_store %arg8[%c28_44, %c366], %36 {strides = array<i32>} : memref<36x384xf32, #tpu.memory_space<vmem>>, vector<4x18xf32>,
    %c0_45 = arith.constant 0 : index
    %c0_46 = arith.constant 0 : index
    %c19_47 = arith.constant 19 : index
    %38 = vector.load %arg2[%c0_45, %c0_46, %c19_47] : memref<1x4x384xf32, #tpu.memory_space<vmem>>, vector<1x4x365xf32>
    %39 = vector.shape_cast %38 : vector<1x4x365xf32> to vector<4x365xf32>
    %c32 = arith.constant 32 : index
    %c0_48 = arith.constant 0 : index
    %40 = vector.load %arg8[%c32, %c0_48] : memref<36x384xf32, #tpu.memory_space<vmem>>, vector<4x365xf32>
    tpu.vector_store %arg8[%c32, %c0_48], %39 {strides = array<i32>} : memref<36x384xf32, #tpu.memory_space<vmem>>, vector<4x365xf32>,
    %cst_49 = arith.constant 0.000000e+00 : f32
    %41 = vector.broadcast %cst_49 : f32 to vector<4x19xf32>
    %c32_50 = arith.constant 32 : index
    %c365 = arith.constant 365 : index
    %42 = vector.load %arg8[%c32_50, %c365] : memref<36x384xf32, #tpu.memory_space<vmem>>, vector<4x19xf32>
    tpu.vector_store %arg8[%c32_50, %c365], %41 {strides = array<i32>} : memref<36x384xf32, #tpu.memory_space<vmem>>, vector<4x19xf32>,
    %c0_51 = arith.constant 0 : index
    %c0_52 = arith.constant 0 : index
    %43 = vector.load %arg3[%c0_51, %c0_52] : memref<4x36xf32, #tpu.memory_space<vmem>>, vector<4x36xf32>
    %c0_53 = arith.constant 0 : index
    %c0_54 = arith.constant 0 : index
    %44 = vector.load %arg8[%c0_53, %c0_54] : memref<36x384xf32, #tpu.memory_space<vmem>>, vector<36x384xf32>
    %cst_55 = arith.constant dense<0.000000e+00> : vector<4x384xf32>
    %45 = tpu.matmul %43, %44, %cst_55 {dimension_numbers = #tpu.dot_dimension_numbers<[1], [0], [0], [1], [0, 0, 1, 1], [], []>} : vector<4x36xf32>, vector<36x384xf32>, vector<4x384xf32> -> vector<4x384xf32>
    %c0_56 = arith.constant 0 : index
    %c0_57 = arith.constant 0 : index
    %46 = vector.load %arg4[%c0_56, %c0_57] : memref<4x1xf32, #tpu.memory_space<vmem>>, vector<4x1xf32>
    %47 = vector.broadcast %46 : vector<4x1xf32> to vector<4x384xf32>
    %48 = arith.addf %45, %47 : vector<4x384xf32>
    %c0_58 = arith.constant 0 : index
    %c0_59 = arith.constant 0 : index
    %49 = vector.load %arg5[%c0_58, %c0_59] : memref<1x384xf32, #tpu.memory_space<vmem>>, vector<1x384xf32>
    %cst_60 = arith.constant 5.000000e-01 : f32
    %50 = vector.broadcast %cst_60 : f32 to vector<1x384xf32>
    %51 = arith.cmpf ogt, %49, %50 : vector<1x384xf32>
    %cst_61 = arith.constant 0.000000e+00 : f32
    %52 = vector.shape_cast %51 : vector<1x384xi1> to vector<1x384xi1>
    %53 = vector.broadcast %52 : vector<1x384xi1> to vector<4x384xi1>
    %54 = vector.broadcast %cst_61 : f32 to vector<4x384xf32>
    %55 = arith.select %53, %48, %54 : vector<4x384xi1>, vector<4x384xf32>
    %c0_62 = arith.constant 0 : index
    %c0_63 = arith.constant 0 : index
    %c0_64 = arith.constant 0 : index
    %56 = vector.load %arg6[%c0_62, %c0_63, %c0_64] : memref<1x4x384xf32, #tpu.memory_space<vmem>>, vector<1x4x384xf32>
    %57 = vector.shape_cast %56 : vector<1x4x384xf32> to vector<4x384xf32>
    %58 = arith.mulf %55, %57 : vector<4x384xf32>
    %c0_65 = arith.constant 0 : index
    %c0_66 = arith.constant 0 : index
    %c0_67 = arith.constant 0 : index
    %59 = vector.load %arg7[%c0_65, %c0_66, %c0_67] : memref<1x4x384xf32, #tpu.memory_space<vmem>>, vector<1x4x384xf32>
    %60 = vector.shape_cast %59 : vector<1x4x384xf32> to vector<4x384xf32>
    %61 = vector.shape_cast %58 : vector<4x384xf32> to vector<1x4x384xf32>
    tpu.vector_store %arg7[%c0_65, %c0_66, %c0_67], %61 {strides = array<i32>} : memref<1x4x384xf32, #tpu.memory_space<vmem>>, vector<1x4x384xf32>,
    return
  }
  func.func @transform_0(%arg0: i32, %arg1: i32) -> (i32, i32, i32) {
    %c0_i32 = arith.constant 0 : i32
    %c0_i32_0 = arith.constant 0 : i32
    %c0_i32_1 = arith.constant 0 : i32
    return %arg0, %c0_i32, %c0_i32_0 : i32, i32, i32
  }
  func.func @transform_1(%arg0: i32, %arg1: i32) -> (i32, i32) {
    %c0_i32 = arith.constant 0 : i32
    %c0_i32_0 = arith.constant 0 : i32
    return %arg1, %c0_i32 : i32, i32
  }
  func.func @transform_2(%arg0: i32, %arg1: i32) -> (i32, i32) {
    %c0_i32 = arith.constant 0 : i32
    %c0_i32_0 = arith.constant 0 : i32
    return %arg1, %c0_i32 : i32, i32
  }
  func.func @transform_3(%arg0: i32, %arg1: i32) -> (i32, i32) {
    %c0_i32 = arith.constant 0 : i32
    %c0_i32_0 = arith.constant 0 : i32
    %c0_i32_1 = arith.constant 0 : i32
    return %c0_i32, %c0_i32_0 : i32, i32
  }
  func.func @transform_4(%arg0: i32, %arg1: i32) -> (i32, i32, i32) {
    %c0_i32 = arith.constant 0 : i32
    %c0_i32_0 = arith.constant 0 : i32
    return %arg0, %arg1, %c0_i32 : i32, i32, i32
  }
  func.func @transform_5(%arg0: i32, %arg1: i32) -> (i32, i32, i32) {
    %c0_i32 = arith.constant 0 : i32
    %c0_i32_0 = arith.constant 0 : i32
    return %arg0, %arg1, %c0_i32 : i32, i32, i32
  }
}

module attributes {stable_mosaic.version = 11 : i64} {
  func.func @kernel(%arg0: i32, %arg1: i32, %arg2: memref<1x4x384xf32, #tpu.memory_space<vmem>>, %arg3: memref<4x36xf32, #tpu.memory_space<vmem>>, %arg4: memref<4x1xf32, #tpu.memory_space<vmem>>, %arg5: memref<1x384xf32, #tpu.memory_space<vmem>>, %arg6: memref<1x4x384xf32, #tpu.memory_space<vmem>>, %arg7: memref<36x384xf32, #tpu.memory_space<vmem>>) attributes {dimension_semantics = [#tpu.dimension_semantics<parallel>, #tpu.dimension_semantics<parallel>], iteration_bounds = array<i64: 2, 1>, scalar_prefetch = 0 : i64, scratch_operands = 1 : i64, tpu.core_type = #tpu.core_type<tc>, window_params = [{transform_indices = @transform_0, window_bounds = array<i64: 1, 4, 384>}, {transform_indices = @transform_1, window_bounds = array<i64: 4, 36>}, {transform_indices = @transform_2, window_bounds = array<i64: 4, 1>}, {pipeline_mode = #tpu.pipeline_mode<synchronous>, transform_indices = @transform_3, window_bounds = array<i64: 1, 384>}, {transform_indices = @transform_4, window_bounds = array<i64: 1, 4, 384>}]} {
    %c0 = arith.constant 0 : index
    %c0_0 = arith.constant 0 : index
    %c0_1 = arith.constant 0 : index
    %0 = vector.load %arg2[%c0, %c0_0, %c0_1] : memref<1x4x384xf32, #tpu.memory_space<vmem>>, vector<1x4x365xf32>
    %1 = vector.shape_cast %0 : vector<1x4x365xf32> to vector<4x365xf32>
    %c0_2 = arith.constant 0 : index
    %c19 = arith.constant 19 : index
    %2 = vector.load %arg7[%c0_2, %c19] : memref<36x384xf32, #tpu.memory_space<vmem>>, vector<4x365xf32>
    tpu.vector_store %arg7[%c0_2, %c19], %1 {strides = array<i32>} : memref<36x384xf32, #tpu.memory_space<vmem>>, vector<4x365xf32>,
    %cst = arith.constant 0.000000e+00 : f32
    %3 = vector.broadcast %cst : f32 to vector<4x19xf32>
    %c0_3 = arith.constant 0 : index
    %c0_4 = arith.constant 0 : index
    %4 = vector.load %arg7[%c0_3, %c0_4] : memref<36x384xf32, #tpu.memory_space<vmem>>, vector<4x19xf32>
    tpu.vector_store %arg7[%c0_3, %c0_4], %3 {strides = array<i32>} : memref<36x384xf32, #tpu.memory_space<vmem>>, vector<4x19xf32>,
    %c0_5 = arith.constant 0 : index
    %c0_6 = arith.constant 0 : index
    %c0_7 = arith.constant 0 : index
    %5 = vector.load %arg2[%c0_5, %c0_6, %c0_7] : memref<1x4x384xf32, #tpu.memory_space<vmem>>, vector<1x4x366xf32>
    %6 = vector.shape_cast %5 : vector<1x4x366xf32> to vector<4x366xf32>
    %c4 = arith.constant 4 : index
    %c18 = arith.constant 18 : index
    %7 = vector.load %arg7[%c4, %c18] : memref<36x384xf32, #tpu.memory_space<vmem>>, vector<4x366xf32>
    tpu.vector_store %arg7[%c4, %c18], %6 {strides = array<i32>} : memref<36x384xf32, #tpu.memory_space<vmem>>, vector<4x366xf32>,
    %cst_8 = arith.constant 0.000000e+00 : f32
    %8 = vector.broadcast %cst_8 : f32 to vector<4x18xf32>
    %c4_9 = arith.constant 4 : index
    %c0_10 = arith.constant 0 : index
    %9 = vector.load %arg7[%c4_9, %c0_10] : memref<36x384xf32, #tpu.memory_space<vmem>>, vector<4x18xf32>
    tpu.vector_store %arg7[%c4_9, %c0_10], %8 {strides = array<i32>} : memref<36x384xf32, #tpu.memory_space<vmem>>, vector<4x18xf32>,
    %c0_11 = arith.constant 0 : index
    %c0_12 = arith.constant 0 : index
    %c0_13 = arith.constant 0 : index
    %10 = vector.load %arg2[%c0_11, %c0_12, %c0_13] : memref<1x4x384xf32, #tpu.memory_space<vmem>>, vector<1x4x367xf32>
    %11 = vector.shape_cast %10 : vector<1x4x367xf32> to vector<4x367xf32>
    %c8 = arith.constant 8 : index
    %c17 = arith.constant 17 : index
    %12 = vector.load %arg7[%c8, %c17] : memref<36x384xf32, #tpu.memory_space<vmem>>, vector<4x367xf32>
    tpu.vector_store %arg7[%c8, %c17], %11 {strides = array<i32>} : memref<36x384xf32, #tpu.memory_space<vmem>>, vector<4x367xf32>,
    %cst_14 = arith.constant 0.000000e+00 : f32
    %13 = vector.broadcast %cst_14 : f32 to vector<4x17xf32>
    %c8_15 = arith.constant 8 : index
    %c0_16 = arith.constant 0 : index
    %14 = vector.load %arg7[%c8_15, %c0_16] : memref<36x384xf32, #tpu.memory_space<vmem>>, vector<4x17xf32>
    tpu.vector_store %arg7[%c8_15, %c0_16], %13 {strides = array<i32>} : memref<36x384xf32, #tpu.memory_space<vmem>>, vector<4x17xf32>,
    %c0_17 = arith.constant 0 : index
    %c0_18 = arith.constant 0 : index
    %c0_19 = arith.constant 0 : index
    %15 = vector.load %arg2[%c0_17, %c0_18, %c0_19] : memref<1x4x384xf32, #tpu.memory_space<vmem>>, vector<1x4x383xf32>
    %16 = vector.shape_cast %15 : vector<1x4x383xf32> to vector<4x383xf32>
    %c12 = arith.constant 12 : index
    %c1 = arith.constant 1 : index
    %17 = vector.load %arg7[%c12, %c1] : memref<36x384xf32, #tpu.memory_space<vmem>>, vector<4x383xf32>
    tpu.vector_store %arg7[%c12, %c1], %16 {strides = array<i32>} : memref<36x384xf32, #tpu.memory_space<vmem>>, vector<4x383xf32>,
    %cst_20 = arith.constant 0.000000e+00 : f32
    %18 = vector.broadcast %cst_20 : f32 to vector<4x1xf32>
    %c12_21 = arith.constant 12 : index
    %c0_22 = arith.constant 0 : index
    %19 = vector.load %arg7[%c12_21, %c0_22] : memref<36x384xf32, #tpu.memory_space<vmem>>, vector<4x1xf32>
    tpu.vector_store %arg7[%c12_21, %c0_22], %18 {strides = array<i32>} : memref<36x384xf32, #tpu.memory_space<vmem>>, vector<4x1xf32>,
    %c0_23 = arith.constant 0 : index
    %c0_24 = arith.constant 0 : index
    %c0_25 = arith.constant 0 : index
    %20 = vector.load %arg2[%c0_23, %c0_24, %c0_25] : memref<1x4x384xf32, #tpu.memory_space<vmem>>, vector<1x4x384xf32>
    %21 = vector.shape_cast %20 : vector<1x4x384xf32> to vector<4x384xf32>
    %c16 = arith.constant 16 : index
    %c0_26 = arith.constant 0 : index
    %22 = vector.load %arg7[%c16, %c0_26] : memref<36x384xf32, #tpu.memory_space<vmem>>, vector<4x384xf32>
    tpu.vector_store %arg7[%c16, %c0_26], %21 {strides = array<i32>} : memref<36x384xf32, #tpu.memory_space<vmem>>, vector<4x384xf32>,
    %c0_27 = arith.constant 0 : index
    %c0_28 = arith.constant 0 : index
    %c1_29 = arith.constant 1 : index
    %23 = vector.load %arg2[%c0_27, %c0_28, %c1_29] : memref<1x4x384xf32, #tpu.memory_space<vmem>>, vector<1x4x383xf32>
    %24 = vector.shape_cast %23 : vector<1x4x383xf32> to vector<4x383xf32>
    %c20 = arith.constant 20 : index
    %c0_30 = arith.constant 0 : index
    %25 = vector.load %arg7[%c20, %c0_30] : memref<36x384xf32, #tpu.memory_space<vmem>>, vector<4x383xf32>
    tpu.vector_store %arg7[%c20, %c0_30], %24 {strides = array<i32>} : memref<36x384xf32, #tpu.memory_space<vmem>>, vector<4x383xf32>,
    %cst_31 = arith.constant 0.000000e+00 : f32
    %26 = vector.broadcast %cst_31 : f32 to vector<4x1xf32>
    %c20_32 = arith.constant 20 : index
    %c383 = arith.constant 383 : index
    %27 = vector.load %arg7[%c20_32, %c383] : memref<36x384xf32, #tpu.memory_space<vmem>>, vector<4x1xf32>
    tpu.vector_store %arg7[%c20_32, %c383], %26 {strides = array<i32>} : memref<36x384xf32, #tpu.memory_space<vmem>>, vector<4x1xf32>,
    %c0_33 = arith.constant 0 : index
    %c0_34 = arith.constant 0 : index
    %c17_35 = arith.constant 17 : index
    %28 = vector.load %arg2[%c0_33, %c0_34, %c17_35] : memref<1x4x384xf32, #tpu.memory_space<vmem>>, vector<1x4x367xf32>
    %29 = vector.shape_cast %28 : vector<1x4x367xf32> to vector<4x367xf32>
    %c24 = arith.constant 24 : index
    %c0_36 = arith.constant 0 : index
    %30 = vector.load %arg7[%c24, %c0_36] : memref<36x384xf32, #tpu.memory_space<vmem>>, vector<4x367xf32>
    tpu.vector_store %arg7[%c24, %c0_36], %29 {strides = array<i32>} : memref<36x384xf32, #tpu.memory_space<vmem>>, vector<4x367xf32>,
    %cst_37 = arith.constant 0.000000e+00 : f32
    %31 = vector.broadcast %cst_37 : f32 to vector<4x17xf32>
    %c24_38 = arith.constant 24 : index
    %c367 = arith.constant 367 : index
    %32 = vector.load %arg7[%c24_38, %c367] : memref<36x384xf32, #tpu.memory_space<vmem>>, vector<4x17xf32>
    tpu.vector_store %arg7[%c24_38, %c367], %31 {strides = array<i32>} : memref<36x384xf32, #tpu.memory_space<vmem>>, vector<4x17xf32>,
    %c0_39 = arith.constant 0 : index
    %c0_40 = arith.constant 0 : index
    %c18_41 = arith.constant 18 : index
    %33 = vector.load %arg2[%c0_39, %c0_40, %c18_41] : memref<1x4x384xf32, #tpu.memory_space<vmem>>, vector<1x4x366xf32>
    %34 = vector.shape_cast %33 : vector<1x4x366xf32> to vector<4x366xf32>
    %c28 = arith.constant 28 : index
    %c0_42 = arith.constant 0 : index
    %35 = vector.load %arg7[%c28, %c0_42] : memref<36x384xf32, #tpu.memory_space<vmem>>, vector<4x366xf32>
    tpu.vector_store %arg7[%c28, %c0_42], %34 {strides = array<i32>} : memref<36x384xf32, #tpu.memory_space<vmem>>, vector<4x366xf32>,
    %cst_43 = arith.constant 0.000000e+00 : f32
    %36 = vector.broadcast %cst_43 : f32 to vector<4x18xf32>
    %c28_44 = arith.constant 28 : index
    %c366 = arith.constant 366 : index
    %37 = vector.load %arg7[%c28_44, %c366] : memref<36x384xf32, #tpu.memory_space<vmem>>, vector<4x18xf32>
    tpu.vector_store %arg7[%c28_44, %c366], %36 {strides = array<i32>} : memref<36x384xf32, #tpu.memory_space<vmem>>, vector<4x18xf32>,
    %c0_45 = arith.constant 0 : index
    %c0_46 = arith.constant 0 : index
    %c19_47 = arith.constant 19 : index
    %38 = vector.load %arg2[%c0_45, %c0_46, %c19_47] : memref<1x4x384xf32, #tpu.memory_space<vmem>>, vector<1x4x365xf32>
    %39 = vector.shape_cast %38 : vector<1x4x365xf32> to vector<4x365xf32>
    %c32 = arith.constant 32 : index
    %c0_48 = arith.constant 0 : index
    %40 = vector.load %arg7[%c32, %c0_48] : memref<36x384xf32, #tpu.memory_space<vmem>>, vector<4x365xf32>
    tpu.vector_store %arg7[%c32, %c0_48], %39 {strides = array<i32>} : memref<36x384xf32, #tpu.memory_space<vmem>>, vector<4x365xf32>,
    %cst_49 = arith.constant 0.000000e+00 : f32
    %41 = vector.broadcast %cst_49 : f32 to vector<4x19xf32>
    %c32_50 = arith.constant 32 : index
    %c365 = arith.constant 365 : index
    %42 = vector.load %arg7[%c32_50, %c365] : memref<36x384xf32, #tpu.memory_space<vmem>>, vector<4x19xf32>
    tpu.vector_store %arg7[%c32_50, %c365], %41 {strides = array<i32>} : memref<36x384xf32, #tpu.memory_space<vmem>>, vector<4x19xf32>,
    %c0_51 = arith.constant 0 : index
    %c0_52 = arith.constant 0 : index
    %43 = vector.load %arg3[%c0_51, %c0_52] : memref<4x36xf32, #tpu.memory_space<vmem>>, vector<4x36xf32>
    %c0_53 = arith.constant 0 : index
    %c0_54 = arith.constant 0 : index
    %44 = vector.load %arg7[%c0_53, %c0_54] : memref<36x384xf32, #tpu.memory_space<vmem>>, vector<36x384xf32>
    %cst_55 = arith.constant dense<0.000000e+00> : vector<4x384xf32>
    %45 = tpu.matmul %43, %44, %cst_55 {dimension_numbers = #tpu.dot_dimension_numbers<[1], [0], [0], [1], [0, 0, 1, 1], [], []>} : vector<4x36xf32>, vector<36x384xf32>, vector<4x384xf32> -> vector<4x384xf32>
    %c0_56 = arith.constant 0 : index
    %c0_57 = arith.constant 0 : index
    %46 = vector.load %arg4[%c0_56, %c0_57] : memref<4x1xf32, #tpu.memory_space<vmem>>, vector<4x1xf32>
    %47 = vector.broadcast %46 : vector<4x1xf32> to vector<4x384xf32>
    %48 = arith.addf %45, %47 : vector<4x384xf32>
    %c0_58 = arith.constant 0 : index
    %c0_59 = arith.constant 0 : index
    %49 = vector.load %arg5[%c0_58, %c0_59] : memref<1x384xf32, #tpu.memory_space<vmem>>, vector<1x384xf32>
    %cst_60 = arith.constant 5.000000e-01 : f32
    %50 = vector.broadcast %cst_60 : f32 to vector<1x384xf32>
    %51 = arith.cmpf ogt, %49, %50 : vector<1x384xf32>
    %cst_61 = arith.constant 0.000000e+00 : f32
    %52 = vector.shape_cast %51 : vector<1x384xi1> to vector<1x384xi1>
    %53 = vector.broadcast %52 : vector<1x384xi1> to vector<4x384xi1>
    %54 = vector.broadcast %cst_61 : f32 to vector<4x384xf32>
    %55 = arith.select %53, %48, %54 : vector<4x384xi1>, vector<4x384xf32>
    %c0_62 = arith.constant 0 : index
    %c0_63 = arith.constant 0 : index
    %c0_64 = arith.constant 0 : index
    %56 = vector.load %arg6[%c0_62, %c0_63, %c0_64] : memref<1x4x384xf32, #tpu.memory_space<vmem>>, vector<1x4x384xf32>
    %57 = vector.shape_cast %56 : vector<1x4x384xf32> to vector<4x384xf32>
    %58 = vector.shape_cast %55 : vector<4x384xf32> to vector<1x4x384xf32>
    tpu.vector_store %arg6[%c0_62, %c0_63, %c0_64], %58 {strides = array<i32>} : memref<1x4x384xf32, #tpu.memory_space<vmem>>, vector<1x4x384xf32>,
    return
  }
  func.func @transform_0(%arg0: i32, %arg1: i32) -> (i32, i32, i32) {
    %c0_i32 = arith.constant 0 : i32
    %c0_i32_0 = arith.constant 0 : i32
    %c0_i32_1 = arith.constant 0 : i32
    return %arg0, %c0_i32, %c0_i32_0 : i32, i32, i32
  }
  func.func @transform_1(%arg0: i32, %arg1: i32) -> (i32, i32) {
    %c0_i32 = arith.constant 0 : i32
    %c0_i32_0 = arith.constant 0 : i32
    return %arg1, %c0_i32 : i32, i32
  }
  func.func @transform_2(%arg0: i32, %arg1: i32) -> (i32, i32) {
    %c0_i32 = arith.constant 0 : i32
    %c0_i32_0 = arith.constant 0 : i32
    return %arg1, %c0_i32 : i32, i32
  }
  func.func @transform_3(%arg0: i32, %arg1: i32) -> (i32, i32) {
    %c0_i32 = arith.constant 0 : i32
    %c0_i32_0 = arith.constant 0 : i32
    %c0_i32_1 = arith.constant 0 : i32
    return %c0_i32, %c0_i32_0 : i32, i32
  }
  func.func @transform_4(%arg0: i32, %arg1: i32) -> (i32, i32, i32) {
    %c0_i32 = arith.constant 0 : i32
    %c0_i32_0 = arith.constant 0 : i32
    return %arg0, %arg1, %c0_i32 : i32, i32, i32
  }
}

module attributes {stable_mosaic.version = 11 : i64} {
  func.func @kernel(%arg0: i32, %arg1: i32, %arg2: memref<1x4x384xf32, #tpu.memory_space<vmem>>, %arg3: memref<1x4x384xf32, #tpu.memory_space<vmem>>, %arg4: memref<8x72xf32, #tpu.memory_space<vmem>>, %arg5: memref<8x1xf32, #tpu.memory_space<vmem>>, %arg6: memref<1x384xf32, #tpu.memory_space<vmem>>, %arg7: memref<1x8x384xf32, #tpu.memory_space<vmem>>, %arg8: memref<72x384xf32, #tpu.memory_space<vmem>>) attributes {dimension_semantics = [#tpu.dimension_semantics<parallel>, #tpu.dimension_semantics<parallel>], iteration_bounds = array<i64: 2, 1>, scalar_prefetch = 0 : i64, scratch_operands = 1 : i64, tpu.core_type = #tpu.core_type<tc>, window_params = [{transform_indices = @transform_0, window_bounds = array<i64: 1, 4, 384>}, {transform_indices = @transform_1, window_bounds = array<i64: 1, 4, 384>}, {transform_indices = @transform_2, window_bounds = array<i64: 8, 72>}, {transform_indices = @transform_3, window_bounds = array<i64: 8, 1>}, {pipeline_mode = #tpu.pipeline_mode<synchronous>, transform_indices = @transform_4, window_bounds = array<i64: 1, 384>}, {transform_indices = @transform_5, window_bounds = array<i64: 1, 8, 384>}]} {
    %c0 = arith.constant 0 : index
    %c0_0 = arith.constant 0 : index
    %c0_1 = arith.constant 0 : index
    %0 = vector.load %arg2[%c0, %c0_0, %c0_1] : memref<1x4x384xf32, #tpu.memory_space<vmem>>, vector<1x4x365xf32>
    %1 = vector.shape_cast %0 : vector<1x4x365xf32> to vector<4x365xf32>
    %c0_2 = arith.constant 0 : index
    %c19 = arith.constant 19 : index
    %2 = vector.load %arg8[%c0_2, %c19] : memref<72x384xf32, #tpu.memory_space<vmem>>, vector<4x365xf32>
    tpu.vector_store %arg8[%c0_2, %c19], %1 {strides = array<i32>} : memref<72x384xf32, #tpu.memory_space<vmem>>, vector<4x365xf32>,
    %cst = arith.constant 0.000000e+00 : f32
    %3 = vector.broadcast %cst : f32 to vector<4x19xf32>
    %c0_3 = arith.constant 0 : index
    %c0_4 = arith.constant 0 : index
    %4 = vector.load %arg8[%c0_3, %c0_4] : memref<72x384xf32, #tpu.memory_space<vmem>>, vector<4x19xf32>
    tpu.vector_store %arg8[%c0_3, %c0_4], %3 {strides = array<i32>} : memref<72x384xf32, #tpu.memory_space<vmem>>, vector<4x19xf32>,
    %c0_5 = arith.constant 0 : index
    %c0_6 = arith.constant 0 : index
    %c0_7 = arith.constant 0 : index
    %5 = vector.load %arg2[%c0_5, %c0_6, %c0_7] : memref<1x4x384xf32, #tpu.memory_space<vmem>>, vector<1x4x366xf32>
    %6 = vector.shape_cast %5 : vector<1x4x366xf32> to vector<4x366xf32>
    %c4 = arith.constant 4 : index
    %c18 = arith.constant 18 : index
    %7 = vector.load %arg8[%c4, %c18] : memref<72x384xf32, #tpu.memory_space<vmem>>, vector<4x366xf32>
    tpu.vector_store %arg8[%c4, %c18], %6 {strides = array<i32>} : memref<72x384xf32, #tpu.memory_space<vmem>>, vector<4x366xf32>,
    %cst_8 = arith.constant 0.000000e+00 : f32
    %8 = vector.broadcast %cst_8 : f32 to vector<4x18xf32>
    %c4_9 = arith.constant 4 : index
    %c0_10 = arith.constant 0 : index
    %9 = vector.load %arg8[%c4_9, %c0_10] : memref<72x384xf32, #tpu.memory_space<vmem>>, vector<4x18xf32>
    tpu.vector_store %arg8[%c4_9, %c0_10], %8 {strides = array<i32>} : memref<72x384xf32, #tpu.memory_space<vmem>>, vector<4x18xf32>,
    %c0_11 = arith.constant 0 : index
    %c0_12 = arith.constant 0 : index
    %c0_13 = arith.constant 0 : index
    %10 = vector.load %arg2[%c0_11, %c0_12, %c0_13] : memref<1x4x384xf32, #tpu.memory_space<vmem>>, vector<1x4x367xf32>
    %11 = vector.shape_cast %10 : vector<1x4x367xf32> to vector<4x367xf32>
    %c8 = arith.constant 8 : index
    %c17 = arith.constant 17 : index
    %12 = vector.load %arg8[%c8, %c17] : memref<72x384xf32, #tpu.memory_space<vmem>>, vector<4x367xf32>
    tpu.vector_store %arg8[%c8, %c17], %11 {strides = array<i32>} : memref<72x384xf32, #tpu.memory_space<vmem>>, vector<4x367xf32>,
    %cst_14 = arith.constant 0.000000e+00 : f32
    %13 = vector.broadcast %cst_14 : f32 to vector<4x17xf32>
    %c8_15 = arith.constant 8 : index
    %c0_16 = arith.constant 0 : index
    %14 = vector.load %arg8[%c8_15, %c0_16] : memref<72x384xf32, #tpu.memory_space<vmem>>, vector<4x17xf32>
    tpu.vector_store %arg8[%c8_15, %c0_16], %13 {strides = array<i32>} : memref<72x384xf32, #tpu.memory_space<vmem>>, vector<4x17xf32>,
    %c0_17 = arith.constant 0 : index
    %c0_18 = arith.constant 0 : index
    %c0_19 = arith.constant 0 : index
    %15 = vector.load %arg2[%c0_17, %c0_18, %c0_19] : memref<1x4x384xf32, #tpu.memory_space<vmem>>, vector<1x4x383xf32>
    %16 = vector.shape_cast %15 : vector<1x4x383xf32> to vector<4x383xf32>
    %c12 = arith.constant 12 : index
    %c1 = arith.constant 1 : index
    %17 = vector.load %arg8[%c12, %c1] : memref<72x384xf32, #tpu.memory_space<vmem>>, vector<4x383xf32>
    tpu.vector_store %arg8[%c12, %c1], %16 {strides = array<i32>} : memref<72x384xf32, #tpu.memory_space<vmem>>, vector<4x383xf32>,
    %cst_20 = arith.constant 0.000000e+00 : f32
    %18 = vector.broadcast %cst_20 : f32 to vector<4x1xf32>
    %c12_21 = arith.constant 12 : index
    %c0_22 = arith.constant 0 : index
    %19 = vector.load %arg8[%c12_21, %c0_22] : memref<72x384xf32, #tpu.memory_space<vmem>>, vector<4x1xf32>
    tpu.vector_store %arg8[%c12_21, %c0_22], %18 {strides = array<i32>} : memref<72x384xf32, #tpu.memory_space<vmem>>, vector<4x1xf32>,
    %c0_23 = arith.constant 0 : index
    %c0_24 = arith.constant 0 : index
    %c0_25 = arith.constant 0 : index
    %20 = vector.load %arg2[%c0_23, %c0_24, %c0_25] : memref<1x4x384xf32, #tpu.memory_space<vmem>>, vector<1x4x384xf32>
    %21 = vector.shape_cast %20 : vector<1x4x384xf32> to vector<4x384xf32>
    %c16 = arith.constant 16 : index
    %c0_26 = arith.constant 0 : index
    %22 = vector.load %arg8[%c16, %c0_26] : memref<72x384xf32, #tpu.memory_space<vmem>>, vector<4x384xf32>
    tpu.vector_store %arg8[%c16, %c0_26], %21 {strides = array<i32>} : memref<72x384xf32, #tpu.memory_space<vmem>>, vector<4x384xf32>,
    %c0_27 = arith.constant 0 : index
    %c0_28 = arith.constant 0 : index
    %c1_29 = arith.constant 1 : index
    %23 = vector.load %arg2[%c0_27, %c0_28, %c1_29] : memref<1x4x384xf32, #tpu.memory_space<vmem>>, vector<1x4x383xf32>
    %24 = vector.shape_cast %23 : vector<1x4x383xf32> to vector<4x383xf32>
    %c20 = arith.constant 20 : index
    %c0_30 = arith.constant 0 : index
    %25 = vector.load %arg8[%c20, %c0_30] : memref<72x384xf32, #tpu.memory_space<vmem>>, vector<4x383xf32>
    tpu.vector_store %arg8[%c20, %c0_30], %24 {strides = array<i32>} : memref<72x384xf32, #tpu.memory_space<vmem>>, vector<4x383xf32>,
    %cst_31 = arith.constant 0.000000e+00 : f32
    %26 = vector.broadcast %cst_31 : f32 to vector<4x1xf32>
    %c20_32 = arith.constant 20 : index
    %c383 = arith.constant 383 : index
    %27 = vector.load %arg8[%c20_32, %c383] : memref<72x384xf32, #tpu.memory_space<vmem>>, vector<4x1xf32>
    tpu.vector_store %arg8[%c20_32, %c383], %26 {strides = array<i32>} : memref<72x384xf32, #tpu.memory_space<vmem>>, vector<4x1xf32>,
    %c0_33 = arith.constant 0 : index
    %c0_34 = arith.constant 0 : index
    %c17_35 = arith.constant 17 : index
    %28 = vector.load %arg2[%c0_33, %c0_34, %c17_35] : memref<1x4x384xf32, #tpu.memory_space<vmem>>, vector<1x4x367xf32>
    %29 = vector.shape_cast %28 : vector<1x4x367xf32> to vector<4x367xf32>
    %c24 = arith.constant 24 : index
    %c0_36 = arith.constant 0 : index
    %30 = vector.load %arg8[%c24, %c0_36] : memref<72x384xf32, #tpu.memory_space<vmem>>, vector<4x367xf32>
    tpu.vector_store %arg8[%c24, %c0_36], %29 {strides = array<i32>} : memref<72x384xf32, #tpu.memory_space<vmem>>, vector<4x367xf32>,
    %cst_37 = arith.constant 0.000000e+00 : f32
    %31 = vector.broadcast %cst_37 : f32 to vector<4x17xf32>
    %c24_38 = arith.constant 24 : index
    %c367 = arith.constant 367 : index
    %32 = vector.load %arg8[%c24_38, %c367] : memref<72x384xf32, #tpu.memory_space<vmem>>, vector<4x17xf32>
    tpu.vector_store %arg8[%c24_38, %c367], %31 {strides = array<i32>} : memref<72x384xf32, #tpu.memory_space<vmem>>, vector<4x17xf32>,
    %c0_39 = arith.constant 0 : index
    %c0_40 = arith.constant 0 : index
    %c18_41 = arith.constant 18 : index
    %33 = vector.load %arg2[%c0_39, %c0_40, %c18_41] : memref<1x4x384xf32, #tpu.memory_space<vmem>>, vector<1x4x366xf32>
    %34 = vector.shape_cast %33 : vector<1x4x366xf32> to vector<4x366xf32>
    %c28 = arith.constant 28 : index
    %c0_42 = arith.constant 0 : index
    %35 = vector.load %arg8[%c28, %c0_42] : memref<72x384xf32, #tpu.memory_space<vmem>>, vector<4x366xf32>
    tpu.vector_store %arg8[%c28, %c0_42], %34 {strides = array<i32>} : memref<72x384xf32, #tpu.memory_space<vmem>>, vector<4x366xf32>,
    %cst_43 = arith.constant 0.000000e+00 : f32
    %36 = vector.broadcast %cst_43 : f32 to vector<4x18xf32>
    %c28_44 = arith.constant 28 : index
    %c366 = arith.constant 366 : index
    %37 = vector.load %arg8[%c28_44, %c366] : memref<72x384xf32, #tpu.memory_space<vmem>>, vector<4x18xf32>
    tpu.vector_store %arg8[%c28_44, %c366], %36 {strides = array<i32>} : memref<72x384xf32, #tpu.memory_space<vmem>>, vector<4x18xf32>,
    %c0_45 = arith.constant 0 : index
    %c0_46 = arith.constant 0 : index
    %c19_47 = arith.constant 19 : index
    %38 = vector.load %arg2[%c0_45, %c0_46, %c19_47] : memref<1x4x384xf32, #tpu.memory_space<vmem>>, vector<1x4x365xf32>
    %39 = vector.shape_cast %38 : vector<1x4x365xf32> to vector<4x365xf32>
    %c32 = arith.constant 32 : index
    %c0_48 = arith.constant 0 : index
    %40 = vector.load %arg8[%c32, %c0_48] : memref<72x384xf32, #tpu.memory_space<vmem>>, vector<4x365xf32>
    tpu.vector_store %arg8[%c32, %c0_48], %39 {strides = array<i32>} : memref<72x384xf32, #tpu.memory_space<vmem>>, vector<4x365xf32>,
    %cst_49 = arith.constant 0.000000e+00 : f32
    %41 = vector.broadcast %cst_49 : f32 to vector<4x19xf32>
    %c32_50 = arith.constant 32 : index
    %c365 = arith.constant 365 : index
    %42 = vector.load %arg8[%c32_50, %c365] : memref<72x384xf32, #tpu.memory_space<vmem>>, vector<4x19xf32>
    tpu.vector_store %arg8[%c32_50, %c365], %41 {strides = array<i32>} : memref<72x384xf32, #tpu.memory_space<vmem>>, vector<4x19xf32>,
    %c0_51 = arith.constant 0 : index
    %c0_52 = arith.constant 0 : index
    %c0_53 = arith.constant 0 : index
    %43 = vector.load %arg3[%c0_51, %c0_52, %c0_53] : memref<1x4x384xf32, #tpu.memory_space<vmem>>, vector<1x4x365xf32>
    %44 = vector.shape_cast %43 : vector<1x4x365xf32> to vector<4x365xf32>
    %c36 = arith.constant 36 : index
    %c19_54 = arith.constant 19 : index
    %45 = vector.load %arg8[%c36, %c19_54] : memref<72x384xf32, #tpu.memory_space<vmem>>, vector<4x365xf32>
    tpu.vector_store %arg8[%c36, %c19_54], %44 {strides = array<i32>} : memref<72x384xf32, #tpu.memory_space<vmem>>, vector<4x365xf32>,
    %cst_55 = arith.constant 0.000000e+00 : f32
    %46 = vector.broadcast %cst_55 : f32 to vector<4x19xf32>
    %c36_56 = arith.constant 36 : index
    %c0_57 = arith.constant 0 : index
    %47 = vector.load %arg8[%c36_56, %c0_57] : memref<72x384xf32, #tpu.memory_space<vmem>>, vector<4x19xf32>
    tpu.vector_store %arg8[%c36_56, %c0_57], %46 {strides = array<i32>} : memref<72x384xf32, #tpu.memory_space<vmem>>, vector<4x19xf32>,
    %c0_58 = arith.constant 0 : index
    %c0_59 = arith.constant 0 : index
    %c0_60 = arith.constant 0 : index
    %48 = vector.load %arg3[%c0_58, %c0_59, %c0_60] : memref<1x4x384xf32, #tpu.memory_space<vmem>>, vector<1x4x366xf32>
    %49 = vector.shape_cast %48 : vector<1x4x366xf32> to vector<4x366xf32>
    %c40 = arith.constant 40 : index
    %c18_61 = arith.constant 18 : index
    %50 = vector.load %arg8[%c40, %c18_61] : memref<72x384xf32, #tpu.memory_space<vmem>>, vector<4x366xf32>
    tpu.vector_store %arg8[%c40, %c18_61], %49 {strides = array<i32>} : memref<72x384xf32, #tpu.memory_space<vmem>>, vector<4x366xf32>,
    %cst_62 = arith.constant 0.000000e+00 : f32
    %51 = vector.broadcast %cst_62 : f32 to vector<4x18xf32>
    %c40_63 = arith.constant 40 : index
    %c0_64 = arith.constant 0 : index
    %52 = vector.load %arg8[%c40_63, %c0_64] : memref<72x384xf32, #tpu.memory_space<vmem>>, vector<4x18xf32>
    tpu.vector_store %arg8[%c40_63, %c0_64], %51 {strides = array<i32>} : memref<72x384xf32, #tpu.memory_space<vmem>>, vector<4x18xf32>,
    %c0_65 = arith.constant 0 : index
    %c0_66 = arith.constant 0 : index
    %c0_67 = arith.constant 0 : index
    %53 = vector.load %arg3[%c0_65, %c0_66, %c0_67] : memref<1x4x384xf32, #tpu.memory_space<vmem>>, vector<1x4x367xf32>
    %54 = vector.shape_cast %53 : vector<1x4x367xf32> to vector<4x367xf32>
    %c44 = arith.constant 44 : index
    %c17_68 = arith.constant 17 : index
    %55 = vector.load %arg8[%c44, %c17_68] : memref<72x384xf32, #tpu.memory_space<vmem>>, vector<4x367xf32>
    tpu.vector_store %arg8[%c44, %c17_68], %54 {strides = array<i32>} : memref<72x384xf32, #tpu.memory_space<vmem>>, vector<4x367xf32>,
    %cst_69 = arith.constant 0.000000e+00 : f32
    %56 = vector.broadcast %cst_69 : f32 to vector<4x17xf32>
    %c44_70 = arith.constant 44 : index
    %c0_71 = arith.constant 0 : index
    %57 = vector.load %arg8[%c44_70, %c0_71] : memref<72x384xf32, #tpu.memory_space<vmem>>, vector<4x17xf32>
    tpu.vector_store %arg8[%c44_70, %c0_71], %56 {strides = array<i32>} : memref<72x384xf32, #tpu.memory_space<vmem>>, vector<4x17xf32>,
    %c0_72 = arith.constant 0 : index
    %c0_73 = arith.constant 0 : index
    %c0_74 = arith.constant 0 : index
    %58 = vector.load %arg3[%c0_72, %c0_73, %c0_74] : memref<1x4x384xf32, #tpu.memory_space<vmem>>, vector<1x4x383xf32>
    %59 = vector.shape_cast %58 : vector<1x4x383xf32> to vector<4x383xf32>
    %c48 = arith.constant 48 : index
    %c1_75 = arith.constant 1 : index
    %60 = vector.load %arg8[%c48, %c1_75] : memref<72x384xf32, #tpu.memory_space<vmem>>, vector<4x383xf32>
    tpu.vector_store %arg8[%c48, %c1_75], %59 {strides = array<i32>} : memref<72x384xf32, #tpu.memory_space<vmem>>, vector<4x383xf32>,
    %cst_76 = arith.constant 0.000000e+00 : f32
    %61 = vector.broadcast %cst_76 : f32 to vector<4x1xf32>
    %c48_77 = arith.constant 48 : index
    %c0_78 = arith.constant 0 : index
    %62 = vector.load %arg8[%c48_77, %c0_78] : memref<72x384xf32, #tpu.memory_space<vmem>>, vector<4x1xf32>
    tpu.vector_store %arg8[%c48_77, %c0_78], %61 {strides = array<i32>} : memref<72x384xf32, #tpu.memory_space<vmem>>, vector<4x1xf32>,
    %c0_79 = arith.constant 0 : index
    %c0_80 = arith.constant 0 : index
    %c0_81 = arith.constant 0 : index
    %63 = vector.load %arg3[%c0_79, %c0_80, %c0_81] : memref<1x4x384xf32, #tpu.memory_space<vmem>>, vector<1x4x384xf32>
    %64 = vector.shape_cast %63 : vector<1x4x384xf32> to vector<4x384xf32>
    %c52 = arith.constant 52 : index
    %c0_82 = arith.constant 0 : index
    %65 = vector.load %arg8[%c52, %c0_82] : memref<72x384xf32, #tpu.memory_space<vmem>>, vector<4x384xf32>
    tpu.vector_store %arg8[%c52, %c0_82], %64 {strides = array<i32>} : memref<72x384xf32, #tpu.memory_space<vmem>>, vector<4x384xf32>,
    %c0_83 = arith.constant 0 : index
    %c0_84 = arith.constant 0 : index
    %c1_85 = arith.constant 1 : index
    %66 = vector.load %arg3[%c0_83, %c0_84, %c1_85] : memref<1x4x384xf32, #tpu.memory_space<vmem>>, vector<1x4x383xf32>
    %67 = vector.shape_cast %66 : vector<1x4x383xf32> to vector<4x383xf32>
    %c56 = arith.constant 56 : index
    %c0_86 = arith.constant 0 : index
    %68 = vector.load %arg8[%c56, %c0_86] : memref<72x384xf32, #tpu.memory_space<vmem>>, vector<4x383xf32>
    tpu.vector_store %arg8[%c56, %c0_86], %67 {strides = array<i32>} : memref<72x384xf32, #tpu.memory_space<vmem>>, vector<4x383xf32>,
    %cst_87 = arith.constant 0.000000e+00 : f32
    %69 = vector.broadcast %cst_87 : f32 to vector<4x1xf32>
    %c56_88 = arith.constant 56 : index
    %c383_89 = arith.constant 383 : index
    %70 = vector.load %arg8[%c56_88, %c383_89] : memref<72x384xf32, #tpu.memory_space<vmem>>, vector<4x1xf32>
    tpu.vector_store %arg8[%c56_88, %c383_89], %69 {strides = array<i32>} : memref<72x384xf32, #tpu.memory_space<vmem>>, vector<4x1xf32>,
    %c0_90 = arith.constant 0 : index
    %c0_91 = arith.constant 0 : index
    %c17_92 = arith.constant 17 : index
    %71 = vector.load %arg3[%c0_90, %c0_91, %c17_92] : memref<1x4x384xf32, #tpu.memory_space<vmem>>, vector<1x4x367xf32>
    %72 = vector.shape_cast %71 : vector<1x4x367xf32> to vector<4x367xf32>
    %c60 = arith.constant 60 : index
    %c0_93 = arith.constant 0 : index
    %73 = vector.load %arg8[%c60, %c0_93] : memref<72x384xf32, #tpu.memory_space<vmem>>, vector<4x367xf32>
    tpu.vector_store %arg8[%c60, %c0_93], %72 {strides = array<i32>} : memref<72x384xf32, #tpu.memory_space<vmem>>, vector<4x367xf32>,
    %cst_94 = arith.constant 0.000000e+00 : f32
    %74 = vector.broadcast %cst_94 : f32 to vector<4x17xf32>
    %c60_95 = arith.constant 60 : index
    %c367_96 = arith.constant 367 : index
    %75 = vector.load %arg8[%c60_95, %c367_96] : memref<72x384xf32, #tpu.memory_space<vmem>>, vector<4x17xf32>
    tpu.vector_store %arg8[%c60_95, %c367_96], %74 {strides = array<i32>} : memref<72x384xf32, #tpu.memory_space<vmem>>, vector<4x17xf32>,
    %c0_97 = arith.constant 0 : index
    %c0_98 = arith.constant 0 : index
    %c18_99 = arith.constant 18 : index
    %76 = vector.load %arg3[%c0_97, %c0_98, %c18_99] : memref<1x4x384xf32, #tpu.memory_space<vmem>>, vector<1x4x366xf32>
    %77 = vector.shape_cast %76 : vector<1x4x366xf32> to vector<4x366xf32>
    %c64 = arith.constant 64 : index
    %c0_100 = arith.constant 0 : index
    %78 = vector.load %arg8[%c64, %c0_100] : memref<72x384xf32, #tpu.memory_space<vmem>>, vector<4x366xf32>
    tpu.vector_store %arg8[%c64, %c0_100], %77 {strides = array<i32>} : memref<72x384xf32, #tpu.memory_space<vmem>>, vector<4x366xf32>,
    %cst_101 = arith.constant 0.000000e+00 : f32
    %79 = vector.broadcast %cst_101 : f32 to vector<4x18xf32>
    %c64_102 = arith.constant 64 : index
    %c366_103 = arith.constant 366 : index
    %80 = vector.load %arg8[%c64_102, %c366_103] : memref<72x384xf32, #tpu.memory_space<vmem>>, vector<4x18xf32>
    tpu.vector_store %arg8[%c64_102, %c366_103], %79 {strides = array<i32>} : memref<72x384xf32, #tpu.memory_space<vmem>>, vector<4x18xf32>,
    %c0_104 = arith.constant 0 : index
    %c0_105 = arith.constant 0 : index
    %c19_106 = arith.constant 19 : index
    %81 = vector.load %arg3[%c0_104, %c0_105, %c19_106] : memref<1x4x384xf32, #tpu.memory_space<vmem>>, vector<1x4x365xf32>
    %82 = vector.shape_cast %81 : vector<1x4x365xf32> to vector<4x365xf32>
    %c68 = arith.constant 68 : index
    %c0_107 = arith.constant 0 : index
    %83 = vector.load %arg8[%c68, %c0_107] : memref<72x384xf32, #tpu.memory_space<vmem>>, vector<4x365xf32>
    tpu.vector_store %arg8[%c68, %c0_107], %82 {strides = array<i32>} : memref<72x384xf32, #tpu.memory_space<vmem>>, vector<4x365xf32>,
    %cst_108 = arith.constant 0.000000e+00 : f32
    %84 = vector.broadcast %cst_108 : f32 to vector<4x19xf32>
    %c68_109 = arith.constant 68 : index
    %c365_110 = arith.constant 365 : index
    %85 = vector.load %arg8[%c68_109, %c365_110] : memref<72x384xf32, #tpu.memory_space<vmem>>, vector<4x19xf32>
    tpu.vector_store %arg8[%c68_109, %c365_110], %84 {strides = array<i32>} : memref<72x384xf32, #tpu.memory_space<vmem>>, vector<4x19xf32>,
    %c0_111 = arith.constant 0 : index
    %c0_112 = arith.constant 0 : index
    %86 = vector.load %arg4[%c0_111, %c0_112] : memref<8x72xf32, #tpu.memory_space<vmem>>, vector<8x72xf32>
    %c0_113 = arith.constant 0 : index
    %c0_114 = arith.constant 0 : index
    %87 = vector.load %arg8[%c0_113, %c0_114] : memref<72x384xf32, #tpu.memory_space<vmem>>, vector<72x384xf32>
    %cst_115 = arith.constant dense<0.000000e+00> : vector<8x384xf32>
    %88 = tpu.matmul %86, %87, %cst_115 {dimension_numbers = #tpu.dot_dimension_numbers<[1], [0], [0], [1], [0, 0, 1, 1], [], []>} : vector<8x72xf32>, vector<72x384xf32>, vector<8x384xf32> -> vector<8x384xf32>
    %c0_116 = arith.constant 0 : index
    %c0_117 = arith.constant 0 : index
    %89 = vector.load %arg5[%c0_116, %c0_117] : memref<8x1xf32, #tpu.memory_space<vmem>>, vector<8x1xf32>
    %90 = vector.broadcast %89 : vector<8x1xf32> to vector<8x384xf32>
    %91 = arith.addf %88, %90 : vector<8x384xf32>
    %c0_118 = arith.constant 0 : index
    %c0_119 = arith.constant 0 : index
    %92 = vector.load %arg6[%c0_118, %c0_119] : memref<1x384xf32, #tpu.memory_space<vmem>>, vector<1x384xf32>
    %cst_120 = arith.constant 5.000000e-01 : f32
    %93 = vector.broadcast %cst_120 : f32 to vector<1x384xf32>
    %94 = arith.cmpf ogt, %92, %93 : vector<1x384xf32>
    %cst_121 = arith.constant 0.000000e+00 : f32
    %95 = vector.shape_cast %94 : vector<1x384xi1> to vector<1x384xi1>
    %96 = vector.broadcast %95 : vector<1x384xi1> to vector<8x384xi1>
    %97 = vector.broadcast %cst_121 : f32 to vector<8x384xf32>
    %98 = arith.select %96, %91, %97 : vector<8x384xi1>, vector<8x384xf32>
    %c0_122 = arith.constant 0 : index
    %c0_123 = arith.constant 0 : index
    %c0_124 = arith.constant 0 : index
    %99 = vector.load %arg7[%c0_122, %c0_123, %c0_124] : memref<1x8x384xf32, #tpu.memory_space<vmem>>, vector<1x8x384xf32>
    %100 = vector.shape_cast %99 : vector<1x8x384xf32> to vector<8x384xf32>
    %101 = vector.shape_cast %98 : vector<8x384xf32> to vector<1x8x384xf32>
    tpu.vector_store %arg7[%c0_122, %c0_123, %c0_124], %101 {strides = array<i32>} : memref<1x8x384xf32, #tpu.memory_space<vmem>>, vector<1x8x384xf32>,
    return
  }
  func.func @transform_0(%arg0: i32, %arg1: i32) -> (i32, i32, i32) {
    %c0_i32 = arith.constant 0 : i32
    %c0_i32_0 = arith.constant 0 : i32
    %c0_i32_1 = arith.constant 0 : i32
    return %arg0, %c0_i32, %c0_i32_0 : i32, i32, i32
  }
  func.func @transform_1(%arg0: i32, %arg1: i32) -> (i32, i32, i32) {
    %c0_i32 = arith.constant 0 : i32
    %c0_i32_0 = arith.constant 0 : i32
    %c0_i32_1 = arith.constant 0 : i32
    return %arg0, %c0_i32, %c0_i32_0 : i32, i32, i32
  }
  func.func @transform_2(%arg0: i32, %arg1: i32) -> (i32, i32) {
    %c0_i32 = arith.constant 0 : i32
    %c0_i32_0 = arith.constant 0 : i32
    return %arg1, %c0_i32 : i32, i32
  }
  func.func @transform_3(%arg0: i32, %arg1: i32) -> (i32, i32) {
    %c0_i32 = arith.constant 0 : i32
    %c0_i32_0 = arith.constant 0 : i32
    return %arg1, %c0_i32 : i32, i32
  }
  func.func @transform_4(%arg0: i32, %arg1: i32) -> (i32, i32) {
    %c0_i32 = arith.constant 0 : i32
    %c0_i32_0 = arith.constant 0 : i32
    %c0_i32_1 = arith.constant 0 : i32
    return %c0_i32, %c0_i32_0 : i32, i32
  }
  func.func @transform_5(%arg0: i32, %arg1: i32) -> (i32, i32, i32) {
    %c0_i32 = arith.constant 0 : i32
    %c0_i32_0 = arith.constant 0 : i32
    return %arg0, %arg1, %c0_i32 : i32, i32, i32
  }
}

module attributes {stable_mosaic.version = 11 : i64} {
  func.func @kernel(%arg0: i32, %arg1: i32, %arg2: memref<1x8x1280xf32, #tpu.memory_space<vmem>>, %arg3: memref<8x72xf32, #tpu.memory_space<vmem>>, %arg4: memref<8x1xf32, #tpu.memory_space<vmem>>, %arg5: memref<1x1280xf32, #tpu.memory_space<vmem>>, %arg6: memref<1x8x1280xf32, #tpu.memory_space<vmem>>, %arg7: memref<72x1280xf32, #tpu.memory_space<vmem>>) attributes {dimension_semantics = [#tpu.dimension_semantics<parallel>, #tpu.dimension_semantics<parallel>], iteration_bounds = array<i64: 2, 1>, scalar_prefetch = 0 : i64, scratch_operands = 1 : i64, tpu.core_type = #tpu.core_type<tc>, window_params = [{transform_indices = @transform_0, window_bounds = array<i64: 1, 8, 1280>}, {transform_indices = @transform_1, window_bounds = array<i64: 8, 72>}, {transform_indices = @transform_2, window_bounds = array<i64: 8, 1>}, {pipeline_mode = #tpu.pipeline_mode<synchronous>, transform_indices = @transform_3, window_bounds = array<i64: 1, 1280>}, {transform_indices = @transform_4, window_bounds = array<i64: 1, 8, 1280>}]} {
    %c0 = arith.constant 0 : index
    %c0_0 = arith.constant 0 : index
    %c0_1 = arith.constant 0 : index
    %0 = vector.load %arg2[%c0, %c0_0, %c0_1] : memref<1x8x1280xf32, #tpu.memory_space<vmem>>, vector<1x8x1245xf32>
    %1 = vector.shape_cast %0 : vector<1x8x1245xf32> to vector<8x1245xf32>
    %c0_2 = arith.constant 0 : index
    %c35 = arith.constant 35 : index
    %2 = vector.load %arg7[%c0_2, %c35] : memref<72x1280xf32, #tpu.memory_space<vmem>>, vector<8x1245xf32>
    tpu.vector_store %arg7[%c0_2, %c35], %1 {strides = array<i32>} : memref<72x1280xf32, #tpu.memory_space<vmem>>, vector<8x1245xf32>,
    %cst = arith.constant 0.000000e+00 : f32
    %3 = vector.broadcast %cst : f32 to vector<8x35xf32>
    %c0_3 = arith.constant 0 : index
    %c0_4 = arith.constant 0 : index
    %4 = vector.load %arg7[%c0_3, %c0_4] : memref<72x1280xf32, #tpu.memory_space<vmem>>, vector<8x35xf32>
    tpu.vector_store %arg7[%c0_3, %c0_4], %3 {strides = array<i32>} : memref<72x1280xf32, #tpu.memory_space<vmem>>, vector<8x35xf32>,
    %c0_5 = arith.constant 0 : index
    %c0_6 = arith.constant 0 : index
    %c0_7 = arith.constant 0 : index
    %5 = vector.load %arg2[%c0_5, %c0_6, %c0_7] : memref<1x8x1280xf32, #tpu.memory_space<vmem>>, vector<1x8x1246xf32>
    %6 = vector.shape_cast %5 : vector<1x8x1246xf32> to vector<8x1246xf32>
    %c8 = arith.constant 8 : index
    %c34 = arith.constant 34 : index
    %7 = vector.load %arg7[%c8, %c34] : memref<72x1280xf32, #tpu.memory_space<vmem>>, vector<8x1246xf32>
    tpu.vector_store %arg7[%c8, %c34], %6 {strides = array<i32>} : memref<72x1280xf32, #tpu.memory_space<vmem>>, vector<8x1246xf32>,
    %cst_8 = arith.constant 0.000000e+00 : f32
    %8 = vector.broadcast %cst_8 : f32 to vector<8x34xf32>
    %c8_9 = arith.constant 8 : index
    %c0_10 = arith.constant 0 : index
    %9 = vector.load %arg7[%c8_9, %c0_10] : memref<72x1280xf32, #tpu.memory_space<vmem>>, vector<8x34xf32>
    tpu.vector_store %arg7[%c8_9, %c0_10], %8 {strides = array<i32>} : memref<72x1280xf32, #tpu.memory_space<vmem>>, vector<8x34xf32>,
    %c0_11 = arith.constant 0 : index
    %c0_12 = arith.constant 0 : index
    %c0_13 = arith.constant 0 : index
    %10 = vector.load %arg2[%c0_11, %c0_12, %c0_13] : memref<1x8x1280xf32, #tpu.memory_space<vmem>>, vector<1x8x1247xf32>
    %11 = vector.shape_cast %10 : vector<1x8x1247xf32> to vector<8x1247xf32>
    %c16 = arith.constant 16 : index
    %c33 = arith.constant 33 : index
    %12 = vector.load %arg7[%c16, %c33] : memref<72x1280xf32, #tpu.memory_space<vmem>>, vector<8x1247xf32>
    tpu.vector_store %arg7[%c16, %c33], %11 {strides = array<i32>} : memref<72x1280xf32, #tpu.memory_space<vmem>>, vector<8x1247xf32>,
    %cst_14 = arith.constant 0.000000e+00 : f32
    %13 = vector.broadcast %cst_14 : f32 to vector<8x33xf32>
    %c16_15 = arith.constant 16 : index
    %c0_16 = arith.constant 0 : index
    %14 = vector.load %arg7[%c16_15, %c0_16] : memref<72x1280xf32, #tpu.memory_space<vmem>>, vector<8x33xf32>
    tpu.vector_store %arg7[%c16_15, %c0_16], %13 {strides = array<i32>} : memref<72x1280xf32, #tpu.memory_space<vmem>>, vector<8x33xf32>,
    %c0_17 = arith.constant 0 : index
    %c0_18 = arith.constant 0 : index
    %c0_19 = arith.constant 0 : index
    %15 = vector.load %arg2[%c0_17, %c0_18, %c0_19] : memref<1x8x1280xf32, #tpu.memory_space<vmem>>, vector<1x8x1279xf32>
    %16 = vector.shape_cast %15 : vector<1x8x1279xf32> to vector<8x1279xf32>
    %c24 = arith.constant 24 : index
    %c1 = arith.constant 1 : index
    %17 = vector.load %arg7[%c24, %c1] : memref<72x1280xf32, #tpu.memory_space<vmem>>, vector<8x1279xf32>
    tpu.vector_store %arg7[%c24, %c1], %16 {strides = array<i32>} : memref<72x1280xf32, #tpu.memory_space<vmem>>, vector<8x1279xf32>,
    %cst_20 = arith.constant 0.000000e+00 : f32
    %18 = vector.broadcast %cst_20 : f32 to vector<8x1xf32>
    %c24_21 = arith.constant 24 : index
    %c0_22 = arith.constant 0 : index
    %19 = vector.load %arg7[%c24_21, %c0_22] : memref<72x1280xf32, #tpu.memory_space<vmem>>, vector<8x1xf32>
    tpu.vector_store %arg7[%c24_21, %c0_22], %18 {strides = array<i32>} : memref<72x1280xf32, #tpu.memory_space<vmem>>, vector<8x1xf32>,
    %c0_23 = arith.constant 0 : index
    %c0_24 = arith.constant 0 : index
    %c0_25 = arith.constant 0 : index
    %20 = vector.load %arg2[%c0_23, %c0_24, %c0_25] : memref<1x8x1280xf32, #tpu.memory_space<vmem>>, vector<1x8x1280xf32>
    %21 = vector.shape_cast %20 : vector<1x8x1280xf32> to vector<8x1280xf32>
    %c32 = arith.constant 32 : index
    %c0_26 = arith.constant 0 : index
    %22 = vector.load %arg7[%c32, %c0_26] : memref<72x1280xf32, #tpu.memory_space<vmem>>, vector<8x1280xf32>
    tpu.vector_store %arg7[%c32, %c0_26], %21 {strides = array<i32>} : memref<72x1280xf32, #tpu.memory_space<vmem>>, vector<8x1280xf32>,
    %c0_27 = arith.constant 0 : index
    %c0_28 = arith.constant 0 : index
    %c1_29 = arith.constant 1 : index
    %23 = vector.load %arg2[%c0_27, %c0_28, %c1_29] : memref<1x8x1280xf32, #tpu.memory_space<vmem>>, vector<1x8x1279xf32>
    %24 = vector.shape_cast %23 : vector<1x8x1279xf32> to vector<8x1279xf32>
    %c40 = arith.constant 40 : index
    %c0_30 = arith.constant 0 : index
    %25 = vector.load %arg7[%c40, %c0_30] : memref<72x1280xf32, #tpu.memory_space<vmem>>, vector<8x1279xf32>
    tpu.vector_store %arg7[%c40, %c0_30], %24 {strides = array<i32>} : memref<72x1280xf32, #tpu.memory_space<vmem>>, vector<8x1279xf32>,
    %cst_31 = arith.constant 0.000000e+00 : f32
    %26 = vector.broadcast %cst_31 : f32 to vector<8x1xf32>
    %c40_32 = arith.constant 40 : index
    %c1279 = arith.constant 1279 : index
    %27 = vector.load %arg7[%c40_32, %c1279] : memref<72x1280xf32, #tpu.memory_space<vmem>>, vector<8x1xf32>
    tpu.vector_store %arg7[%c40_32, %c1279], %26 {strides = array<i32>} : memref<72x1280xf32, #tpu.memory_space<vmem>>, vector<8x1xf32>,
    %c0_33 = arith.constant 0 : index
    %c0_34 = arith.constant 0 : index
    %c33_35 = arith.constant 33 : index
    %28 = vector.load %arg2[%c0_33, %c0_34, %c33_35] : memref<1x8x1280xf32, #tpu.memory_space<vmem>>, vector<1x8x1247xf32>
    %29 = vector.shape_cast %28 : vector<1x8x1247xf32> to vector<8x1247xf32>
    %c48 = arith.constant 48 : index
    %c0_36 = arith.constant 0 : index
    %30 = vector.load %arg7[%c48, %c0_36] : memref<72x1280xf32, #tpu.memory_space<vmem>>, vector<8x1247xf32>
    tpu.vector_store %arg7[%c48, %c0_36], %29 {strides = array<i32>} : memref<72x1280xf32, #tpu.memory_space<vmem>>, vector<8x1247xf32>,
    %cst_37 = arith.constant 0.000000e+00 : f32
    %31 = vector.broadcast %cst_37 : f32 to vector<8x33xf32>
    %c48_38 = arith.constant 48 : index
    %c1247 = arith.constant 1247 : index
    %32 = vector.load %arg7[%c48_38, %c1247] : memref<72x1280xf32, #tpu.memory_space<vmem>>, vector<8x33xf32>
    tpu.vector_store %arg7[%c48_38, %c1247], %31 {strides = array<i32>} : memref<72x1280xf32, #tpu.memory_space<vmem>>, vector<8x33xf32>,
    %c0_39 = arith.constant 0 : index
    %c0_40 = arith.constant 0 : index
    %c34_41 = arith.constant 34 : index
    %33 = vector.load %arg2[%c0_39, %c0_40, %c34_41] : memref<1x8x1280xf32, #tpu.memory_space<vmem>>, vector<1x8x1246xf32>
    %34 = vector.shape_cast %33 : vector<1x8x1246xf32> to vector<8x1246xf32>
    %c56 = arith.constant 56 : index
    %c0_42 = arith.constant 0 : index
    %35 = vector.load %arg7[%c56, %c0_42] : memref<72x1280xf32, #tpu.memory_space<vmem>>, vector<8x1246xf32>
    tpu.vector_store %arg7[%c56, %c0_42], %34 {strides = array<i32>} : memref<72x1280xf32, #tpu.memory_space<vmem>>, vector<8x1246xf32>,
    %cst_43 = arith.constant 0.000000e+00 : f32
    %36 = vector.broadcast %cst_43 : f32 to vector<8x34xf32>
    %c56_44 = arith.constant 56 : index
    %c1246 = arith.constant 1246 : index
    %37 = vector.load %arg7[%c56_44, %c1246] : memref<72x1280xf32, #tpu.memory_space<vmem>>, vector<8x34xf32>
    tpu.vector_store %arg7[%c56_44, %c1246], %36 {strides = array<i32>} : memref<72x1280xf32, #tpu.memory_space<vmem>>, vector<8x34xf32>,
    %c0_45 = arith.constant 0 : index
    %c0_46 = arith.constant 0 : index
    %c35_47 = arith.constant 35 : index
    %38 = vector.load %arg2[%c0_45, %c0_46, %c35_47] : memref<1x8x1280xf32, #tpu.memory_space<vmem>>, vector<1x8x1245xf32>
    %39 = vector.shape_cast %38 : vector<1x8x1245xf32> to vector<8x1245xf32>
    %c64 = arith.constant 64 : index
    %c0_48 = arith.constant 0 : index
    %40 = vector.load %arg7[%c64, %c0_48] : memref<72x1280xf32, #tpu.memory_space<vmem>>, vector<8x1245xf32>
    tpu.vector_store %arg7[%c64, %c0_48], %39 {strides = array<i32>} : memref<72x1280xf32, #tpu.memory_space<vmem>>, vector<8x1245xf32>,
    %cst_49 = arith.constant 0.000000e+00 : f32
    %41 = vector.broadcast %cst_49 : f32 to vector<8x35xf32>
    %c64_50 = arith.constant 64 : index
    %c1245 = arith.constant 1245 : index
    %42 = vector.load %arg7[%c64_50, %c1245] : memref<72x1280xf32, #tpu.memory_space<vmem>>, vector<8x35xf32>
    tpu.vector_store %arg7[%c64_50, %c1245], %41 {strides = array<i32>} : memref<72x1280xf32, #tpu.memory_space<vmem>>, vector<8x35xf32>,
    %c0_51 = arith.constant 0 : index
    %c0_52 = arith.constant 0 : index
    %43 = vector.load %arg3[%c0_51, %c0_52] : memref<8x72xf32, #tpu.memory_space<vmem>>, vector<8x72xf32>
    %c0_53 = arith.constant 0 : index
    %c0_54 = arith.constant 0 : index
    %44 = vector.load %arg7[%c0_53, %c0_54] : memref<72x1280xf32, #tpu.memory_space<vmem>>, vector<72x1280xf32>
    %cst_55 = arith.constant dense<0.000000e+00> : vector<8x1280xf32>
    %45 = tpu.matmul %43, %44, %cst_55 {dimension_numbers = #tpu.dot_dimension_numbers<[1], [0], [0], [1], [0, 0, 1, 1], [], []>} : vector<8x72xf32>, vector<72x1280xf32>, vector<8x1280xf32> -> vector<8x1280xf32>
    %c0_56 = arith.constant 0 : index
    %c0_57 = arith.constant 0 : index
    %46 = vector.load %arg4[%c0_56, %c0_57] : memref<8x1xf32, #tpu.memory_space<vmem>>, vector<8x1xf32>
    %47 = vector.broadcast %46 : vector<8x1xf32> to vector<8x1280xf32>
    %48 = arith.addf %45, %47 : vector<8x1280xf32>
    %c0_58 = arith.constant 0 : index
    %c0_59 = arith.constant 0 : index
    %49 = vector.load %arg5[%c0_58, %c0_59] : memref<1x1280xf32, #tpu.memory_space<vmem>>, vector<1x1280xf32>
    %cst_60 = arith.constant 5.000000e-01 : f32
    %50 = vector.broadcast %cst_60 : f32 to vector<1x1280xf32>
    %51 = arith.cmpf ogt, %49, %50 : vector<1x1280xf32>
    %cst_61 = arith.constant 0.000000e+00 : f32
    %52 = vector.shape_cast %51 : vector<1x1280xi1> to vector<1x1280xi1>
    %53 = vector.broadcast %52 : vector<1x1280xi1> to vector<8x1280xi1>
    %54 = vector.broadcast %cst_61 : f32 to vector<8x1280xf32>
    %55 = arith.select %53, %48, %54 : vector<8x1280xi1>, vector<8x1280xf32>
    %c0_62 = arith.constant 0 : index
    %c0_63 = arith.constant 0 : index
    %c0_64 = arith.constant 0 : index
    %56 = vector.load %arg6[%c0_62, %c0_63, %c0_64] : memref<1x8x1280xf32, #tpu.memory_space<vmem>>, vector<1x8x1280xf32>
    %57 = vector.shape_cast %56 : vector<1x8x1280xf32> to vector<8x1280xf32>
    %58 = vector.shape_cast %55 : vector<8x1280xf32> to vector<1x8x1280xf32>
    tpu.vector_store %arg6[%c0_62, %c0_63, %c0_64], %58 {strides = array<i32>} : memref<1x8x1280xf32, #tpu.memory_space<vmem>>, vector<1x8x1280xf32>,
    return
  }
  func.func @transform_0(%arg0: i32, %arg1: i32) -> (i32, i32, i32) {
    %c0_i32 = arith.constant 0 : i32
    %c0_i32_0 = arith.constant 0 : i32
    %c0_i32_1 = arith.constant 0 : i32
    return %arg0, %c0_i32, %c0_i32_0 : i32, i32, i32
  }
  func.func @transform_1(%arg0: i32, %arg1: i32) -> (i32, i32) {
    %c0_i32 = arith.constant 0 : i32
    %c0_i32_0 = arith.constant 0 : i32
    return %arg1, %c0_i32 : i32, i32
  }
  func.func @transform_2(%arg0: i32, %arg1: i32) -> (i32, i32) {
    %c0_i32 = arith.constant 0 : i32
    %c0_i32_0 = arith.constant 0 : i32
    return %arg1, %c0_i32 : i32, i32
  }
  func.func @transform_3(%arg0: i32, %arg1: i32) -> (i32, i32) {
    %c0_i32 = arith.constant 0 : i32
    %c0_i32_0 = arith.constant 0 : i32
    %c0_i32_1 = arith.constant 0 : i32
    return %c0_i32, %c0_i32_0 : i32, i32
  }
  func.func @transform_4(%arg0: i32, %arg1: i32) -> (i32, i32, i32) {
    %c0_i32 = arith.constant 0 : i32
    %c0_i32_0 = arith.constant 0 : i32
    return %arg0, %arg1, %c0_i32 : i32, i32, i32
  }
}

module attributes {stable_mosaic.version = 11 : i64} {
  func.func @kernel(%arg0: i32, %arg1: i32, %arg2: memref<1x4x1280xf32, #tpu.memory_space<vmem>>, %arg3: memref<4x36xf32, #tpu.memory_space<vmem>>, %arg4: memref<4x1xf32, #tpu.memory_space<vmem>>, %arg5: memref<1x1280xf32, #tpu.memory_space<vmem>>, %arg6: memref<1x4x1280xf32, #tpu.memory_space<vmem>>, %arg7: memref<36x1280xf32, #tpu.memory_space<vmem>>) attributes {dimension_semantics = [#tpu.dimension_semantics<parallel>, #tpu.dimension_semantics<parallel>], iteration_bounds = array<i64: 2, 1>, scalar_prefetch = 0 : i64, scratch_operands = 1 : i64, tpu.core_type = #tpu.core_type<tc>, window_params = [{transform_indices = @transform_0, window_bounds = array<i64: 1, 4, 1280>}, {transform_indices = @transform_1, window_bounds = array<i64: 4, 36>}, {transform_indices = @transform_2, window_bounds = array<i64: 4, 1>}, {pipeline_mode = #tpu.pipeline_mode<synchronous>, transform_indices = @transform_3, window_bounds = array<i64: 1, 1280>}, {transform_indices = @transform_4, window_bounds = array<i64: 1, 4, 1280>}]} {
    %c0 = arith.constant 0 : index
    %c0_0 = arith.constant 0 : index
    %c0_1 = arith.constant 0 : index
    %0 = vector.load %arg2[%c0, %c0_0, %c0_1] : memref<1x4x1280xf32, #tpu.memory_space<vmem>>, vector<1x4x1245xf32>
    %1 = vector.shape_cast %0 : vector<1x4x1245xf32> to vector<4x1245xf32>
    %c0_2 = arith.constant 0 : index
    %c35 = arith.constant 35 : index
    %2 = vector.load %arg7[%c0_2, %c35] : memref<36x1280xf32, #tpu.memory_space<vmem>>, vector<4x1245xf32>
    tpu.vector_store %arg7[%c0_2, %c35], %1 {strides = array<i32>} : memref<36x1280xf32, #tpu.memory_space<vmem>>, vector<4x1245xf32>,
    %cst = arith.constant 0.000000e+00 : f32
    %3 = vector.broadcast %cst : f32 to vector<4x35xf32>
    %c0_3 = arith.constant 0 : index
    %c0_4 = arith.constant 0 : index
    %4 = vector.load %arg7[%c0_3, %c0_4] : memref<36x1280xf32, #tpu.memory_space<vmem>>, vector<4x35xf32>
    tpu.vector_store %arg7[%c0_3, %c0_4], %3 {strides = array<i32>} : memref<36x1280xf32, #tpu.memory_space<vmem>>, vector<4x35xf32>,
    %c0_5 = arith.constant 0 : index
    %c0_6 = arith.constant 0 : index
    %c0_7 = arith.constant 0 : index
    %5 = vector.load %arg2[%c0_5, %c0_6, %c0_7] : memref<1x4x1280xf32, #tpu.memory_space<vmem>>, vector<1x4x1246xf32>
    %6 = vector.shape_cast %5 : vector<1x4x1246xf32> to vector<4x1246xf32>
    %c4 = arith.constant 4 : index
    %c34 = arith.constant 34 : index
    %7 = vector.load %arg7[%c4, %c34] : memref<36x1280xf32, #tpu.memory_space<vmem>>, vector<4x1246xf32>
    tpu.vector_store %arg7[%c4, %c34], %6 {strides = array<i32>} : memref<36x1280xf32, #tpu.memory_space<vmem>>, vector<4x1246xf32>,
    %cst_8 = arith.constant 0.000000e+00 : f32
    %8 = vector.broadcast %cst_8 : f32 to vector<4x34xf32>
    %c4_9 = arith.constant 4 : index
    %c0_10 = arith.constant 0 : index
    %9 = vector.load %arg7[%c4_9, %c0_10] : memref<36x1280xf32, #tpu.memory_space<vmem>>, vector<4x34xf32>
    tpu.vector_store %arg7[%c4_9, %c0_10], %8 {strides = array<i32>} : memref<36x1280xf32, #tpu.memory_space<vmem>>, vector<4x34xf32>,
    %c0_11 = arith.constant 0 : index
    %c0_12 = arith.constant 0 : index
    %c0_13 = arith.constant 0 : index
    %10 = vector.load %arg2[%c0_11, %c0_12, %c0_13] : memref<1x4x1280xf32, #tpu.memory_space<vmem>>, vector<1x4x1247xf32>
    %11 = vector.shape_cast %10 : vector<1x4x1247xf32> to vector<4x1247xf32>
    %c8 = arith.constant 8 : index
    %c33 = arith.constant 33 : index
    %12 = vector.load %arg7[%c8, %c33] : memref<36x1280xf32, #tpu.memory_space<vmem>>, vector<4x1247xf32>
    tpu.vector_store %arg7[%c8, %c33], %11 {strides = array<i32>} : memref<36x1280xf32, #tpu.memory_space<vmem>>, vector<4x1247xf32>,
    %cst_14 = arith.constant 0.000000e+00 : f32
    %13 = vector.broadcast %cst_14 : f32 to vector<4x33xf32>
    %c8_15 = arith.constant 8 : index
    %c0_16 = arith.constant 0 : index
    %14 = vector.load %arg7[%c8_15, %c0_16] : memref<36x1280xf32, #tpu.memory_space<vmem>>, vector<4x33xf32>
    tpu.vector_store %arg7[%c8_15, %c0_16], %13 {strides = array<i32>} : memref<36x1280xf32, #tpu.memory_space<vmem>>, vector<4x33xf32>,
    %c0_17 = arith.constant 0 : index
    %c0_18 = arith.constant 0 : index
    %c0_19 = arith.constant 0 : index
    %15 = vector.load %arg2[%c0_17, %c0_18, %c0_19] : memref<1x4x1280xf32, #tpu.memory_space<vmem>>, vector<1x4x1279xf32>
    %16 = vector.shape_cast %15 : vector<1x4x1279xf32> to vector<4x1279xf32>
    %c12 = arith.constant 12 : index
    %c1 = arith.constant 1 : index
    %17 = vector.load %arg7[%c12, %c1] : memref<36x1280xf32, #tpu.memory_space<vmem>>, vector<4x1279xf32>
    tpu.vector_store %arg7[%c12, %c1], %16 {strides = array<i32>} : memref<36x1280xf32, #tpu.memory_space<vmem>>, vector<4x1279xf32>,
    %cst_20 = arith.constant 0.000000e+00 : f32
    %18 = vector.broadcast %cst_20 : f32 to vector<4x1xf32>
    %c12_21 = arith.constant 12 : index
    %c0_22 = arith.constant 0 : index
    %19 = vector.load %arg7[%c12_21, %c0_22] : memref<36x1280xf32, #tpu.memory_space<vmem>>, vector<4x1xf32>
    tpu.vector_store %arg7[%c12_21, %c0_22], %18 {strides = array<i32>} : memref<36x1280xf32, #tpu.memory_space<vmem>>, vector<4x1xf32>,
    %c0_23 = arith.constant 0 : index
    %c0_24 = arith.constant 0 : index
    %c0_25 = arith.constant 0 : index
    %20 = vector.load %arg2[%c0_23, %c0_24, %c0_25] : memref<1x4x1280xf32, #tpu.memory_space<vmem>>, vector<1x4x1280xf32>
    %21 = vector.shape_cast %20 : vector<1x4x1280xf32> to vector<4x1280xf32>
    %c16 = arith.constant 16 : index
    %c0_26 = arith.constant 0 : index
    %22 = vector.load %arg7[%c16, %c0_26] : memref<36x1280xf32, #tpu.memory_space<vmem>>, vector<4x1280xf32>
    tpu.vector_store %arg7[%c16, %c0_26], %21 {strides = array<i32>} : memref<36x1280xf32, #tpu.memory_space<vmem>>, vector<4x1280xf32>,
    %c0_27 = arith.constant 0 : index
    %c0_28 = arith.constant 0 : index
    %c1_29 = arith.constant 1 : index
    %23 = vector.load %arg2[%c0_27, %c0_28, %c1_29] : memref<1x4x1280xf32, #tpu.memory_space<vmem>>, vector<1x4x1279xf32>
    %24 = vector.shape_cast %23 : vector<1x4x1279xf32> to vector<4x1279xf32>
    %c20 = arith.constant 20 : index
    %c0_30 = arith.constant 0 : index
    %25 = vector.load %arg7[%c20, %c0_30] : memref<36x1280xf32, #tpu.memory_space<vmem>>, vector<4x1279xf32>
    tpu.vector_store %arg7[%c20, %c0_30], %24 {strides = array<i32>} : memref<36x1280xf32, #tpu.memory_space<vmem>>, vector<4x1279xf32>,
    %cst_31 = arith.constant 0.000000e+00 : f32
    %26 = vector.broadcast %cst_31 : f32 to vector<4x1xf32>
    %c20_32 = arith.constant 20 : index
    %c1279 = arith.constant 1279 : index
    %27 = vector.load %arg7[%c20_32, %c1279] : memref<36x1280xf32, #tpu.memory_space<vmem>>, vector<4x1xf32>
    tpu.vector_store %arg7[%c20_32, %c1279], %26 {strides = array<i32>} : memref<36x1280xf32, #tpu.memory_space<vmem>>, vector<4x1xf32>,
    %c0_33 = arith.constant 0 : index
    %c0_34 = arith.constant 0 : index
    %c33_35 = arith.constant 33 : index
    %28 = vector.load %arg2[%c0_33, %c0_34, %c33_35] : memref<1x4x1280xf32, #tpu.memory_space<vmem>>, vector<1x4x1247xf32>
    %29 = vector.shape_cast %28 : vector<1x4x1247xf32> to vector<4x1247xf32>
    %c24 = arith.constant 24 : index
    %c0_36 = arith.constant 0 : index
    %30 = vector.load %arg7[%c24, %c0_36] : memref<36x1280xf32, #tpu.memory_space<vmem>>, vector<4x1247xf32>
    tpu.vector_store %arg7[%c24, %c0_36], %29 {strides = array<i32>} : memref<36x1280xf32, #tpu.memory_space<vmem>>, vector<4x1247xf32>,
    %cst_37 = arith.constant 0.000000e+00 : f32
    %31 = vector.broadcast %cst_37 : f32 to vector<4x33xf32>
    %c24_38 = arith.constant 24 : index
    %c1247 = arith.constant 1247 : index
    %32 = vector.load %arg7[%c24_38, %c1247] : memref<36x1280xf32, #tpu.memory_space<vmem>>, vector<4x33xf32>
    tpu.vector_store %arg7[%c24_38, %c1247], %31 {strides = array<i32>} : memref<36x1280xf32, #tpu.memory_space<vmem>>, vector<4x33xf32>,
    %c0_39 = arith.constant 0 : index
    %c0_40 = arith.constant 0 : index
    %c34_41 = arith.constant 34 : index
    %33 = vector.load %arg2[%c0_39, %c0_40, %c34_41] : memref<1x4x1280xf32, #tpu.memory_space<vmem>>, vector<1x4x1246xf32>
    %34 = vector.shape_cast %33 : vector<1x4x1246xf32> to vector<4x1246xf32>
    %c28 = arith.constant 28 : index
    %c0_42 = arith.constant 0 : index
    %35 = vector.load %arg7[%c28, %c0_42] : memref<36x1280xf32, #tpu.memory_space<vmem>>, vector<4x1246xf32>
    tpu.vector_store %arg7[%c28, %c0_42], %34 {strides = array<i32>} : memref<36x1280xf32, #tpu.memory_space<vmem>>, vector<4x1246xf32>,
    %cst_43 = arith.constant 0.000000e+00 : f32
    %36 = vector.broadcast %cst_43 : f32 to vector<4x34xf32>
    %c28_44 = arith.constant 28 : index
    %c1246 = arith.constant 1246 : index
    %37 = vector.load %arg7[%c28_44, %c1246] : memref<36x1280xf32, #tpu.memory_space<vmem>>, vector<4x34xf32>
    tpu.vector_store %arg7[%c28_44, %c1246], %36 {strides = array<i32>} : memref<36x1280xf32, #tpu.memory_space<vmem>>, vector<4x34xf32>,
    %c0_45 = arith.constant 0 : index
    %c0_46 = arith.constant 0 : index
    %c35_47 = arith.constant 35 : index
    %38 = vector.load %arg2[%c0_45, %c0_46, %c35_47] : memref<1x4x1280xf32, #tpu.memory_space<vmem>>, vector<1x4x1245xf32>
    %39 = vector.shape_cast %38 : vector<1x4x1245xf32> to vector<4x1245xf32>
    %c32 = arith.constant 32 : index
    %c0_48 = arith.constant 0 : index
    %40 = vector.load %arg7[%c32, %c0_48] : memref<36x1280xf32, #tpu.memory_space<vmem>>, vector<4x1245xf32>
    tpu.vector_store %arg7[%c32, %c0_48], %39 {strides = array<i32>} : memref<36x1280xf32, #tpu.memory_space<vmem>>, vector<4x1245xf32>,
    %cst_49 = arith.constant 0.000000e+00 : f32
    %41 = vector.broadcast %cst_49 : f32 to vector<4x35xf32>
    %c32_50 = arith.constant 32 : index
    %c1245 = arith.constant 1245 : index
    %42 = vector.load %arg7[%c32_50, %c1245] : memref<36x1280xf32, #tpu.memory_space<vmem>>, vector<4x35xf32>
    tpu.vector_store %arg7[%c32_50, %c1245], %41 {strides = array<i32>} : memref<36x1280xf32, #tpu.memory_space<vmem>>, vector<4x35xf32>,
    %c0_51 = arith.constant 0 : index
    %c0_52 = arith.constant 0 : index
    %43 = vector.load %arg3[%c0_51, %c0_52] : memref<4x36xf32, #tpu.memory_space<vmem>>, vector<4x36xf32>
    %c0_53 = arith.constant 0 : index
    %c0_54 = arith.constant 0 : index
    %44 = vector.load %arg7[%c0_53, %c0_54] : memref<36x1280xf32, #tpu.memory_space<vmem>>, vector<36x1280xf32>
    %cst_55 = arith.constant dense<0.000000e+00> : vector<4x1280xf32>
    %45 = tpu.matmul %43, %44, %cst_55 {dimension_numbers = #tpu.dot_dimension_numbers<[1], [0], [0], [1], [0, 0, 1, 1], [], []>} : vector<4x36xf32>, vector<36x1280xf32>, vector<4x1280xf32> -> vector<4x1280xf32>
    %c0_56 = arith.constant 0 : index
    %c0_57 = arith.constant 0 : index
    %46 = vector.load %arg4[%c0_56, %c0_57] : memref<4x1xf32, #tpu.memory_space<vmem>>, vector<4x1xf32>
    %47 = vector.broadcast %46 : vector<4x1xf32> to vector<4x1280xf32>
    %48 = arith.addf %45, %47 : vector<4x1280xf32>
    %c0_58 = arith.constant 0 : index
    %c0_59 = arith.constant 0 : index
    %49 = vector.load %arg5[%c0_58, %c0_59] : memref<1x1280xf32, #tpu.memory_space<vmem>>, vector<1x1280xf32>
    %cst_60 = arith.constant 5.000000e-01 : f32
    %50 = vector.broadcast %cst_60 : f32 to vector<1x1280xf32>
    %51 = arith.cmpf ogt, %49, %50 : vector<1x1280xf32>
    %cst_61 = arith.constant 0.000000e+00 : f32
    %52 = vector.shape_cast %51 : vector<1x1280xi1> to vector<1x1280xi1>
    %53 = vector.broadcast %52 : vector<1x1280xi1> to vector<4x1280xi1>
    %54 = vector.broadcast %cst_61 : f32 to vector<4x1280xf32>
    %55 = arith.select %53, %48, %54 : vector<4x1280xi1>, vector<4x1280xf32>
    %c0_62 = arith.constant 0 : index
    %c0_63 = arith.constant 0 : index
    %c0_64 = arith.constant 0 : index
    %56 = vector.load %arg6[%c0_62, %c0_63, %c0_64] : memref<1x4x1280xf32, #tpu.memory_space<vmem>>, vector<1x4x1280xf32>
    %57 = vector.shape_cast %56 : vector<1x4x1280xf32> to vector<4x1280xf32>
    %58 = vector.shape_cast %55 : vector<4x1280xf32> to vector<1x4x1280xf32>
    tpu.vector_store %arg6[%c0_62, %c0_63, %c0_64], %58 {strides = array<i32>} : memref<1x4x1280xf32, #tpu.memory_space<vmem>>, vector<1x4x1280xf32>,
    return
  }
  func.func @transform_0(%arg0: i32, %arg1: i32) -> (i32, i32, i32) {
    %c0_i32 = arith.constant 0 : i32
    %c0_i32_0 = arith.constant 0 : i32
    %c0_i32_1 = arith.constant 0 : i32
    return %arg0, %c0_i32, %c0_i32_0 : i32, i32, i32
  }
  func.func @transform_1(%arg0: i32, %arg1: i32) -> (i32, i32) {
    %c0_i32 = arith.constant 0 : i32
    %c0_i32_0 = arith.constant 0 : i32
    return %arg1, %c0_i32 : i32, i32
  }
  func.func @transform_2(%arg0: i32, %arg1: i32) -> (i32, i32) {
    %c0_i32 = arith.constant 0 : i32
    %c0_i32_0 = arith.constant 0 : i32
    return %arg1, %c0_i32 : i32, i32
  }
  func.func @transform_3(%arg0: i32, %arg1: i32) -> (i32, i32) {
    %c0_i32 = arith.constant 0 : i32
    %c0_i32_0 = arith.constant 0 : i32
    %c0_i32_1 = arith.constant 0 : i32
    return %c0_i32, %c0_i32_0 : i32, i32
  }
  func.func @transform_4(%arg0: i32, %arg1: i32) -> (i32, i32, i32) {
    %c0_i32 = arith.constant 0 : i32
    %c0_i32_0 = arith.constant 0 : i32
    return %arg0, %arg1, %c0_i32 : i32, i32, i32
  }
}

module attributes {stable_mosaic.version = 11 : i64} {
  func.func @kernel(%arg0: i32, %arg1: i32, %arg2: memref<1x4x1280xf32, #tpu.memory_space<vmem>>, %arg3: memref<4x36xf32, #tpu.memory_space<vmem>>, %arg4: memref<4x1xf32, #tpu.memory_space<vmem>>, %arg5: memref<1x1280xf32, #tpu.memory_space<vmem>>, %arg6: memref<1x4x1280xf32, #tpu.memory_space<vmem>>, %arg7: memref<1x4x1280xf32, #tpu.memory_space<vmem>>, %arg8: memref<1x4x1280xf32, #tpu.memory_space<vmem>>, %arg9: memref<36x1280xf32, #tpu.memory_space<vmem>>) attributes {dimension_semantics = [#tpu.dimension_semantics<parallel>, #tpu.dimension_semantics<parallel>], iteration_bounds = array<i64: 2, 1>, scalar_prefetch = 0 : i64, scratch_operands = 1 : i64, tpu.core_type = #tpu.core_type<tc>, window_params = [{transform_indices = @transform_0, window_bounds = array<i64: 1, 4, 1280>}, {transform_indices = @transform_1, window_bounds = array<i64: 4, 36>}, {transform_indices = @transform_2, window_bounds = array<i64: 4, 1>}, {pipeline_mode = #tpu.pipeline_mode<synchronous>, transform_indices = @transform_3, window_bounds = array<i64: 1, 1280>}, {transform_indices = @transform_4, window_bounds = array<i64: 1, 4, 1280>}, {transform_indices = @transform_5, window_bounds = array<i64: 1, 4, 1280>}, {transform_indices = @transform_6, window_bounds = array<i64: 1, 4, 1280>}]} {
    %c0 = arith.constant 0 : index
    %c0_0 = arith.constant 0 : index
    %c0_1 = arith.constant 0 : index
    %0 = vector.load %arg2[%c0, %c0_0, %c0_1] : memref<1x4x1280xf32, #tpu.memory_space<vmem>>, vector<1x4x1245xf32>
    %1 = vector.shape_cast %0 : vector<1x4x1245xf32> to vector<4x1245xf32>
    %c0_2 = arith.constant 0 : index
    %c35 = arith.constant 35 : index
    %2 = vector.load %arg9[%c0_2, %c35] : memref<36x1280xf32, #tpu.memory_space<vmem>>, vector<4x1245xf32>
    tpu.vector_store %arg9[%c0_2, %c35], %1 {strides = array<i32>} : memref<36x1280xf32, #tpu.memory_space<vmem>>, vector<4x1245xf32>,
    %cst = arith.constant 0.000000e+00 : f32
    %3 = vector.broadcast %cst : f32 to vector<4x35xf32>
    %c0_3 = arith.constant 0 : index
    %c0_4 = arith.constant 0 : index
    %4 = vector.load %arg9[%c0_3, %c0_4] : memref<36x1280xf32, #tpu.memory_space<vmem>>, vector<4x35xf32>
    tpu.vector_store %arg9[%c0_3, %c0_4], %3 {strides = array<i32>} : memref<36x1280xf32, #tpu.memory_space<vmem>>, vector<4x35xf32>,
    %c0_5 = arith.constant 0 : index
    %c0_6 = arith.constant 0 : index
    %c0_7 = arith.constant 0 : index
    %5 = vector.load %arg2[%c0_5, %c0_6, %c0_7] : memref<1x4x1280xf32, #tpu.memory_space<vmem>>, vector<1x4x1246xf32>
    %6 = vector.shape_cast %5 : vector<1x4x1246xf32> to vector<4x1246xf32>
    %c4 = arith.constant 4 : index
    %c34 = arith.constant 34 : index
    %7 = vector.load %arg9[%c4, %c34] : memref<36x1280xf32, #tpu.memory_space<vmem>>, vector<4x1246xf32>
    tpu.vector_store %arg9[%c4, %c34], %6 {strides = array<i32>} : memref<36x1280xf32, #tpu.memory_space<vmem>>, vector<4x1246xf32>,
    %cst_8 = arith.constant 0.000000e+00 : f32
    %8 = vector.broadcast %cst_8 : f32 to vector<4x34xf32>
    %c4_9 = arith.constant 4 : index
    %c0_10 = arith.constant 0 : index
    %9 = vector.load %arg9[%c4_9, %c0_10] : memref<36x1280xf32, #tpu.memory_space<vmem>>, vector<4x34xf32>
    tpu.vector_store %arg9[%c4_9, %c0_10], %8 {strides = array<i32>} : memref<36x1280xf32, #tpu.memory_space<vmem>>, vector<4x34xf32>,
    %c0_11 = arith.constant 0 : index
    %c0_12 = arith.constant 0 : index
    %c0_13 = arith.constant 0 : index
    %10 = vector.load %arg2[%c0_11, %c0_12, %c0_13] : memref<1x4x1280xf32, #tpu.memory_space<vmem>>, vector<1x4x1247xf32>
    %11 = vector.shape_cast %10 : vector<1x4x1247xf32> to vector<4x1247xf32>
    %c8 = arith.constant 8 : index
    %c33 = arith.constant 33 : index
    %12 = vector.load %arg9[%c8, %c33] : memref<36x1280xf32, #tpu.memory_space<vmem>>, vector<4x1247xf32>
    tpu.vector_store %arg9[%c8, %c33], %11 {strides = array<i32>} : memref<36x1280xf32, #tpu.memory_space<vmem>>, vector<4x1247xf32>,
    %cst_14 = arith.constant 0.000000e+00 : f32
    %13 = vector.broadcast %cst_14 : f32 to vector<4x33xf32>
    %c8_15 = arith.constant 8 : index
    %c0_16 = arith.constant 0 : index
    %14 = vector.load %arg9[%c8_15, %c0_16] : memref<36x1280xf32, #tpu.memory_space<vmem>>, vector<4x33xf32>
    tpu.vector_store %arg9[%c8_15, %c0_16], %13 {strides = array<i32>} : memref<36x1280xf32, #tpu.memory_space<vmem>>, vector<4x33xf32>,
    %c0_17 = arith.constant 0 : index
    %c0_18 = arith.constant 0 : index
    %c0_19 = arith.constant 0 : index
    %15 = vector.load %arg2[%c0_17, %c0_18, %c0_19] : memref<1x4x1280xf32, #tpu.memory_space<vmem>>, vector<1x4x1279xf32>
    %16 = vector.shape_cast %15 : vector<1x4x1279xf32> to vector<4x1279xf32>
    %c12 = arith.constant 12 : index
    %c1 = arith.constant 1 : index
    %17 = vector.load %arg9[%c12, %c1] : memref<36x1280xf32, #tpu.memory_space<vmem>>, vector<4x1279xf32>
    tpu.vector_store %arg9[%c12, %c1], %16 {strides = array<i32>} : memref<36x1280xf32, #tpu.memory_space<vmem>>, vector<4x1279xf32>,
    %cst_20 = arith.constant 0.000000e+00 : f32
    %18 = vector.broadcast %cst_20 : f32 to vector<4x1xf32>
    %c12_21 = arith.constant 12 : index
    %c0_22 = arith.constant 0 : index
    %19 = vector.load %arg9[%c12_21, %c0_22] : memref<36x1280xf32, #tpu.memory_space<vmem>>, vector<4x1xf32>
    tpu.vector_store %arg9[%c12_21, %c0_22], %18 {strides = array<i32>} : memref<36x1280xf32, #tpu.memory_space<vmem>>, vector<4x1xf32>,
    %c0_23 = arith.constant 0 : index
    %c0_24 = arith.constant 0 : index
    %c0_25 = arith.constant 0 : index
    %20 = vector.load %arg2[%c0_23, %c0_24, %c0_25] : memref<1x4x1280xf32, #tpu.memory_space<vmem>>, vector<1x4x1280xf32>
    %21 = vector.shape_cast %20 : vector<1x4x1280xf32> to vector<4x1280xf32>
    %c16 = arith.constant 16 : index
    %c0_26 = arith.constant 0 : index
    %22 = vector.load %arg9[%c16, %c0_26] : memref<36x1280xf32, #tpu.memory_space<vmem>>, vector<4x1280xf32>
    tpu.vector_store %arg9[%c16, %c0_26], %21 {strides = array<i32>} : memref<36x1280xf32, #tpu.memory_space<vmem>>, vector<4x1280xf32>,
    %c0_27 = arith.constant 0 : index
    %c0_28 = arith.constant 0 : index
    %c1_29 = arith.constant 1 : index
    %23 = vector.load %arg2[%c0_27, %c0_28, %c1_29] : memref<1x4x1280xf32, #tpu.memory_space<vmem>>, vector<1x4x1279xf32>
    %24 = vector.shape_cast %23 : vector<1x4x1279xf32> to vector<4x1279xf32>
    %c20 = arith.constant 20 : index
    %c0_30 = arith.constant 0 : index
    %25 = vector.load %arg9[%c20, %c0_30] : memref<36x1280xf32, #tpu.memory_space<vmem>>, vector<4x1279xf32>
    tpu.vector_store %arg9[%c20, %c0_30], %24 {strides = array<i32>} : memref<36x1280xf32, #tpu.memory_space<vmem>>, vector<4x1279xf32>,
    %cst_31 = arith.constant 0.000000e+00 : f32
    %26 = vector.broadcast %cst_31 : f32 to vector<4x1xf32>
    %c20_32 = arith.constant 20 : index
    %c1279 = arith.constant 1279 : index
    %27 = vector.load %arg9[%c20_32, %c1279] : memref<36x1280xf32, #tpu.memory_space<vmem>>, vector<4x1xf32>
    tpu.vector_store %arg9[%c20_32, %c1279], %26 {strides = array<i32>} : memref<36x1280xf32, #tpu.memory_space<vmem>>, vector<4x1xf32>,
    %c0_33 = arith.constant 0 : index
    %c0_34 = arith.constant 0 : index
    %c33_35 = arith.constant 33 : index
    %28 = vector.load %arg2[%c0_33, %c0_34, %c33_35] : memref<1x4x1280xf32, #tpu.memory_space<vmem>>, vector<1x4x1247xf32>
    %29 = vector.shape_cast %28 : vector<1x4x1247xf32> to vector<4x1247xf32>
    %c24 = arith.constant 24 : index
    %c0_36 = arith.constant 0 : index
    %30 = vector.load %arg9[%c24, %c0_36] : memref<36x1280xf32, #tpu.memory_space<vmem>>, vector<4x1247xf32>
    tpu.vector_store %arg9[%c24, %c0_36], %29 {strides = array<i32>} : memref<36x1280xf32, #tpu.memory_space<vmem>>, vector<4x1247xf32>,
    %cst_37 = arith.constant 0.000000e+00 : f32
    %31 = vector.broadcast %cst_37 : f32 to vector<4x33xf32>
    %c24_38 = arith.constant 24 : index
    %c1247 = arith.constant 1247 : index
    %32 = vector.load %arg9[%c24_38, %c1247] : memref<36x1280xf32, #tpu.memory_space<vmem>>, vector<4x33xf32>
    tpu.vector_store %arg9[%c24_38, %c1247], %31 {strides = array<i32>} : memref<36x1280xf32, #tpu.memory_space<vmem>>, vector<4x33xf32>,
    %c0_39 = arith.constant 0 : index
    %c0_40 = arith.constant 0 : index
    %c34_41 = arith.constant 34 : index
    %33 = vector.load %arg2[%c0_39, %c0_40, %c34_41] : memref<1x4x1280xf32, #tpu.memory_space<vmem>>, vector<1x4x1246xf32>
    %34 = vector.shape_cast %33 : vector<1x4x1246xf32> to vector<4x1246xf32>
    %c28 = arith.constant 28 : index
    %c0_42 = arith.constant 0 : index
    %35 = vector.load %arg9[%c28, %c0_42] : memref<36x1280xf32, #tpu.memory_space<vmem>>, vector<4x1246xf32>
    tpu.vector_store %arg9[%c28, %c0_42], %34 {strides = array<i32>} : memref<36x1280xf32, #tpu.memory_space<vmem>>, vector<4x1246xf32>,
    %cst_43 = arith.constant 0.000000e+00 : f32
    %36 = vector.broadcast %cst_43 : f32 to vector<4x34xf32>
    %c28_44 = arith.constant 28 : index
    %c1246 = arith.constant 1246 : index
    %37 = vector.load %arg9[%c28_44, %c1246] : memref<36x1280xf32, #tpu.memory_space<vmem>>, vector<4x34xf32>
    tpu.vector_store %arg9[%c28_44, %c1246], %36 {strides = array<i32>} : memref<36x1280xf32, #tpu.memory_space<vmem>>, vector<4x34xf32>,
    %c0_45 = arith.constant 0 : index
    %c0_46 = arith.constant 0 : index
    %c35_47 = arith.constant 35 : index
    %38 = vector.load %arg2[%c0_45, %c0_46, %c35_47] : memref<1x4x1280xf32, #tpu.memory_space<vmem>>, vector<1x4x1245xf32>
    %39 = vector.shape_cast %38 : vector<1x4x1245xf32> to vector<4x1245xf32>
    %c32 = arith.constant 32 : index
    %c0_48 = arith.constant 0 : index
    %40 = vector.load %arg9[%c32, %c0_48] : memref<36x1280xf32, #tpu.memory_space<vmem>>, vector<4x1245xf32>
    tpu.vector_store %arg9[%c32, %c0_48], %39 {strides = array<i32>} : memref<36x1280xf32, #tpu.memory_space<vmem>>, vector<4x1245xf32>,
    %cst_49 = arith.constant 0.000000e+00 : f32
    %41 = vector.broadcast %cst_49 : f32 to vector<4x35xf32>
    %c32_50 = arith.constant 32 : index
    %c1245 = arith.constant 1245 : index
    %42 = vector.load %arg9[%c32_50, %c1245] : memref<36x1280xf32, #tpu.memory_space<vmem>>, vector<4x35xf32>
    tpu.vector_store %arg9[%c32_50, %c1245], %41 {strides = array<i32>} : memref<36x1280xf32, #tpu.memory_space<vmem>>, vector<4x35xf32>,
    %c0_51 = arith.constant 0 : index
    %c0_52 = arith.constant 0 : index
    %43 = vector.load %arg3[%c0_51, %c0_52] : memref<4x36xf32, #tpu.memory_space<vmem>>, vector<4x36xf32>
    %c0_53 = arith.constant 0 : index
    %c0_54 = arith.constant 0 : index
    %44 = vector.load %arg9[%c0_53, %c0_54] : memref<36x1280xf32, #tpu.memory_space<vmem>>, vector<36x1280xf32>
    %cst_55 = arith.constant dense<0.000000e+00> : vector<4x1280xf32>
    %45 = tpu.matmul %43, %44, %cst_55 {dimension_numbers = #tpu.dot_dimension_numbers<[1], [0], [0], [1], [0, 0, 1, 1], [], []>} : vector<4x36xf32>, vector<36x1280xf32>, vector<4x1280xf32> -> vector<4x1280xf32>
    %c0_56 = arith.constant 0 : index
    %c0_57 = arith.constant 0 : index
    %46 = vector.load %arg4[%c0_56, %c0_57] : memref<4x1xf32, #tpu.memory_space<vmem>>, vector<4x1xf32>
    %47 = vector.broadcast %46 : vector<4x1xf32> to vector<4x1280xf32>
    %48 = arith.addf %45, %47 : vector<4x1280xf32>
    %c0_58 = arith.constant 0 : index
    %c0_59 = arith.constant 0 : index
    %49 = vector.load %arg5[%c0_58, %c0_59] : memref<1x1280xf32, #tpu.memory_space<vmem>>, vector<1x1280xf32>
    %cst_60 = arith.constant 5.000000e-01 : f32
    %50 = vector.broadcast %cst_60 : f32 to vector<1x1280xf32>
    %51 = arith.cmpf ogt, %49, %50 : vector<1x1280xf32>
    %cst_61 = arith.constant 0.000000e+00 : f32
    %52 = vector.shape_cast %51 : vector<1x1280xi1> to vector<1x1280xi1>
    %53 = vector.broadcast %52 : vector<1x1280xi1> to vector<4x1280xi1>
    %54 = vector.broadcast %cst_61 : f32 to vector<4x1280xf32>
    %55 = arith.select %53, %48, %54 : vector<4x1280xi1>, vector<4x1280xf32>
    %c0_62 = arith.constant 0 : index
    %c0_63 = arith.constant 0 : index
    %c0_64 = arith.constant 0 : index
    %56 = vector.load %arg6[%c0_62, %c0_63, %c0_64] : memref<1x4x1280xf32, #tpu.memory_space<vmem>>, vector<1x4x1280xf32>
    %57 = vector.shape_cast %56 : vector<1x4x1280xf32> to vector<4x1280xf32>
    %58 = arith.mulf %55, %57 : vector<4x1280xf32>
    %c0_65 = arith.constant 0 : index
    %c0_66 = arith.constant 0 : index
    %c0_67 = arith.constant 0 : index
    %59 = vector.load %arg7[%c0_65, %c0_66, %c0_67] : memref<1x4x1280xf32, #tpu.memory_space<vmem>>, vector<1x4x1280xf32>
    %60 = vector.shape_cast %59 : vector<1x4x1280xf32> to vector<4x1280xf32>
    %61 = arith.mulf %58, %60 : vector<4x1280xf32>
    %c0_68 = arith.constant 0 : index
    %c0_69 = arith.constant 0 : index
    %c0_70 = arith.constant 0 : index
    %62 = vector.load %arg8[%c0_68, %c0_69, %c0_70] : memref<1x4x1280xf32, #tpu.memory_space<vmem>>, vector<1x4x1280xf32>
    %63 = vector.shape_cast %62 : vector<1x4x1280xf32> to vector<4x1280xf32>
    %64 = vector.shape_cast %61 : vector<4x1280xf32> to vector<1x4x1280xf32>
    tpu.vector_store %arg8[%c0_68, %c0_69, %c0_70], %64 {strides = array<i32>} : memref<1x4x1280xf32, #tpu.memory_space<vmem>>, vector<1x4x1280xf32>,
    return
  }
  func.func @transform_0(%arg0: i32, %arg1: i32) -> (i32, i32, i32) {
    %c0_i32 = arith.constant 0 : i32
    %c0_i32_0 = arith.constant 0 : i32
    %c0_i32_1 = arith.constant 0 : i32
    return %arg0, %c0_i32, %c0_i32_0 : i32, i32, i32
  }
  func.func @transform_1(%arg0: i32, %arg1: i32) -> (i32, i32) {
    %c0_i32 = arith.constant 0 : i32
    %c0_i32_0 = arith.constant 0 : i32
    return %arg1, %c0_i32 : i32, i32
  }
  func.func @transform_2(%arg0: i32, %arg1: i32) -> (i32, i32) {
    %c0_i32 = arith.constant 0 : i32
    %c0_i32_0 = arith.constant 0 : i32
    return %arg1, %c0_i32 : i32, i32
  }
  func.func @transform_3(%arg0: i32, %arg1: i32) -> (i32, i32) {
    %c0_i32 = arith.constant 0 : i32
    %c0_i32_0 = arith.constant 0 : i32
    %c0_i32_1 = arith.constant 0 : i32
    return %c0_i32, %c0_i32_0 : i32, i32
  }
  func.func @transform_4(%arg0: i32, %arg1: i32) -> (i32, i32, i32) {
    %c0_i32 = arith.constant 0 : i32
    %c0_i32_0 = arith.constant 0 : i32
    return %arg0, %arg1, %c0_i32 : i32, i32, i32
  }
  func.func @transform_5(%arg0: i32, %arg1: i32) -> (i32, i32, i32) {
    %c0_i32 = arith.constant 0 : i32
    %c0_i32_0 = arith.constant 0 : i32
    return %arg0, %arg1, %c0_i32 : i32, i32, i32
  }
  func.func @transform_6(%arg0: i32, %arg1: i32) -> (i32, i32, i32) {
    %c0_i32 = arith.constant 0 : i32
    %c0_i32_0 = arith.constant 0 : i32
    return %arg0, %arg1, %c0_i32 : i32, i32, i32
  }
}

module attributes {stable_mosaic.version = 11 : i64} {
  func.func @kernel(%arg0: i32, %arg1: i32, %arg2: memref<1x4x1280xf32, #tpu.memory_space<vmem>>, %arg3: memref<1x8x1280xf32, #tpu.memory_space<vmem>>, %arg4: memref<12x108xf32, #tpu.memory_space<vmem>>, %arg5: memref<12x1xf32, #tpu.memory_space<vmem>>, %arg6: memref<1x1280xf32, #tpu.memory_space<vmem>>, %arg7: memref<1x12x1280xf32, #tpu.memory_space<vmem>>, %arg8: memref<108x1280xf32, #tpu.memory_space<vmem>>) attributes {dimension_semantics = [#tpu.dimension_semantics<parallel>, #tpu.dimension_semantics<parallel>], iteration_bounds = array<i64: 2, 1>, scalar_prefetch = 0 : i64, scratch_operands = 1 : i64, tpu.core_type = #tpu.core_type<tc>, window_params = [{transform_indices = @transform_0, window_bounds = array<i64: 1, 4, 1280>}, {transform_indices = @transform_1, window_bounds = array<i64: 1, 8, 1280>}, {transform_indices = @transform_2, window_bounds = array<i64: 12, 108>}, {transform_indices = @transform_3, window_bounds = array<i64: 12, 1>}, {pipeline_mode = #tpu.pipeline_mode<synchronous>, transform_indices = @transform_4, window_bounds = array<i64: 1, 1280>}, {transform_indices = @transform_5, window_bounds = array<i64: 1, 12, 1280>}]} {
    %c0 = arith.constant 0 : index
    %c0_0 = arith.constant 0 : index
    %c0_1 = arith.constant 0 : index
    %0 = vector.load %arg2[%c0, %c0_0, %c0_1] : memref<1x4x1280xf32, #tpu.memory_space<vmem>>, vector<1x4x1245xf32>
    %1 = vector.shape_cast %0 : vector<1x4x1245xf32> to vector<4x1245xf32>
    %c0_2 = arith.constant 0 : index
    %c35 = arith.constant 35 : index
    %2 = vector.load %arg8[%c0_2, %c35] : memref<108x1280xf32, #tpu.memory_space<vmem>>, vector<4x1245xf32>
    tpu.vector_store %arg8[%c0_2, %c35], %1 {strides = array<i32>} : memref<108x1280xf32, #tpu.memory_space<vmem>>, vector<4x1245xf32>,
    %cst = arith.constant 0.000000e+00 : f32
    %3 = vector.broadcast %cst : f32 to vector<4x35xf32>
    %c0_3 = arith.constant 0 : index
    %c0_4 = arith.constant 0 : index
    %4 = vector.load %arg8[%c0_3, %c0_4] : memref<108x1280xf32, #tpu.memory_space<vmem>>, vector<4x35xf32>
    tpu.vector_store %arg8[%c0_3, %c0_4], %3 {strides = array<i32>} : memref<108x1280xf32, #tpu.memory_space<vmem>>, vector<4x35xf32>,
    %c0_5 = arith.constant 0 : index
    %c0_6 = arith.constant 0 : index
    %c0_7 = arith.constant 0 : index
    %5 = vector.load %arg2[%c0_5, %c0_6, %c0_7] : memref<1x4x1280xf32, #tpu.memory_space<vmem>>, vector<1x4x1246xf32>
    %6 = vector.shape_cast %5 : vector<1x4x1246xf32> to vector<4x1246xf32>
    %c4 = arith.constant 4 : index
    %c34 = arith.constant 34 : index
    %7 = vector.load %arg8[%c4, %c34] : memref<108x1280xf32, #tpu.memory_space<vmem>>, vector<4x1246xf32>
    tpu.vector_store %arg8[%c4, %c34], %6 {strides = array<i32>} : memref<108x1280xf32, #tpu.memory_space<vmem>>, vector<4x1246xf32>,
    %cst_8 = arith.constant 0.000000e+00 : f32
    %8 = vector.broadcast %cst_8 : f32 to vector<4x34xf32>
    %c4_9 = arith.constant 4 : index
    %c0_10 = arith.constant 0 : index
    %9 = vector.load %arg8[%c4_9, %c0_10] : memref<108x1280xf32, #tpu.memory_space<vmem>>, vector<4x34xf32>
    tpu.vector_store %arg8[%c4_9, %c0_10], %8 {strides = array<i32>} : memref<108x1280xf32, #tpu.memory_space<vmem>>, vector<4x34xf32>,
    %c0_11 = arith.constant 0 : index
    %c0_12 = arith.constant 0 : index
    %c0_13 = arith.constant 0 : index
    %10 = vector.load %arg2[%c0_11, %c0_12, %c0_13] : memref<1x4x1280xf32, #tpu.memory_space<vmem>>, vector<1x4x1247xf32>
    %11 = vector.shape_cast %10 : vector<1x4x1247xf32> to vector<4x1247xf32>
    %c8 = arith.constant 8 : index
    %c33 = arith.constant 33 : index
    %12 = vector.load %arg8[%c8, %c33] : memref<108x1280xf32, #tpu.memory_space<vmem>>, vector<4x1247xf32>
    tpu.vector_store %arg8[%c8, %c33], %11 {strides = array<i32>} : memref<108x1280xf32, #tpu.memory_space<vmem>>, vector<4x1247xf32>,
    %cst_14 = arith.constant 0.000000e+00 : f32
    %13 = vector.broadcast %cst_14 : f32 to vector<4x33xf32>
    %c8_15 = arith.constant 8 : index
    %c0_16 = arith.constant 0 : index
    %14 = vector.load %arg8[%c8_15, %c0_16] : memref<108x1280xf32, #tpu.memory_space<vmem>>, vector<4x33xf32>
    tpu.vector_store %arg8[%c8_15, %c0_16], %13 {strides = array<i32>} : memref<108x1280xf32, #tpu.memory_space<vmem>>, vector<4x33xf32>,
    %c0_17 = arith.constant 0 : index
    %c0_18 = arith.constant 0 : index
    %c0_19 = arith.constant 0 : index
    %15 = vector.load %arg2[%c0_17, %c0_18, %c0_19] : memref<1x4x1280xf32, #tpu.memory_space<vmem>>, vector<1x4x1279xf32>
    %16 = vector.shape_cast %15 : vector<1x4x1279xf32> to vector<4x1279xf32>
    %c12 = arith.constant 12 : index
    %c1 = arith.constant 1 : index
    %17 = vector.load %arg8[%c12, %c1] : memref<108x1280xf32, #tpu.memory_space<vmem>>, vector<4x1279xf32>
    tpu.vector_store %arg8[%c12, %c1], %16 {strides = array<i32>} : memref<108x1280xf32, #tpu.memory_space<vmem>>, vector<4x1279xf32>,
    %cst_20 = arith.constant 0.000000e+00 : f32
    %18 = vector.broadcast %cst_20 : f32 to vector<4x1xf32>
    %c12_21 = arith.constant 12 : index
    %c0_22 = arith.constant 0 : index
    %19 = vector.load %arg8[%c12_21, %c0_22] : memref<108x1280xf32, #tpu.memory_space<vmem>>, vector<4x1xf32>
    tpu.vector_store %arg8[%c12_21, %c0_22], %18 {strides = array<i32>} : memref<108x1280xf32, #tpu.memory_space<vmem>>, vector<4x1xf32>,
    %c0_23 = arith.constant 0 : index
    %c0_24 = arith.constant 0 : index
    %c0_25 = arith.constant 0 : index
    %20 = vector.load %arg2[%c0_23, %c0_24, %c0_25] : memref<1x4x1280xf32, #tpu.memory_space<vmem>>, vector<1x4x1280xf32>
    %21 = vector.shape_cast %20 : vector<1x4x1280xf32> to vector<4x1280xf32>
    %c16 = arith.constant 16 : index
    %c0_26 = arith.constant 0 : index
    %22 = vector.load %arg8[%c16, %c0_26] : memref<108x1280xf32, #tpu.memory_space<vmem>>, vector<4x1280xf32>
    tpu.vector_store %arg8[%c16, %c0_26], %21 {strides = array<i32>} : memref<108x1280xf32, #tpu.memory_space<vmem>>, vector<4x1280xf32>,
    %c0_27 = arith.constant 0 : index
    %c0_28 = arith.constant 0 : index
    %c1_29 = arith.constant 1 : index
    %23 = vector.load %arg2[%c0_27, %c0_28, %c1_29] : memref<1x4x1280xf32, #tpu.memory_space<vmem>>, vector<1x4x1279xf32>
    %24 = vector.shape_cast %23 : vector<1x4x1279xf32> to vector<4x1279xf32>
    %c20 = arith.constant 20 : index
    %c0_30 = arith.constant 0 : index
    %25 = vector.load %arg8[%c20, %c0_30] : memref<108x1280xf32, #tpu.memory_space<vmem>>, vector<4x1279xf32>
    tpu.vector_store %arg8[%c20, %c0_30], %24 {strides = array<i32>} : memref<108x1280xf32, #tpu.memory_space<vmem>>, vector<4x1279xf32>,
    %cst_31 = arith.constant 0.000000e+00 : f32
    %26 = vector.broadcast %cst_31 : f32 to vector<4x1xf32>
    %c20_32 = arith.constant 20 : index
    %c1279 = arith.constant 1279 : index
    %27 = vector.load %arg8[%c20_32, %c1279] : memref<108x1280xf32, #tpu.memory_space<vmem>>, vector<4x1xf32>
    tpu.vector_store %arg8[%c20_32, %c1279], %26 {strides = array<i32>} : memref<108x1280xf32, #tpu.memory_space<vmem>>, vector<4x1xf32>,
    %c0_33 = arith.constant 0 : index
    %c0_34 = arith.constant 0 : index
    %c33_35 = arith.constant 33 : index
    %28 = vector.load %arg2[%c0_33, %c0_34, %c33_35] : memref<1x4x1280xf32, #tpu.memory_space<vmem>>, vector<1x4x1247xf32>
    %29 = vector.shape_cast %28 : vector<1x4x1247xf32> to vector<4x1247xf32>
    %c24 = arith.constant 24 : index
    %c0_36 = arith.constant 0 : index
    %30 = vector.load %arg8[%c24, %c0_36] : memref<108x1280xf32, #tpu.memory_space<vmem>>, vector<4x1247xf32>
    tpu.vector_store %arg8[%c24, %c0_36], %29 {strides = array<i32>} : memref<108x1280xf32, #tpu.memory_space<vmem>>, vector<4x1247xf32>,
    %cst_37 = arith.constant 0.000000e+00 : f32
    %31 = vector.broadcast %cst_37 : f32 to vector<4x33xf32>
    %c24_38 = arith.constant 24 : index
    %c1247 = arith.constant 1247 : index
    %32 = vector.load %arg8[%c24_38, %c1247] : memref<108x1280xf32, #tpu.memory_space<vmem>>, vector<4x33xf32>
    tpu.vector_store %arg8[%c24_38, %c1247], %31 {strides = array<i32>} : memref<108x1280xf32, #tpu.memory_space<vmem>>, vector<4x33xf32>,
    %c0_39 = arith.constant 0 : index
    %c0_40 = arith.constant 0 : index
    %c34_41 = arith.constant 34 : index
    %33 = vector.load %arg2[%c0_39, %c0_40, %c34_41] : memref<1x4x1280xf32, #tpu.memory_space<vmem>>, vector<1x4x1246xf32>
    %34 = vector.shape_cast %33 : vector<1x4x1246xf32> to vector<4x1246xf32>
    %c28 = arith.constant 28 : index
    %c0_42 = arith.constant 0 : index
    %35 = vector.load %arg8[%c28, %c0_42] : memref<108x1280xf32, #tpu.memory_space<vmem>>, vector<4x1246xf32>
    tpu.vector_store %arg8[%c28, %c0_42], %34 {strides = array<i32>} : memref<108x1280xf32, #tpu.memory_space<vmem>>, vector<4x1246xf32>,
    %cst_43 = arith.constant 0.000000e+00 : f32
    %36 = vector.broadcast %cst_43 : f32 to vector<4x34xf32>
    %c28_44 = arith.constant 28 : index
    %c1246 = arith.constant 1246 : index
    %37 = vector.load %arg8[%c28_44, %c1246] : memref<108x1280xf32, #tpu.memory_space<vmem>>, vector<4x34xf32>
    tpu.vector_store %arg8[%c28_44, %c1246], %36 {strides = array<i32>} : memref<108x1280xf32, #tpu.memory_space<vmem>>, vector<4x34xf32>,
    %c0_45 = arith.constant 0 : index
    %c0_46 = arith.constant 0 : index
    %c35_47 = arith.constant 35 : index
    %38 = vector.load %arg2[%c0_45, %c0_46, %c35_47] : memref<1x4x1280xf32, #tpu.memory_space<vmem>>, vector<1x4x1245xf32>
    %39 = vector.shape_cast %38 : vector<1x4x1245xf32> to vector<4x1245xf32>
    %c32 = arith.constant 32 : index
    %c0_48 = arith.constant 0 : index
    %40 = vector.load %arg8[%c32, %c0_48] : memref<108x1280xf32, #tpu.memory_space<vmem>>, vector<4x1245xf32>
    tpu.vector_store %arg8[%c32, %c0_48], %39 {strides = array<i32>} : memref<108x1280xf32, #tpu.memory_space<vmem>>, vector<4x1245xf32>,
    %cst_49 = arith.constant 0.000000e+00 : f32
    %41 = vector.broadcast %cst_49 : f32 to vector<4x35xf32>
    %c32_50 = arith.constant 32 : index
    %c1245 = arith.constant 1245 : index
    %42 = vector.load %arg8[%c32_50, %c1245] : memref<108x1280xf32, #tpu.memory_space<vmem>>, vector<4x35xf32>
    tpu.vector_store %arg8[%c32_50, %c1245], %41 {strides = array<i32>} : memref<108x1280xf32, #tpu.memory_space<vmem>>, vector<4x35xf32>,
    %c0_51 = arith.constant 0 : index
    %c0_52 = arith.constant 0 : index
    %c0_53 = arith.constant 0 : index
    %43 = vector.load %arg3[%c0_51, %c0_52, %c0_53] : memref<1x8x1280xf32, #tpu.memory_space<vmem>>, vector<1x8x1245xf32>
    %44 = vector.shape_cast %43 : vector<1x8x1245xf32> to vector<8x1245xf32>
    %c36 = arith.constant 36 : index
    %c35_54 = arith.constant 35 : index
    %45 = vector.load %arg8[%c36, %c35_54] : memref<108x1280xf32, #tpu.memory_space<vmem>>, vector<8x1245xf32>
    tpu.vector_store %arg8[%c36, %c35_54], %44 {strides = array<i32>} : memref<108x1280xf32, #tpu.memory_space<vmem>>, vector<8x1245xf32>,
    %cst_55 = arith.constant 0.000000e+00 : f32
    %46 = vector.broadcast %cst_55 : f32 to vector<8x35xf32>
    %c36_56 = arith.constant 36 : index
    %c0_57 = arith.constant 0 : index
    %47 = vector.load %arg8[%c36_56, %c0_57] : memref<108x1280xf32, #tpu.memory_space<vmem>>, vector<8x35xf32>
    tpu.vector_store %arg8[%c36_56, %c0_57], %46 {strides = array<i32>} : memref<108x1280xf32, #tpu.memory_space<vmem>>, vector<8x35xf32>,
    %c0_58 = arith.constant 0 : index
    %c0_59 = arith.constant 0 : index
    %c0_60 = arith.constant 0 : index
    %48 = vector.load %arg3[%c0_58, %c0_59, %c0_60] : memref<1x8x1280xf32, #tpu.memory_space<vmem>>, vector<1x8x1246xf32>
    %49 = vector.shape_cast %48 : vector<1x8x1246xf32> to vector<8x1246xf32>
    %c44 = arith.constant 44 : index
    %c34_61 = arith.constant 34 : index
    %50 = vector.load %arg8[%c44, %c34_61] : memref<108x1280xf32, #tpu.memory_space<vmem>>, vector<8x1246xf32>
    tpu.vector_store %arg8[%c44, %c34_61], %49 {strides = array<i32>} : memref<108x1280xf32, #tpu.memory_space<vmem>>, vector<8x1246xf32>,
    %cst_62 = arith.constant 0.000000e+00 : f32
    %51 = vector.broadcast %cst_62 : f32 to vector<8x34xf32>
    %c44_63 = arith.constant 44 : index
    %c0_64 = arith.constant 0 : index
    %52 = vector.load %arg8[%c44_63, %c0_64] : memref<108x1280xf32, #tpu.memory_space<vmem>>, vector<8x34xf32>
    tpu.vector_store %arg8[%c44_63, %c0_64], %51 {strides = array<i32>} : memref<108x1280xf32, #tpu.memory_space<vmem>>, vector<8x34xf32>,
    %c0_65 = arith.constant 0 : index
    %c0_66 = arith.constant 0 : index
    %c0_67 = arith.constant 0 : index
    %53 = vector.load %arg3[%c0_65, %c0_66, %c0_67] : memref<1x8x1280xf32, #tpu.memory_space<vmem>>, vector<1x8x1247xf32>
    %54 = vector.shape_cast %53 : vector<1x8x1247xf32> to vector<8x1247xf32>
    %c52 = arith.constant 52 : index
    %c33_68 = arith.constant 33 : index
    %55 = vector.load %arg8[%c52, %c33_68] : memref<108x1280xf32, #tpu.memory_space<vmem>>, vector<8x1247xf32>
    tpu.vector_store %arg8[%c52, %c33_68], %54 {strides = array<i32>} : memref<108x1280xf32, #tpu.memory_space<vmem>>, vector<8x1247xf32>,
    %cst_69 = arith.constant 0.000000e+00 : f32
    %56 = vector.broadcast %cst_69 : f32 to vector<8x33xf32>
    %c52_70 = arith.constant 52 : index
    %c0_71 = arith.constant 0 : index
    %57 = vector.load %arg8[%c52_70, %c0_71] : memref<108x1280xf32, #tpu.memory_space<vmem>>, vector<8x33xf32>
    tpu.vector_store %arg8[%c52_70, %c0_71], %56 {strides = array<i32>} : memref<108x1280xf32, #tpu.memory_space<vmem>>, vector<8x33xf32>,
    %c0_72 = arith.constant 0 : index
    %c0_73 = arith.constant 0 : index
    %c0_74 = arith.constant 0 : index
    %58 = vector.load %arg3[%c0_72, %c0_73, %c0_74] : memref<1x8x1280xf32, #tpu.memory_space<vmem>>, vector<1x8x1279xf32>
    %59 = vector.shape_cast %58 : vector<1x8x1279xf32> to vector<8x1279xf32>
    %c60 = arith.constant 60 : index
    %c1_75 = arith.constant 1 : index
    %60 = vector.load %arg8[%c60, %c1_75] : memref<108x1280xf32, #tpu.memory_space<vmem>>, vector<8x1279xf32>
    tpu.vector_store %arg8[%c60, %c1_75], %59 {strides = array<i32>} : memref<108x1280xf32, #tpu.memory_space<vmem>>, vector<8x1279xf32>,
    %cst_76 = arith.constant 0.000000e+00 : f32
    %61 = vector.broadcast %cst_76 : f32 to vector<8x1xf32>
    %c60_77 = arith.constant 60 : index
    %c0_78 = arith.constant 0 : index
    %62 = vector.load %arg8[%c60_77, %c0_78] : memref<108x1280xf32, #tpu.memory_space<vmem>>, vector<8x1xf32>
    tpu.vector_store %arg8[%c60_77, %c0_78], %61 {strides = array<i32>} : memref<108x1280xf32, #tpu.memory_space<vmem>>, vector<8x1xf32>,
    %c0_79 = arith.constant 0 : index
    %c0_80 = arith.constant 0 : index
    %c0_81 = arith.constant 0 : index
    %63 = vector.load %arg3[%c0_79, %c0_80, %c0_81] : memref<1x8x1280xf32, #tpu.memory_space<vmem>>, vector<1x8x1280xf32>
    %64 = vector.shape_cast %63 : vector<1x8x1280xf32> to vector<8x1280xf32>
    %c68 = arith.constant 68 : index
    %c0_82 = arith.constant 0 : index
    %65 = vector.load %arg8[%c68, %c0_82] : memref<108x1280xf32, #tpu.memory_space<vmem>>, vector<8x1280xf32>
    tpu.vector_store %arg8[%c68, %c0_82], %64 {strides = array<i32>} : memref<108x1280xf32, #tpu.memory_space<vmem>>, vector<8x1280xf32>,
    %c0_83 = arith.constant 0 : index
    %c0_84 = arith.constant 0 : index
    %c1_85 = arith.constant 1 : index
    %66 = vector.load %arg3[%c0_83, %c0_84, %c1_85] : memref<1x8x1280xf32, #tpu.memory_space<vmem>>, vector<1x8x1279xf32>
    %67 = vector.shape_cast %66 : vector<1x8x1279xf32> to vector<8x1279xf32>
    %c76 = arith.constant 76 : index
    %c0_86 = arith.constant 0 : index
    %68 = vector.load %arg8[%c76, %c0_86] : memref<108x1280xf32, #tpu.memory_space<vmem>>, vector<8x1279xf32>
    tpu.vector_store %arg8[%c76, %c0_86], %67 {strides = array<i32>} : memref<108x1280xf32, #tpu.memory_space<vmem>>, vector<8x1279xf32>,
    %cst_87 = arith.constant 0.000000e+00 : f32
    %69 = vector.broadcast %cst_87 : f32 to vector<8x1xf32>
    %c76_88 = arith.constant 76 : index
    %c1279_89 = arith.constant 1279 : index
    %70 = vector.load %arg8[%c76_88, %c1279_89] : memref<108x1280xf32, #tpu.memory_space<vmem>>, vector<8x1xf32>
    tpu.vector_store %arg8[%c76_88, %c1279_89], %69 {strides = array<i32>} : memref<108x1280xf32, #tpu.memory_space<vmem>>, vector<8x1xf32>,
    %c0_90 = arith.constant 0 : index
    %c0_91 = arith.constant 0 : index
    %c33_92 = arith.constant 33 : index
    %71 = vector.load %arg3[%c0_90, %c0_91, %c33_92] : memref<1x8x1280xf32, #tpu.memory_space<vmem>>, vector<1x8x1247xf32>
    %72 = vector.shape_cast %71 : vector<1x8x1247xf32> to vector<8x1247xf32>
    %c84 = arith.constant 84 : index
    %c0_93 = arith.constant 0 : index
    %73 = vector.load %arg8[%c84, %c0_93] : memref<108x1280xf32, #tpu.memory_space<vmem>>, vector<8x1247xf32>
    tpu.vector_store %arg8[%c84, %c0_93], %72 {strides = array<i32>} : memref<108x1280xf32, #tpu.memory_space<vmem>>, vector<8x1247xf32>,
    %cst_94 = arith.constant 0.000000e+00 : f32
    %74 = vector.broadcast %cst_94 : f32 to vector<8x33xf32>
    %c84_95 = arith.constant 84 : index
    %c1247_96 = arith.constant 1247 : index
    %75 = vector.load %arg8[%c84_95, %c1247_96] : memref<108x1280xf32, #tpu.memory_space<vmem>>, vector<8x33xf32>
    tpu.vector_store %arg8[%c84_95, %c1247_96], %74 {strides = array<i32>} : memref<108x1280xf32, #tpu.memory_space<vmem>>, vector<8x33xf32>,
    %c0_97 = arith.constant 0 : index
    %c0_98 = arith.constant 0 : index
    %c34_99 = arith.constant 34 : index
    %76 = vector.load %arg3[%c0_97, %c0_98, %c34_99] : memref<1x8x1280xf32, #tpu.memory_space<vmem>>, vector<1x8x1246xf32>
    %77 = vector.shape_cast %76 : vector<1x8x1246xf32> to vector<8x1246xf32>
    %c92 = arith.constant 92 : index
    %c0_100 = arith.constant 0 : index
    %78 = vector.load %arg8[%c92, %c0_100] : memref<108x1280xf32, #tpu.memory_space<vmem>>, vector<8x1246xf32>
    tpu.vector_store %arg8[%c92, %c0_100], %77 {strides = array<i32>} : memref<108x1280xf32, #tpu.memory_space<vmem>>, vector<8x1246xf32>,
    %cst_101 = arith.constant 0.000000e+00 : f32
    %79 = vector.broadcast %cst_101 : f32 to vector<8x34xf32>
    %c92_102 = arith.constant 92 : index
    %c1246_103 = arith.constant 1246 : index
    %80 = vector.load %arg8[%c92_102, %c1246_103] : memref<108x1280xf32, #tpu.memory_space<vmem>>, vector<8x34xf32>
    tpu.vector_store %arg8[%c92_102, %c1246_103], %79 {strides = array<i32>} : memref<108x1280xf32, #tpu.memory_space<vmem>>, vector<8x34xf32>,
    %c0_104 = arith.constant 0 : index
    %c0_105 = arith.constant 0 : index
    %c35_106 = arith.constant 35 : index
    %81 = vector.load %arg3[%c0_104, %c0_105, %c35_106] : memref<1x8x1280xf32, #tpu.memory_space<vmem>>, vector<1x8x1245xf32>
    %82 = vector.shape_cast %81 : vector<1x8x1245xf32> to vector<8x1245xf32>
    %c100 = arith.constant 100 : index
    %c0_107 = arith.constant 0 : index
    %83 = vector.load %arg8[%c100, %c0_107] : memref<108x1280xf32, #tpu.memory_space<vmem>>, vector<8x1245xf32>
    tpu.vector_store %arg8[%c100, %c0_107], %82 {strides = array<i32>} : memref<108x1280xf32, #tpu.memory_space<vmem>>, vector<8x1245xf32>,
    %cst_108 = arith.constant 0.000000e+00 : f32
    %84 = vector.broadcast %cst_108 : f32 to vector<8x35xf32>
    %c100_109 = arith.constant 100 : index
    %c1245_110 = arith.constant 1245 : index
    %85 = vector.load %arg8[%c100_109, %c1245_110] : memref<108x1280xf32, #tpu.memory_space<vmem>>, vector<8x35xf32>
    tpu.vector_store %arg8[%c100_109, %c1245_110], %84 {strides = array<i32>} : memref<108x1280xf32, #tpu.memory_space<vmem>>, vector<8x35xf32>,
    %c0_111 = arith.constant 0 : index
    %c0_112 = arith.constant 0 : index
    %86 = vector.load %arg4[%c0_111, %c0_112] : memref<12x108xf32, #tpu.memory_space<vmem>>, vector<12x108xf32>
    %c0_113 = arith.constant 0 : index
    %c0_114 = arith.constant 0 : index
    %87 = vector.load %arg8[%c0_113, %c0_114] : memref<108x1280xf32, #tpu.memory_space<vmem>>, vector<108x1280xf32>
    %cst_115 = arith.constant dense<0.000000e+00> : vector<12x1280xf32>
    %88 = tpu.matmul %86, %87, %cst_115 {dimension_numbers = #tpu.dot_dimension_numbers<[1], [0], [0], [1], [0, 0, 1, 1], [], []>} : vector<12x108xf32>, vector<108x1280xf32>, vector<12x1280xf32> -> vector<12x1280xf32>
    %c0_116 = arith.constant 0 : index
    %c0_117 = arith.constant 0 : index
    %89 = vector.load %arg5[%c0_116, %c0_117] : memref<12x1xf32, #tpu.memory_space<vmem>>, vector<12x1xf32>
    %90 = vector.broadcast %89 : vector<12x1xf32> to vector<12x1280xf32>
    %91 = arith.addf %88, %90 : vector<12x1280xf32>
    %c0_118 = arith.constant 0 : index
    %c0_119 = arith.constant 0 : index
    %92 = vector.load %arg6[%c0_118, %c0_119] : memref<1x1280xf32, #tpu.memory_space<vmem>>, vector<1x1280xf32>
    %cst_120 = arith.constant 5.000000e-01 : f32
    %93 = vector.broadcast %cst_120 : f32 to vector<1x1280xf32>
    %94 = arith.cmpf ogt, %92, %93 : vector<1x1280xf32>
    %cst_121 = arith.constant 0.000000e+00 : f32
    %95 = vector.shape_cast %94 : vector<1x1280xi1> to vector<1x1280xi1>
    %96 = vector.broadcast %95 : vector<1x1280xi1> to vector<12x1280xi1>
    %97 = vector.broadcast %cst_121 : f32 to vector<12x1280xf32>
    %98 = arith.select %96, %91, %97 : vector<12x1280xi1>, vector<12x1280xf32>
    %c0_122 = arith.constant 0 : index
    %c0_123 = arith.constant 0 : index
    %c0_124 = arith.constant 0 : index
    %99 = vector.load %arg7[%c0_122, %c0_123, %c0_124] : memref<1x12x1280xf32, #tpu.memory_space<vmem>>, vector<1x12x1280xf32>
    %100 = vector.shape_cast %99 : vector<1x12x1280xf32> to vector<12x1280xf32>
    %101 = vector.shape_cast %98 : vector<12x1280xf32> to vector<1x12x1280xf32>
    tpu.vector_store %arg7[%c0_122, %c0_123, %c0_124], %101 {strides = array<i32>} : memref<1x12x1280xf32, #tpu.memory_space<vmem>>, vector<1x12x1280xf32>,
    return
  }
  func.func @transform_0(%arg0: i32, %arg1: i32) -> (i32, i32, i32) {
    %c0_i32 = arith.constant 0 : i32
    %c0_i32_0 = arith.constant 0 : i32
    %c0_i32_1 = arith.constant 0 : i32
    return %arg0, %c0_i32, %c0_i32_0 : i32, i32, i32
  }
  func.func @transform_1(%arg0: i32, %arg1: i32) -> (i32, i32, i32) {
    %c0_i32 = arith.constant 0 : i32
    %c0_i32_0 = arith.constant 0 : i32
    %c0_i32_1 = arith.constant 0 : i32
    return %arg0, %c0_i32, %c0_i32_0 : i32, i32, i32
  }
  func.func @transform_2(%arg0: i32, %arg1: i32) -> (i32, i32) {
    %c0_i32 = arith.constant 0 : i32
    %c0_i32_0 = arith.constant 0 : i32
    return %arg1, %c0_i32 : i32, i32
  }
  func.func @transform_3(%arg0: i32, %arg1: i32) -> (i32, i32) {
    %c0_i32 = arith.constant 0 : i32
    %c0_i32_0 = arith.constant 0 : i32
    return %arg1, %c0_i32 : i32, i32
  }
  func.func @transform_4(%arg0: i32, %arg1: i32) -> (i32, i32) {
    %c0_i32 = arith.constant 0 : i32
    %c0_i32_0 = arith.constant 0 : i32
    %c0_i32_1 = arith.constant 0 : i32
    return %c0_i32, %c0_i32_0 : i32, i32
  }
  func.func @transform_5(%arg0: i32, %arg1: i32) -> (i32, i32, i32) {
    %c0_i32 = arith.constant 0 : i32
    %c0_i32_0 = arith.constant 0 : i32
    return %arg0, %arg1, %c0_i32 : i32, i32, i32
  }
}

module attributes {stable_mosaic.version = 11 : i64} {
  func.func @kernel(%arg0: i32, %arg1: i32, %arg2: memref<1x12x1280xf32, #tpu.memory_space<vmem>>, %arg3: memref<1x108xf32, #tpu.memory_space<vmem>>, %arg4: memref<1x1xf32, #tpu.memory_space<vmem>>, %arg5: memref<1x1280xf32, #tpu.memory_space<vmem>>, %arg6: memref<1x1x1280xf32, #tpu.memory_space<vmem>>, %arg7: memref<108x1280xf32, #tpu.memory_space<vmem>>) attributes {dimension_semantics = [#tpu.dimension_semantics<parallel>, #tpu.dimension_semantics<parallel>], iteration_bounds = array<i64: 2, 1>, scalar_prefetch = 0 : i64, scratch_operands = 1 : i64, tpu.core_type = #tpu.core_type<tc>, window_params = [{transform_indices = @transform_0, window_bounds = array<i64: 1, 12, 1280>}, {transform_indices = @transform_1, window_bounds = array<i64: 1, 108>}, {transform_indices = @transform_2, window_bounds = array<i64: 1, 1>}, {pipeline_mode = #tpu.pipeline_mode<synchronous>, transform_indices = @transform_3, window_bounds = array<i64: 1, 1280>}, {transform_indices = @transform_4, window_bounds = array<i64: 1, 1, 1280>}]} {
    %c0 = arith.constant 0 : index
    %c0_0 = arith.constant 0 : index
    %c0_1 = arith.constant 0 : index
    %0 = vector.load %arg2[%c0, %c0_0, %c0_1] : memref<1x12x1280xf32, #tpu.memory_space<vmem>>, vector<1x12x1245xf32>
    %1 = vector.shape_cast %0 : vector<1x12x1245xf32> to vector<12x1245xf32>
    %c0_2 = arith.constant 0 : index
    %c35 = arith.constant 35 : index
    %2 = vector.load %arg7[%c0_2, %c35] : memref<108x1280xf32, #tpu.memory_space<vmem>>, vector<12x1245xf32>
    tpu.vector_store %arg7[%c0_2, %c35], %1 {strides = array<i32>} : memref<108x1280xf32, #tpu.memory_space<vmem>>, vector<12x1245xf32>,
    %cst = arith.constant 0.000000e+00 : f32
    %3 = vector.broadcast %cst : f32 to vector<12x35xf32>
    %c0_3 = arith.constant 0 : index
    %c0_4 = arith.constant 0 : index
    %4 = vector.load %arg7[%c0_3, %c0_4] : memref<108x1280xf32, #tpu.memory_space<vmem>>, vector<12x35xf32>
    tpu.vector_store %arg7[%c0_3, %c0_4], %3 {strides = array<i32>} : memref<108x1280xf32, #tpu.memory_space<vmem>>, vector<12x35xf32>,
    %c0_5 = arith.constant 0 : index
    %c0_6 = arith.constant 0 : index
    %c0_7 = arith.constant 0 : index
    %5 = vector.load %arg2[%c0_5, %c0_6, %c0_7] : memref<1x12x1280xf32, #tpu.memory_space<vmem>>, vector<1x12x1246xf32>
    %6 = vector.shape_cast %5 : vector<1x12x1246xf32> to vector<12x1246xf32>
    %c12 = arith.constant 12 : index
    %c34 = arith.constant 34 : index
    %7 = vector.load %arg7[%c12, %c34] : memref<108x1280xf32, #tpu.memory_space<vmem>>, vector<12x1246xf32>
    tpu.vector_store %arg7[%c12, %c34], %6 {strides = array<i32>} : memref<108x1280xf32, #tpu.memory_space<vmem>>, vector<12x1246xf32>,
    %cst_8 = arith.constant 0.000000e+00 : f32
    %8 = vector.broadcast %cst_8 : f32 to vector<12x34xf32>
    %c12_9 = arith.constant 12 : index
    %c0_10 = arith.constant 0 : index
    %9 = vector.load %arg7[%c12_9, %c0_10] : memref<108x1280xf32, #tpu.memory_space<vmem>>, vector<12x34xf32>
    tpu.vector_store %arg7[%c12_9, %c0_10], %8 {strides = array<i32>} : memref<108x1280xf32, #tpu.memory_space<vmem>>, vector<12x34xf32>,
    %c0_11 = arith.constant 0 : index
    %c0_12 = arith.constant 0 : index
    %c0_13 = arith.constant 0 : index
    %10 = vector.load %arg2[%c0_11, %c0_12, %c0_13] : memref<1x12x1280xf32, #tpu.memory_space<vmem>>, vector<1x12x1247xf32>
    %11 = vector.shape_cast %10 : vector<1x12x1247xf32> to vector<12x1247xf32>
    %c24 = arith.constant 24 : index
    %c33 = arith.constant 33 : index
    %12 = vector.load %arg7[%c24, %c33] : memref<108x1280xf32, #tpu.memory_space<vmem>>, vector<12x1247xf32>
    tpu.vector_store %arg7[%c24, %c33], %11 {strides = array<i32>} : memref<108x1280xf32, #tpu.memory_space<vmem>>, vector<12x1247xf32>,
    %cst_14 = arith.constant 0.000000e+00 : f32
    %13 = vector.broadcast %cst_14 : f32 to vector<12x33xf32>
    %c24_15 = arith.constant 24 : index
    %c0_16 = arith.constant 0 : index
    %14 = vector.load %arg7[%c24_15, %c0_16] : memref<108x1280xf32, #tpu.memory_space<vmem>>, vector<12x33xf32>
    tpu.vector_store %arg7[%c24_15, %c0_16], %13 {strides = array<i32>} : memref<108x1280xf32, #tpu.memory_space<vmem>>, vector<12x33xf32>,
    %c0_17 = arith.constant 0 : index
    %c0_18 = arith.constant 0 : index
    %c0_19 = arith.constant 0 : index
    %15 = vector.load %arg2[%c0_17, %c0_18, %c0_19] : memref<1x12x1280xf32, #tpu.memory_space<vmem>>, vector<1x12x1279xf32>
    %16 = vector.shape_cast %15 : vector<1x12x1279xf32> to vector<12x1279xf32>
    %c36 = arith.constant 36 : index
    %c1 = arith.constant 1 : index
    %17 = vector.load %arg7[%c36, %c1] : memref<108x1280xf32, #tpu.memory_space<vmem>>, vector<12x1279xf32>
    tpu.vector_store %arg7[%c36, %c1], %16 {strides = array<i32>} : memref<108x1280xf32, #tpu.memory_space<vmem>>, vector<12x1279xf32>,
    %cst_20 = arith.constant 0.000000e+00 : f32
    %18 = vector.broadcast %cst_20 : f32 to vector<12x1xf32>
    %c36_21 = arith.constant 36 : index
    %c0_22 = arith.constant 0 : index
    %19 = vector.load %arg7[%c36_21, %c0_22] : memref<108x1280xf32, #tpu.memory_space<vmem>>, vector<12x1xf32>
    tpu.vector_store %arg7[%c36_21, %c0_22], %18 {strides = array<i32>} : memref<108x1280xf32, #tpu.memory_space<vmem>>, vector<12x1xf32>,
    %c0_23 = arith.constant 0 : index
    %c0_24 = arith.constant 0 : index
    %c0_25 = arith.constant 0 : index
    %20 = vector.load %arg2[%c0_23, %c0_24, %c0_25] : memref<1x12x1280xf32, #tpu.memory_space<vmem>>, vector<1x12x1280xf32>
    %21 = vector.shape_cast %20 : vector<1x12x1280xf32> to vector<12x1280xf32>
    %c48 = arith.constant 48 : index
    %c0_26 = arith.constant 0 : index
    %22 = vector.load %arg7[%c48, %c0_26] : memref<108x1280xf32, #tpu.memory_space<vmem>>, vector<12x1280xf32>
    tpu.vector_store %arg7[%c48, %c0_26], %21 {strides = array<i32>} : memref<108x1280xf32, #tpu.memory_space<vmem>>, vector<12x1280xf32>,
    %c0_27 = arith.constant 0 : index
    %c0_28 = arith.constant 0 : index
    %c1_29 = arith.constant 1 : index
    %23 = vector.load %arg2[%c0_27, %c0_28, %c1_29] : memref<1x12x1280xf32, #tpu.memory_space<vmem>>, vector<1x12x1279xf32>
    %24 = vector.shape_cast %23 : vector<1x12x1279xf32> to vector<12x1279xf32>
    %c60 = arith.constant 60 : index
    %c0_30 = arith.constant 0 : index
    %25 = vector.load %arg7[%c60, %c0_30] : memref<108x1280xf32, #tpu.memory_space<vmem>>, vector<12x1279xf32>
    tpu.vector_store %arg7[%c60, %c0_30], %24 {strides = array<i32>} : memref<108x1280xf32, #tpu.memory_space<vmem>>, vector<12x1279xf32>,
    %cst_31 = arith.constant 0.000000e+00 : f32
    %26 = vector.broadcast %cst_31 : f32 to vector<12x1xf32>
    %c60_32 = arith.constant 60 : index
    %c1279 = arith.constant 1279 : index
    %27 = vector.load %arg7[%c60_32, %c1279] : memref<108x1280xf32, #tpu.memory_space<vmem>>, vector<12x1xf32>
    tpu.vector_store %arg7[%c60_32, %c1279], %26 {strides = array<i32>} : memref<108x1280xf32, #tpu.memory_space<vmem>>, vector<12x1xf32>,
    %c0_33 = arith.constant 0 : index
    %c0_34 = arith.constant 0 : index
    %c33_35 = arith.constant 33 : index
    %28 = vector.load %arg2[%c0_33, %c0_34, %c33_35] : memref<1x12x1280xf32, #tpu.memory_space<vmem>>, vector<1x12x1247xf32>
    %29 = vector.shape_cast %28 : vector<1x12x1247xf32> to vector<12x1247xf32>
    %c72 = arith.constant 72 : index
    %c0_36 = arith.constant 0 : index
    %30 = vector.load %arg7[%c72, %c0_36] : memref<108x1280xf32, #tpu.memory_space<vmem>>, vector<12x1247xf32>
    tpu.vector_store %arg7[%c72, %c0_36], %29 {strides = array<i32>} : memref<108x1280xf32, #tpu.memory_space<vmem>>, vector<12x1247xf32>,
    %cst_37 = arith.constant 0.000000e+00 : f32
    %31 = vector.broadcast %cst_37 : f32 to vector<12x33xf32>
    %c72_38 = arith.constant 72 : index
    %c1247 = arith.constant 1247 : index
    %32 = vector.load %arg7[%c72_38, %c1247] : memref<108x1280xf32, #tpu.memory_space<vmem>>, vector<12x33xf32>
    tpu.vector_store %arg7[%c72_38, %c1247], %31 {strides = array<i32>} : memref<108x1280xf32, #tpu.memory_space<vmem>>, vector<12x33xf32>,
    %c0_39 = arith.constant 0 : index
    %c0_40 = arith.constant 0 : index
    %c34_41 = arith.constant 34 : index
    %33 = vector.load %arg2[%c0_39, %c0_40, %c34_41] : memref<1x12x1280xf32, #tpu.memory_space<vmem>>, vector<1x12x1246xf32>
    %34 = vector.shape_cast %33 : vector<1x12x1246xf32> to vector<12x1246xf32>
    %c84 = arith.constant 84 : index
    %c0_42 = arith.constant 0 : index
    %35 = vector.load %arg7[%c84, %c0_42] : memref<108x1280xf32, #tpu.memory_space<vmem>>, vector<12x1246xf32>
    tpu.vector_store %arg7[%c84, %c0_42], %34 {strides = array<i32>} : memref<108x1280xf32, #tpu.memory_space<vmem>>, vector<12x1246xf32>,
    %cst_43 = arith.constant 0.000000e+00 : f32
    %36 = vector.broadcast %cst_43 : f32 to vector<12x34xf32>
    %c84_44 = arith.constant 84 : index
    %c1246 = arith.constant 1246 : index
    %37 = vector.load %arg7[%c84_44, %c1246] : memref<108x1280xf32, #tpu.memory_space<vmem>>, vector<12x34xf32>
    tpu.vector_store %arg7[%c84_44, %c1246], %36 {strides = array<i32>} : memref<108x1280xf32, #tpu.memory_space<vmem>>, vector<12x34xf32>,
    %c0_45 = arith.constant 0 : index
    %c0_46 = arith.constant 0 : index
    %c35_47 = arith.constant 35 : index
    %38 = vector.load %arg2[%c0_45, %c0_46, %c35_47] : memref<1x12x1280xf32, #tpu.memory_space<vmem>>, vector<1x12x1245xf32>
    %39 = vector.shape_cast %38 : vector<1x12x1245xf32> to vector<12x1245xf32>
    %c96 = arith.constant 96 : index
    %c0_48 = arith.constant 0 : index
    %40 = vector.load %arg7[%c96, %c0_48] : memref<108x1280xf32, #tpu.memory_space<vmem>>, vector<12x1245xf32>
    tpu.vector_store %arg7[%c96, %c0_48], %39 {strides = array<i32>} : memref<108x1280xf32, #tpu.memory_space<vmem>>, vector<12x1245xf32>,
    %cst_49 = arith.constant 0.000000e+00 : f32
    %41 = vector.broadcast %cst_49 : f32 to vector<12x35xf32>
    %c96_50 = arith.constant 96 : index
    %c1245 = arith.constant 1245 : index
    %42 = vector.load %arg7[%c96_50, %c1245] : memref<108x1280xf32, #tpu.memory_space<vmem>>, vector<12x35xf32>
    tpu.vector_store %arg7[%c96_50, %c1245], %41 {strides = array<i32>} : memref<108x1280xf32, #tpu.memory_space<vmem>>, vector<12x35xf32>,
    %c0_51 = arith.constant 0 : index
    %c0_52 = arith.constant 0 : index
    %43 = vector.load %arg3[%c0_51, %c0_52] : memref<1x108xf32, #tpu.memory_space<vmem>>, vector<1x108xf32>
    %c0_53 = arith.constant 0 : index
    %c0_54 = arith.constant 0 : index
    %44 = vector.load %arg7[%c0_53, %c0_54] : memref<108x1280xf32, #tpu.memory_space<vmem>>, vector<108x1280xf32>
    %cst_55 = arith.constant dense<0.000000e+00> : vector<1x1280xf32>
    %45 = tpu.matmul %43, %44, %cst_55 {dimension_numbers = #tpu.dot_dimension_numbers<[1], [0], [0], [1], [0, 0, 1, 1], [], []>} : vector<1x108xf32>, vector<108x1280xf32>, vector<1x1280xf32> -> vector<1x1280xf32>
    %c0_56 = arith.constant 0 : index
    %c0_57 = arith.constant 0 : index
    %46 = vector.load %arg4[%c0_56, %c0_57] : memref<1x1xf32, #tpu.memory_space<vmem>>, vector<1x1xf32>
    %47 = vector.broadcast %46 : vector<1x1xf32> to vector<1x1280xf32>
    %48 = arith.addf %45, %47 : vector<1x1280xf32>
    %c0_58 = arith.constant 0 : index
    %c0_59 = arith.constant 0 : index
    %49 = vector.load %arg5[%c0_58, %c0_59] : memref<1x1280xf32, #tpu.memory_space<vmem>>, vector<1x1280xf32>
    %cst_60 = arith.constant 5.000000e-01 : f32
    %50 = vector.broadcast %cst_60 : f32 to vector<1x1280xf32>
    %51 = arith.cmpf ogt, %49, %50 : vector<1x1280xf32>
    %cst_61 = arith.constant 0.000000e+00 : f32
    %52 = vector.broadcast %cst_61 : f32 to vector<1x1280xf32>
    %53 = arith.select %51, %48, %52 : vector<1x1280xi1>, vector<1x1280xf32>
    %c0_62 = arith.constant 0 : index
    %c0_63 = arith.constant 0 : index
    %c0_64 = arith.constant 0 : index
    %54 = vector.load %arg6[%c0_62, %c0_63, %c0_64] : memref<1x1x1280xf32, #tpu.memory_space<vmem>>, vector<1x1x1280xf32>
    %55 = vector.shape_cast %54 : vector<1x1x1280xf32> to vector<1x1280xf32>
    %56 = vector.shape_cast %53 : vector<1x1280xf32> to vector<1x1x1280xf32>
    tpu.vector_store %arg6[%c0_62, %c0_63, %c0_64], %56 {strides = array<i32>} : memref<1x1x1280xf32, #tpu.memory_space<vmem>>, vector<1x1x1280xf32>,
    return
  }
  func.func @transform_0(%arg0: i32, %arg1: i32) -> (i32, i32, i32) {
    %c0_i32 = arith.constant 0 : i32
    %c0_i32_0 = arith.constant 0 : i32
    %c0_i32_1 = arith.constant 0 : i32
    return %arg0, %c0_i32, %c0_i32_0 : i32, i32, i32
  }
  func.func @transform_1(%arg0: i32, %arg1: i32) -> (i32, i32) {
    %c0_i32 = arith.constant 0 : i32
    %c0_i32_0 = arith.constant 0 : i32
    return %arg1, %c0_i32 : i32, i32
  }
  func.func @transform_2(%arg0: i32, %arg1: i32) -> (i32, i32) {
    %c0_i32 = arith.constant 0 : i32
    %c0_i32_0 = arith.constant 0 : i32
    return %arg1, %c0_i32 : i32, i32
  }
  func.func @transform_3(%arg0: i32, %arg1: i32) -> (i32, i32) {
    %c0_i32 = arith.constant 0 : i32
    %c0_i32_0 = arith.constant 0 : i32
    %c0_i32_1 = arith.constant 0 : i32
    return %c0_i32, %c0_i32_0 : i32, i32
  }
  func.func @transform_4(%arg0: i32, %arg1: i32) -> (i32, i32, i32) {
    %c0_i32 = arith.constant 0 : i32
    %c0_i32_0 = arith.constant 0 : i32
    return %arg0, %arg1, %c0_i32 : i32, i32, i32
  }
}

</mosaic_0001>

<bundles_post_ra>
// kernel: ncd_forward.8
= control target key start
LH: loop header
LB: loop body
LE: loop exit
PB: predicated region body
PF: predicated region fallthrough
CT: control target
= control target key end

     0   :  { %s1019_s18 = smov 0   ;;  %s1021_s19 = smov 0   ;;  %s1110_s0 = inlined_call_operand.vmem [shape: f32[2,4,384], index: 0, kind: input, shape index: {}]   ;;  %s1111_s1 = inlined_call_operand.vmem [shape: f32[4,36], index: 1, kind: input, shape index: {}]   ;;  %s1112_s2 = inlined_call_operand.vmem [shape: f32[4,1], index: 2, kind: input, shape index: {}]   ;;  %s1113_s3 = inlined_call_operand.vmem [shape: f32[1,384], index: 3, kind: input, shape index: {}]   ;;  %s1114_s4 = inlined_call_operand.vmem [shape: f32[2,4,384], index: 4, kind: input, shape index: {}]   ;;  %s1115_s5 = inlined_call_operand.vmem [shape: f32[2,4,384], index: 5, kind: output, shape index: {}]  }
   0x1   :  { %s1023_s20 = smov 0  }
   0x2 LB: > { %s27_s21 = sadd.s32 1, %s971_s19  ;;  %p864_p0 = scmp.ge.s32.totalorder %s975_s20, 1  ;;  %s975_s20 = sphi %s1023_s20, %s15_s20   ;;  %s971_s19 = sphi %s1021_s19, %s1117_s19   ;;  %s967_s18 = sphi %s1019_s18, %s1116_s18  }
   0x3   : > { %p29_p1 = scmp.ge.s32.totalorder %s27_s21, 2  ;;  %p235_p2 = scmp.lt.s32.totalorder %s975_s20, 3 }
   0x5   : > { %s1119_s21 = smov (%p29_p1, %s27_s21), 0  ;;  %p236_p3 = pnand %p864_p0, %p235_p2 }
   0x6   : > { %p284_p4 = scmp.lt.s32.totalorder (!%p236_p3), %s967_s18, 1  ;;  %v977_v0 = vmov (!%p236_p3), 0.0   ;;  %s978_s26 = smov (!%p236_p3), 18   ;;  %v982_v8 = vmov (!%p236_p3), 0.0|0.0   ;;  %vm987_vm0 = vmmov (!%p236_p3), 0   ;;  %v988_v14 = vmov (!%p236_p3), 0  }
   0x7   : > { %239 = sbr.rel (%p236_p3) target bundleno = 411 (0x19b), region = 40  ;;  %611 = vmatprep.mubr.f32.mxu0 (!%p236_p3), %v977_v0  ;;  %s979_s27 = smov (!%p236_p3), 19   ;;  %902 = vmatprep.subr.bf16.mxu1 (!%p236_p3), %v982_v8  ;;  %v527_v15 = vld [vmem:[%s1112_s2] sm:$0xf] (!%p236_p3)  ;;  %vm332_vm1 = vcmask (!%p236_p3), 1043608   ;;  %vm336_vm2 = vcmask (!%p236_p3), 150528  }
   0x8   : > { %s980_s28 = smov (!%p236_p3), 17   ;;  %s981_s29 = smov (!%p236_p3), 1   ;;  %891 = vmatprep.mubr.msk.f32.mxu1 (!%p236_p3), %vm987_vm0, %v977_v0  ;;  %945 = vset.pattern.permute.xlu0 (!%p236_p3), %v988_v14  ;;  %vm350_vm3 = vcmask (!%p236_p3), 146432   ;;  %vm356_vm4 = vcmask (!%p236_p3), 1047700   ;;  %vm379_vm5 = vcmask (!%p236_p3), 1043592   ;;  %vm360_vm6 = vcmask (!%p236_p3), 146436  }
   0x9   : > { %s983_s30 = smov (!%p236_p3), 127   ;;  %s984_s6 = smov (!%p236_p3), 111   ;;  %vm383_vm7 = vcmask (!%p236_p3), 134144   ;;  %vm373_vm8 = vcmask (!%p236_p3), 138240   ;;  %vm326_vm9 = vcmask (!%p236_p3), 154624   ;;  %vm397_vm10 = vcmask (!%p236_p3), 7168  }
   0xa   : > { %s985_s7 = smov (!%p236_p3), 110   ;;  %s986_s8 = smov (!%p236_p3), 109   ;;  %vm403_vm11 = vcmask (!%p236_p3), 1047564   ;;  %vm407_vm12 = vcmask (!%p236_p3), 7172   ;;  %vm437_vm13 = vcmask (!%p236_p3), 1039364   ;;  %vm429_vm14 = vcmask (!%p236_p3), 1039360  }
   0xb   : > { %vm439_vm15 = vcmask (!%p236_p3), 1048572   ;;  %vm460_vm0 = vcmask (!%p236_p3), 904192  }
   0xe   : > { %s1121_s18 = smov (!%p284_p4, %s967_s18), 1 }
   0xf   : > { %s1038_s22 = smul.u32 12, %s1121_s18 }
  0x11   : > { %s1044_s25 = scalar_lea.vmem %s1110_s0, %s1038_s22  ;;  %s305_s17 = scalar_lea.vmem %s1114_s4, %s1038_s22 }
  0x12   : > { %v338_v1 = vld [vmem:[%s1044_s25] sm:$0xff]  ;;  %v948_v4 = vld [vmem:[%s1044_s25 + $0x8] ss:$0 sps:$4 sm:$0xff]   ;;  %s314_s24 = scalar_lea.vmem %s1115_s5, %s1038_s22 }
  0x13   : > { %346 = vrot.lane.b32.xlu1 %v338_v1, %s978_s26  ;;  %v342_v2 = vcombine.low %v338_v1, %v338_v1  ;;  %320 = vrot.lane.b32.xlu0 %v338_v1, %s979_s27  ;;  %v319_v3 = vcombine.high %v338_v1, %v338_v1  ;;  %414 = vst [vmem:[#allocation2 + $0x30] sm:$0xf] %v338_v1  ;;  %v316_v5 = vld [vmem:[%s1044_s25 + $0x8] sm:$0xf] }
  0x14   : > { %v949_v6 = vld [vmem:[%s1044_s25 + $0x8] ss:$0 sps:$4 sm:$0xff]  }
  0x15   : > { %415 = vst [vmem:[#allocation2 + $0x38] sm:$0xf] %v319_v3  ;;  %v363_v7 = vld [vmem:[%s1044_s25 + $0x8] sm:$0xf] }
  0x16   : > { %v950_v9 = vld [vmem:[%s1044_s25 + $0x8] ss:$0 sps:$4 sm:$0xff]  }
  0x17   : > { %344 = vrot.lane.b32.xlu1 %v342_v2, %s978_s26  ;;  %367 = vrot.lane.b32.xlu0 %v338_v1, %s980_s28  ;;  %v442_v10 = vld [vmem:[%s1044_s25 + $0x8] sm:$0xf] }
  0x18   : > { %v951_v11 = vld [vmem:[%s1044_s25 + $0x8] ss:$0 sps:$4 sm:$0xff]  }
  0x19   : > { %v410_v12 = vld [vmem:[%s1044_s25 + $0x8] sm:$0xf] }
  0x1a   : > { %416 = vst [vmem:[#allocation2 + $0x40] sm:$0xf] %v410_v12  ;;  %v489_v13 = vld [vmem:[%s1044_s25 + $0x8] sm:$0xf] }
  0x1b   : > { %369 = vrot.lane.b32.xlu1 %v319_v3, %s980_s28  ;;  %322 = vrot.lane.b32.xlu0 %v319_v3, %s979_s27 }
  0x1f   : > { %393 = vrot.lane.b32.xlu1 %v338_v1, %s981_s29  ;;  %391 = vrot.lane.b32.xlu0 %v342_v2, %s981_s29 }
  0x23   : > { %348 = vrot.lane.b32.xlu1 %v948_v4, %s978_s26  ;;  %324 = vrot.lane.b32.xlu0 %v316_v5, %s979_s27 }
  0x27   : > { %395 = vrot.lane.b32.xlu1 %v949_v6, %s981_s29  ;;  %371 = vrot.lane.b32.xlu0 %v363_v7, %s980_s28 }
  0x2b   : > { %427 = vrot.lane.b32.xlu1 %v950_v9, %s983_s30  ;;  %425 = vrot.lane.b32.xlu0 %v338_v1, %s983_s30 }
  0x2f   : > { %450 = vrot.lane.b32.xlu1 %v442_v10, %s984_s6  ;;  %448 = vrot.lane.b32.xlu0 %v319_v3, %s984_s6 }
  0x33   : > { %474 = vrot.lane.b32.xlu1 %v951_v11, %s985_s7  ;;  %472 = vrot.lane.b32.xlu0 %v338_v1, %s985_s7  ;;  %v511_v11 = vld [vmem:[%s1111_s1] sm:$0xf] }
  0x37   : > { %446 = vrot.lane.b32.xlu1 %v338_v1, %s984_s6  ;;  %423 = vrot.lane.b32.xlu0 %v342_v2, %s983_s30 }
  0x3b   : > { %495 = vrot.lane.b32.xlu1 %v319_v3, %s986_s8  ;;  %470 = vrot.lane.b32.xlu0 %v342_v2, %s985_s7 }
  0x3f   : > { %493 = vrot.lane.b32.xlu1 %v338_v1, %s986_s8  ;;  %497 = vrot.lane.b32.xlu0 %v489_v13, %s986_s8 }
  0x43   : > { %530 = vperm.xlu0 %945, %v527_v15  }
  0x85   : > { %v347_v16 = vpop.permute.xlu1 %346  ;;  %v321_v17 = vpop.permute.xlu0 %320 }
  0x86   : > { %333 = vst.msk [vmem:[#allocation2] sm:$0xf] %vm332_vm1, %v321_v17  ;;  %vm452_vm1 = vcmask 908288  }
  0x87   : > { %337 = vst.msk [vmem:[#allocation2] sm:$0xf] %vm336_vm2, %v977_v0  ;;  %vm462_vm2 = vcmask 1044344  }
  0x89   : > { %v345_v18 = vpop.permute.xlu1 %344  ;;  %v368_v19 = vpop.permute.xlu0 %367 }
  0x8a   : > { %v351_v20 = vsel %vm350_vm3, %v345_v18, %v347_v16  ;;  %357 = vst.msk [vmem:[#allocation2] sm:$0xf0] %vm356_vm4, %v345_v18  ;;  %vm476_vm4 = vcmask 900096  }
  0x8b   : > { %380 = vst.msk [vmem:[#allocation2 + $0x18] sm:$0xf] %vm379_vm5, %v368_v19  ;;  %358 = vst [vmem:[#allocation2 + $0x8] sm:$0xf0] %v351_v20  ;;  %vm486_vm5 = vcmask 1048436  }
  0x8c   : > { %361 = vst.msk [vmem:[#allocation2] sm:$0xf0] %vm360_vm6, %v977_v0  ;;  %vm499_vm6 = vcmask 891904  }
  0x8d   : > { %384 = vst.msk [vmem:[#allocation2 + $0x18] sm:$0xf] %vm383_vm7, %v977_v0  ;;  %v370_v21 = vpop.permute.xlu1 %369  ;;  %v323_v22 = vpop.permute.xlu0 %322  ;;  %vm507_vm7 = vcmask 887808  }
  0x8e   : > { %v374_v23 = vsel %vm373_vm8, %v368_v19, %v370_v21  ;;  %v327_v24 = vsel %vm326_vm9, %v321_v17, %v323_v22 }
  0x8f   : > { %381 = vst [vmem:[#allocation2 + $0x20] sm:$0xf] %v374_v23  ;;  %334 = vst [vmem:[#allocation2 + $0x8] sm:$0xf] %v327_v24 }
  0x91   : > { %v394_v25 = vpop.permute.xlu1 %393  ;;  %v392_v26 = vpop.permute.xlu0 %391 }
  0x92   : > { %v398_v27 = vsel %vm397_vm10, %v392_v26, %v394_v25  ;;  %404 = vst.msk [vmem:[#allocation2 + $0x18] sm:$0xf0] %vm403_vm11, %v392_v26  ;;  %v709_v26 = vld [vmem:[%s305_s17] sm:$0xff] }
  0x93   : > { %405 = vst [vmem:[#allocation2 + $0x20] sm:$0xf0] %v398_v27  ;;  %408 = vst.msk [vmem:[#allocation2 + $0x18] sm:$0xf0] %vm407_vm12, %v977_v0  ;;  %v512_v32 = vld [vmem:[#allocation2] sm:$0xff] }
  0x95   : > { %v349_v28 = vpop.permute.xlu1 %348  ;;  %v325_v29 = vpop.permute.xlu0 %324 }
  0x96   : > { %v352_v30 = vsel %vm350_vm3, %v347_v16, %v349_v28  ;;  %v328_v31 = vsel %vm326_vm9, %v323_v22, %v325_v29  ;;  %v513_v37 = vld [vmem:[#allocation2 + $0x8] sm:$0xff]  ;;  %vm484_vm3 = vcmask 900100   ;;  %vm537_vm9 = vcmask 1043456   ;;  %v688_v16 = vld [vmem:[%s1113_s3] sm:$0x7] }
  0x97   : > { %359 = vst [vmem:[#allocation2 + $0x10] sm:$0xf0] %v352_v30  ;;  %335 = vst [vmem:[#allocation2 + $0x10] sm:$0xf] %v328_v31  ;;  %vm689_vm11 = vcmp.gt.f32.partialorder %v688_v16, 0.5 }
  0x98   : > { %v690_v19 = vsel %vm689_vm11, 1, %v988_v14  ;;  %v710_v29 = vld [vmem:[%s305_s17 + $0x8] sm:$0xf] }
  0x99   : > { %v396_v33 = vpop.permute.xlu1 %395  ;;  %v372_v34 = vpop.permute.xlu0 %371 }
  0x9a   : > { %v399_v35 = vsel %vm397_vm10, %v394_v25, %v396_v33  ;;  %v375_v36 = vsel %vm373_vm8, %v370_v21, %v372_v34  ;;  %v516_v38 = vld [vmem:[#allocation2 + $0x20] sm:$0xff]  ;;  %v515_v39 = vld [vmem:[#allocation2 + $0x18] sm:$0xff]  ;;  %vm509_vm8 = vcmask 1044328   ;;  %vm533_vm10 = vcmask 293888  }
  0x9b   : > { %406 = vst [vmem:[#allocation2 + $0x28] sm:$0xf0] %v399_v35  ;;  %382 = vst [vmem:[#allocation2 + $0x28] sm:$0xf] %v375_v36  ;;  %v894_v40 = vpack.c.bf16 %v516_v38, %v513_v37  ;;  %v896_v41 = vpack.c.bf16 %v515_v39, %v512_v32  ;;  %v712_v33 = vcombine.high %v709_v26, %v709_v26 }
  0x9d   : > { %v428_v42 = vpop.permute.xlu1 %427  ;;  %895 = vmatprep.subr.bf16.mxu0 %v894_v40  ;;  %v426_v43 = vpop.permute.xlu0 %425 }
  0x9e   : > { %438 = vst.msk [vmem:[#allocation2 + $0x40] sm:$0xf0] %vm437_vm13, %v428_v42  ;;  %v431_v44 = vsel %vm429_vm14, %v426_v43, %v428_v42  ;;  %897 = vmatpush1.bf16.msra.mxu0 %v896_v41  ;;  %v514_v48 = vld [vmem:[#allocation2 + $0x10] sm:$0xff] }
  0x9f   : > { %440 = vst.msk [vmem:[#allocation2 + $0x40] sm:$0xf0] %vm439_vm15, %v977_v0  ;;  %436 = vst [vmem:[#allocation2 + $0x38] sm:$0xf0] %v431_v44 }
  0xa1   : > { %v451_v45 = vpop.permute.xlu1 %450  ;;  %v449_v46 = vpop.permute.xlu0 %448 }
  0xa2   : > { %461 = vst.msk [vmem:[#allocation2 + $0x58] sm:$0xf] %vm460_vm0, %v451_v45  ;;  %v454_v47 = vsel %vm452_vm1, %v449_v46, %v451_v45  ;;  %v517_v49 = vld [vmem:[#allocation2 + $0x28] sm:$0xff] }
  0xa3   : > { %463 = vst.msk [vmem:[#allocation2 + $0x58] sm:$0xf] %vm462_vm2, %v977_v0  ;;  %459 = vst [vmem:[#allocation2 + $0x50] sm:$0xf] %v454_v47  ;;  %v903_v50 = vpack.c.bf16 %v517_v49, %v514_v48 }
  0xa5   : > { %v475_v51 = vpop.permute.xlu1 %474  ;;  %904 = vmatpush3.bf16.msra.mxu1 %v903_v50  ;;  %v473_v52 = vpop.permute.xlu0 %472 }
  0xa6   : > { %485 = vst.msk [vmem:[#allocation2 + $0x58] sm:$0xf0] %vm484_vm3, %v475_v51  ;;  %v478_v53 = vsel %vm476_vm4, %v473_v52, %v475_v51  ;;  %905 = vmatprep.subr.bf16.mxu1 %v982_v8  ;;  %v520_v58 = vld [vmem:[#allocation2 + $0x40] sm:$0xff]  ;;  %v519_v62 = vld [vmem:[#allocation2 + $0x38] sm:$0xff] }
  0xa7   : > { %487 = vst.msk [vmem:[#allocation2 + $0x58] sm:$0xf0] %vm486_vm5, %v977_v0  ;;  %483 = vst [vmem:[#allocation2 + $0x50] sm:$0xf0] %v478_v53 }
  0xa9   : > { %v447_v54 = vpop.permute.xlu1 %446  ;;  %v424_v55 = vpop.permute.xlu0 %423 }
  0xaa   : > { %v453_v56 = vsel %vm452_vm1, %v447_v54, %v449_v46  ;;  %v430_v57 = vsel %vm429_vm14, %v424_v55, %v426_v43 }
  0xab   : > { %458 = vst [vmem:[#allocation2 + $0x48] sm:$0xf] %v453_v56  ;;  %435 = vst [vmem:[#allocation2 + $0x30] sm:$0xf0] %v430_v57 }
  0xad   : > { %v496_v59 = vpop.permute.xlu1 %495  ;;  %v471_v60 = vpop.permute.xlu0 %470 }
  0xae   : > { %v477_v61 = vsel %vm476_vm4, %v471_v60, %v473_v52  ;;  %v522_v63 = vld [vmem:[#allocation2 + $0x50] sm:$0xff]  ;;  %v523_v1 = vld [vmem:[#allocation2 + $0x58] sm:$0xff] }
  0xaf   : > { %482 = vst [vmem:[#allocation2 + $0x48] sm:$0xf0] %v477_v61  ;;  %v898_v2 = vpack.c.bf16 %v522_v63, %v519_v62  ;;  %v906_v3 = vpack.c.bf16 %v523_v1, %v520_v58 }
  0xb1   : > { %v494_v4 = vpop.permute.xlu1 %493  ;;  %899 = vmatprep.subr.bf16.mxu0 %v898_v2  ;;  %v498_v5 = vpop.permute.xlu0 %497  ;;  %907 = vmatpush3.bf16.msra.mxu1 %v906_v3 }
  0xb2   : > { %v500_v6 = vsel %vm499_vm6, %v494_v4, %v496_v59  ;;  %v501_v7 = vsel %vm499_vm6, %v496_v59, %v498_v5  ;;  %508 = vst.msk [vmem:[#allocation2 + $0x70] sm:$0xf] %vm507_vm7, %v498_v5  ;;  %889 = vmatprep.subr.mxu1 %v977_v0  ;;  %v518_v8 = vld [vmem:[#allocation2 + $0x30] sm:$0xff] }
  0xb3   : > { %505 = vst [vmem:[#allocation2 + $0x60] sm:$0xf] %v500_v6  ;;  %506 = vst [vmem:[#allocation2 + $0x68] sm:$0xf] %v501_v7 }
  0xb4   : > { %510 = vst.msk [vmem:[#allocation2 + $0x70] sm:$0xf] %vm509_vm8, %v977_v0  ;;  %v691_v0 = vlaneseq }
  0xb6   : > { %v521_v9 = vld [vmem:[#allocation2 + $0x48] sm:$0xff]  ;;  %v692_v17 = vshrl.u32 %v691_v0, 7 }
  0xb7   : > { %v900_v10 = vpack.c.bf16 %v521_v9, %v518_v8 }
  0xb8   : > { %v701_v18 = vsub.s32 2, %v692_v17  ;;  %v693_v20 = vsub.s32 0, %v692_v17  ;;  %v697_v21 = vsub.s32 1, %v692_v17 }
  0xb9   : > { %901 = vmatpush1.bf16.msra.mxu0 %v900_v10 }
  0xba   : > { %v525_v12 = vld [vmem:[#allocation2 + $0x68] sm:$0xf]  ;;  %v524_v15 = vld [vmem:[#allocation2 + $0x60] sm:$0xf]  ;;  %v702_v22 = vrot.slane %v690_v19, %v701_v18  ;;  %v694_v23 = vrot.slane %v690_v19, %v693_v20  ;;  %v698_v25 = vrot.slane %v690_v19, %v697_v21 }
  0xbb   : > { %v526_v13 = vld [vmem:[#allocation2 + $0x70] sm:$0xf]  ;;  %868 = vmatprep.subr.msk.mxu0 %vm537_vm9, %v525_v12 }
  0xbc   : > { %890 = vmatpush3.msk.msra.mxu1 %vm537_vm9, %v526_v13  ;;  %vm705_vm12 = vcmp.eq.s32.totalorder %v702_v22, 1  ;;  %vm703_vm13 = vcmp.eq.s32.totalorder %v694_v23, 1  ;;  %vm704_vm14 = vcmp.eq.s32.totalorder %v698_v25, 1 }
  0xbd   : > { %892 = vmatmul.mubr.msk.f32.vlgmr.msra.gmra.mrb[0].mxu1 %vm533_vm10, %v511_v11  ;;  %869 = vmatpush1.msk.msra.mxu0 %vm537_vm9, %v524_v15 }
  0xbe   : > { %870 = vmatmul.mubr.msk.f32.vlgmr.msra.gmra.mrb[0].mxu0 %vm533_vm10, %v511_v11 }
  0xc2   : > { %v531_v24 = vpop.permute.xlu0 %530 }
 0x190   : > { %v684_v27 = vpop.f32.mrb[0].mxu1 }
 0x191   : > { %v685_v28 = vadd.f32 %v684_v27, %v531_v24  ;;  %v893_v30 = vpop.f32.mrb[1].mxu1  ;;  %v613_v31 = vpop.f32.mrb[0].mxu0 }
 0x192   : > { %v614_v14 = vadd.f32 %v613_v31, %v531_v24  ;;  %v615_v32 = vpop.f32.mrb[1].mxu0 }
 0x193   : > { %v708_v34 = vsel %vm705_vm12, %v685_v28, 0.0  ;;  %v616_v35 = vadd.f32 %v615_v32, %v531_v24 }
 0x194   : > { %v716_v36 = vmul.f32 %v710_v29, %v708_v34  ;;  %v706_v37 = vsel %vm703_vm13, %v614_v14, 0.0 }
 0x195   : > { %v714_v38 = vmul.f32 %v709_v26, %v706_v37  ;;  %v707_v39 = vsel %vm704_vm14, %v616_v35, 0.0 }
 0x196   : > { %722 = vst [vmem:[%s314_s24 + $0x8] sm:$0xf] %v716_v36  ;;  %v715_v40 = vmul.f32 %v712_v33, %v707_v39 }
 0x198   : > { %v719_v41 = vcombine.low %v714_v38, %v715_v40 }
 0x19a   : > { %721 = vst [vmem:[%s314_s24] sm:$0xff] %v719_v41 }
 0x19b PF: > { %s15_s20 = sadd.s32 1, %s975_s20   ;;  %s1116_s18 = smov %s971_s19 }
 0x19c   : > { %p12_p5 = scmp.ge.s32.totalorder %s15_s20, 4   ;;  %s1117_s19 = smov %s1119_s21 }
 0x19e   :  { %14 = sbr.rel (!%p12_p5) target bundleno = 2 (0x2), region = 79 }

// kernel: ncd_forward.11
= control target key start
LH: loop header
LB: loop body
LE: loop exit
PB: predicated region body
PF: predicated region fallthrough
CT: control target
= control target key end

     0   :  { %s922_s15 = smov 0   ;;  %s924_s16 = smov 0   ;;  %s1012_s0 = inlined_call_operand.vmem [shape: f32[2,4,384], index: 0, kind: input, shape index: {}]   ;;  %s1013_s1 = inlined_call_operand.vmem [shape: f32[4,36], index: 1, kind: input, shape index: {}]   ;;  %s1014_s2 = inlined_call_operand.vmem [shape: f32[4,1], index: 2, kind: input, shape index: {}]   ;;  %s1015_s3 = inlined_call_operand.vmem [shape: f32[1,384], index: 3, kind: input, shape index: {}]   ;;  %s1016_s4 = inlined_call_operand.vmem [shape: f32[2,4,384], index: 4, kind: output, shape index: {}]  }
   0x1   :  { %s926_s17 = smov 0  }
   0x2 LB: > { %s26_s18 = sadd.s32 1, %s879_s16  ;;  %p774_p0 = scmp.ge.s32.totalorder %s883_s17, 1  ;;  %s883_s17 = sphi %s926_s17, %s14_s17   ;;  %s879_s16 = sphi %s924_s16, %s1018_s16   ;;  %s875_s15 = sphi %s922_s15, %s1017_s15  }
   0x3   : > { %p28_p1 = scmp.ge.s32.totalorder %s26_s18, 2  ;;  %p194_p2 = scmp.lt.s32.totalorder %s883_s17, 3 }
   0x5   : > { %s1020_s18 = smov (%p28_p1, %s26_s18), 0  ;;  %p195_p3 = pnand %p774_p0, %p194_p2 }
   0x6   : > { %p232_p4 = scmp.lt.s32.totalorder (!%p195_p3), %s875_s15, 1  ;;  %v885_v0 = vmov (!%p195_p3), 0.0   ;;  %s886_s23 = smov (!%p195_p3), 18   ;;  %v890_v8 = vmov (!%p195_p3), 0.0|0.0   ;;  %vm895_vm0 = vmmov (!%p195_p3), 0   ;;  %v896_v14 = vmov (!%p195_p3), 0  }
   0x7   : > { %198 = sbr.rel (%p195_p3) target bundleno = 409 (0x199), region = 36  ;;  %550 = vmatprep.mubr.f32.mxu0 (!%p195_p3), %v885_v0  ;;  %s887_s24 = smov (!%p195_p3), 19   ;;  %811 = vmatprep.subr.bf16.mxu1 (!%p195_p3), %v890_v8  ;;  %v466_v15 = vld [vmem:[%s1014_s2] sm:$0xf] (!%p195_p3)  ;;  %vm271_vm1 = vcmask (!%p195_p3), 1043608   ;;  %vm275_vm2 = vcmask (!%p195_p3), 150528  }
   0x8   : > { %s888_s25 = smov (!%p195_p3), 17   ;;  %s889_s26 = smov (!%p195_p3), 1   ;;  %800 = vmatprep.mubr.msk.f32.mxu1 (!%p195_p3), %vm895_vm0, %v885_v0  ;;  %854 = vset.pattern.permute.xlu0 (!%p195_p3), %v896_v14  ;;  %vm289_vm3 = vcmask (!%p195_p3), 146432   ;;  %vm295_vm4 = vcmask (!%p195_p3), 1047700   ;;  %vm318_vm5 = vcmask (!%p195_p3), 1043592   ;;  %vm299_vm6 = vcmask (!%p195_p3), 146436  }
   0x9   : > { %s891_s27 = smov (!%p195_p3), 127   ;;  %s892_s28 = smov (!%p195_p3), 111   ;;  %vm322_vm7 = vcmask (!%p195_p3), 134144   ;;  %vm312_vm8 = vcmask (!%p195_p3), 138240   ;;  %vm265_vm9 = vcmask (!%p195_p3), 154624   ;;  %vm336_vm10 = vcmask (!%p195_p3), 7168  }
   0xa   : > { %s893_s29 = smov (!%p195_p3), 110   ;;  %s894_s30 = smov (!%p195_p3), 109   ;;  %vm342_vm11 = vcmask (!%p195_p3), 1047564   ;;  %vm346_vm12 = vcmask (!%p195_p3), 7172   ;;  %vm376_vm13 = vcmask (!%p195_p3), 1039364   ;;  %vm368_vm14 = vcmask (!%p195_p3), 1039360  }
   0xb   : > { %vm378_vm15 = vcmask (!%p195_p3), 1048572   ;;  %vm399_vm0 = vcmask (!%p195_p3), 904192  }
   0xe   : > { %s1022_s15 = smov (!%p232_p4, %s875_s15), 1 }
   0xf   : > { %s817_s19 = smul.u32 12, %s1022_s15 }
  0x11   : > { %s949_s22 = scalar_lea.vmem %s1012_s0, %s817_s19  ;;  %s253_s13 = scalar_lea.vmem %s1016_s4, %s817_s19 }
  0x12   : > { %v277_v1 = vld [vmem:[%s949_s22] sm:$0xff]  ;;  %v857_v4 = vld [vmem:[%s949_s22 + $0x8] ss:$0 sps:$4 sm:$0xff]  }
  0x13   : > { %285 = vrot.lane.b32.xlu1 %v277_v1, %s886_s23  ;;  %v281_v2 = vcombine.low %v277_v1, %v277_v1  ;;  %259 = vrot.lane.b32.xlu0 %v277_v1, %s887_s24  ;;  %v258_v3 = vcombine.high %v277_v1, %v277_v1  ;;  %353 = vst [vmem:[#allocation2 + $0x30] sm:$0xf] %v277_v1  ;;  %v255_v5 = vld [vmem:[%s949_s22 + $0x8] sm:$0xf] }
  0x14   : > { %v858_v6 = vld [vmem:[%s949_s22 + $0x8] ss:$0 sps:$4 sm:$0xff]  }
  0x15   : > { %354 = vst [vmem:[#allocation2 + $0x38] sm:$0xf] %v258_v3  ;;  %v302_v7 = vld [vmem:[%s949_s22 + $0x8] sm:$0xf] }
  0x16   : > { %v859_v9 = vld [vmem:[%s949_s22 + $0x8] ss:$0 sps:$4 sm:$0xff]  }
  0x17   : > { %283 = vrot.lane.b32.xlu1 %v281_v2, %s886_s23  ;;  %306 = vrot.lane.b32.xlu0 %v277_v1, %s888_s25  ;;  %v381_v10 = vld [vmem:[%s949_s22 + $0x8] sm:$0xf] }
  0x18   : > { %v860_v11 = vld [vmem:[%s949_s22 + $0x8] ss:$0 sps:$4 sm:$0xff]  }
  0x19   : > { %v349_v12 = vld [vmem:[%s949_s22 + $0x8] sm:$0xf] }
  0x1a   : > { %355 = vst [vmem:[#allocation2 + $0x40] sm:$0xf] %v349_v12  ;;  %v428_v13 = vld [vmem:[%s949_s22 + $0x8] sm:$0xf] }
  0x1b   : > { %308 = vrot.lane.b32.xlu1 %v258_v3, %s888_s25  ;;  %261 = vrot.lane.b32.xlu0 %v258_v3, %s887_s24 }
  0x1f   : > { %332 = vrot.lane.b32.xlu1 %v277_v1, %s889_s26  ;;  %330 = vrot.lane.b32.xlu0 %v281_v2, %s889_s26 }
  0x23   : > { %287 = vrot.lane.b32.xlu1 %v857_v4, %s886_s23  ;;  %263 = vrot.lane.b32.xlu0 %v255_v5, %s887_s24 }
  0x27   : > { %334 = vrot.lane.b32.xlu1 %v858_v6, %s889_s26  ;;  %310 = vrot.lane.b32.xlu0 %v302_v7, %s888_s25 }
  0x2b   : > { %366 = vrot.lane.b32.xlu1 %v859_v9, %s891_s27  ;;  %364 = vrot.lane.b32.xlu0 %v277_v1, %s891_s27 }
  0x2f   : > { %389 = vrot.lane.b32.xlu1 %v381_v10, %s892_s28  ;;  %387 = vrot.lane.b32.xlu0 %v258_v3, %s892_s28 }
  0x33   : > { %413 = vrot.lane.b32.xlu1 %v860_v11, %s893_s29  ;;  %411 = vrot.lane.b32.xlu0 %v277_v1, %s893_s29  ;;  %v450_v11 = vld [vmem:[%s1013_s1] sm:$0xf] }
  0x37   : > { %385 = vrot.lane.b32.xlu1 %v277_v1, %s892_s28  ;;  %362 = vrot.lane.b32.xlu0 %v281_v2, %s891_s27 }
  0x3b   : > { %434 = vrot.lane.b32.xlu1 %v258_v3, %s894_s30  ;;  %409 = vrot.lane.b32.xlu0 %v281_v2, %s893_s29 }
  0x3f   : > { %432 = vrot.lane.b32.xlu1 %v277_v1, %s894_s30  ;;  %436 = vrot.lane.b32.xlu0 %v428_v13, %s894_s30 }
  0x43   : > { %469 = vperm.xlu0 %854, %v466_v15  }
  0x85   : > { %v286_v16 = vpop.permute.xlu1 %285  ;;  %v260_v17 = vpop.permute.xlu0 %259 }
  0x86   : > { %272 = vst.msk [vmem:[#allocation2] sm:$0xf] %vm271_vm1, %v260_v17  ;;  %vm391_vm1 = vcmask 908288  }
  0x87   : > { %276 = vst.msk [vmem:[#allocation2] sm:$0xf] %vm275_vm2, %v885_v0  ;;  %vm401_vm2 = vcmask 1044344  }
  0x89   : > { %v284_v18 = vpop.permute.xlu1 %283  ;;  %v307_v19 = vpop.permute.xlu0 %306 }
  0x8a   : > { %v290_v20 = vsel %vm289_vm3, %v284_v18, %v286_v16  ;;  %296 = vst.msk [vmem:[#allocation2] sm:$0xf0] %vm295_vm4, %v284_v18  ;;  %vm415_vm4 = vcmask 900096  }
  0x8b   : > { %319 = vst.msk [vmem:[#allocation2 + $0x18] sm:$0xf] %vm318_vm5, %v307_v19  ;;  %297 = vst [vmem:[#allocation2 + $0x8] sm:$0xf0] %v290_v20  ;;  %vm425_vm5 = vcmask 1048436  }
  0x8c   : > { %300 = vst.msk [vmem:[#allocation2] sm:$0xf0] %vm299_vm6, %v885_v0  ;;  %vm438_vm6 = vcmask 891904  }
  0x8d   : > { %323 = vst.msk [vmem:[#allocation2 + $0x18] sm:$0xf] %vm322_vm7, %v885_v0  ;;  %v309_v21 = vpop.permute.xlu1 %308  ;;  %v262_v22 = vpop.permute.xlu0 %261  ;;  %vm446_vm7 = vcmask 887808  }
  0x8e   : > { %v313_v23 = vsel %vm312_vm8, %v307_v19, %v309_v21  ;;  %v266_v24 = vsel %vm265_vm9, %v260_v17, %v262_v22 }
  0x8f   : > { %320 = vst [vmem:[#allocation2 + $0x20] sm:$0xf] %v313_v23  ;;  %273 = vst [vmem:[#allocation2 + $0x8] sm:$0xf] %v266_v24 }
  0x91   : > { %v333_v25 = vpop.permute.xlu1 %332  ;;  %v331_v26 = vpop.permute.xlu0 %330 }
  0x92   : > { %v337_v27 = vsel %vm336_vm10, %v331_v26, %v333_v25  ;;  %343 = vst.msk [vmem:[#allocation2 + $0x18] sm:$0xf0] %vm342_vm11, %v331_v26 }
  0x93   : > { %344 = vst [vmem:[#allocation2 + $0x20] sm:$0xf0] %v337_v27  ;;  %347 = vst.msk [vmem:[#allocation2 + $0x18] sm:$0xf0] %vm346_vm12, %v885_v0  ;;  %v451_v32 = vld [vmem:[#allocation2] sm:$0xff] }
  0x95   : > { %v288_v28 = vpop.permute.xlu1 %287  ;;  %v264_v29 = vpop.permute.xlu0 %263 }
  0x96   : > { %v291_v30 = vsel %vm289_vm3, %v286_v16, %v288_v28  ;;  %v267_v31 = vsel %vm265_vm9, %v262_v22, %v264_v29  ;;  %v452_v37 = vld [vmem:[#allocation2 + $0x8] sm:$0xff]  ;;  %vm423_vm3 = vcmask 900100   ;;  %vm476_vm9 = vcmask 1043456   ;;  %v627_v16 = vld [vmem:[%s1015_s3] sm:$0x7] }
  0x97   : > { %298 = vst [vmem:[#allocation2 + $0x10] sm:$0xf0] %v291_v30  ;;  %274 = vst [vmem:[#allocation2 + $0x10] sm:$0xf] %v267_v31  ;;  %vm628_vm11 = vcmp.gt.f32.partialorder %v627_v16, 0.5 }
  0x98   : > { %v629_v19 = vsel %vm628_vm11, 1, %v896_v14 }
  0x99   : > { %v335_v33 = vpop.permute.xlu1 %334  ;;  %v311_v34 = vpop.permute.xlu0 %310 }
  0x9a   : > { %v338_v35 = vsel %vm336_vm10, %v333_v25, %v335_v33  ;;  %v314_v36 = vsel %vm312_vm8, %v309_v21, %v311_v34  ;;  %v455_v38 = vld [vmem:[#allocation2 + $0x20] sm:$0xff]  ;;  %v454_v39 = vld [vmem:[#allocation2 + $0x18] sm:$0xff]  ;;  %vm448_vm8 = vcmask 1044328   ;;  %vm472_vm10 = vcmask 293888  }
  0x9b   : > { %345 = vst [vmem:[#allocation2 + $0x28] sm:$0xf0] %v338_v35  ;;  %321 = vst [vmem:[#allocation2 + $0x28] sm:$0xf] %v314_v36  ;;  %v803_v40 = vpack.c.bf16 %v455_v38, %v452_v37  ;;  %v805_v41 = vpack.c.bf16 %v454_v39, %v451_v32 }
  0x9d   : > { %v367_v42 = vpop.permute.xlu1 %366  ;;  %804 = vmatprep.subr.bf16.mxu0 %v803_v40  ;;  %v365_v43 = vpop.permute.xlu0 %364 }
  0x9e   : > { %377 = vst.msk [vmem:[#allocation2 + $0x40] sm:$0xf0] %vm376_vm13, %v367_v42  ;;  %v370_v44 = vsel %vm368_vm14, %v365_v43, %v367_v42  ;;  %806 = vmatpush1.bf16.msra.mxu0 %v805_v41  ;;  %v453_v48 = vld [vmem:[#allocation2 + $0x10] sm:$0xff] }
  0x9f   : > { %379 = vst.msk [vmem:[#allocation2 + $0x40] sm:$0xf0] %vm378_vm15, %v885_v0  ;;  %375 = vst [vmem:[#allocation2 + $0x38] sm:$0xf0] %v370_v44 }
  0xa1   : > { %v390_v45 = vpop.permute.xlu1 %389  ;;  %v388_v46 = vpop.permute.xlu0 %387 }
  0xa2   : > { %400 = vst.msk [vmem:[#allocation2 + $0x58] sm:$0xf] %vm399_vm0, %v390_v45  ;;  %v393_v47 = vsel %vm391_vm1, %v388_v46, %v390_v45  ;;  %v456_v49 = vld [vmem:[#allocation2 + $0x28] sm:$0xff] }
  0xa3   : > { %402 = vst.msk [vmem:[#allocation2 + $0x58] sm:$0xf] %vm401_vm2, %v885_v0  ;;  %398 = vst [vmem:[#allocation2 + $0x50] sm:$0xf] %v393_v47  ;;  %v812_v50 = vpack.c.bf16 %v456_v49, %v453_v48 }
  0xa5   : > { %v414_v51 = vpop.permute.xlu1 %413  ;;  %813 = vmatpush3.bf16.msra.mxu1 %v812_v50  ;;  %v412_v52 = vpop.permute.xlu0 %411 }
  0xa6   : > { %424 = vst.msk [vmem:[#allocation2 + $0x58] sm:$0xf0] %vm423_vm3, %v414_v51  ;;  %v417_v53 = vsel %vm415_vm4, %v412_v52, %v414_v51  ;;  %814 = vmatprep.subr.bf16.mxu1 %v890_v8  ;;  %v459_v58 = vld [vmem:[#allocation2 + $0x40] sm:$0xff]  ;;  %v458_v62 = vld [vmem:[#allocation2 + $0x38] sm:$0xff] }
  0xa7   : > { %426 = vst.msk [vmem:[#allocation2 + $0x58] sm:$0xf0] %vm425_vm5, %v885_v0  ;;  %422 = vst [vmem:[#allocation2 + $0x50] sm:$0xf0] %v417_v53 }
  0xa9   : > { %v386_v54 = vpop.permute.xlu1 %385  ;;  %v363_v55 = vpop.permute.xlu0 %362 }
  0xaa   : > { %v392_v56 = vsel %vm391_vm1, %v386_v54, %v388_v46  ;;  %v369_v57 = vsel %vm368_vm14, %v363_v55, %v365_v43 }
  0xab   : > { %397 = vst [vmem:[#allocation2 + $0x48] sm:$0xf] %v392_v56  ;;  %374 = vst [vmem:[#allocation2 + $0x30] sm:$0xf0] %v369_v57 }
  0xad   : > { %v435_v59 = vpop.permute.xlu1 %434  ;;  %v410_v60 = vpop.permute.xlu0 %409 }
  0xae   : > { %v416_v61 = vsel %vm415_vm4, %v410_v60, %v412_v52  ;;  %v461_v63 = vld [vmem:[#allocation2 + $0x50] sm:$0xff]  ;;  %v462_v1 = vld [vmem:[#allocation2 + $0x58] sm:$0xff] }
  0xaf   : > { %421 = vst [vmem:[#allocation2 + $0x48] sm:$0xf0] %v416_v61  ;;  %v807_v2 = vpack.c.bf16 %v461_v63, %v458_v62  ;;  %v815_v3 = vpack.c.bf16 %v462_v1, %v459_v58 }
  0xb1   : > { %v433_v4 = vpop.permute.xlu1 %432  ;;  %808 = vmatprep.subr.bf16.mxu0 %v807_v2  ;;  %v437_v5 = vpop.permute.xlu0 %436  ;;  %816 = vmatpush3.bf16.msra.mxu1 %v815_v3 }
  0xb2   : > { %v439_v6 = vsel %vm438_vm6, %v433_v4, %v435_v59  ;;  %v440_v7 = vsel %vm438_vm6, %v435_v59, %v437_v5  ;;  %447 = vst.msk [vmem:[#allocation2 + $0x70] sm:$0xf] %vm446_vm7, %v437_v5  ;;  %798 = vmatprep.subr.mxu1 %v885_v0  ;;  %v457_v8 = vld [vmem:[#allocation2 + $0x30] sm:$0xff] }
  0xb3   : > { %444 = vst [vmem:[#allocation2 + $0x60] sm:$0xf] %v439_v6  ;;  %445 = vst [vmem:[#allocation2 + $0x68] sm:$0xf] %v440_v7 }
  0xb4   : > { %449 = vst.msk [vmem:[#allocation2 + $0x70] sm:$0xf] %vm448_vm8, %v885_v0  ;;  %v630_v0 = vlaneseq }
  0xb6   : > { %v460_v9 = vld [vmem:[#allocation2 + $0x48] sm:$0xff]  ;;  %v631_v17 = vshrl.u32 %v630_v0, 7 }
  0xb7   : > { %v809_v10 = vpack.c.bf16 %v460_v9, %v457_v8 }
  0xb8   : > { %v640_v18 = vsub.s32 2, %v631_v17  ;;  %v632_v20 = vsub.s32 0, %v631_v17  ;;  %v636_v21 = vsub.s32 1, %v631_v17 }
  0xb9   : > { %810 = vmatpush1.bf16.msra.mxu0 %v809_v10 }
  0xba   : > { %v464_v12 = vld [vmem:[#allocation2 + $0x68] sm:$0xf]  ;;  %v463_v15 = vld [vmem:[#allocation2 + $0x60] sm:$0xf]  ;;  %v641_v22 = vrot.slane %v629_v19, %v640_v18  ;;  %v633_v23 = vrot.slane %v629_v19, %v632_v20  ;;  %v637_v25 = vrot.slane %v629_v19, %v636_v21 }
  0xbb   : > { %v465_v13 = vld [vmem:[#allocation2 + $0x70] sm:$0xf]  ;;  %777 = vmatprep.subr.msk.mxu0 %vm476_vm9, %v464_v12 }
  0xbc   : > { %799 = vmatpush3.msk.msra.mxu1 %vm476_vm9, %v465_v13  ;;  %vm644_vm12 = vcmp.eq.s32.totalorder %v641_v22, 1  ;;  %vm642_vm13 = vcmp.eq.s32.totalorder %v633_v23, 1  ;;  %vm643_vm14 = vcmp.eq.s32.totalorder %v637_v25, 1 }
  0xbd   : > { %801 = vmatmul.mubr.msk.f32.vlgmr.msra.gmra.mrb[0].mxu1 %vm472_vm10, %v450_v11  ;;  %778 = vmatpush1.msk.msra.mxu0 %vm476_vm9, %v463_v15 }
  0xbe   : > { %779 = vmatmul.mubr.msk.f32.vlgmr.msra.gmra.mrb[0].mxu0 %vm472_vm10, %v450_v11 }
  0xc2   : > { %v470_v24 = vpop.permute.xlu0 %469 }
 0x190   : > { %v623_v26 = vpop.f32.mrb[0].mxu1 }
 0x191   : > { %v624_v27 = vadd.f32 %v623_v26, %v470_v24  ;;  %v802_v28 = vpop.f32.mrb[1].mxu1  ;;  %v552_v29 = vpop.f32.mrb[0].mxu0 }
 0x192   : > { %v553_v30 = vadd.f32 %v552_v29, %v470_v24  ;;  %v554_v31 = vpop.f32.mrb[1].mxu0 }
 0x193   : > { %v647_v14 = vsel %vm644_vm12, %v624_v27, 0.0  ;;  %v555_v32 = vadd.f32 %v554_v31, %v470_v24 }
 0x194   : > { %653 = vst [vmem:[%s253_s13 + $0x8] sm:$0xf] %v647_v14  ;;  %v645_v33 = vsel %vm642_vm13, %v553_v30, 0.0 }
 0x195   : > { %v646_v34 = vsel %vm643_vm14, %v555_v32, 0.0 }
 0x196   : > { %v650_v35 = vcombine.low %v645_v33, %v646_v34 }
 0x198   : > { %652 = vst [vmem:[%s253_s13] sm:$0xff] %v650_v35 }
 0x199 PF: > { %s14_s17 = sadd.s32 1, %s883_s17   ;;  %s1017_s15 = smov %s879_s16 }
 0x19a   : > { %p11_p5 = scmp.ge.s32.totalorder %s14_s17, 4   ;;  %s1018_s16 = smov %s1020_s18 }
 0x19c   :  { %13 = sbr.rel (!%p11_p5) target bundleno = 2 (0x2), region = 72 }

// kernel: ncd_forward.12
= control target key start
LH: loop header
LB: loop body
LE: loop exit
PB: predicated region body
PF: predicated region fallthrough
CT: control target
= control target key end

     0   :  { %s1208_s18 = smov 0   ;;  %s1210_s19 = smov 0   ;;  %s1408_s0 = inlined_call_operand.vmem [shape: f32[2,4,384], index: 0, kind: input, shape index: {}]   ;;  %s1409_s1 = inlined_call_operand.vmem [shape: f32[2,4,384], index: 1, kind: input, shape index: {}]   ;;  %s1410_s2 = inlined_call_operand.vmem [shape: f32[8,72], index: 2, kind: input, shape index: {}]   ;;  %s1411_s3 = inlined_call_operand.vmem [shape: f32[8,1], index: 3, kind: input, shape index: {}]   ;;  %s1412_s4 = inlined_call_operand.vmem [shape: f32[1,384], index: 4, kind: input, shape index: {}]   ;;  %s1413_s5 = inlined_call_operand.vmem [shape: f32[2,8,384], index: 5, kind: output, shape index: {}]  }
   0x1   :  { %s1212_s20 = smov 0  }
   0x2 LB: > { %s27_s21 = sadd.s32 1, %s1160_s19  ;;  %p1023_p0 = scmp.ge.s32.totalorder %s1164_s20, 1  ;;  %s1164_s20 = sphi %s1212_s20, %s15_s20   ;;  %s1160_s19 = sphi %s1210_s19, %s1415_s19   ;;  %s1156_s18 = sphi %s1208_s18, %s1414_s18  }
   0x3   : > { %p29_p1 = scmp.ge.s32.totalorder %s27_s21, 2  ;;  %p229_p2 = scmp.lt.s32.totalorder %s1164_s20, 3 }
   0x5   : > { %s1417_s21 = smov (%p29_p1, %s27_s21), 0  ;;  %p230_p3 = pnand %p1023_p0, %p229_p2 }
   0x6   : > { %p274_p4 = scmp.lt.s32.totalorder (!%p230_p3), %s1156_s18, 1  ;;  %v1166_v0 = vmov (!%p230_p3), 0.0   ;;  %s1167_s29 = smov (!%p230_p3), 18   ;;  %v1171_v10 = vmov (!%p230_p3), 0.0|0.0   ;;  %vm1176_vm0 = vmmov (!%p230_p3), 0   ;;  %v1177_v26 = vmov (!%p230_p3), 0  }
   0x7   : > { %233 = sbr.rel (%p230_p3) target bundleno = 453 (0x1c5), region = 40  ;;  %790 = vmatprep.mubr.f32.mxu0 (!%p230_p3), %v1166_v0  ;;  %s1168_s30 = smov (!%p230_p3), 19   ;;  %1078 = vmatprep.subr.bf16.mxu1 (!%p230_p3), %v1171_v10  ;;  %v716_v27 = vld [vmem:[%s1411_s3] sm:$0xff] (!%p230_p3)  ;;  %vm318_vm1 = vcmask (!%p230_p3), 1043608   ;;  %vm322_vm2 = vcmask (!%p230_p3), 150528   ;;  %vm336_vm3 = vcmask (!%p230_p3), 146432  }
   0x8   : > { %s1169_s6 = smov (!%p230_p3), 17   ;;  %s1170_s7 = smov (!%p230_p3), 1   ;;  %1059 = vmatprep.mubr.msk.f32.mxu1 (!%p230_p3), %vm1176_vm0, %v1166_v0  ;;  %1128 = vset.pattern.permute.xlu0 (!%p230_p3), %v1177_v26  ;;  %vm342_vm4 = vcmask (!%p230_p3), 1047700   ;;  %vm365_vm5 = vcmask (!%p230_p3), 1043592   ;;  %vm346_vm6 = vcmask (!%p230_p3), 146436   ;;  %vm369_vm7 = vcmask (!%p230_p3), 134144  }
   0x9   : > { %s1172_s8 = smov (!%p230_p3), 127   ;;  %s1173_s9 = smov (!%p230_p3), 111   ;;  %vm359_vm8 = vcmask (!%p230_p3), 138240   ;;  %vm312_vm9 = vcmask (!%p230_p3), 154624   ;;  %vm383_vm10 = vcmask (!%p230_p3), 7168   ;;  %vm389_vm11 = vcmask (!%p230_p3), 1047564  }
   0xa   : > { %s1174_s10 = smov (!%p230_p3), 110   ;;  %s1175_s11 = smov (!%p230_p3), 109   ;;  %vm393_vm12 = vcmask (!%p230_p3), 7172   ;;  %vm423_vm13 = vcmask (!%p230_p3), 1039364   ;;  %vm415_vm14 = vcmask (!%p230_p3), 1039360   ;;  %vm425_vm15 = vcmask (!%p230_p3), 1048572  }
   0xb   : > { %vm446_vm0 = vcmask (!%p230_p3), 904192  }
   0xe   : > { %s1419_s18 = smov (!%p274_p4, %s1156_s18), 1 }
   0xf   : > { %s1090_s22 = smul.u32 12, %s1419_s18 }
  0x11   : > { %s1233_s25 = scalar_lea.vmem %s1408_s0, %s1090_s22  ;;  %s1239_s28 = scalar_lea.vmem %s1409_s1, %s1090_s22 }
  0x12   : > { %v324_v1 = vld [vmem:[%s1233_s25] sm:$0xff]  ;;  %v1131_v6 = vld [vmem:[%s1233_s25 + $0x8] ss:$0 sps:$4 sm:$0xff]   ;;  %s1091_s22 = smul.u32 24, %s1419_s18 }
  0x13   : > { %332 = vrot.lane.b32.xlu1 %v324_v1, %s1167_s29  ;;  %v328_v2 = vcombine.low %v324_v1, %v324_v1  ;;  %306 = vrot.lane.b32.xlu0 %v324_v1, %s1168_s30  ;;  %v305_v3 = vcombine.high %v324_v1, %v324_v1  ;;  %400 = vst [vmem:[#allocation2 + $0x30] sm:$0xf] %v324_v1  ;;  %v1244_v4 = vld [vmem:[%s1239_s28] sm:$0xff]  ;;  %v302_v7 = vld [vmem:[%s1233_s25 + $0x8] sm:$0xf] }
  0x14   : > { %v1250_v5 = vcombine.low %v1244_v4, %v1244_v4  ;;  %596 = vst [vmem:[#allocation2 + $0x98] sm:$0xf0] %v1244_v4  ;;  %v1132_v8 = vld [vmem:[%s1233_s25 + $0x8] ss:$0 sps:$4 sm:$0xff]   ;;  %v524_v16 = vcombine.high %v1244_v4, %v1244_v4 }
  0x15   : > { %401 = vst [vmem:[#allocation2 + $0x38] sm:$0xf] %v305_v3  ;;  %v349_v9 = vld [vmem:[%s1233_s25 + $0x8] sm:$0xf] }
  0x16   : > { %595 = vst [vmem:[#allocation2 + $0x90] sm:$0xf0] %v1250_v5  ;;  %v1133_v11 = vld [vmem:[%s1233_s25 + $0x8] ss:$0 sps:$4 sm:$0xff]  }
  0x17   : > { %330 = vrot.lane.b32.xlu1 %v328_v2, %s1167_s29  ;;  %353 = vrot.lane.b32.xlu0 %v324_v1, %s1169_s6  ;;  %v428_v12 = vld [vmem:[%s1233_s25 + $0x8] sm:$0xf] }
  0x18   : > { %v1134_v13 = vld [vmem:[%s1233_s25 + $0x8] ss:$0 sps:$4 sm:$0xff]  }
  0x19   : > { %v475_v14 = vld [vmem:[%s1233_s25 + $0x8] sm:$0xf] }
  0x1a   : > { %v396_v15 = vld [vmem:[%s1233_s25 + $0x8] sm:$0xf]  ;;  %s300_s25 = scalar_lea.vmem %s1413_s5, %s1091_s22 }
  0x1b   : > { %355 = vrot.lane.b32.xlu1 %v305_v3, %s1169_s6  ;;  %308 = vrot.lane.b32.xlu0 %v305_v3, %s1168_s30  ;;  %402 = vst [vmem:[#allocation2 + $0x40] sm:$0xf] %v396_v15  ;;  %v1137_v17 = vld [vmem:[%s1239_s28 + $0x8] ss:$0 sps:$4 sm:$0xff]  }
  0x1c   : > { %v521_v18 = vld [vmem:[%s1239_s28 + $0x8] sm:$0xf] }
  0x1d   : > { %v1138_v19 = vld [vmem:[%s1239_s28 + $0x8] ss:$0 sps:$4 sm:$0xff]  }
  0x1e   : > { %v1141_v20 = vld [vmem:[%s1239_s28 + $0x8] ss:$0 sps:$4 sm:$0xff]  }
  0x1f   : > { %379 = vrot.lane.b32.xlu1 %v324_v1, %s1170_s7  ;;  %377 = vrot.lane.b32.xlu0 %v328_v2, %s1170_s7  ;;  %597 = vst [vmem:[#allocation2 + $0xa0] sm:$0xf0] %v1141_v20  ;;  %v599_v21 = vld [vmem:[%s1239_s28 + $0x8] sm:$0xf] }
  0x20   : > { %v1139_v22 = vld [vmem:[%s1239_s28 + $0x8] ss:$0 sps:$4 sm:$0xff]  }
  0x21   : > { %v566_v23 = vld [vmem:[%s1239_s28 + $0x8] sm:$0xf] }
  0x22   : > { %v644_v24 = vld [vmem:[%s1239_s28 + $0x8] sm:$0xf] }
  0x23   : > { %334 = vrot.lane.b32.xlu1 %v1131_v6, %s1167_s29  ;;  %310 = vrot.lane.b32.xlu0 %v302_v7, %s1168_s30  ;;  %v1140_v25 = vld [vmem:[%s1239_s28 + $0x8] ss:$0 sps:$4 sm:$0xff]  }
  0x27   : > { %381 = vrot.lane.b32.xlu1 %v1132_v8, %s1170_s7  ;;  %357 = vrot.lane.b32.xlu0 %v349_v9, %s1169_s6 }
  0x2b   : > { %413 = vrot.lane.b32.xlu1 %v1133_v11, %s1172_s8  ;;  %411 = vrot.lane.b32.xlu0 %v324_v1, %s1172_s8 }
  0x2f   : > { %436 = vrot.lane.b32.xlu1 %v428_v12, %s1173_s9  ;;  %434 = vrot.lane.b32.xlu0 %v305_v3, %s1173_s9 }
  0x33   : > { %460 = vrot.lane.b32.xlu1 %v1134_v13, %s1174_s10  ;;  %458 = vrot.lane.b32.xlu0 %v324_v1, %s1174_s10 }
  0x37   : > { %432 = vrot.lane.b32.xlu1 %v324_v1, %s1173_s9  ;;  %409 = vrot.lane.b32.xlu0 %v328_v2, %s1172_s8 }
  0x3b   : > { %481 = vrot.lane.b32.xlu1 %v305_v3, %s1175_s11  ;;  %456 = vrot.lane.b32.xlu0 %v328_v2, %s1174_s10 }
  0x3f   : > { %503 = vrot.lane.b32.xlu1 %v1250_v5, %s1168_s30  ;;  %483 = vrot.lane.b32.xlu0 %v475_v14, %s1175_s11 }
  0x43   : > { %525 = vrot.lane.b32.xlu1 %v1244_v4, %s1167_s29  ;;  %505 = vrot.lane.b32.xlu0 %v1244_v4, %s1168_s30 }
  0x47   : > { %548 = vrot.lane.b32.xlu1 %v1250_v5, %s1169_s6  ;;  %527 = vrot.lane.b32.xlu0 %v524_v16, %s1167_s29 }
  0x4b   : > { %479 = vrot.lane.b32.xlu1 %v324_v1, %s1175_s11  ;;  %550 = vrot.lane.b32.xlu0 %v1244_v4, %s1169_s6 }
  0x4f   : > { %529 = vrot.lane.b32.xlu1 %v521_v18, %s1167_s29  ;;  %507 = vrot.lane.b32.xlu0 %v1137_v17, %s1168_s30 }
  0x53   : > { %570 = vrot.lane.b32.xlu1 %v1244_v4, %s1170_s7  ;;  %552 = vrot.lane.b32.xlu0 %v1138_v19, %s1169_s6 }
  0x57   : > { %605 = vrot.lane.b32.xlu1 %v524_v16, %s1172_s8  ;;  %572 = vrot.lane.b32.xlu0 %v524_v16, %s1170_s7 }
  0x5b   : > { %628 = vrot.lane.b32.xlu1 %v1244_v4, %s1173_s9  ;;  %607 = vrot.lane.b32.xlu0 %v599_v21, %s1172_s8 }
  0x5f   : > { %603 = vrot.lane.b32.xlu1 %v1244_v4, %s1172_s8  ;;  %630 = vrot.lane.b32.xlu0 %v1139_v22, %s1173_s9 }
  0x63   : > { %574 = vrot.lane.b32.xlu1 %v566_v23, %s1170_s7  ;;  %626 = vrot.lane.b32.xlu0 %v1250_v5, %s1173_s9 }
  0x67   : > { %652 = vrot.lane.b32.xlu1 %v644_v24, %s1174_s10  ;;  %650 = vrot.lane.b32.xlu0 %v524_v16, %s1174_s10 }
  0x6b   : > { %675 = vrot.lane.b32.xlu1 %v1140_v25, %s1175_s11  ;;  %673 = vrot.lane.b32.xlu0 %v1244_v4, %s1175_s11 }
  0x6f   : > { %671 = vrot.lane.b32.xlu1 %v1250_v5, %s1175_s11  ;;  %648 = vrot.lane.b32.xlu0 %v1244_v4, %s1174_s10 }
  0x73   : > { %719 = vperm.xlu0 %1128, %v716_v27  }
  0x85   : > { %v333_v28 = vpop.permute.xlu1 %332  ;;  %v307_v29 = vpop.permute.xlu0 %306 }
  0x86   : > { %319 = vst.msk [vmem:[#allocation2] sm:$0xf] %vm318_vm1, %v307_v29  ;;  %vm438_vm1 = vcmask 908288  }
  0x87   : > { %323 = vst.msk [vmem:[#allocation2] sm:$0xf] %vm322_vm2, %v1166_v0  ;;  %vm448_vm2 = vcmask 1044344  }
  0x89   : > { %v331_v30 = vpop.permute.xlu1 %330  ;;  %v354_v31 = vpop.permute.xlu0 %353 }
  0x8a   : > { %v337_v32 = vsel %vm336_vm3, %v331_v30, %v333_v28  ;;  %343 = vst.msk [vmem:[#allocation2] sm:$0xf0] %vm342_vm4, %v331_v30  ;;  %vm470_vm4 = vcmask 900100  }
  0x8b   : > { %366 = vst.msk [vmem:[#allocation2 + $0x18] sm:$0xf] %vm365_vm5, %v354_v31  ;;  %344 = vst [vmem:[#allocation2 + $0x8] sm:$0xf0] %v337_v32  ;;  %vm462_vm5 = vcmask 900096  }
  0x8c   : > { %347 = vst.msk [vmem:[#allocation2] sm:$0xf0] %vm346_vm6, %v1166_v0  ;;  %vm472_vm6 = vcmask 1048436  }
  0x8d   : > { %370 = vst.msk [vmem:[#allocation2 + $0x18] sm:$0xf] %vm369_vm7, %v1166_v0  ;;  %v356_v33 = vpop.permute.xlu1 %355  ;;  %v309_v34 = vpop.permute.xlu0 %308  ;;  %vm514_vm7 = vcmask 1047708  }
  0x8e   : > { %v360_v35 = vsel %vm359_vm8, %v354_v31, %v356_v33  ;;  %v313_v36 = vsel %vm312_vm9, %v307_v29, %v309_v34 }
  0x8f   : > { %367 = vst [vmem:[#allocation2 + $0x20] sm:$0xf] %v360_v35  ;;  %320 = vst [vmem:[#allocation2 + $0x8] sm:$0xf] %v313_v36 }
  0x91   : > { %v380_v37 = vpop.permute.xlu1 %379  ;;  %v378_v38 = vpop.permute.xlu0 %377 }
  0x92   : > { %v384_v39 = vsel %vm383_vm10, %v378_v38, %v380_v37  ;;  %390 = vst.msk [vmem:[#allocation2 + $0x18] sm:$0xf0] %vm389_vm11, %v378_v38  ;;  %vm485_vm11 = vcmask 891904  }
  0x93   : > { %391 = vst [vmem:[#allocation2 + $0x20] sm:$0xf0] %v384_v39  ;;  %394 = vst.msk [vmem:[#allocation2 + $0x18] sm:$0xf0] %vm393_vm12, %v1166_v0  ;;  %v689_v44 = vld [vmem:[#allocation2] sm:$0xff]  ;;  %vm493_vm12 = vcmask 887808  }
  0x95   : > { %v335_v40 = vpop.permute.xlu1 %334  ;;  %v311_v41 = vpop.permute.xlu0 %310 }
  0x96   : > { %v338_v42 = vsel %vm336_vm3, %v333_v28, %v335_v40  ;;  %v314_v43 = vsel %vm312_vm9, %v309_v34, %v311_v41  ;;  %v690_v49 = vld [vmem:[#allocation2 + $0x8] sm:$0xff] }
  0x97   : > { %345 = vst [vmem:[#allocation2 + $0x10] sm:$0xf0] %v338_v42  ;;  %321 = vst [vmem:[#allocation2 + $0x10] sm:$0xf] %v314_v43 }
  0x99   : > { %v382_v45 = vpop.permute.xlu1 %381  ;;  %v358_v46 = vpop.permute.xlu0 %357 }
  0x9a   : > { %v385_v47 = vsel %vm383_vm10, %v380_v37, %v382_v45  ;;  %v361_v48 = vsel %vm359_vm8, %v356_v33, %v358_v46  ;;  %v693_v50 = vld [vmem:[#allocation2 + $0x20] sm:$0xff]  ;;  %v692_v51 = vld [vmem:[#allocation2 + $0x18] sm:$0xff] }
  0x9b   : > { %392 = vst [vmem:[#allocation2 + $0x28] sm:$0xf0] %v385_v47  ;;  %368 = vst [vmem:[#allocation2 + $0x28] sm:$0xf] %v361_v48  ;;  %v1062_v52 = vpack.c.bf16 %v693_v50, %v690_v49  ;;  %v1064_v53 = vpack.c.bf16 %v692_v51, %v689_v44 }
  0x9d   : > { %v414_v54 = vpop.permute.xlu1 %413  ;;  %1063 = vmatprep.subr.bf16.mxu0 %v1062_v52  ;;  %v412_v55 = vpop.permute.xlu0 %411 }
  0x9e   : > { %424 = vst.msk [vmem:[#allocation2 + $0x40] sm:$0xf0] %vm423_vm13, %v414_v54  ;;  %v417_v56 = vsel %vm415_vm14, %v412_v55, %v414_v54  ;;  %1065 = vmatpush1.bf16.msra.mxu0 %v1064_v53  ;;  %v691_v60 = vld [vmem:[#allocation2 + $0x10] sm:$0xff]  ;;  %vm518_vm13 = vcmask 154628  }
  0x9f   : > { %426 = vst.msk [vmem:[#allocation2 + $0x40] sm:$0xf0] %vm425_vm15, %v1166_v0  ;;  %422 = vst [vmem:[#allocation2 + $0x38] sm:$0xf0] %v417_v56  ;;  %vm495_vm15 = vcmask 1044328  }
  0xa1   : > { %v437_v57 = vpop.permute.xlu1 %436  ;;  %v435_v58 = vpop.permute.xlu0 %434 }
  0xa2   : > { %447 = vst.msk [vmem:[#allocation2 + $0x58] sm:$0xf] %vm446_vm0, %v437_v57  ;;  %v440_v59 = vsel %vm438_vm1, %v435_v58, %v437_v57  ;;  %v694_v61 = vld [vmem:[#allocation2 + $0x28] sm:$0xff]  ;;  %vm536_vm0 = vcmask 1043600  }
  0xa3   : > { %449 = vst.msk [vmem:[#allocation2 + $0x58] sm:$0xf] %vm448_vm2, %v1166_v0  ;;  %445 = vst [vmem:[#allocation2 + $0x50] sm:$0xf] %v440_v59  ;;  %v1079_v62 = vpack.c.bf16 %v694_v61, %v691_v60  ;;  %vm540_vm2 = vcmask 142336  }
  0xa5   : > { %v461_v63 = vpop.permute.xlu1 %460  ;;  %1080 = vmatpush3.bf16.msra.mxu1 %v1079_v62  ;;  %v459_v1 = vpop.permute.xlu0 %458 }
  0xa6   : > { %471 = vst.msk [vmem:[#allocation2 + $0x58] sm:$0xf0] %vm470_vm4, %v461_v63  ;;  %v464_v2 = vsel %vm462_vm5, %v459_v1, %v461_v63  ;;  %1081 = vmatprep.subr.bf16.mxu1 %v1171_v10  ;;  %v697_v7 = vld [vmem:[#allocation2 + $0x40] sm:$0xff]  ;;  %v696_v12 = vld [vmem:[#allocation2 + $0x38] sm:$0xff]  ;;  %vm559_vm4 = vcmask 1047692  }
  0xa7   : > { %473 = vst.msk [vmem:[#allocation2 + $0x58] sm:$0xf0] %vm472_vm6, %v1166_v0  ;;  %469 = vst [vmem:[#allocation2 + $0x50] sm:$0xf0] %v464_v2  ;;  %vm563_vm6 = vcmask 138244  }
  0xa9   : > { %v433_v3 = vpop.permute.xlu1 %432  ;;  %v410_v4 = vpop.permute.xlu0 %409 }
  0xaa   : > { %v439_v5 = vsel %vm438_vm1, %v433_v3, %v435_v58  ;;  %v416_v6 = vsel %vm415_vm14, %v410_v4, %v412_v55 }
  0xab   : > { %444 = vst [vmem:[#allocation2 + $0x48] sm:$0xf] %v439_v5  ;;  %421 = vst [vmem:[#allocation2 + $0x30] sm:$0xf0] %v416_v6 }
  0xad   : > { %v482_v8 = vpop.permute.xlu1 %481  ;;  %v457_v9 = vpop.permute.xlu0 %456 }
  0xae   : > { %v463_v11 = vsel %vm462_vm5, %v457_v9, %v459_v1  ;;  %v699_v13 = vld [vmem:[#allocation2 + $0x50] sm:$0xff]  ;;  %v700_v14 = vld [vmem:[#allocation2 + $0x58] sm:$0xff] }
  0xaf   : > { %468 = vst [vmem:[#allocation2 + $0x48] sm:$0xf0] %v463_v11  ;;  %v1066_v15 = vpack.c.bf16 %v699_v13, %v696_v12  ;;  %v1082_v16 = vpack.c.bf16 %v700_v14, %v697_v7 }
  0xb1   : > { %v504_v17 = vpop.permute.xlu1 %503  ;;  %1067 = vmatprep.subr.bf16.mxu0 %v1066_v15  ;;  %v484_v18 = vpop.permute.xlu0 %483  ;;  %1083 = vmatpush3.bf16.msra.mxu1 %v1082_v16 }
  0xb2   : > { %515 = vst.msk [vmem:[#allocation2 + $0x60] sm:$0xf0] %vm514_vm7, %v504_v17  ;;  %v487_v19 = vsel %vm485_vm11, %v482_v8, %v484_v18  ;;  %1084 = vmatprep.subr.bf16.mxu1 %v1171_v10  ;;  %v695_v23 = vld [vmem:[#allocation2 + $0x30] sm:$0xff]  ;;  %vm581_vm7 = vcmask 1043464  }
  0xb3   : > { %494 = vst.msk [vmem:[#allocation2 + $0x70] sm:$0xf] %vm493_vm12, %v484_v18  ;;  %492 = vst [vmem:[#allocation2 + $0x68] sm:$0xf] %v487_v19  ;;  %vm585_vm12 = vcmask 3072  }
  0xb4   : > { %519 = vst.msk [vmem:[#allocation2 + $0x60] sm:$0xf0] %vm518_vm13, %v1166_v0  ;;  %vm641_vm13 = vcmask 1048444  }
  0xb5   : > { %496 = vst.msk [vmem:[#allocation2 + $0x70] sm:$0xf] %vm495_vm15, %v1166_v0  ;;  %v526_v20 = vpop.permute.xlu1 %525  ;;  %v506_v21 = vpop.permute.xlu0 %505  ;;  %vm661_vm15 = vcmask 896000  }
  0xb6   : > { %537 = vst.msk [vmem:[#allocation2 + $0x78] sm:$0xf] %vm536_vm0, %v526_v20  ;;  %v509_v22 = vsel %vm312_vm9, %v504_v17, %v506_v21  ;;  %v698_v24 = vld [vmem:[#allocation2 + $0x48] sm:$0xff]  ;;  %vm663_vm0 = vcmask 1044336  }
  0xb7   : > { %541 = vst.msk [vmem:[#allocation2 + $0x78] sm:$0xf] %vm540_vm2, %v1166_v0  ;;  %516 = vst [vmem:[#allocation2 + $0x68] sm:$0xf0] %v509_v22  ;;  %v1068_v25 = vpack.c.bf16 %v698_v24, %v695_v23  ;;  %vm686_vm2 = vcmask 1048428   ;;  %v870_v24 = vlaneseq }
  0xb9   : > { %v549_v27 = vpop.permute.xlu1 %548  ;;  %1069 = vmatpush1.bf16.msra.mxu0 %v1068_v25  ;;  %v528_v28 = vpop.permute.xlu0 %527  ;;  %v871_v25 = vshrl.u32 %v870_v24, 7 }
  0xba   : > { %560 = vst.msk [vmem:[#allocation2 + $0x78] sm:$0xf0] %vm559_vm4, %v549_v27  ;;  %v531_v29 = vsel %vm336_vm3, %v526_v20, %v528_v28  ;;  %v688_v20 = vld [vmem:[%s1410_s2] sm:$0xff] }
  0xbb   : > { %564 = vst.msk [vmem:[#allocation2 + $0x78] sm:$0xf0] %vm563_vm6, %v1166_v0  ;;  %538 = vst [vmem:[#allocation2 + $0x80] sm:$0xf] %v531_v29  ;;  %v872_v29 = vsub.s32 0, %v871_v25 }
  0xbd   : > { %v480_v30 = vpop.permute.xlu1 %479  ;;  %v551_v31 = vpop.permute.xlu0 %550 }
  0xbe   : > { %v486_v32 = vsel %vm485_vm11, %v480_v30, %v482_v8  ;;  %v554_v33 = vsel %vm359_vm8, %v549_v27, %v551_v31  ;;  %v702_v42 = vld [vmem:[#allocation2 + $0x68] sm:$0xff]  ;;  %v880_v27 = vsub.s32 2, %v871_v25 }
  0xbf   : > { %491 = vst [vmem:[#allocation2 + $0x60] sm:$0xf] %v486_v32  ;;  %561 = vst [vmem:[#allocation2 + $0x80] sm:$0xf0] %v554_v33 }
  0xc1   : > { %v530_v34 = vpop.permute.xlu1 %529  ;;  %v508_v35 = vpop.permute.xlu0 %507 }
  0xc2   : > { %v532_v36 = vsel %vm336_vm3, %v528_v28, %v530_v34  ;;  %v510_v37 = vsel %vm312_vm9, %v506_v21, %v508_v35  ;;  %v704_v38 = vld [vmem:[#allocation2 + $0x78] sm:$0xff]  ;;  %vm616_vm3 = vcmask 1035264   ;;  %vm618_vm9 = vcmask 1044472  }
  0xc3   : > { %539 = vst [vmem:[#allocation2 + $0x88] sm:$0xf] %v532_v36  ;;  %517 = vst [vmem:[#allocation2 + $0x70] sm:$0xf0] %v510_v37 }
  0xc5   : > { %v571_v39 = vpop.permute.xlu1 %570  ;;  %v553_v40 = vpop.permute.xlu0 %552 }
  0xc6   : > { %582 = vst.msk [vmem:[#allocation2 + $0x90] sm:$0xf] %vm581_vm7, %v571_v39  ;;  %v555_v41 = vsel %vm359_vm8, %v551_v31, %v553_v40  ;;  %v705_v43 = vld [vmem:[#allocation2 + $0x80] sm:$0xff]  ;;  %vm639_vm8 = vcmask 908292   ;;  %v876_v31 = vsub.s32 1, %v871_v25 }
  0xc7   : > { %v701_v44 = vld [vmem:[#allocation2 + $0x60] sm:$0xff]  ;;  %586 = vst.msk [vmem:[#allocation2 + $0x90] sm:$0xf] %vm585_vm12, %v1166_v0  ;;  %562 = vst [vmem:[#allocation2 + $0x88] sm:$0xf0] %v555_v41  ;;  %v1070_v45 = vpack.c.bf16 %v705_v43, %v702_v42 }
  0xc8   : > { %v1072_v46 = vpack.c.bf16 %v704_v38, %v701_v44 }
  0xc9   : > { %v606_v47 = vpop.permute.xlu1 %605  ;;  %1071 = vmatprep.subr.bf16.mxu0 %v1070_v45  ;;  %v573_v48 = vpop.permute.xlu0 %572 }
  0xca   : > { %v576_v49 = vsel %vm383_vm10, %v571_v39, %v573_v48  ;;  %1073 = vmatpush1.bf16.msra.mxu0 %v1072_v46  ;;  %v703_v53 = vld [vmem:[#allocation2 + $0x70] sm:$0xff] }
  0xcb   : > { %583 = vst [vmem:[#allocation2 + $0x98] sm:$0xf] %v576_v49 }
  0xcd   : > { %v629_v50 = vpop.permute.xlu1 %628  ;;  %v608_v51 = vpop.permute.xlu0 %607 }
  0xce   : > { %v610_v52 = vsel %vm415_vm14, %v606_v47, %v608_v51  ;;  %617 = vst.msk [vmem:[#allocation2 + $0xb8] sm:$0xf] %vm616_vm3, %v608_v51  ;;  %v706_v54 = vld [vmem:[#allocation2 + $0x88] sm:$0xff]  ;;  %v707_v6 = vld [vmem:[#allocation2 + $0x90] sm:$0xff] }
  0xcf   : > { %615 = vst [vmem:[#allocation2 + $0xb0] sm:$0xf] %v610_v52  ;;  %619 = vst.msk [vmem:[#allocation2 + $0xb8] sm:$0xf] %vm618_vm9, %v1166_v0  ;;  %v1085_v55 = vpack.c.bf16 %v706_v54, %v703_v53 }
  0xd1   : > { %v604_v56 = vpop.permute.xlu1 %603  ;;  %1086 = vmatpush3.bf16.msra.mxu1 %v1085_v55  ;;  %v631_v57 = vpop.permute.xlu0 %630 }
  0xd2   : > { %v609_v58 = vsel %vm415_vm14, %v604_v56, %v606_v47  ;;  %v633_v59 = vsel %vm438_vm1, %v629_v50, %v631_v57  ;;  %640 = vst.msk [vmem:[#allocation2 + $0xb8] sm:$0xf0] %vm639_vm8, %v631_v57  ;;  %1087 = vmatprep.subr.bf16.mxu1 %v1171_v10  ;;  %v708_v10 = vld [vmem:[#allocation2 + $0x98] sm:$0xff]  ;;  %vm684_vm14 = vcmask 891908  }
  0xd3   : > { %614 = vst [vmem:[#allocation2 + $0xa8] sm:$0xf] %v609_v58  ;;  %638 = vst [vmem:[#allocation2 + $0xb0] sm:$0xf0] %v633_v59 }
  0xd4   : > { %642 = vst.msk [vmem:[#allocation2 + $0xb8] sm:$0xf0] %vm641_vm13, %v1166_v0 }
  0xd5   : > { %v575_v60 = vpop.permute.xlu1 %574  ;;  %v627_v61 = vpop.permute.xlu0 %626 }
  0xd6   : > { %v577_v62 = vsel %vm383_vm10, %v573_v48, %v575_v60  ;;  %v632_v63 = vsel %vm438_vm1, %v627_v61, %v629_v50  ;;  %vm722_vm10 = vcmask 588800  }
  0xd7   : > { %584 = vst [vmem:[#allocation2 + $0xa0] sm:$0xf] %v577_v62  ;;  %637 = vst [vmem:[#allocation2 + $0xa8] sm:$0xf0] %v632_v63 }
  0xd9   : > { %v653_v1 = vpop.permute.xlu1 %652  ;;  %v651_v2 = vpop.permute.xlu0 %650 }
  0xda   : > { %662 = vst.msk [vmem:[#allocation2 + $0xd0] sm:$0xf] %vm661_vm15, %v653_v1  ;;  %v655_v3 = vsel %vm462_vm5, %v651_v2, %v653_v1  ;;  %v711_v4 = vld [vmem:[#allocation2 + $0xb0] sm:$0xff] }
  0xdb   : > { %664 = vst.msk [vmem:[#allocation2 + $0xd0] sm:$0xf] %vm663_vm0, %v1166_v0  ;;  %660 = vst [vmem:[#allocation2 + $0xc8] sm:$0xf] %v655_v3  ;;  %v1074_v5 = vpack.c.bf16 %v711_v4, %v708_v10  ;;  %v712_v7 = vld [vmem:[#allocation2 + $0xb8] sm:$0xff] }
  0xdd   : > { %v676_v8 = vpop.permute.xlu1 %675  ;;  %1075 = vmatprep.subr.bf16.mxu0 %v1074_v5  ;;  %v674_v9 = vpop.permute.xlu0 %673 }
  0xde   : > { %685 = vst.msk [vmem:[#allocation2 + $0xd0] sm:$0xf0] %vm684_vm14, %v676_v8  ;;  %v678_v11 = vsel %vm485_vm11, %v674_v9, %v676_v8  ;;  %v710_v12 = vld [vmem:[#allocation2 + $0xa8] sm:$0xff]  ;;  %v709_v13 = vld [vmem:[#allocation2 + $0xa0] sm:$0xff] }
  0xdf   : > { %687 = vst.msk [vmem:[#allocation2 + $0xd0] sm:$0xf0] %vm686_vm2, %v1166_v0  ;;  %683 = vst [vmem:[#allocation2 + $0xc8] sm:$0xf0] %v678_v11  ;;  %v1076_v14 = vpack.c.bf16 %v710_v12, %v707_v6  ;;  %v1088_v15 = vpack.c.bf16 %v712_v7, %v709_v13 }
  0xe1   : > { %v672_v16 = vpop.permute.xlu1 %671  ;;  %1077 = vmatpush1.bf16.msra.mxu0 %v1076_v14  ;;  %1089 = vmatpush3.bf16.msra.mxu1 %v1088_v15  ;;  %v649_v17 = vpop.permute.xlu0 %648 }
  0xe2   : > { %v677_v18 = vsel %vm485_vm11, %v672_v16, %v674_v9  ;;  %v654_v19 = vsel %vm462_vm5, %v649_v17, %v651_v2  ;;  %1057 = vmatprep.subr.mxu1 %v1166_v0  ;;  %v867_v0 = vld [vmem:[%s1412_s4] sm:$0x7] }
  0xe3   : > { %682 = vst [vmem:[#allocation2 + $0xc0] sm:$0xf0] %v677_v18  ;;  %659 = vst [vmem:[#allocation2 + $0xc0] sm:$0xf] %v654_v19  ;;  %vm868_vm1 = vcmp.gt.f32.partialorder %v867_v0, 0.5 }
  0xe4   : > { %v869_v28 = vsel %vm868_vm1, 1, %v1177_v26 }
  0xe5   : > { %v881_v30 = vrot.slane %v869_v28, %v880_v27  ;;  %v873_v33 = vrot.slane %v869_v28, %v872_v29  ;;  %v877_v35 = vrot.slane %v869_v28, %v876_v31 }
  0xe6   : > { %v714_v21 = vld [vmem:[#allocation2 + $0xc8] sm:$0xff]  ;;  %v715_v22 = vld [vmem:[#allocation2 + $0xd0] sm:$0xff] }
  0xe7   : > { %742 = vmatprep.subr.mxu0 %v714_v21  ;;  %1058 = vmatpush3.msra.mxu1 %v715_v22  ;;  %vm884_vm5 = vcmp.eq.s32.totalorder %v881_v30, 1  ;;  %vm882_vm11 = vcmp.eq.s32.totalorder %v873_v33, 1  ;;  %vm883_vm4 = vcmp.eq.s32.totalorder %v877_v35, 1 }
  0xe8   : > { %1060 = vmatmul.mubr.msk.f32.vlgmr.msra.gmra.mrb[0].mxu1 %vm722_vm10, %v688_v20 }
  0xea   : > { %v713_v23 = vld [vmem:[#allocation2 + $0xc0] sm:$0xff] }
  0xeb   : > { %743 = vmatpush1.msra.mxu0 %v713_v23 }
  0xec   : > { %1027 = vmatmul.mubr.msk.f32.vlgmr.msra.gmra.mrb[0].mxu0 %vm722_vm10, %v688_v20 }
  0xf2   : > { %v720_v32 = vpop.permute.xlu0 %719 }
 0x1bb   : > { %v863_v34 = vpop.f32.mrb[0].mxu1 }
 0x1bc   : > { %v864_v36 = vadd.f32 %v863_v34, %v720_v32  ;;  %v1061_v37 = vpop.f32.mrb[1].mxu1 }
 0x1be   : > { %v887_v38 = vsel %vm884_vm5, %v864_v36, 0.0 }
 0x1bf   : > { %v792_v39 = vpop.f32.mrb[0].mxu0  ;;  %890 = vst [vmem:[%s300_s25 + $0x10] sm:$0xff] %v887_v38 }
 0x1c0   : > { %v793_v26 = vadd.f32 %v792_v39, %v720_v32  ;;  %v794_v40 = vpop.f32.mrb[1].mxu0 }
 0x1c1   : > { %v795_v41 = vadd.f32 %v794_v40, %v720_v32 }
 0x1c2   : > { %v885_v42 = vsel %vm882_vm11, %v793_v26, 0.0 }
 0x1c3   : > { %888 = vst [vmem:[%s300_s25] sm:$0xff] %v885_v42  ;;  %v886_v43 = vsel %vm883_vm4, %v795_v41, 0.0 }
 0x1c4   : > { %889 = vst [vmem:[%s300_s25 + $0x8] sm:$0xff] %v886_v43 }
 0x1c5 PF: > { %s15_s20 = sadd.s32 1, %s1164_s20   ;;  %s1414_s18 = smov %s1160_s19 }
 0x1c6   : > { %p12_p5 = scmp.ge.s32.totalorder %s15_s20, 4   ;;  %s1415_s19 = smov %s1417_s21 }
 0x1c8   :  { %14 = sbr.rel (!%p12_p5) target bundleno = 2 (0x2), region = 79 }

// kernel: ncd_forward.13
= control target key start
LH: loop header
LB: loop body
LE: loop exit
PB: predicated region body
PF: predicated region fallthrough
CT: control target
= control target key end

     0   :  { %s1687_s15 = smov 0   ;;  %s1689_s16 = smov 0   ;;  %s2113_s0 = inlined_call_operand.vmem [shape: f32[2,8,1280], index: 0, kind: input, shape index: {}]   ;;  %s2114_s1 = inlined_call_operand.vmem [shape: f32[8,72], index: 1, kind: input, shape index: {}]   ;;  %s2115_s2 = inlined_call_operand.vmem [shape: f32[8,1], index: 2, kind: input, shape index: {}]   ;;  %s2116_s3 = inlined_call_operand.vmem [shape: f32[1,1280], index: 3, kind: input, shape index: {}]   ;;  %s2117_s4 = inlined_call_operand.vmem [shape: f32[2,8,1280], index: 4, kind: output, shape index: {}]  }
   0x1   :  { %s1691_s17 = smov 0  }
   0x2 LB: > { %s26_s18 = sadd.s32 1, %s1646_s16  ;;  %p1502_p0 = scmp.ge.s32.totalorder %s1650_s17, 1  ;;  %s1650_s17 = sphi %s1691_s17, %s14_s17   ;;  %s1646_s16 = sphi %s1689_s16, %s2119_s16   ;;  %s1642_s15 = sphi %s1687_s15, %s2118_s15  }
   0x3   : > { %p28_p1 = scmp.ge.s32.totalorder %s26_s18, 2  ;;  %p194_p2 = scmp.lt.s32.totalorder %s1650_s17, 3 }
   0x5   : > { %s2121_s18 = smov (%p28_p1, %s26_s18), 0  ;;  %p195_p3 = pnand %p1502_p0, %p194_p2 }
   0x6   : > { %p232_p4 = scmp.lt.s32.totalorder (!%p195_p3), %s1642_s15, 1  ;;  %v1652_v0 = vmov (!%p195_p3), 0.0   ;;  %s1653_s23 = smov (!%p195_p3), 34   ;;  %vm386_vm0 = vcmask (!%p195_p3), 1047824   ;;  %vm314_vm1 = vcmask (!%p195_p3), 1047832   ;;  %vm366_vm2 = vcmask (!%p195_p3), 277504  }
   0x7   : > { %198 = sbr.rel (%p195_p3) target bundleno = 521 (0x209), region = 36  ;;  %1015 = vmatprep.mubr.f32.mxu0 (!%p195_p3), %v1652_v0  ;;  %1086 = vmatprep.mubr.f32.mxu1 (!%p195_p3), %v1652_v0  ;;  %s1654_s24 = smov (!%p195_p3), 35   ;;  %vm294_vm3 = vcmask (!%p195_p3), 285696   ;;  %vm438_vm4 = vcmask (!%p195_p3), 269312   ;;  %vm458_vm5 = vcmask (!%p195_p3), 1047816   ;;  %vm510_vm6 = vcmask (!%p195_p3), 7168  }
   0x8   : > { %s1655_s25 = smov (!%p195_p3), 33   ;;  %s1656_s26 = smov (!%p195_p3), 1   ;;  %vm530_vm7 = vcmask (!%p195_p3), 1047560   ;;  %vm602_vm8 = vcmask (!%p195_p3), 1039360   ;;  %vm674_vm9 = vcmask (!%p195_p3), 777216   ;;  %vm746_vm10 = vcmask (!%p195_p3), 769024  }
   0x9   : > { %s1657_s27 = smov (!%p195_p3), 127   ;;  %s1658_s28 = smov (!%p195_p3), 95   ;;  %v1661_v60 = vmov (!%p195_p3), 0   ;;  %v941_v61 = vld [vmem:[%s2115_s2] sm:$0xff] (!%p195_p3)  ;;  %vm818_vm11 = vcmask (!%p195_p3), 760832   ;;  %vm947_vm12 = vcmask (!%p195_p3), 588800  }
   0xa   : > { %s1659_s29 = smov (!%p195_p3), 94   ;;  %s1660_s30 = smov (!%p195_p3), 93   ;;  %1627 = vset.pattern.permute.xlu0 (!%p195_p3), %v1661_v60  ;;  %vm632_vm13 = vcmask (!%p195_p3), 1048568   ;;  %vm704_vm14 = vcmask (!%p195_p3), 1048312   ;;  %vm776_vm15 = vcmask (!%p195_p3), 1048304  }
   0xe   : > { %s2123_s15 = smov (!%p232_p4, %s1642_s15), 1 }
   0xf   : > { %s1592_s19 = smul.u32 80, %s2123_s15 }
  0x11   : > { %s236_s22 = scalar_lea.vmem %s2113_s0, %s1592_s19  ;;  %s2092_s20 = scalar_lea.vmem %s2117_s4, %s1592_s19 }
  0x12   : > { %v1715_v1 = vld [vmem:[%s236_s22] sm:$0xff]  ;;  %v1717_v2 = vld [vmem:[%s236_s22 + $0x8] sm:$0xff]  ;;  %v1719_v3 = vld [vmem:[%s236_s22 + $0x10] sm:$0xff] }
  0x13   : > { %346 = vrot.lane.b32.xlu1 %v1715_v1, %s1653_s23  ;;  %274 = vrot.lane.b32.xlu0 %v1715_v1, %s1654_s24  ;;  %v1725_v4 = vld [vmem:[%s236_s22 + $0x20] sm:$0xff]  ;;  %v1727_v5 = vld [vmem:[%s236_s22 + $0x18] sm:$0xff] }
  0x14   : > { %v1729_v6 = vld [vmem:[%s236_s22 + $0x28] sm:$0xff]  ;;  %v1731_v7 = vld [vmem:[%s236_s22 + $0x30] sm:$0xff]  ;;  %v1733_v8 = vld [vmem:[%s236_s22 + $0x38] sm:$0xff] }
  0x15   : > { %v1735_v9 = vld [vmem:[%s236_s22 + $0x48] sm:$0xff]  ;;  %v1737_v10 = vld [vmem:[%s236_s22 + $0x40] sm:$0xff] }
  0x17   : > { %348 = vrot.lane.b32.xlu1 %v1717_v2, %s1653_s23  ;;  %276 = vrot.lane.b32.xlu0 %v1717_v2, %s1654_s24 }
  0x1b   : > { %420 = vrot.lane.b32.xlu1 %v1717_v2, %s1655_s25  ;;  %418 = vrot.lane.b32.xlu0 %v1715_v1, %s1655_s25 }
  0x1f   : > { %492 = vrot.lane.b32.xlu1 %v1717_v2, %s1656_s26  ;;  %490 = vrot.lane.b32.xlu0 %v1715_v1, %s1656_s26 }
  0x23   : > { %586 = vrot.lane.b32.xlu1 %v1719_v3, %s1657_s27  ;;  %584 = vrot.lane.b32.xlu0 %v1717_v2, %s1657_s27 }
  0x27   : > { %656 = vrot.lane.b32.xlu1 %v1717_v2, %s1658_s28  ;;  %582 = vrot.lane.b32.xlu0 %v1715_v1, %s1657_s27 }
  0x2b   : > { %728 = vrot.lane.b32.xlu1 %v1717_v2, %s1659_s29  ;;  %658 = vrot.lane.b32.xlu0 %v1719_v3, %s1658_s28 }
  0x2f   : > { %654 = vrot.lane.b32.xlu1 %v1715_v1, %s1658_s28  ;;  %730 = vrot.lane.b32.xlu0 %v1719_v3, %s1659_s29 }
  0x33   : > { %278 = vrot.lane.b32.xlu1 %v1719_v3, %s1654_s24  ;;  %726 = vrot.lane.b32.xlu0 %v1715_v1, %s1659_s29 }
  0x37   : > { %282 = vrot.lane.b32.xlu1 %v1725_v4, %s1654_s24  ;;  %280 = vrot.lane.b32.xlu0 %v1727_v5, %s1654_s24 }
  0x3b   : > { %350 = vrot.lane.b32.xlu1 %v1719_v3, %s1653_s23  ;;  %284 = vrot.lane.b32.xlu0 %v1729_v6, %s1654_s24 }
  0x3f   : > { %354 = vrot.lane.b32.xlu1 %v1725_v4, %s1653_s23  ;;  %352 = vrot.lane.b32.xlu0 %v1727_v5, %s1653_s23 }
  0x43   : > { %800 = vrot.lane.b32.xlu1 %v1717_v2, %s1660_s30  ;;  %356 = vrot.lane.b32.xlu0 %v1729_v6, %s1653_s23 }
  0x47   : > { %798 = vrot.lane.b32.xlu1 %v1715_v1, %s1660_s30  ;;  %802 = vrot.lane.b32.xlu0 %v1719_v3, %s1660_s30 }
  0x4b   : > { %424 = vrot.lane.b32.xlu1 %v1727_v5, %s1655_s25  ;;  %422 = vrot.lane.b32.xlu0 %v1719_v3, %s1655_s25 }
  0x4f   : > { %428 = vrot.lane.b32.xlu1 %v1729_v6, %s1655_s25  ;;  %426 = vrot.lane.b32.xlu0 %v1725_v4, %s1655_s25 }
  0x53   : > { %496 = vrot.lane.b32.xlu1 %v1727_v5, %s1656_s26  ;;  %494 = vrot.lane.b32.xlu0 %v1719_v3, %s1656_s26 }
  0x57   : > { %500 = vrot.lane.b32.xlu1 %v1729_v6, %s1656_s26  ;;  %498 = vrot.lane.b32.xlu0 %v1725_v4, %s1656_s26 }
  0x5b   : > { %590 = vrot.lane.b32.xlu1 %v1725_v4, %s1657_s27  ;;  %588 = vrot.lane.b32.xlu0 %v1727_v5, %s1657_s27 }
  0x5f   : > { %594 = vrot.lane.b32.xlu1 %v1731_v7, %s1657_s27  ;;  %592 = vrot.lane.b32.xlu0 %v1729_v6, %s1657_s27 }
  0x63   : > { %662 = vrot.lane.b32.xlu1 %v1725_v4, %s1658_s28  ;;  %660 = vrot.lane.b32.xlu0 %v1727_v5, %s1658_s28 }
  0x67   : > { %666 = vrot.lane.b32.xlu1 %v1731_v7, %s1658_s28  ;;  %664 = vrot.lane.b32.xlu0 %v1729_v6, %s1658_s28 }
  0x6b   : > { %734 = vrot.lane.b32.xlu1 %v1725_v4, %s1659_s29  ;;  %732 = vrot.lane.b32.xlu0 %v1727_v5, %s1659_s29 }
  0x6f   : > { %738 = vrot.lane.b32.xlu1 %v1731_v7, %s1659_s29  ;;  %736 = vrot.lane.b32.xlu0 %v1729_v6, %s1659_s29 }
  0x73   : > { %288 = vrot.lane.b32.xlu1 %v1733_v8, %s1654_s24  ;;  %286 = vrot.lane.b32.xlu0 %v1731_v7, %s1654_s24 }
  0x77   : > { %292 = vrot.lane.b32.xlu1 %v1735_v9, %s1654_s24  ;;  %290 = vrot.lane.b32.xlu0 %v1737_v10, %s1654_s24 }
  0x7b   : > { %360 = vrot.lane.b32.xlu1 %v1733_v8, %s1653_s23  ;;  %358 = vrot.lane.b32.xlu0 %v1731_v7, %s1653_s23 }
  0x7f   : > { %364 = vrot.lane.b32.xlu1 %v1735_v9, %s1653_s23  ;;  %362 = vrot.lane.b32.xlu0 %v1737_v10, %s1653_s23 }
  0x83   : > { %806 = vrot.lane.b32.xlu1 %v1725_v4, %s1660_s30  ;;  %804 = vrot.lane.b32.xlu0 %v1727_v5, %s1660_s30 }
  0x85   : > { %v347_v11 = vpop.permute.xlu1 %346  ;;  %v275_v12 = vpop.permute.xlu0 %274 }
  0x86   : > { %387 = vst.msk [vmem:[#allocation2 + $0x50] sm:$0xff] %vm386_vm0, %v347_v11  ;;  %vm848_vm0 = vcmask 1048296  }
  0x87   : > { %315 = vst.msk [vmem:[#allocation2] sm:$0xff] %vm314_vm1, %v275_v12  ;;  %810 = vrot.lane.b32.xlu1 %v1731_v7, %s1660_s30  ;;  %808 = vrot.lane.b32.xlu0 %v1729_v6, %s1660_s30 }
  0x88   : > { %397 = vst.msk [vmem:[#allocation2 + $0x50] sm:$0xff] %vm366_vm2, %v1652_v0 }
  0x89   : > { %325 = vst.msk [vmem:[#allocation2] sm:$0xff] %vm294_vm3, %v1652_v0  ;;  %v1859_v13 = vpop.permute.xlu1 %348  ;;  %v1861_v14 = vpop.permute.xlu0 %276 }
  0x8a   : > { %v367_v15 = vsel %vm366_vm2, %v347_v11, %v1859_v13  ;;  %v295_v16 = vsel %vm294_vm3, %v275_v12, %v1861_v14 }
  0x8b   : > { %432 = vrot.lane.b32.xlu1 %v1733_v8, %s1655_s25  ;;  %430 = vrot.lane.b32.xlu0 %v1731_v7, %s1655_s25  ;;  %v1512_v17 = vpack.c.bf16 %v367_v15, %v295_v16 }
  0x8d   : > { %v1871_v18 = vpop.permute.xlu1 %420  ;;  %v419_v19 = vpop.permute.xlu0 %418  ;;  %1513 = vmatprep.subr.bf16.mxu0 %v1512_v17 }
  0x8e   : > { %v439_v20 = vsel %vm438_vm4, %v419_v19, %v1871_v18  ;;  %459 = vst.msk [vmem:[#allocation2 + $0xa0] sm:$0xff] %vm458_vm5, %v419_v19 }
  0x8f   : > { %v861_v22 = vld [vmem:[#allocation2 + $0x50] sm:$0xff]  ;;  %469 = vst.msk [vmem:[#allocation2 + $0xa0] sm:$0xff] %vm438_vm4, %v1652_v0  ;;  %436 = vrot.lane.b32.xlu1 %v1735_v9, %s1655_s25  ;;  %434 = vrot.lane.b32.xlu0 %v1737_v10, %s1655_s25 }
  0x90   : > { %v851_v21 = vld [vmem:[#allocation2] sm:$0xff] }
  0x91   : > { %v1514_v23 = vpack.c.bf16 %v861_v22, %v851_v21  ;;  %v1881_v24 = vpop.permute.xlu1 %492  ;;  %v491_v25 = vpop.permute.xlu0 %490  ;;  %v1964_v21 = vld [vmem:[%s2114_s1] sm:$0xff] }
  0x92   : > { %v511_v26 = vsel %vm510_vm6, %v491_v25, %v1881_v24  ;;  %531 = vst.msk [vmem:[#allocation2 + $0xf0] sm:$0xff] %vm530_vm7, %v491_v25 }
  0x93   : > { %1515 = vmatpush1.bf16.msra.mxu0 %v1514_v23  ;;  %541 = vst.msk [vmem:[#allocation2 + $0xf0] sm:$0xff] %vm510_vm6, %v1652_v0  ;;  %504 = vrot.lane.b32.xlu1 %v1733_v8, %s1656_s26  ;;  %v1516_v27 = vpack.c.bf16 %v511_v26, %v439_v20 }
  0x94   : > { %502 = vrot.lane.b32.xlu0 %v1731_v7, %s1656_s26 }
  0x95   : > { %v1891_v28 = vpop.permute.xlu1 %586  ;;  %v585_v29 = vpop.permute.xlu0 %584  ;;  %1517 = vmatprep.subr.bf16.mxu0 %v1516_v27 }
  0x96   : > { %v604_v30 = vsel %vm602_vm8, %v585_v29, %v1891_v28  ;;  %v871_v31 = vld [vmem:[#allocation2 + $0xa0] sm:$0xff] }
  0x97   : > { %508 = vrot.lane.b32.xlu1 %v1735_v9, %s1656_s26  ;;  %v1520_v37 = vpack.c.bf16 %v604_v30, %v1717_v2 }
  0x98   : > { %506 = vrot.lane.b32.xlu0 %v1737_v10, %s1656_s26 }
  0x99   : > { %v657_v32 = vpop.permute.xlu1 %656  ;;  %v583_v33 = vpop.permute.xlu0 %582 }
  0x9a   : > { %v603_v34 = vsel %vm602_vm8, %v583_v33, %v585_v29  ;;  %v881_v35 = vld [vmem:[#allocation2 + $0xf0] sm:$0xff] }
  0x9b   : > { %598 = vrot.lane.b32.xlu1 %v1737_v10, %s1657_s27  ;;  %v1518_v36 = vpack.c.bf16 %v881_v35, %v871_v31  ;;  %v1522_v41 = vpack.c.bf16 %v603_v34, %v1715_v1 }
  0x9c   : > { %596 = vrot.lane.b32.xlu0 %v1733_v8, %s1657_s27 }
  0x9d   : > { %v729_v38 = vpop.permute.xlu1 %728  ;;  %v1905_v39 = vpop.permute.xlu0 %658  ;;  %1519 = vmatpush1.bf16.msra.mxu0 %v1518_v36 }
  0x9e   : > { %v676_v40 = vsel %vm674_vm9, %v657_v32, %v1905_v39  ;;  %1521 = vmatprep.subr.bf16.mxu0 %v1520_v37 }
  0x9f   : > { %668 = vrot.lane.b32.xlu1 %v1733_v8, %s1658_s28 }
  0xa0   : > { %600 = vrot.lane.b32.xlu0 %v1735_v9, %s1657_s27 }
  0xa1   : > { %v655_v42 = vpop.permute.xlu1 %654  ;;  %v1914_v43 = vpop.permute.xlu0 %730  ;;  %1523 = vmatpush1.bf16.msra.mxu0 %v1522_v41 }
  0xa2   : > { %v675_v44 = vsel %vm674_vm9, %v655_v42, %v657_v32  ;;  %v748_v45 = vsel %vm746_vm10, %v729_v38, %v1914_v43 }
  0xa3   : > { %672 = vrot.lane.b32.xlu1 %v1735_v9, %s1658_s28  ;;  %v1524_v46 = vpack.c.bf16 %v748_v45, %v676_v40 }
  0xa4   : > { %670 = vrot.lane.b32.xlu0 %v1737_v10, %s1658_s28 }
  0xa5   : > { %v279_v47 = vpop.permute.xlu1 %278  ;;  %v727_v48 = vpop.permute.xlu0 %726  ;;  %1525 = vmatprep.subr.bf16.mxu0 %v1524_v46 }
  0xa6   : > { %v296_v49 = vsel %vm294_vm3, %v1861_v14, %v279_v47  ;;  %v747_v50 = vsel %vm746_vm10, %v727_v48, %v729_v38 }
  0xa7   : > { %742 = vrot.lane.b32.xlu1 %v1737_v10, %s1659_s29  ;;  %v1526_v51 = vpack.c.bf16 %v747_v50, %v675_v44 }
  0xa8   : > { %740 = vrot.lane.b32.xlu0 %v1733_v8, %s1659_s29 }
  0xa9   : > { %v283_v52 = vpop.permute.xlu1 %282  ;;  %v281_v53 = vpop.permute.xlu0 %280  ;;  %1527 = vmatpush1.bf16.msra.mxu0 %v1526_v51 }
  0xaa   : > { %v297_v54 = vsel %vm294_vm3, %v279_v47, %v281_v53  ;;  %v298_v55 = vsel %vm294_vm3, %v281_v53, %v283_v52 }
  0xab   : > { %812 = vrot.lane.b32.xlu1 %v1733_v8, %s1660_s30 }
  0xac   : > { %744 = vrot.lane.b32.xlu0 %v1735_v9, %s1659_s29 }
  0xad   : > { %v351_v56 = vpop.permute.xlu1 %350  ;;  %v1936_v57 = vpop.permute.xlu0 %284 }
  0xae   : > { %v368_v58 = vsel %vm366_vm2, %v1859_v13, %v351_v56  ;;  %v299_v59 = vsel %vm294_vm3, %v283_v52, %v1936_v57 }
  0xaf   : > { %816 = vrot.lane.b32.xlu1 %v1735_v9, %s1660_s30  ;;  %v1530_v12 = vpack.c.bf16 %v368_v58, %v296_v49 }
  0xb0   : > { %814 = vrot.lane.b32.xlu0 %v1737_v10, %s1660_s30 }
  0xb1   : > { %v355_v62 = vpop.permute.xlu1 %354  ;;  %v353_v63 = vpop.permute.xlu0 %352 }
  0xb2   : > { %v369_v1 = vsel %vm366_vm2, %v351_v56, %v353_v63  ;;  %v370_v2 = vsel %vm366_vm2, %v353_v63, %v355_v62 }
  0xb3   : > { %v1528_v11 = vpack.c.bf16 %v369_v1, %v297_v54  ;;  %v1546_v23 = vpack.c.bf16 %v370_v2, %v298_v55 }
  0xb4   : > { %944 = vperm.xlu0 %1627, %v941_v61  }
  0xb5   : > { %v801_v13 = vpop.permute.xlu1 %800  ;;  %v1952_v14 = vpop.permute.xlu0 %356  ;;  %1529 = vmatprep.subr.bf16.mxu1 %v1528_v11 }
  0xb6   : > { %v371_v15 = vsel %vm366_vm2, %v355_v62, %v1952_v14  ;;  %1531 = vmatpush1.bf16.msra.mxu1 %v1530_v12 }
  0xb7   : > { %v1544_v22 = vpack.c.bf16 %v371_v15, %v299_v59 }
  0xb9   : > { %v799_v16 = vpop.permute.xlu1 %798  ;;  %v1956_v17 = vpop.permute.xlu0 %802 }
  0xba   : > { %v819_v19 = vsel %vm818_vm11, %v799_v16, %v801_v13  ;;  %v820_v20 = vsel %vm818_vm11, %v801_v13, %v1956_v17 }
  0xbb   : > { %967 = vmatprep.subr.mxu0 %v820_v20 }
  0xbc   : > { %968 = vmatpush1.msra.mxu0 %v819_v19 }
  0xbd   : > { %v425_v25 = vpop.permute.xlu1 %424  ;;  %v423_v26 = vpop.permute.xlu0 %422  ;;  %1545 = vmatprep.subr.bf16.mxu0 %v1544_v22  ;;  %1505 = vmatmul.mubr.msk.f32.vlgmr.msra.gmra.mrb[0].mxu0 %vm947_vm12, %v1964_v21 }
  0xbe   : > { %v440_v27 = vsel %vm438_vm4, %v1871_v18, %v423_v26  ;;  %v441_v29 = vsel %vm438_vm4, %v423_v26, %v425_v25  ;;  %1547 = vmatpush1.bf16.msra.mxu0 %v1546_v23  ;;  %1157 = vmatprep.mubr.f32.mxu0 %v1652_v0 }
  0xc1   : > { %v1972_v30 = vpop.permute.xlu1 %428  ;;  %v427_v31 = vpop.permute.xlu0 %426 }
  0xc2   : > { %v442_v32 = vsel %vm438_vm4, %v425_v25, %v427_v31  ;;  %v443_v33 = vsel %vm438_vm4, %v427_v31, %v1972_v30 }
  0xc5   : > { %v497_v34 = vpop.permute.xlu1 %496  ;;  %v495_v35 = vpop.permute.xlu0 %494 }
  0xc6   : > { %v512_v36 = vsel %vm510_vm6, %v1881_v24, %v495_v35  ;;  %v513_v18 = vsel %vm510_vm6, %v495_v35, %v497_v34 }
  0xc7   : > { %v1532_v37 = vpack.c.bf16 %v513_v18, %v441_v29  ;;  %v1534_v38 = vpack.c.bf16 %v512_v36, %v440_v27 }
  0xc9   : > { %v1980_v40 = vpop.permute.xlu1 %500  ;;  %v499_v41 = vpop.permute.xlu0 %498  ;;  %1533 = vmatprep.subr.bf16.mxu1 %v1532_v37 }
  0xca   : > { %v514_v42 = vsel %vm510_vm6, %v497_v34, %v499_v41  ;;  %v515_v44 = vsel %vm510_vm6, %v499_v41, %v1980_v40  ;;  %1535 = vmatpush1.bf16.msra.mxu1 %v1534_v38 }
  0xcb   : > { %v1548_v45 = vpack.c.bf16 %v515_v44, %v443_v33  ;;  %v1550_v46 = vpack.c.bf16 %v514_v42, %v442_v32 }
  0xcd   : > { %v591_v47 = vpop.permute.xlu1 %590  ;;  %v589_v48 = vpop.permute.xlu0 %588  ;;  %1549 = vmatprep.subr.bf16.mxu0 %v1548_v45 }
  0xce   : > { %v605_v24 = vsel %vm602_vm8, %v1891_v28, %v589_v48  ;;  %v606_v49 = vsel %vm602_vm8, %v589_v48, %v591_v47  ;;  %1551 = vmatpush1.bf16.msra.mxu0 %v1550_v46 }
  0xcf   : > { %v1536_v50 = vpack.c.bf16 %v606_v49, %v1727_v5  ;;  %v1538_v51 = vpack.c.bf16 %v605_v24, %v1719_v3 }
  0xd1   : > { %v1990_v52 = vpop.permute.xlu1 %594  ;;  %v593_v53 = vpop.permute.xlu0 %592  ;;  %1537 = vmatprep.subr.bf16.mxu1 %v1536_v50 }
  0xd2   : > { %v607_v54 = vsel %vm602_vm8, %v591_v47, %v593_v53  ;;  %v608_v55 = vsel %vm602_vm8, %v593_v53, %v1990_v52  ;;  %1539 = vmatpush1.bf16.msra.mxu1 %v1538_v51 }
  0xd3   : > { %v1552_v56 = vpack.c.bf16 %v608_v55, %v1729_v6  ;;  %v1554_v28 = vpack.c.bf16 %v607_v54, %v1725_v4 }
  0xd5   : > { %v663_v58 = vpop.permute.xlu1 %662  ;;  %v661_v59 = vpop.permute.xlu0 %660  ;;  %1553 = vmatprep.subr.bf16.mxu0 %v1552_v56 }
  0xd6   : > { %v677_v3 = vsel %vm674_vm9, %v1905_v39, %v661_v59  ;;  %v678_v5 = vsel %vm674_vm9, %v661_v59, %v663_v58  ;;  %1555 = vmatpush1.bf16.msra.mxu0 %v1554_v28 }
  0xd9   : > { %v2000_v61 = vpop.permute.xlu1 %666  ;;  %v665_v62 = vpop.permute.xlu0 %664 }
  0xda   : > { %v679_v63 = vsel %vm674_vm9, %v663_v58, %v665_v62  ;;  %v680_v1 = vsel %vm674_vm9, %v665_v62, %v2000_v61 }
  0xdd   : > { %v735_v6 = vpop.permute.xlu1 %734  ;;  %v733_v2 = vpop.permute.xlu0 %732 }
  0xde   : > { %v749_v4 = vsel %vm746_vm10, %v1914_v43, %v733_v2  ;;  %v750_v11 = vsel %vm746_vm10, %v733_v2, %v735_v6 }
  0xdf   : > { %v1540_v12 = vpack.c.bf16 %v750_v11, %v678_v5  ;;  %v1542_v39 = vpack.c.bf16 %v749_v4, %v677_v3 }
  0xe1   : > { %v2008_v13 = vpop.permute.xlu1 %738  ;;  %v737_v15 = vpop.permute.xlu0 %736  ;;  %1541 = vmatprep.subr.bf16.mxu1 %v1540_v12 }
  0xe2   : > { %v751_v16 = vsel %vm746_vm10, %v735_v6, %v737_v15  ;;  %v752_v19 = vsel %vm746_vm10, %v737_v15, %v2008_v13  ;;  %1543 = vmatpush1.bf16.msra.mxu1 %v1542_v39 }
  0xe3   : > { %v1556_v20 = vpack.c.bf16 %v752_v19, %v680_v1  ;;  %v1558_v22 = vpack.c.bf16 %v751_v16, %v679_v63 }
  0xe5   : > { %v289_v23 = vpop.permute.xlu1 %288  ;;  %v287_v25 = vpop.permute.xlu0 %286  ;;  %1557 = vmatprep.subr.bf16.mxu0 %v1556_v20 }
  0xe6   : > { %v300_v43 = vsel %vm294_vm3, %v1936_v57, %v287_v25  ;;  %v301_v26 = vsel %vm294_vm3, %v287_v25, %v289_v23  ;;  %1559 = vmatpush1.bf16.msra.mxu0 %v1558_v22 }
  0xe9   : > { %v293_v27 = vpop.permute.xlu1 %292  ;;  %v291_v29 = vpop.permute.xlu0 %290 }
  0xea   : > { %v302_v31 = vsel %vm294_vm3, %v289_v23, %v291_v29  ;;  %v303_v32 = vsel %vm294_vm3, %v291_v29, %v293_v27 }
  0xed   : > { %v361_v33 = vpop.permute.xlu1 %360  ;;  %v359_v34 = vpop.permute.xlu0 %358 }
  0xee   : > { %v372_v35 = vsel %vm366_vm2, %v1952_v14, %v359_v34  ;;  %v373_v36 = vsel %vm366_vm2, %v359_v34, %v361_v33 }
  0xef   : > { %v1560_v46 = vpack.c.bf16 %v373_v36, %v301_v26  ;;  %v1562_v47 = vpack.c.bf16 %v372_v35, %v300_v43 }
  0xf1   : > { %v365_v18 = vpop.permute.xlu1 %364  ;;  %v363_v37 = vpop.permute.xlu0 %362 }
  0xf2   : > { %v374_v57 = vsel %vm366_vm2, %v361_v33, %v363_v37  ;;  %v375_v38 = vsel %vm366_vm2, %v363_v37, %v365_v18 }
  0xf3   : > { %v1578_v50 = vpack.c.bf16 %v374_v57, %v302_v31 }
  0xf5   : > { %v807_v41 = vpop.permute.xlu1 %806  ;;  %v805_v42 = vpop.permute.xlu0 %804 }
  0xf6   : > { %v821_v44 = vsel %vm818_vm11, %v1956_v17, %v805_v42  ;;  %v822_v45 = vsel %vm818_vm11, %v805_v42, %v807_v41  ;;  %v1576_v17 = vpack.c.bf16 %v375_v38, %v303_v32 }
  0xf7   : > { %1038 = vmatprep.subr.mxu1 %v822_v45 }
  0xf8   : > { %1039 = vmatpush1.msra.mxu1 %v821_v44 }
  0xf9   : > { %v2026_v14 = vpop.permute.xlu1 %810  ;;  %v809_v48 = vpop.permute.xlu0 %808  ;;  %1561 = vmatprep.subr.bf16.mxu1 %v1560_v46  ;;  %1506 = vmatmul.mubr.msk.f32.vlgmr.msra.gmra.mrb[0].mxu1 %vm947_vm12, %v1964_v21 }
  0xfa   : > { %v823_v24 = vsel %vm818_vm11, %v807_v41, %v809_v48  ;;  %v824_v49 = vsel %vm818_vm11, %v809_v48, %v2026_v14  ;;  %1563 = vmatpush1.bf16.msra.mxu1 %v1562_v47  ;;  %1228 = vmatprep.mubr.f32.mxu1 %v1652_v0  ;;  %v1312_v48 = vlaneseq }
  0xfb   : > { %1109 = vmatprep.subr.mxu0 %v824_v49 }
  0xfc   : > { %1110 = vmatpush1.msra.mxu0 %v823_v24  ;;  %v1313_v24 = vshrl.u32 %v1312_v48, 7 }
  0xfd   : > { %v433_v51 = vpop.permute.xlu1 %432  ;;  %v431_v53 = vpop.permute.xlu0 %430  ;;  %1577 = vmatprep.subr.bf16.mxu0 %v1576_v17  ;;  %1507 = vmatmul.mubr.msk.f32.vlgmr.msra.gmra.mrb[2].mxu0 %vm947_vm12, %v1964_v21 }
  0xfe   : > { %v444_v54 = vsel %vm438_vm4, %v1972_v30, %v431_v53  ;;  %v445_v55 = vsel %vm438_vm4, %v431_v53, %v433_v51  ;;  %1579 = vmatpush1.bf16.msra.mxu0 %v1578_v50  ;;  %1299 = vmatprep.mubr.f32.mxu0 %v1652_v0  ;;  %v1330_v49 = vsub.s32 4, %v1313_v24 }
 0x101   : > { %v437_v56 = vpop.permute.xlu1 %436  ;;  %v435_v28 = vpop.permute.xlu0 %434 }
 0x102   : > { %v446_v58 = vsel %vm438_vm4, %v433_v51, %v435_v28  ;;  %v447_v59 = vsel %vm438_vm4, %v435_v28, %v437_v56  ;;  %v1334_v51 = vsub.s32 5, %v1313_v24  ;;  %v1342_v56 = vsub.s32 7, %v1313_v24 }
 0x105   : > { %v505_v3 = vpop.permute.xlu1 %504 }
 0x106   : > { %v503_v5 = vpop.permute.xlu0 %502 }
 0x107   : > { %v516_v62 = vsel %vm510_vm6, %v1980_v40, %v503_v5  ;;  %v517_v63 = vsel %vm510_vm6, %v503_v5, %v505_v3 }
 0x108   : > { %v1564_v1 = vpack.c.bf16 %v517_v63, %v445_v55  ;;  %v1566_v30 = vpack.c.bf16 %v516_v62, %v444_v54  ;;  %v1307_v54 = vld [vmem:[%s2116_s3 + $0x8] sm:$0x3]  ;;  %v1338_v55 = vsub.s32 6, %v1313_v24 }
 0x109   : > { %v509_v6 = vpop.permute.xlu1 %508  ;;  %vm1309_vm2 = vcmp.gt.f32.partialorder %v1307_v54, 0.5 }
 0x10a   : > { %v507_v2 = vpop.permute.xlu0 %506  ;;  %1565 = vmatprep.subr.bf16.mxu1 %v1564_v1 }
 0x10b   : > { %v518_v4 = vsel %vm510_vm6, %v505_v3, %v507_v2  ;;  %v519_v11 = vsel %vm510_vm6, %v507_v2, %v509_v6  ;;  %1567 = vmatpush1.bf16.msra.mxu1 %v1566_v30  ;;  %v1318_v3 = vsub.s32 1, %v1313_v24 }
 0x10c   : > { %v1580_v12 = vpack.c.bf16 %v519_v11, %v447_v59  ;;  %v1582_v39 = vpack.c.bf16 %v518_v4, %v446_v58  ;;  %v1311_v58 = vsel %vm1309_vm2, 1, %v1661_v60  ;;  %v1314_v59 = vsub.s32 0, %v1313_v24 }
 0x10d   : > { %v599_v15 = vpop.permute.xlu1 %598  ;;  %v1351_v62 = vrot.slane %v1311_v58, %v1318_v3 }
 0x10e   : > { %v597_v16 = vpop.permute.xlu0 %596  ;;  %1581 = vmatprep.subr.bf16.mxu0 %v1580_v12  ;;  %v1347_v5 = vrot.slane %v1311_v58, %v1314_v59 }
 0x10f   : > { %v609_v40 = vsel %vm602_vm8, %v1990_v52, %v597_v16  ;;  %v610_v19 = vsel %vm602_vm8, %v597_v16, %v599_v15  ;;  %1583 = vmatpush1.bf16.msra.mxu0 %v1582_v39  ;;  %v1322_v39 = vsub.s32 2, %v1313_v24 }
 0x110   : > { %v1568_v20 = vpack.c.bf16 %v610_v19, %v1733_v8  ;;  %v1570_v22 = vpack.c.bf16 %v609_v40, %v1731_v7 }
 0x111   : > { %v669_v23 = vpop.permute.xlu1 %668 }
 0x112   : > { %v601_v25 = vpop.permute.xlu0 %600  ;;  %1569 = vmatprep.subr.bf16.mxu1 %v1568_v20  ;;  %v681_v43 = vsel %vm674_vm9, %v2000_v61, %v669_v23 }
 0x113   : > { %v611_v26 = vsel %vm602_vm8, %v599_v15, %v601_v25  ;;  %631 = vst.msk [vmem:[#allocation2 + $0x1d8] sm:$0xff] %vm602_vm8, %v601_v25  ;;  %1571 = vmatpush1.bf16.msra.mxu1 %v1570_v22  ;;  %v1326_v15 = vsub.s32 3, %v1313_v24 }
 0x114   : > { %633 = vst.msk [vmem:[#allocation2 + $0x1d8] sm:$0xff] %vm632_vm13, %v1652_v0  ;;  %v1586_v18 = vpack.c.bf16 %v611_v26, %v1737_v10 }
 0x115   : > { %v673_v52 = vpop.permute.xlu1 %672 }
 0x116   : > { %v671_v27 = vpop.permute.xlu0 %670  ;;  %703 = vst.msk [vmem:[#allocation2 + $0x228] sm:$0xff] %vm674_vm9, %v673_v52 }
 0x117   : > { %v682_v7 = vsel %vm674_vm9, %v669_v23, %v671_v27  ;;  %v683_v8 = vsel %vm674_vm9, %v671_v27, %v673_v52  ;;  %705 = vst.msk [vmem:[#allocation2 + $0x228] sm:$0xff] %vm704_vm14, %v1652_v0 }
 0x119   : > { %v743_v29 = vpop.permute.xlu1 %742 }
 0x11a   : > { %v741_v61 = vpop.permute.xlu0 %740 }
 0x11b   : > { %v753_v31 = vsel %vm746_vm10, %v2008_v13, %v741_v61  ;;  %v754_v32 = vsel %vm746_vm10, %v741_v61, %v743_v29  ;;  %v910_v33 = vld [vmem:[#allocation2 + $0x1d8] sm:$0xff] }
 0x11c   : > { %v1584_v34 = vpack.c.bf16 %v910_v33, %v1735_v9  ;;  %v1572_v35 = vpack.c.bf16 %v754_v32, %v682_v7  ;;  %v1574_v36 = vpack.c.bf16 %v753_v31, %v681_v43 }
 0x11d   : > { %v813_v37 = vpop.permute.xlu1 %812 }
 0x11e   : > { %1585 = vmatprep.subr.bf16.mxu0 %v1584_v34  ;;  %v745_v57 = vpop.permute.xlu0 %744  ;;  %1573 = vmatprep.subr.bf16.mxu1 %v1572_v35  ;;  %v825_v38 = vsel %vm818_vm11, %v2026_v14, %v813_v37  ;;  %v920_v44 = vld [vmem:[#allocation2 + $0x228] sm:$0xff] }
 0x11f   : > { %v755_v41 = vsel %vm746_vm10, %v743_v29, %v745_v57  ;;  %775 = vst.msk [vmem:[#allocation2 + $0x278] sm:$0xff] %vm746_vm10, %v745_v57  ;;  %1587 = vmatpush1.bf16.msra.mxu0 %v1586_v18  ;;  %1575 = vmatpush1.bf16.msra.mxu1 %v1574_v36 }
 0x120   : > { %777 = vst.msk [vmem:[#allocation2 + $0x278] sm:$0xff] %vm776_vm15, %v1652_v0  ;;  %v1590_v47 = vpack.c.bf16 %v755_v41, %v683_v8 }
 0x121   : > { %v817_v13 = vpop.permute.xlu1 %816 }
 0x122   : > { %v815_v9 = vpop.permute.xlu0 %814  ;;  %847 = vst.msk [vmem:[#allocation2 + $0x2c8] sm:$0xff] %vm818_vm11, %v817_v13 }
 0x123   : > { %v826_v10 = vsel %vm818_vm11, %v813_v37, %v815_v9  ;;  %v827_v42 = vsel %vm818_vm11, %v815_v9, %v817_v13  ;;  %849 = vst.msk [vmem:[#allocation2 + $0x2c8] sm:$0xff] %vm848_vm0, %v1652_v0  ;;  %v1306_v0 = vld [vmem:[%s2116_s3] sm:$0xff]  ;;  %vm1360_vm11 = vcmp.eq.s32.totalorder %v1347_v5, 1 }
 0x124   : > { %1180 = vmatprep.subr.mxu1 %v826_v10  ;;  %vm1308_vm1 = vcmp.gt.f32.partialorder %v1306_v0, 0.5 }
 0x125   : > { %1181 = vmatpush1.msra.mxu1 %v825_v38  ;;  %v1310_v17 = vsel %vm1308_vm1, 1, %v1661_v60 }
 0x126   : > { %1508 = vmatmul.mubr.msk.f32.vlgmr.msra.gmra.mrb[2].mxu1 %vm947_vm12, %v1964_v21  ;;  %v1331_v50 = vrot.slane %v1310_v17, %v1330_v49  ;;  %v1335_v53 = vrot.slane %v1310_v17, %v1334_v51  ;;  %v1343_v28 = vrot.slane %v1310_v17, %v1342_v56  ;;  %v1315_v63 = vrot.slane %v1310_v17, %v1314_v59 }
 0x127   : > { %v930_v45 = vld [vmem:[#allocation2 + $0x278] sm:$0xff]  ;;  %v1319_v1 = vrot.slane %v1310_v17, %v1318_v3  ;;  %v1323_v16 = vrot.slane %v1310_v17, %v1322_v39  ;;  %v1327_v40 = vrot.slane %v1310_v17, %v1326_v15 }
 0x128   : > { %v1588_v46 = vpack.c.bf16 %v930_v45, %v920_v44  ;;  %vm1352_vm3 = vcmp.eq.s32.totalorder %v1315_v63, 1  ;;  %vm1356_vm7 = vcmp.eq.s32.totalorder %v1331_v50, 1  ;;  %vm1357_vm8 = vcmp.eq.s32.totalorder %v1335_v53, 1 }
 0x129   : > { %vm1353_vm4 = vcmp.eq.s32.totalorder %v1319_v1, 1  ;;  %vm1354_vm5 = vcmp.eq.s32.totalorder %v1323_v16, 1  ;;  %vm1355_vm6 = vcmp.eq.s32.totalorder %v1327_v40, 1  ;;  %vm1359_vm10 = vcmp.eq.s32.totalorder %v1343_v28, 1 }
 0x12a   : > { %1589 = vmatprep.subr.bf16.mxu0 %v1588_v46  ;;  %v940_v14 = vld [vmem:[#allocation2 + $0x2c8] sm:$0xff] }
 0x12b   : > { %1591 = vmatpush1.bf16.msra.mxu0 %v1590_v47 }
 0x12c   : > { %1251 = vmatprep.subr.mxu0 %v940_v14 }
 0x12f   : > { %1252 = vmatpush1.msra.mxu0 %v827_v42 }
 0x130   : > { %1509 = vmatmul.mubr.msk.f32.vlgmr.msra.gmra.mrb[4].mxu0 %vm947_vm12, %v1964_v21  ;;  %v1339_v21 = vrot.slane %v1310_v17, %v1338_v55  ;;  %vm1361_vm12 = vcmp.eq.s32.totalorder %v1351_v62, 1 }
 0x132   : > { %vm1358_vm9 = vcmp.eq.s32.totalorder %v1339_v21, 1 }
 0x133   : > { %v945_v30 = vpop.permute.xlu0 %944 }
 0x190   : > { %v1017_v6 = vpop.f32.mrb[0].mxu0 }
 0x191   : > { %v1019_v2 = vpop.f32.mrb[1].mxu0  ;;  %v1018_v4 = vadd.f32 %v1017_v6, %v945_v30 }
 0x192   : > { %v1020_v60 = vadd.f32 %v1019_v2, %v945_v30 }
 0x193   : > { %v1362_v11 = vsel %vm1352_vm3, %v1018_v4, 0.0 }
 0x194   : > { %1372 = vst [vmem:[%s2092_s20] sm:$0xff] %v1362_v11  ;;  %v1363_v12 = vsel %vm1353_vm4, %v1020_v60, 0.0 }
 0x195   : > { %1373 = vst [vmem:[%s2092_s20 + $0x8] sm:$0xff] %v1363_v12 }
 0x1cc   : > { %v1088_v19 = vpop.f32.mrb[0].mxu1 }
 0x1cd   : > { %v1089_v20 = vadd.f32 %v1088_v19, %v945_v30  ;;  %v1090_v22 = vpop.f32.mrb[1].mxu1 }
 0x1ce   : > { %v1091_v23 = vadd.f32 %v1090_v22, %v945_v30 }
 0x1cf   : > { %v1364_v25 = vsel %vm1354_vm5, %v1089_v20, 0.0 }
 0x1d0   : > { %1374 = vst [vmem:[%s2092_s20 + $0x10] sm:$0xff] %v1364_v25  ;;  %v1159_v43 = vpop.f32.mrb[2].mxu0  ;;  %v1365_v26 = vsel %vm1355_vm6, %v1091_v23, 0.0 }
 0x1d1   : > { %v1160_v52 = vadd.f32 %v1159_v43, %v945_v30  ;;  %1375 = vst [vmem:[%s2092_s20 + $0x18] sm:$0xff] %v1365_v26  ;;  %v1161_v27 = vpop.f32.mrb[3].mxu0 }
 0x1d2   : > { %v1162_v7 = vadd.f32 %v1161_v27, %v945_v30 }
 0x1d3   : > { %v1366_v8 = vsel %vm1356_vm7, %v1160_v52, 0.0 }
 0x1d4   : > { %1376 = vst [vmem:[%s2092_s20 + $0x20] sm:$0xff] %v1366_v8  ;;  %v1367_v29 = vsel %vm1357_vm8, %v1162_v7, 0.0 }
 0x1d5   : > { %1377 = vst [vmem:[%s2092_s20 + $0x28] sm:$0xff] %v1367_v29 }
 0x1f9   : > { %v1230_v61 = vpop.f32.mrb[2].mxu1 }
 0x1fa   : > { %v1231_v31 = vadd.f32 %v1230_v61, %v945_v30  ;;  %v1232_v32 = vpop.f32.mrb[3].mxu1 }
 0x1fb   : > { %v1233_v33 = vadd.f32 %v1232_v32, %v945_v30 }
 0x1fc   : > { %v1368_v34 = vsel %vm1358_vm9, %v1231_v31, 0.0 }
 0x1fd   : > { %1378 = vst [vmem:[%s2092_s20 + $0x30] sm:$0xff] %v1368_v34  ;;  %v1369_v35 = vsel %vm1359_vm10, %v1233_v33, 0.0 }
 0x1fe   : > { %1379 = vst [vmem:[%s2092_s20 + $0x38] sm:$0xff] %v1369_v35 }
 0x203   : > { %v1301_v36 = vpop.f32.mrb[4].mxu0 }
 0x204   : > { %v1302_v18 = vadd.f32 %v1301_v36, %v945_v30  ;;  %v1303_v37 = vpop.f32.mrb[5].mxu0 }
 0x205   : > { %v1304_v57 = vadd.f32 %v1303_v37, %v945_v30 }
 0x206   : > { %v1370_v38 = vsel %vm1360_vm11, %v1302_v18, 0.0 }
 0x207   : > { %1380 = vst [vmem:[%s2092_s20 + $0x40] sm:$0xff] %v1370_v38  ;;  %v1371_v41 = vsel %vm1361_vm12, %v1304_v57, 0.0 }
 0x208   : > { %1381 = vst [vmem:[%s2092_s20 + $0x48] sm:$0xff] %v1371_v41 }
 0x209 PF: > { %s14_s17 = sadd.s32 1, %s1650_s17   ;;  %s2118_s15 = smov %s1646_s16 }
 0x20a   : > { %p11_p5 = scmp.ge.s32.totalorder %s14_s17, 4   ;;  %s2119_s16 = smov %s2121_s18 }
 0x20c   :  { %13 = sbr.rel (!%p11_p5) target bundleno = 2 (0x2), region = 72 }

// kernel: ncd_forward.9
= control target key start
LH: loop header
LB: loop body
LE: loop exit
PB: predicated region body
PF: predicated region fallthrough
CT: control target
= control target key end

     0   :  { %s1651_s15 = smov 0   ;;  %s1653_s16 = smov 0   ;;  %s2070_s0 = inlined_call_operand.vmem [shape: f32[2,4,1280], index: 0, kind: input, shape index: {}]   ;;  %s2071_s1 = inlined_call_operand.vmem [shape: f32[4,36], index: 1, kind: input, shape index: {}]   ;;  %s2072_s2 = inlined_call_operand.vmem [shape: f32[4,1], index: 2, kind: input, shape index: {}]   ;;  %s2073_s3 = inlined_call_operand.vmem [shape: f32[1,1280], index: 3, kind: input, shape index: {}]   ;;  %s2074_s4 = inlined_call_operand.vmem [shape: f32[2,4,1280], index: 4, kind: output, shape index: {}]  }
   0x1   :  { %s1655_s17 = smov 0  }
   0x2 LB: > { %s26_s18 = sadd.s32 1, %s1610_s16  ;;  %p1486_p0 = scmp.ge.s32.totalorder %s1614_s17, 1  ;;  %s1614_s17 = sphi %s1655_s17, %s14_s17   ;;  %s1610_s16 = sphi %s1653_s16, %s2076_s16   ;;  %s1606_s15 = sphi %s1651_s15, %s2075_s15  }
   0x3   : > { %p28_p1 = scmp.ge.s32.totalorder %s26_s18, 2  ;;  %p194_p2 = scmp.lt.s32.totalorder %s1614_s17, 3 }
   0x5   : > { %s2078_s18 = smov (%p28_p1, %s26_s18), 0  ;;  %p195_p3 = pnand %p1486_p0, %p194_p2 }
   0x6   : > { %p232_p4 = scmp.lt.s32.totalorder (!%p195_p3), %s1606_s15, 1  ;;  %v1616_v0 = vmov (!%p195_p3), 0.0   ;;  %s1617_s23 = smov (!%p195_p3), 34   ;;  %vm309_vm0 = vcmask (!%p195_p3), 1043736   ;;  %vm320_vm1 = vcmask (!%p195_p3), 281600   ;;  %vm357_vm2 = vcmask (!%p195_p3), 277504  }
   0x7   : > { %198 = sbr.rel (%p195_p3) target bundleno = 523 (0x20b), region = 36  ;;  %984 = vmatprep.mubr.f32.mxu0 (!%p195_p3), %v1616_v0  ;;  %1055 = vmatprep.mubr.f32.mxu1 (!%p195_p3), %v1616_v0  ;;  %s1618_s24 = smov (!%p195_p3), 35   ;;  %vm377_vm3 = vcmask (!%p195_p3), 1047828   ;;  %vm445_vm4 = vcmask (!%p195_p3), 1043720   ;;  %vm388_vm5 = vcmask (!%p195_p3), 277508   ;;  %vm456_vm6 = vcmask (!%p195_p3), 265216  }
   0x8   : > { %s1619_s25 = smov (!%p195_p3), 33   ;;  %s1620_s26 = smov (!%p195_p3), 1   ;;  %vm425_vm7 = vcmask (!%p195_p3), 269312   ;;  %vm289_vm8 = vcmask (!%p195_p3), 285696   ;;  %vm493_vm9 = vcmask (!%p195_p3), 7168   ;;  %vm513_vm10 = vcmask (!%p195_p3), 1047564  }
   0x9   : > { %s1621_s27 = smov (!%p195_p3), 127   ;;  %s1622_s28 = smov (!%p195_p3), 95   ;;  %vm524_vm11 = vcmask (!%p195_p3), 7172   ;;  %vm591_vm12 = vcmask (!%p195_p3), 1039360   ;;  %vm659_vm13 = vcmask (!%p195_p3), 777216   ;;  %vm727_vm14 = vcmask (!%p195_p3), 769024  }
   0xa   : > { %s1623_s29 = smov (!%p195_p3), 94   ;;  %s1624_s30 = smov (!%p195_p3), 93   ;;  %vm795_vm15 = vcmask (!%p195_p3), 760832  }
   0xe   : > { %s2080_s15 = smov (!%p232_p4, %s1606_s15), 1 }
   0xf   : > { %s1546_s19 = smul.u32 40, %s2080_s15 }
  0x11   : > { %s236_s22 = scalar_lea.vmem %s2070_s0, %s1546_s19  ;;  %s2054_s20 = scalar_lea.vmem %s2074_s4, %s1546_s19 }
  0x12   : > { %v1679_v1 = vld [vmem:[%s236_s22] sm:$0xff]  ;;  %v1681_v2 = vld [vmem:[%s236_s22 + $0x8] sm:$0xff]  ;;  %v1683_v3 = vld [vmem:[%s236_s22 + $0x10] sm:$0xff] }
  0x13   : > { %339 = vrot.lane.b32.xlu1 %v1679_v1, %s1617_s23  ;;  %v332_v4 = vcombine.low %v1679_v1, %v1679_v1  ;;  %269 = vrot.lane.b32.xlu0 %v1679_v1, %s1618_s24  ;;  %v264_v5 = vcombine.high %v1679_v1, %v1679_v1  ;;  %v1693_v6 = vld [vmem:[%s236_s22 + $0x18] sm:$0xff]  ;;  %v1695_v7 = vld [vmem:[%s236_s22 + $0x20] sm:$0xff]  ;;  %546 = vst [vmem:[#allocation2 + $0xa0] sm:$0xf] %v1679_v1  ;;  %548 = vst [vmem:[#allocation2 + $0xb0] sm:$0xf] %v1681_v2 }
  0x14   : > { %550 = vst [vmem:[#allocation2 + $0xc0] sm:$0xf] %v1683_v3  ;;  %v1702_v8 = vcombine.high %v1681_v2, %v1681_v2  ;;  %v1706_v9 = vcombine.high %v1683_v3, %v1683_v3  ;;  %552 = vst [vmem:[#allocation2 + $0xd0] sm:$0xf] %v1693_v6  ;;  %v1712_v10 = vcombine.high %v1693_v6, %v1693_v6 }
  0x15   : > { %554 = vst [vmem:[#allocation2 + $0xe0] sm:$0xf] %v1695_v7  ;;  %v1716_v11 = vcombine.high %v1695_v7, %v1695_v7  ;;  %547 = vst [vmem:[#allocation2 + $0xa8] sm:$0xf] %v264_v5  ;;  %v567_v12 = vcombine.low %v1681_v2, %v1681_v2  ;;  %v334_v13 = vcombine.low %v1683_v3, %v1683_v3 }
  0x16   : > { %549 = vst [vmem:[#allocation2 + $0xb8] sm:$0xf] %v1702_v8  ;;  %551 = vst [vmem:[#allocation2 + $0xc8] sm:$0xf] %v1706_v9  ;;  %v569_v14 = vcombine.low %v1693_v6, %v1693_v6  ;;  %v1815_v15 = vcombine.low %v1695_v7, %v1695_v7 }
  0x17   : > { %337 = vrot.lane.b32.xlu1 %v332_v4, %s1617_s23  ;;  %405 = vrot.lane.b32.xlu0 %v1679_v1, %s1619_s25  ;;  %553 = vst [vmem:[#allocation2 + $0xd8] sm:$0xf] %v1712_v10  ;;  %555 = vst [vmem:[#allocation2 + $0xe8] sm:$0xf] %v1716_v11 }
  0x1b   : > { %407 = vrot.lane.b32.xlu1 %v264_v5, %s1619_s25  ;;  %271 = vrot.lane.b32.xlu0 %v264_v5, %s1618_s24 }
  0x1f   : > { %475 = vrot.lane.b32.xlu1 %v1679_v1, %s1620_s26  ;;  %473 = vrot.lane.b32.xlu0 %v332_v4, %s1620_s26 }
  0x23   : > { %575 = vrot.lane.b32.xlu1 %v567_v12, %s1621_s27  ;;  %573 = vrot.lane.b32.xlu0 %v1679_v1, %s1621_s27 }
  0x27   : > { %643 = vrot.lane.b32.xlu1 %v1681_v2, %s1622_s28  ;;  %641 = vrot.lane.b32.xlu0 %v264_v5, %s1622_s28 }
  0x2b   : > { %711 = vrot.lane.b32.xlu1 %v567_v12, %s1623_s29  ;;  %709 = vrot.lane.b32.xlu0 %v1679_v1, %s1623_s29 }
  0x2f   : > { %639 = vrot.lane.b32.xlu1 %v1679_v1, %s1622_s28  ;;  %571 = vrot.lane.b32.xlu0 %v332_v4, %s1621_s27 }
  0x33   : > { %273 = vrot.lane.b32.xlu1 %v1681_v2, %s1618_s24  ;;  %707 = vrot.lane.b32.xlu0 %v332_v4, %s1623_s29 }
  0x37   : > { %277 = vrot.lane.b32.xlu1 %v1683_v3, %s1618_s24  ;;  %275 = vrot.lane.b32.xlu0 %v1702_v8, %s1618_s24 }
  0x3b   : > { %341 = vrot.lane.b32.xlu1 %v567_v12, %s1617_s23  ;;  %279 = vrot.lane.b32.xlu0 %v1706_v9, %s1618_s24 }
  0x3f   : > { %345 = vrot.lane.b32.xlu1 %v334_v13, %s1617_s23  ;;  %343 = vrot.lane.b32.xlu0 %v1681_v2, %s1617_s23 }
  0x43   : > { %409 = vrot.lane.b32.xlu1 %v1681_v2, %s1619_s25  ;;  %347 = vrot.lane.b32.xlu0 %v1683_v3, %s1617_s23 }
  0x47   : > { %413 = vrot.lane.b32.xlu1 %v1683_v3, %s1619_s25  ;;  %411 = vrot.lane.b32.xlu0 %v1702_v8, %s1619_s25 }
  0x4b   : > { %477 = vrot.lane.b32.xlu1 %v567_v12, %s1620_s26  ;;  %415 = vrot.lane.b32.xlu0 %v1706_v9, %s1619_s25 }
  0x4f   : > { %481 = vrot.lane.b32.xlu1 %v334_v13, %s1620_s26  ;;  %479 = vrot.lane.b32.xlu0 %v1681_v2, %s1620_s26 }
  0x53   : > { %777 = vrot.lane.b32.xlu1 %v264_v5, %s1624_s30  ;;  %483 = vrot.lane.b32.xlu0 %v1683_v3, %s1620_s26 }
  0x57   : > { %775 = vrot.lane.b32.xlu1 %v1679_v1, %s1624_s30  ;;  %779 = vrot.lane.b32.xlu0 %v1681_v2, %s1624_s30 }
  0x5b   : > { %579 = vrot.lane.b32.xlu1 %v334_v13, %s1621_s27  ;;  %577 = vrot.lane.b32.xlu0 %v1681_v2, %s1621_s27 }
  0x5f   : > { %583 = vrot.lane.b32.xlu1 %v569_v14, %s1621_s27  ;;  %581 = vrot.lane.b32.xlu0 %v1683_v3, %s1621_s27 }
  0x63   : > { %647 = vrot.lane.b32.xlu1 %v1683_v3, %s1622_s28  ;;  %645 = vrot.lane.b32.xlu0 %v1702_v8, %s1622_s28 }
  0x67   : > { %651 = vrot.lane.b32.xlu1 %v1693_v6, %s1622_s28  ;;  %649 = vrot.lane.b32.xlu0 %v1706_v9, %s1622_s28 }
  0x6b   : > { %715 = vrot.lane.b32.xlu1 %v334_v13, %s1623_s29  ;;  %713 = vrot.lane.b32.xlu0 %v1681_v2, %s1623_s29  ;;  %v1625_v2 = vmov 0  }
  0x6c   : > { %1581 = vset.pattern.permute.xlu0 %v1625_v2 }
  0x6f   : > { %719 = vrot.lane.b32.xlu1 %v569_v14, %s1623_s29  ;;  %717 = vrot.lane.b32.xlu0 %v1683_v3, %s1623_s29 }
  0x73   : > { %283 = vrot.lane.b32.xlu1 %v1712_v10, %s1618_s24  ;;  %281 = vrot.lane.b32.xlu0 %v1693_v6, %s1618_s24 }
  0x77   : > { %287 = vrot.lane.b32.xlu1 %v1716_v11, %s1618_s24  ;;  %285 = vrot.lane.b32.xlu0 %v1695_v7, %s1618_s24 }
  0x7b   : > { %351 = vrot.lane.b32.xlu1 %v1693_v6, %s1617_s23  ;;  %349 = vrot.lane.b32.xlu0 %v569_v14, %s1617_s23 }
  0x7f   : > { %355 = vrot.lane.b32.xlu1 %v1695_v7, %s1617_s23  ;;  %353 = vrot.lane.b32.xlu0 %v1815_v15, %s1617_s23 }
  0x83   : > { %419 = vrot.lane.b32.xlu1 %v1712_v10, %s1619_s25  ;;  %417 = vrot.lane.b32.xlu0 %v1693_v6, %s1619_s25 }
  0x85   : > { %v1825_v16 = vpop.permute.xlu1 %339  ;;  %v270_v17 = vpop.permute.xlu0 %269 }
  0x86   : > { %310 = vst.msk [vmem:[#allocation2] sm:$0xf] %vm309_vm0, %v270_v17  ;;  %vm889_vm0 = vcmask 1043456  }
  0x87   : > { %321 = vst.msk [vmem:[#allocation2] sm:$0xf] %vm320_vm1, %v1616_v0  ;;  %423 = vrot.lane.b32.xlu1 %v1716_v11, %s1619_s25  ;;  %421 = vrot.lane.b32.xlu0 %v1695_v7, %s1619_s25  ;;  %vm885_vm1 = vcmask 293888  }
  0x89   : > { %v338_v18 = vpop.permute.xlu1 %337  ;;  %v406_v19 = vpop.permute.xlu0 %405 }
  0x8a   : > { %v358_v20 = vsel %vm357_vm2, %v338_v18, %v1825_v16  ;;  %378 = vst.msk [vmem:[#allocation2] sm:$0xf0] %vm377_vm3, %v338_v18  ;;  %vm622_vm3 = vcmask 1048572  }
  0x8b   : > { %446 = vst.msk [vmem:[#allocation2 + $0x50] sm:$0xf] %vm445_vm4, %v406_v19  ;;  %379 = vst [vmem:[#allocation2 + $0x8] sm:$0xf0] %v358_v20  ;;  %487 = vrot.lane.b32.xlu1 %v1693_v6, %s1620_s26  ;;  %485 = vrot.lane.b32.xlu0 %v569_v14, %s1620_s26  ;;  %vm688_vm4 = vcmask 773120  }
  0x8c   : > { %389 = vst.msk [vmem:[#allocation2] sm:$0xf0] %vm388_vm5, %v1616_v0  ;;  %vm690_vm5 = vcmask 1044216  }
  0x8d   : > { %457 = vst.msk [vmem:[#allocation2 + $0x50] sm:$0xf] %vm456_vm6, %v1616_v0  ;;  %v1839_v21 = vpop.permute.xlu1 %407  ;;  %v272_v22 = vpop.permute.xlu0 %271  ;;  %vm756_vm6 = vcmask 769028  }
  0x8e   : > { %v426_v23 = vsel %vm425_vm7, %v406_v19, %v1839_v21  ;;  %v290_v24 = vsel %vm289_vm8, %v270_v17, %v272_v22 }
  0x8f   : > { %447 = vst [vmem:[#allocation2 + $0x58] sm:$0xf] %v426_v23  ;;  %311 = vst [vmem:[#allocation2 + $0x8] sm:$0xf] %v290_v24  ;;  %491 = vrot.lane.b32.xlu1 %v1695_v7, %s1620_s26  ;;  %489 = vrot.lane.b32.xlu0 %v1815_v15, %s1620_s26 }
  0x91   : > { %v1848_v25 = vpop.permute.xlu1 %475  ;;  %v474_v26 = vpop.permute.xlu0 %473 }
  0x92   : > { %v494_v27 = vsel %vm493_vm9, %v474_v26, %v1848_v25  ;;  %514 = vst.msk [vmem:[#allocation2 + $0x50] sm:$0xf0] %vm513_vm10, %v474_v26 }
  0x93   : > { %515 = vst [vmem:[#allocation2 + $0x58] sm:$0xf0] %v494_v27  ;;  %525 = vst.msk [vmem:[#allocation2 + $0x50] sm:$0xf0] %vm524_vm11, %v1616_v0  ;;  %783 = vrot.lane.b32.xlu1 %v1683_v3, %s1624_s30  ;;  %781 = vrot.lane.b32.xlu0 %v1702_v8, %s1624_s30  ;;  %v829_v31 = vld [vmem:[#allocation2] sm:$0xff] }
  0x94   : > { %v879_v3 = vld [vmem:[%s2072_s2] sm:$0xf] }
  0x95   : > { %v1857_v28 = vpop.permute.xlu1 %575  ;;  %v574_v29 = vpop.permute.xlu0 %573 }
  0x96   : > { %v593_v30 = vsel %vm591_vm12, %v574_v29, %v1857_v28  ;;  %v830_v35 = vld [vmem:[#allocation2 + $0x8] sm:$0xff] }
  0x97   : > { %612 = vst [vmem:[#allocation2 + $0xa8] sm:$0xf0] %v593_v30  ;;  %787 = vrot.lane.b32.xlu1 %v1693_v6, %s1624_s30  ;;  %785 = vrot.lane.b32.xlu0 %v1706_v9, %s1624_s30 }
  0x99   : > { %v1865_v32 = vpop.permute.xlu1 %643  ;;  %v642_v33 = vpop.permute.xlu0 %641 }
  0x9a   : > { %v661_v34 = vsel %vm659_vm13, %v642_v33, %v1865_v32  ;;  %v840_v36 = vld [vmem:[#allocation2 + $0x58] sm:$0xff]  ;;  %v839_v37 = vld [vmem:[#allocation2 + $0x50] sm:$0xff] }
  0x9b   : > { %680 = vst [vmem:[#allocation2 + $0xf8] sm:$0xf] %v661_v34  ;;  %587 = vrot.lane.b32.xlu1 %v1815_v15, %s1621_s27  ;;  %585 = vrot.lane.b32.xlu0 %v1693_v6, %s1621_s27  ;;  %v1506_v38 = vpack.c.bf16 %v840_v36, %v830_v35  ;;  %v1508_v39 = vpack.c.bf16 %v839_v37, %v829_v31 }
  0x9d   : > { %v1873_v40 = vpop.permute.xlu1 %711  ;;  %1507 = vmatprep.subr.bf16.mxu0 %v1506_v38  ;;  %v710_v41 = vpop.permute.xlu0 %709 }
  0x9e   : > { %v729_v42 = vsel %vm727_vm14, %v710_v41, %v1873_v40  ;;  %1509 = vmatpush1.bf16.msra.mxu0 %v1508_v39  ;;  %v850_v51 = vld [vmem:[#allocation2 + $0xa8] sm:$0xff] }
  0x9f   : > { %748 = vst [vmem:[#allocation2 + $0xf8] sm:$0xf0] %v729_v42  ;;  %653 = vrot.lane.b32.xlu1 %v1712_v10, %s1622_s28  ;;  %589 = vrot.lane.b32.xlu0 %v1695_v7, %s1621_s27 }
  0xa1   : > { %v640_v43 = vpop.permute.xlu1 %639  ;;  %v572_v44 = vpop.permute.xlu0 %571 }
  0xa2   : > { %v660_v45 = vsel %vm659_vm13, %v640_v43, %v642_v33  ;;  %v592_v46 = vsel %vm591_vm12, %v572_v44, %v574_v29 }
  0xa3   : > { %679 = vst [vmem:[#allocation2 + $0xf0] sm:$0xf] %v660_v45  ;;  %611 = vst [vmem:[#allocation2 + $0xa0] sm:$0xf0] %v592_v46  ;;  %657 = vrot.lane.b32.xlu1 %v1716_v11, %s1622_s28  ;;  %655 = vrot.lane.b32.xlu0 %v1695_v7, %s1622_s28 }
  0xa5   : > { %v274_v47 = vpop.permute.xlu1 %273  ;;  %v708_v48 = vpop.permute.xlu0 %707 }
  0xa6   : > { %v291_v49 = vsel %vm289_vm8, %v272_v22, %v274_v47  ;;  %v728_v50 = vsel %vm727_vm14, %v708_v48, %v710_v41  ;;  %v860_v52 = vld [vmem:[#allocation2 + $0xf8] sm:$0xff] }
  0xa7   : > { %312 = vst [vmem:[#allocation2 + $0x10] sm:$0xf] %v291_v49  ;;  %747 = vst [vmem:[#allocation2 + $0xf0] sm:$0xf0] %v728_v50  ;;  %723 = vrot.lane.b32.xlu1 %v1815_v15, %s1623_s29  ;;  %721 = vrot.lane.b32.xlu0 %v1693_v6, %s1623_s29  ;;  %v1510_v53 = vpack.c.bf16 %v860_v52, %v850_v51 }
  0xa9   : > { %v278_v54 = vpop.permute.xlu1 %277  ;;  %1511 = vmatprep.subr.bf16.mxu0 %v1510_v53  ;;  %v276_v55 = vpop.permute.xlu0 %275 }
  0xaa   : > { %v292_v56 = vsel %vm289_vm8, %v274_v47, %v276_v55  ;;  %v293_v57 = vsel %vm289_vm8, %v276_v55, %v278_v54  ;;  %v849_v62 = vld [vmem:[#allocation2 + $0xa0] sm:$0xff] }
  0xab   : > { %313 = vst [vmem:[#allocation2 + $0x18] sm:$0xf] %v292_v56  ;;  %314 = vst [vmem:[#allocation2 + $0x20] sm:$0xf] %v293_v57  ;;  %789 = vrot.lane.b32.xlu1 %v1712_v10, %s1624_s30  ;;  %725 = vrot.lane.b32.xlu0 %v1695_v7, %s1623_s29  ;;  %v1948_v47 = vld [vmem:[%s2071_s1] sm:$0xf] }
  0xad   : > { %v342_v58 = vpop.permute.xlu1 %341  ;;  %v1899_v59 = vpop.permute.xlu0 %279 }
  0xae   : > { %v359_v60 = vsel %vm357_vm2, %v1825_v16, %v342_v58  ;;  %v294_v61 = vsel %vm289_vm8, %v278_v54, %v1899_v59  ;;  %v859_v63 = vld [vmem:[#allocation2 + $0xf0] sm:$0xff] }
  0xaf   : > { %380 = vst [vmem:[#allocation2 + $0x10] sm:$0xf0] %v359_v60  ;;  %315 = vst [vmem:[#allocation2 + $0x28] sm:$0xf] %v294_v61  ;;  %791 = vrot.lane.b32.xlu0 %v1695_v7, %s1624_s30  ;;  %793 = vrot.lane.b32.xlu1 %v1716_v11, %s1624_s30  ;;  %v1512_v1 = vpack.c.bf16 %v859_v63, %v849_v62 }
  0xb1   : > { %v346_v4 = vpop.permute.xlu1 %345  ;;  %1513 = vmatpush1.bf16.msra.mxu0 %v1512_v1  ;;  %v344_v5 = vpop.permute.xlu0 %343 }
  0xb2   : > { %v360_v6 = vsel %vm357_vm2, %v342_v58, %v344_v5  ;;  %v361_v8 = vsel %vm357_vm2, %v344_v5, %v346_v4 }
  0xb3   : > { %381 = vst [vmem:[#allocation2 + $0x18] sm:$0xf0] %v360_v6  ;;  %382 = vst [vmem:[#allocation2 + $0x20] sm:$0xf0] %v361_v8  ;;  %882 = vperm.xlu0 %1581, %v879_v3  }
  0xb5   : > { %v410_v7 = vpop.permute.xlu1 %409  ;;  %v1915_v9 = vpop.permute.xlu0 %347 }
  0xb6   : > { %v427_v10 = vsel %vm425_vm7, %v1839_v21, %v410_v7  ;;  %v362_v11 = vsel %vm357_vm2, %v346_v4, %v1915_v9  ;;  %v831_v37 = vld [vmem:[#allocation2 + $0x10] sm:$0xff] }
  0xb7   : > { %448 = vst [vmem:[#allocation2 + $0x60] sm:$0xf] %v427_v10  ;;  %383 = vst [vmem:[#allocation2 + $0x28] sm:$0xf0] %v362_v11 }
  0xb9   : > { %v414_v12 = vpop.permute.xlu1 %413  ;;  %v412_v13 = vpop.permute.xlu0 %411 }
  0xba   : > { %v428_v14 = vsel %vm425_vm7, %v410_v7, %v412_v13  ;;  %v429_v15 = vsel %vm425_vm7, %v412_v13, %v414_v12  ;;  %v832_v34 = vld [vmem:[#allocation2 + $0x18] sm:$0xff]  ;;  %v833_v54 = vld [vmem:[#allocation2 + $0x20] sm:$0xff] }
  0xbb   : > { %449 = vst [vmem:[#allocation2 + $0x68] sm:$0xf] %v428_v14  ;;  %450 = vst [vmem:[#allocation2 + $0x70] sm:$0xf] %v429_v15 }
  0xbd   : > { %v478_v16 = vpop.permute.xlu1 %477  ;;  %v1923_v17 = vpop.permute.xlu0 %415 }
  0xbe   : > { %v495_v18 = vsel %vm493_vm9, %v1848_v25, %v478_v16  ;;  %v430_v19 = vsel %vm425_vm7, %v414_v12, %v1923_v17  ;;  %v834_v52 = vld [vmem:[#allocation2 + $0x28] sm:$0xff] }
  0xbf   : > { %516 = vst [vmem:[#allocation2 + $0x60] sm:$0xf0] %v495_v18  ;;  %451 = vst [vmem:[#allocation2 + $0x78] sm:$0xf] %v430_v19 }
  0xc1   : > { %v482_v20 = vpop.permute.xlu1 %481  ;;  %v480_v21 = vpop.permute.xlu0 %479 }
  0xc2   : > { %v496_v22 = vsel %vm493_vm9, %v478_v16, %v480_v21  ;;  %v497_v23 = vsel %vm493_vm9, %v480_v21, %v482_v20 }
  0xc3   : > { %517 = vst [vmem:[#allocation2 + $0x68] sm:$0xf0] %v496_v22  ;;  %518 = vst [vmem:[#allocation2 + $0x70] sm:$0xf0] %v497_v23 }
  0xc5   : > { %v778_v24 = vpop.permute.xlu1 %777  ;;  %v1931_v26 = vpop.permute.xlu0 %483 }
  0xc6   : > { %v498_v27 = vsel %vm493_vm9, %v482_v20, %v1931_v26  ;;  %v841_v30 = vld [vmem:[#allocation2 + $0x60] sm:$0xff] }
  0xc7   : > { %519 = vst [vmem:[#allocation2 + $0x78] sm:$0xf0] %v498_v27  ;;  %v1516_v38 = vpack.c.bf16 %v841_v30, %v831_v37 }
  0xc9   : > { %v776_v25 = vpop.permute.xlu1 %775  ;;  %v1935_v29 = vpop.permute.xlu0 %779 }
  0xca   : > { %v796_v31 = vsel %vm795_vm15, %v776_v25, %v778_v24  ;;  %v797_v33 = vsel %vm795_vm15, %v778_v24, %v1935_v29  ;;  %v842_v35 = vld [vmem:[#allocation2 + $0x68] sm:$0xff]  ;;  %v843_v48 = vld [vmem:[#allocation2 + $0x70] sm:$0xff] }
  0xcb   : > { %815 = vst [vmem:[#allocation2 + $0x140] sm:$0xf] %v796_v31  ;;  %816 = vst [vmem:[#allocation2 + $0x148] sm:$0xf] %v797_v33  ;;  %v1514_v36 = vpack.c.bf16 %v842_v35, %v832_v34  ;;  %v1524_v55 = vpack.c.bf16 %v843_v48, %v833_v54 }
  0xcd   : > { %v580_v39 = vpop.permute.xlu1 %579  ;;  %1515 = vmatprep.subr.bf16.mxu1 %v1514_v36  ;;  %v578_v41 = vpop.permute.xlu0 %577 }
  0xce   : > { %v594_v42 = vsel %vm591_vm12, %v1857_v28, %v578_v41  ;;  %v595_v43 = vsel %vm591_vm12, %v578_v41, %v580_v39  ;;  %1517 = vmatpush1.bf16.msra.mxu1 %v1516_v38  ;;  %v844_v44 = vld [vmem:[#allocation2 + $0x78] sm:$0xff] }
  0xcf   : > { %613 = vst [vmem:[#allocation2 + $0xb0] sm:$0xf0] %v594_v42  ;;  %614 = vst [vmem:[#allocation2 + $0xb8] sm:$0xf0] %v595_v43  ;;  %v1522_v53 = vpack.c.bf16 %v844_v44, %v834_v52 }
  0xd1   : > { %v1943_v45 = vpop.permute.xlu1 %583  ;;  %v582_v46 = vpop.permute.xlu0 %581 }
  0xd2   : > { %v596_v49 = vsel %vm591_vm12, %v580_v39, %v582_v46  ;;  %v597_v28 = vsel %vm591_vm12, %v582_v46, %v1943_v45  ;;  %v870_v50 = vld [vmem:[#allocation2 + $0x148] sm:$0xf]  ;;  %v869_v51 = vld [vmem:[#allocation2 + $0x140] sm:$0xf] }
  0xd3   : > { %615 = vst [vmem:[#allocation2 + $0xc0] sm:$0xf0] %v596_v49  ;;  %616 = vst [vmem:[#allocation2 + $0xc8] sm:$0xf0] %v597_v28  ;;  %1489 = vmatprep.subr.msk.mxu0 %vm889_vm0, %v870_v50 }
  0xd4   : > { %1490 = vmatpush1.msk.msra.mxu0 %vm889_vm0, %v869_v51 }
  0xd5   : > { %v648_v56 = vpop.permute.xlu1 %647  ;;  %1523 = vmatprep.subr.bf16.mxu0 %v1522_v53  ;;  %v646_v57 = vpop.permute.xlu0 %645  ;;  %1491 = vmatmul.mubr.msk.f32.vlgmr.msra.gmra.mrb[0].mxu0 %vm885_vm1, %v1948_v47 }
  0xd6   : > { %v662_v58 = vsel %vm659_vm13, %v1865_v32, %v646_v57  ;;  %v663_v60 = vsel %vm659_vm13, %v646_v57, %v648_v56  ;;  %1525 = vmatpush1.bf16.msra.mxu0 %v1524_v55  ;;  %1126 = vmatprep.mubr.f32.mxu0 %v1616_v0  ;;  %v852_v13 = vld [vmem:[#allocation2 + $0xb8] sm:$0xff]  ;;  %v851_v16 = vld [vmem:[#allocation2 + $0xb0] sm:$0xff] }
  0xd7   : > { %681 = vst [vmem:[#allocation2 + $0x100] sm:$0xf] %v662_v58  ;;  %682 = vst [vmem:[#allocation2 + $0x108] sm:$0xf] %v663_v60 }
  0xd9   : > { %v1961_v61 = vpop.permute.xlu1 %651  ;;  %v650_v62 = vpop.permute.xlu0 %649 }
  0xda   : > { %v664_v63 = vsel %vm659_vm13, %v648_v56, %v650_v62  ;;  %v665_v1 = vsel %vm659_vm13, %v650_v62, %v1961_v61  ;;  %v854_v23 = vld [vmem:[#allocation2 + $0xc8] sm:$0xff] }
  0xdb   : > { %683 = vst [vmem:[#allocation2 + $0x110] sm:$0xf] %v664_v63  ;;  %684 = vst [vmem:[#allocation2 + $0x118] sm:$0xf] %v665_v1 }
  0xdd   : > { %v716_v3 = vpop.permute.xlu1 %715  ;;  %v714_v4 = vpop.permute.xlu0 %713 }
  0xde   : > { %v730_v32 = vsel %vm727_vm14, %v1873_v40, %v714_v4  ;;  %v731_v5 = vsel %vm727_vm14, %v714_v4, %v716_v3 }
  0xdf   : > { %749 = vst [vmem:[#allocation2 + $0x100] sm:$0xf0] %v730_v32  ;;  %750 = vst [vmem:[#allocation2 + $0x108] sm:$0xf0] %v731_v5 }
  0xe1   : > { %v1969_v6 = vpop.permute.xlu1 %719  ;;  %v718_v8 = vpop.permute.xlu0 %717 }
  0xe2   : > { %v732_v7 = vsel %vm727_vm14, %v716_v3, %v718_v8  ;;  %v733_v10 = vsel %vm727_vm14, %v718_v8, %v1969_v6 }
  0xe3   : > { %751 = vst [vmem:[#allocation2 + $0x110] sm:$0xf0] %v732_v7  ;;  %752 = vst [vmem:[#allocation2 + $0x118] sm:$0xf0] %v733_v10 }
  0xe5   : > { %v284_v11 = vpop.permute.xlu1 %283  ;;  %v282_v12 = vpop.permute.xlu0 %281 }
  0xe6   : > { %v295_v40 = vsel %vm289_vm8, %v1899_v59, %v282_v12  ;;  %v296_v14 = vsel %vm289_vm8, %v282_v12, %v284_v11  ;;  %v862_v15 = vld [vmem:[#allocation2 + $0x108] sm:$0xff]  ;;  %v861_v18 = vld [vmem:[#allocation2 + $0x100] sm:$0xff] }
  0xe7   : > { %316 = vst [vmem:[#allocation2 + $0x30] sm:$0xf] %v295_v40  ;;  %317 = vst [vmem:[#allocation2 + $0x38] sm:$0xf] %v296_v14  ;;  %v1518_v19 = vpack.c.bf16 %v862_v15, %v852_v13  ;;  %v1520_v20 = vpack.c.bf16 %v861_v18, %v851_v16  ;;  %v853_v59 = vld [vmem:[#allocation2 + $0xc0] sm:$0xff] }
  0xe9   : > { %v288_v21 = vpop.permute.xlu1 %287  ;;  %1519 = vmatprep.subr.bf16.mxu1 %v1518_v19  ;;  %v286_v22 = vpop.permute.xlu0 %285 }
  0xea   : > { %v297_v24 = vsel %vm289_vm8, %v284_v11, %v286_v22  ;;  %v298_v27 = vsel %vm289_vm8, %v286_v22, %v288_v21  ;;  %1521 = vmatpush1.bf16.msra.mxu1 %v1520_v20  ;;  %v864_v25 = vld [vmem:[#allocation2 + $0x118] sm:$0xff]  ;;  %v863_v30 = vld [vmem:[#allocation2 + $0x110] sm:$0xff]  ;;  %vm824_vm8 = vcmask 756736  }
  0xeb   : > { %318 = vst [vmem:[#allocation2 + $0x40] sm:$0xf] %v297_v24  ;;  %319 = vst [vmem:[#allocation2 + $0x48] sm:$0xf] %v298_v27  ;;  %v1526_v31 = vpack.c.bf16 %v864_v25, %v854_v23  ;;  %v1528_v33 = vpack.c.bf16 %v863_v30, %v853_v59 }
  0xed   : > { %v352_v34 = vpop.permute.xlu1 %351  ;;  %1527 = vmatprep.subr.bf16.mxu0 %v1526_v31  ;;  %v350_v35 = vpop.permute.xlu0 %349 }
  0xee   : > { %v363_v36 = vsel %vm357_vm2, %v1915_v9, %v350_v35  ;;  %v364_v37 = vsel %vm357_vm2, %v350_v35, %v352_v34  ;;  %1529 = vmatpush1.bf16.msra.mxu0 %v1528_v33 }
  0xef   : > { %384 = vst [vmem:[#allocation2 + $0x30] sm:$0xf0] %v363_v36  ;;  %385 = vst [vmem:[#allocation2 + $0x38] sm:$0xf0] %v364_v37 }
  0xf1   : > { %v356_v38 = vpop.permute.xlu1 %355  ;;  %v354_v39 = vpop.permute.xlu0 %353 }
  0xf2   : > { %v365_v41 = vsel %vm357_vm2, %v352_v34, %v354_v39  ;;  %v366_v42 = vsel %vm357_vm2, %v354_v39, %v356_v38  ;;  %vm620_vm2 = vcmask 1039364  }
  0xf3   : > { %386 = vst [vmem:[#allocation2 + $0x40] sm:$0xf0] %v365_v41  ;;  %387 = vst [vmem:[#allocation2 + $0x48] sm:$0xf0] %v366_v42 }
  0xf5   : > { %v420_v43 = vpop.permute.xlu1 %419  ;;  %v418_v44 = vpop.permute.xlu0 %417 }
  0xf6   : > { %v431_v46 = vsel %vm425_vm7, %v1923_v17, %v418_v44  ;;  %v432_v9 = vsel %vm425_vm7, %v418_v44, %v420_v43  ;;  %v836_v13 = vld [vmem:[#allocation2 + $0x38] sm:$0xff]  ;;  %v835_v14 = vld [vmem:[#allocation2 + $0x30] sm:$0xff] }
  0xf7   : > { %452 = vst [vmem:[#allocation2 + $0x80] sm:$0xf] %v431_v46  ;;  %453 = vst [vmem:[#allocation2 + $0x88] sm:$0xf] %v432_v9 }
  0xf9   : > { %v424_v48 = vpop.permute.xlu1 %423  ;;  %v422_v49 = vpop.permute.xlu0 %421 }
  0xfa   : > { %v433_v28 = vsel %vm425_vm7, %v420_v43, %v422_v49  ;;  %v434_v50 = vsel %vm425_vm7, %v422_v49, %v424_v48  ;;  %v838_v24 = vld [vmem:[#allocation2 + $0x48] sm:$0xff]  ;;  %v837_v25 = vld [vmem:[#allocation2 + $0x40] sm:$0xff]  ;;  %vm758_vm7 = vcmask 1048308  }
  0xfb   : > { %454 = vst [vmem:[#allocation2 + $0x90] sm:$0xf] %v433_v28  ;;  %455 = vst [vmem:[#allocation2 + $0x98] sm:$0xf] %v434_v50 }
  0xfd   : > { %v488_v51 = vpop.permute.xlu1 %487  ;;  %v486_v52 = vpop.permute.xlu0 %485 }
  0xfe   : > { %v499_v53 = vsel %vm493_vm9, %v1931_v26, %v486_v52  ;;  %v500_v54 = vsel %vm493_vm9, %v486_v52, %v488_v51 }
  0xff   : > { %520 = vst [vmem:[#allocation2 + $0x80] sm:$0xf0] %v499_v53  ;;  %521 = vst [vmem:[#allocation2 + $0x88] sm:$0xf0] %v500_v54 }
 0x101   : > { %v492_v17 = vpop.permute.xlu1 %491  ;;  %v490_v55 = vpop.permute.xlu0 %489 }
 0x102   : > { %v501_v56 = vsel %vm493_vm9, %v488_v51, %v490_v55  ;;  %v502_v57 = vsel %vm493_vm9, %v490_v55, %v492_v17  ;;  %vm826_vm9 = vcmask 1044200  }
 0x103   : > { %522 = vst [vmem:[#allocation2 + $0x90] sm:$0xf0] %v501_v56  ;;  %523 = vst [vmem:[#allocation2 + $0x98] sm:$0xf0] %v502_v57 }
 0x105   : > { %v784_v58 = vpop.permute.xlu1 %783  ;;  %v782_v60 = vpop.permute.xlu0 %781 }
 0x106   : > { %v798_v62 = vsel %vm795_vm15, %v1935_v29, %v782_v60  ;;  %v799_v63 = vsel %vm795_vm15, %v782_v60, %v784_v58  ;;  %v846_v32 = vld [vmem:[#allocation2 + $0x88] sm:$0xff]  ;;  %v845_v7 = vld [vmem:[#allocation2 + $0x80] sm:$0xff] }
 0x107   : > { %817 = vst [vmem:[#allocation2 + $0x150] sm:$0xf] %v798_v62  ;;  %818 = vst [vmem:[#allocation2 + $0x158] sm:$0xf] %v799_v63  ;;  %v1530_v40 = vpack.c.bf16 %v846_v32, %v836_v13  ;;  %v1532_v15 = vpack.c.bf16 %v845_v7, %v835_v14  ;;  %v1275_v62 = vld [vmem:[%s2073_s3] sm:$0xff]  ;;  %v1281_v63 = vlaneseq }
 0x108   : > { %vm1277_vm10 = vcmp.gt.f32.partialorder %v1275_v62, 0.5 }
 0x109   : > { %v1997_v26 = vpop.permute.xlu1 %787  ;;  %v786_v1 = vpop.permute.xlu0 %785 }
 0x10a   : > { %v800_v3 = vsel %vm795_vm15, %v784_v58, %v786_v1  ;;  %v801_v4 = vsel %vm795_vm15, %v786_v1, %v1997_v26  ;;  %v848_v16 = vld [vmem:[#allocation2 + $0x98] sm:$0xff]  ;;  %v847_v19 = vld [vmem:[#allocation2 + $0x90] sm:$0xff] }
 0x10b   : > { %819 = vst [vmem:[#allocation2 + $0x160] sm:$0xf] %v800_v3  ;;  %820 = vst [vmem:[#allocation2 + $0x168] sm:$0xf] %v801_v4  ;;  %v1538_v27 = vpack.c.bf16 %v848_v16, %v838_v24  ;;  %v1279_v3 = vsel %vm1277_vm10, 1, %v1625_v2 }
 0x10d   : > { %v588_v5 = vpop.permute.xlu1 %587  ;;  %v586_v8 = vpop.permute.xlu0 %585 }
 0x10e   : > { %v598_v29 = vsel %vm591_vm12, %v1943_v45, %v586_v8  ;;  %v599_v10 = vsel %vm591_vm12, %v586_v8, %v588_v5  ;;  %v872_v11 = vld [vmem:[#allocation2 + $0x158] sm:$0xf]  ;;  %v871_v12 = vld [vmem:[#allocation2 + $0x150] sm:$0xf]  ;;  %v1276_v8 = vld [vmem:[%s2073_s3 + $0x8] sm:$0x3] }
 0x10f   : > { %617 = vst [vmem:[#allocation2 + $0xd0] sm:$0xf0] %v598_v29  ;;  %618 = vst [vmem:[#allocation2 + $0xd8] sm:$0xf0] %v599_v10  ;;  %1492 = vmatprep.subr.msk.mxu1 %vm889_vm0, %v872_v11  ;;  %vm1278_vm11 = vcmp.gt.f32.partialorder %v1276_v8, 0.5 }
 0x110   : > { %1493 = vmatpush1.msk.msra.mxu1 %vm889_vm0, %v871_v12 }
 0x111   : > { %v654_v18 = vpop.permute.xlu1 %653  ;;  %1531 = vmatprep.subr.bf16.mxu1 %v1530_v40  ;;  %v590_v45 = vpop.permute.xlu0 %589  ;;  %1494 = vmatmul.mubr.msk.f32.vlgmr.msra.gmra.mrb[0].mxu1 %vm885_vm1, %v1948_v47 }
 0x112   : > { %v666_v20 = vsel %vm659_vm13, %v1961_v61, %v654_v18  ;;  %v600_v21 = vsel %vm591_vm12, %v588_v5, %v590_v45  ;;  %621 = vst.msk [vmem:[#allocation2 + $0xe8] sm:$0xf0] %vm620_vm2, %v590_v45  ;;  %1533 = vmatpush1.bf16.msra.mxu1 %v1532_v15  ;;  %v874_v22 = vld [vmem:[#allocation2 + $0x168] sm:$0xf]  ;;  %v873_v23 = vld [vmem:[#allocation2 + $0x160] sm:$0xf]  ;;  %1197 = vmatprep.mubr.f32.mxu1 %v1616_v0 }
 0x113   : > { %685 = vst [vmem:[#allocation2 + $0x120] sm:$0xf] %v666_v20  ;;  %619 = vst [vmem:[#allocation2 + $0xe0] sm:$0xf0] %v600_v21  ;;  %1495 = vmatprep.subr.msk.mxu0 %vm889_vm0, %v874_v22  ;;  %v1540_v61 = vpack.c.bf16 %v847_v19, %v837_v25 }
 0x114   : > { %623 = vst.msk [vmem:[#allocation2 + $0xe8] sm:$0xf0] %vm622_vm3, %v1616_v0  ;;  %1496 = vmatpush1.msk.msra.mxu0 %vm889_vm0, %v873_v23 }
 0x115   : > { %v658_v59 = vpop.permute.xlu1 %657  ;;  %1539 = vmatprep.subr.bf16.mxu0 %v1538_v27  ;;  %v656_v30 = vpop.permute.xlu0 %655  ;;  %1497 = vmatmul.mubr.msk.f32.vlgmr.msra.gmra.mrb[2].mxu0 %vm885_vm1, %v1948_v47 }
 0x116   : > { %689 = vst.msk [vmem:[#allocation2 + $0x138] sm:$0xf] %vm688_vm4, %v658_v59  ;;  %v667_v31 = vsel %vm659_vm13, %v654_v18, %v656_v30  ;;  %v668_v33 = vsel %vm659_vm13, %v656_v30, %v658_v59  ;;  %1541 = vmatpush1.bf16.msra.mxu0 %v1540_v61  ;;  %1268 = vmatprep.mubr.f32.mxu0 %v1616_v0  ;;  %v856_v44 = vld [vmem:[#allocation2 + $0xd8] sm:$0xff]  ;;  %v855_v49 = vld [vmem:[#allocation2 + $0xd0] sm:$0xff] }
 0x117   : > { %691 = vst.msk [vmem:[#allocation2 + $0x138] sm:$0xf] %vm690_vm5, %v1616_v0  ;;  %686 = vst [vmem:[#allocation2 + $0x128] sm:$0xf] %v667_v31 }
 0x118   : > { %687 = vst [vmem:[#allocation2 + $0x130] sm:$0xf] %v668_v33 }
 0x119   : > { %v724_v34 = vpop.permute.xlu1 %723  ;;  %v722_v35 = vpop.permute.xlu0 %721 }
 0x11a   : > { %v734_v36 = vsel %vm727_vm14, %v1969_v6, %v722_v35  ;;  %v735_v37 = vsel %vm727_vm14, %v722_v35, %v724_v34  ;;  %v857_v54 = vld [vmem:[#allocation2 + $0xe0] sm:$0xff] }
 0x11b   : > { %753 = vst [vmem:[#allocation2 + $0x120] sm:$0xf0] %v734_v36  ;;  %754 = vst [vmem:[#allocation2 + $0x128] sm:$0xf0] %v735_v37  ;;  %v858_v52 = vld [vmem:[#allocation2 + $0xe8] sm:$0xff] }
 0x11d   : > { %v790_v38 = vpop.permute.xlu1 %789  ;;  %v726_v39 = vpop.permute.xlu0 %725 }
 0x11e   : > { %v802_v41 = vsel %vm795_vm15, %v1997_v26, %v790_v38  ;;  %v736_v42 = vsel %vm727_vm14, %v724_v34, %v726_v39  ;;  %757 = vst.msk [vmem:[#allocation2 + $0x138] sm:$0xf0] %vm756_vm6, %v726_v39  ;;  %v1282_v26 = vshrl.u32 %v1281_v63, 7 }
 0x11f   : > { %821 = vst [vmem:[#allocation2 + $0x170] sm:$0xf] %v802_v41  ;;  %755 = vst [vmem:[#allocation2 + $0x130] sm:$0xf0] %v736_v42 }
 0x120   : > { %759 = vst.msk [vmem:[#allocation2 + $0x138] sm:$0xf0] %vm758_vm7, %v1616_v0  ;;  %v1299_v1 = vsub.s32 4, %v1282_v26  ;;  %v1303_v32 = vsub.s32 5, %v1282_v26  ;;  %v1307_v7 = vsub.s32 6, %v1282_v26  ;;  %v1311_v29 = vsub.s32 7, %v1282_v26 }
 0x121   : > { %v792_v6 = vpop.permute.xlu0 %791  ;;  %v794_v43 = vpop.permute.xlu1 %793  ;;  %v1283_v10 = vsub.s32 0, %v1282_v26  ;;  %v1287_v11 = vsub.s32 1, %v1282_v26  ;;  %v1291_v24 = vsub.s32 2, %v1282_v26  ;;  %v1295_v27 = vsub.s32 3, %v1282_v26 }
 0x122   : > { %v803_v46 = vsel %vm795_vm15, %v790_v38, %v792_v6  ;;  %v804_v9 = vsel %vm795_vm15, %v792_v6, %v794_v43  ;;  %825 = vst.msk [vmem:[#allocation2 + $0x188] sm:$0xf] %vm824_vm8, %v794_v43  ;;  %v866_v48 = vld [vmem:[#allocation2 + $0x128] sm:$0xff]  ;;  %v865_v28 = vld [vmem:[#allocation2 + $0x120] sm:$0xff]  ;;  %v1300_v4 = vrot.slane %v1279_v3, %v1299_v1  ;;  %v1304_v5 = vrot.slane %v1279_v3, %v1303_v32 }
 0x123   : > { %822 = vst [vmem:[#allocation2 + $0x178] sm:$0xf] %v803_v46  ;;  %823 = vst [vmem:[#allocation2 + $0x180] sm:$0xf] %v804_v9  ;;  %v1534_v50 = vpack.c.bf16 %v866_v48, %v856_v44  ;;  %v1536_v51 = vpack.c.bf16 %v865_v28, %v855_v49  ;;  %v1308_v12 = vrot.slane %v1279_v3, %v1307_v7 }
 0x124   : > { %827 = vst.msk [vmem:[#allocation2 + $0x188] sm:$0xf] %vm826_vm9, %v1616_v0  ;;  %v1312_v13 = vrot.slane %v1279_v3, %v1311_v29  ;;  %v1284_v15 = vrot.slane %v1279_v3, %v1283_v10  ;;  %v1288_v16 = vrot.slane %v1279_v3, %v1287_v11  ;;  %v1292_v25 = vrot.slane %v1279_v3, %v1291_v24 }
 0x125   : > { %1535 = vmatprep.subr.bf16.mxu1 %v1534_v50  ;;  %v1296_v61 = vrot.slane %v1279_v3, %v1295_v27  ;;  %vm1327_vm2 = vcmp.eq.s32.totalorder %v1308_v12, 1 }
 0x126   : > { %1537 = vmatpush1.bf16.msra.mxu1 %v1536_v51  ;;  %v867_v17 = vld [vmem:[#allocation2 + $0x130] sm:$0xff]  ;;  %vm1321_vm12 = vcmp.eq.s32.totalorder %v1284_v15, 1  ;;  %vm1322_vm13 = vcmp.eq.s32.totalorder %v1288_v16, 1  ;;  %vm1323_vm14 = vcmp.eq.s32.totalorder %v1292_v25, 1  ;;  %vm1328_vm3 = vcmp.eq.s32.totalorder %v1312_v13, 1 }
 0x127   : > { %v868_v53 = vld [vmem:[#allocation2 + $0x138] sm:$0xff]  ;;  %v1544_v56 = vpack.c.bf16 %v867_v17, %v857_v54  ;;  %v875_v60 = vld [vmem:[#allocation2 + $0x170] sm:$0xf]  ;;  %vm1324_vm15 = vcmp.eq.s32.totalorder %v1296_v61, 1 }
 0x128   : > { %v1542_v55 = vpack.c.bf16 %v868_v53, %v858_v52 }
 0x12a   : > { %1543 = vmatprep.subr.bf16.mxu0 %v1542_v55  ;;  %v876_v57 = vld [vmem:[#allocation2 + $0x178] sm:$0xf]  ;;  %v877_v0 = vld [vmem:[#allocation2 + $0x180] sm:$0xf] }
 0x12b   : > { %1545 = vmatpush1.bf16.msra.mxu0 %v1544_v56  ;;  %v878_v58 = vld [vmem:[#allocation2 + $0x188] sm:$0xf]  ;;  %1498 = vmatprep.subr.msk.mxu1 %vm889_vm0, %v876_v57 }
 0x12c   : > { %1501 = vmatprep.subr.msk.mxu0 %vm889_vm0, %v878_v58  ;;  %1499 = vmatpush1.msk.msra.mxu1 %vm889_vm0, %v875_v60 }
 0x12d   : > { %1500 = vmatmul.mubr.msk.f32.vlgmr.msra.gmra.mrb[2].mxu1 %vm885_vm1, %v1948_v47 }
 0x12f   : > { %1502 = vmatpush1.msk.msra.mxu0 %vm889_vm0, %v877_v0  ;;  %vm1325_vm0 = vcmp.eq.s32.totalorder %v1300_v4, 1 }
 0x130   : > { %1503 = vmatmul.mubr.msk.f32.vlgmr.msra.gmra.mrb[4].mxu0 %vm885_vm1, %v1948_v47  ;;  %v1280_v47 = vsel %vm1278_vm11, 1, %v1625_v2  ;;  %vm1326_vm1 = vcmp.eq.s32.totalorder %v1304_v5, 1 }
 0x131   : > { %v1316_v40 = vrot.slane %v1280_v47, %v1283_v10  ;;  %v1320_v14 = vrot.slane %v1280_v47, %v1287_v11 }
 0x132   : > { %v883_v18 = vpop.permute.xlu0 %882 }
 0x133   : > { %vm1329_vm4 = vcmp.eq.s32.totalorder %v1316_v40, 1  ;;  %vm1330_vm5 = vcmp.eq.s32.totalorder %v1320_v14, 1 }
 0x1a8   : > { %v986_v45 = vpop.f32.mrb[0].mxu0 }
 0x1a9   : > { %v988_v19 = vpop.f32.mrb[1].mxu0  ;;  %v987_v20 = vadd.f32 %v986_v45, %v883_v18 }
 0x1aa   : > { %v989_v21 = vadd.f32 %v988_v19, %v883_v18 }
 0x1ab   : > { %v1331_v22 = vsel %vm1321_vm12, %v987_v20, 0.0 }
 0x1ac   : > { %v1332_v2 = vsel %vm1322_vm13, %v989_v21, 0.0 }
 0x1ad   : > { %v1351_v23 = vcombine.low %v1331_v22, %v1332_v2 }
 0x1af   : > { %1361 = vst [vmem:[%s2054_s20] sm:$0xff] %v1351_v23 }
 0x1e4   : > { %v1057_v59 = vpop.f32.mrb[0].mxu1 }
 0x1e5   : > { %v1058_v30 = vadd.f32 %v1057_v59, %v883_v18  ;;  %v1059_v31 = vpop.f32.mrb[1].mxu1 }
 0x1e6   : > { %v1060_v33 = vadd.f32 %v1059_v31, %v883_v18 }
 0x1e7   : > { %v1333_v34 = vsel %vm1323_vm14, %v1058_v30, 0.0 }
 0x1e8   : > { %v1128_v35 = vpop.f32.mrb[2].mxu0  ;;  %v1334_v36 = vsel %vm1324_vm15, %v1060_v33, 0.0 }
 0x1e9   : > { %v1129_v37 = vadd.f32 %v1128_v35, %v883_v18  ;;  %v1352_v38 = vcombine.low %v1333_v34, %v1334_v36  ;;  %v1130_v39 = vpop.f32.mrb[3].mxu0 }
 0x1ea   : > { %v1131_v41 = vadd.f32 %v1130_v39, %v883_v18 }
 0x1eb   : > { %v1335_v42 = vsel %vm1325_vm0, %v1129_v37, 0.0  ;;  %1362 = vst [vmem:[%s2054_s20 + $0x8] sm:$0xff] %v1352_v38 }
 0x1ec   : > { %v1336_v6 = vsel %vm1326_vm1, %v1131_v41, 0.0 }
 0x1ed   : > { %v1353_v43 = vcombine.low %v1335_v42, %v1336_v6 }
 0x1ef   : > { %1363 = vst [vmem:[%s2054_s20 + $0x10] sm:$0xff] %v1353_v43 }
 0x200   : > { %v1199_v44 = vpop.f32.mrb[2].mxu1 }
 0x201   : > { %v1200_v46 = vadd.f32 %v1199_v44, %v883_v18  ;;  %v1201_v9 = vpop.f32.mrb[3].mxu1 }
 0x202   : > { %v1202_v48 = vadd.f32 %v1201_v9, %v883_v18 }
 0x203   : > { %v1270_v49 = vpop.f32.mrb[4].mxu0  ;;  %v1337_v28 = vsel %vm1327_vm2, %v1200_v46, 0.0 }
 0x204   : > { %v1271_v50 = vadd.f32 %v1270_v49, %v883_v18  ;;  %v1272_v51 = vpop.f32.mrb[5].mxu0  ;;  %v1338_v52 = vsel %vm1328_vm3, %v1202_v48, 0.0 }
 0x205   : > { %v1273_v53 = vadd.f32 %v1272_v51, %v883_v18  ;;  %v1354_v54 = vcombine.low %v1337_v28, %v1338_v52 }
 0x206   : > { %v1339_v17 = vsel %vm1329_vm4, %v1271_v50, 0.0 }
 0x207   : > { %v1340_v55 = vsel %vm1330_vm5, %v1273_v53, 0.0  ;;  %1364 = vst [vmem:[%s2054_s20 + $0x18] sm:$0xff] %v1354_v54 }
 0x208   : > { %v1355_v56 = vcombine.low %v1339_v17, %v1340_v55 }
 0x20a   : > { %1365 = vst [vmem:[%s2054_s20 + $0x20] sm:$0xff] %v1355_v56 }
 0x20b PF: > { %s14_s17 = sadd.s32 1, %s1614_s17   ;;  %s2075_s15 = smov %s1610_s16 }
 0x20c   : > { %p11_p5 = scmp.ge.s32.totalorder %s14_s17, 4   ;;  %s2076_s16 = smov %s2078_s18 }
 0x20e   :  { %13 = sbr.rel (!%p11_p5) target bundleno = 2 (0x2), region = 72 }

// kernel: ncd_forward.10
= control target key start
LH: loop header
LB: loop body
LE: loop exit
PB: predicated region body
PF: predicated region fallthrough
CT: control target
= control target key end

     0   :  { %s1897_s21 = smov 0   ;;  %s1899_s22 = smov 0   ;;  %s2365_s0 = inlined_call_operand.vmem [shape: f32[2,4,1280], index: 0, kind: input, shape index: {}]   ;;  %s2366_s1 = inlined_call_operand.vmem [shape: f32[4,36], index: 1, kind: input, shape index: {}]   ;;  %s2367_s2 = inlined_call_operand.vmem [shape: f32[4,1], index: 2, kind: input, shape index: {}]   ;;  %s2368_s3 = inlined_call_operand.vmem [shape: f32[1,1280], index: 3, kind: input, shape index: {}]   ;;  %s2369_s4 = inlined_call_operand.vmem [shape: f32[2,4,1280], index: 4, kind: input, shape index: {}]   ;;  %s2370_s5 = inlined_call_operand.vmem [shape: f32[2,4,1280], index: 5, kind: input, shape index: {}]   ;;  %s2371_s6 = inlined_call_operand.vmem [shape: f32[2,4,1280], index: 6, kind: output, shape index: {}]  }
   0x1   :  { %s1901_s23 = smov 0  }
   0x2 LB: > { %s28_s24 = sadd.s32 1, %s1846_s22  ;;  %p1710_p0 = scmp.ge.s32.totalorder %s1850_s23, 1  ;;  %s1850_s23 = sphi %s1901_s23, %s16_s23   ;;  %s1846_s22 = sphi %s1899_s22, %s2373_s22   ;;  %s1842_s21 = sphi %s1897_s21, %s2372_s21  }
   0x3   : > { %p30_p1 = scmp.ge.s32.totalorder %s28_s24, 2  ;;  %p276_p2 = scmp.lt.s32.totalorder %s1850_s23, 3 }
   0x5   : > { %s2375_s24 = smov (%p30_p1, %s28_s24), 0  ;;  %p277_p3 = pnand %p1710_p0, %p276_p2 }
   0x6   : > { %p336_p4 = scmp.lt.s32.totalorder (!%p277_p3), %s1842_s21, 1  ;;  %v1852_v0 = vmov (!%p277_p3), 0.0   ;;  %s1853_s29 = smov (!%p277_p3), 34   ;;  %vm431_vm0 = vcmask (!%p277_p3), 1043736   ;;  %vm442_vm1 = vcmask (!%p277_p3), 281600   ;;  %vm479_vm2 = vcmask (!%p277_p3), 277504  }
   0x7   : > { %280 = sbr.rel (%p277_p3) target bundleno = 527 (0x20f), region = 44  ;;  %1106 = vmatprep.mubr.f32.mxu0 (!%p277_p3), %v1852_v0  ;;  %1177 = vmatprep.mubr.f32.mxu1 (!%p277_p3), %v1852_v0  ;;  %s1854_s30 = smov (!%p277_p3), 35   ;;  %vm499_vm3 = vcmask (!%p277_p3), 1047828   ;;  %vm567_vm4 = vcmask (!%p277_p3), 1043720   ;;  %vm510_vm5 = vcmask (!%p277_p3), 277508   ;;  %vm578_vm6 = vcmask (!%p277_p3), 265216  }
   0x8   : > { %s1855_s7 = smov (!%p277_p3), 33   ;;  %s1856_s8 = smov (!%p277_p3), 1   ;;  %vm547_vm7 = vcmask (!%p277_p3), 269312   ;;  %vm411_vm8 = vcmask (!%p277_p3), 285696   ;;  %vm615_vm9 = vcmask (!%p277_p3), 7168   ;;  %vm635_vm10 = vcmask (!%p277_p3), 1047564  }
   0x9   : > { %s1857_s9 = smov (!%p277_p3), 127   ;;  %s1858_s10 = smov (!%p277_p3), 95   ;;  %vm646_vm11 = vcmask (!%p277_p3), 7172   ;;  %vm713_vm12 = vcmask (!%p277_p3), 1039360   ;;  %vm781_vm13 = vcmask (!%p277_p3), 777216   ;;  %vm849_vm14 = vcmask (!%p277_p3), 769024  }
   0xa   : > { %s1859_s11 = smov (!%p277_p3), 94   ;;  %s1860_s12 = smov (!%p277_p3), 93   ;;  %vm917_vm15 = vcmask (!%p277_p3), 760832  }
   0xe   : > { %s2377_s21 = smov (!%p336_p4, %s1842_s21), 1 }
   0xf   : > { %s1917_s25 = smul.u32 40, %s2377_s21 }
  0x11   : > { %s340_s28 = scalar_lea.vmem %s2365_s0, %s1917_s25  ;;  %s2309_s27 = scalar_lea.vmem %s2369_s4, %s1917_s25 }
  0x12   : > { %v1923_v1 = vld [vmem:[%s340_s28] sm:$0xff]  ;;  %v1925_v2 = vld [vmem:[%s340_s28 + $0x8] sm:$0xff]  ;;  %v1927_v3 = vld [vmem:[%s340_s28 + $0x10] sm:$0xff] }
  0x13   : > { %461 = vrot.lane.b32.xlu1 %v1923_v1, %s1853_s29  ;;  %v454_v4 = vcombine.low %v1923_v1, %v1923_v1  ;;  %391 = vrot.lane.b32.xlu0 %v1923_v1, %s1854_s30  ;;  %v386_v5 = vcombine.high %v1923_v1, %v1923_v1  ;;  %v1937_v6 = vld [vmem:[%s340_s28 + $0x18] sm:$0xff]  ;;  %v1939_v7 = vld [vmem:[%s340_s28 + $0x20] sm:$0xff]  ;;  %668 = vst [vmem:[#allocation2 + $0xa0] sm:$0xf] %v1923_v1  ;;  %670 = vst [vmem:[#allocation2 + $0xb0] sm:$0xf] %v1925_v2 }
  0x14   : > { %672 = vst [vmem:[#allocation2 + $0xc0] sm:$0xf] %v1927_v3  ;;  %v1946_v8 = vcombine.high %v1925_v2, %v1925_v2  ;;  %v1950_v9 = vcombine.high %v1927_v3, %v1927_v3  ;;  %674 = vst [vmem:[#allocation2 + $0xd0] sm:$0xf] %v1937_v6  ;;  %v1956_v10 = vcombine.high %v1937_v6, %v1937_v6 }
  0x15   : > { %676 = vst [vmem:[#allocation2 + $0xe0] sm:$0xf] %v1939_v7  ;;  %v1960_v11 = vcombine.high %v1939_v7, %v1939_v7  ;;  %669 = vst [vmem:[#allocation2 + $0xa8] sm:$0xf] %v386_v5  ;;  %v689_v12 = vcombine.low %v1925_v2, %v1925_v2  ;;  %v456_v13 = vcombine.low %v1927_v3, %v1927_v3 }
  0x16   : > { %671 = vst [vmem:[#allocation2 + $0xb8] sm:$0xf] %v1946_v8  ;;  %673 = vst [vmem:[#allocation2 + $0xc8] sm:$0xf] %v1950_v9  ;;  %v691_v14 = vcombine.low %v1937_v6, %v1937_v6  ;;  %v2059_v15 = vcombine.low %v1939_v7, %v1939_v7 }
  0x17   : > { %459 = vrot.lane.b32.xlu1 %v454_v4, %s1853_s29  ;;  %527 = vrot.lane.b32.xlu0 %v1923_v1, %s1855_s7  ;;  %675 = vst [vmem:[#allocation2 + $0xd8] sm:$0xf] %v1956_v10  ;;  %677 = vst [vmem:[#allocation2 + $0xe8] sm:$0xf] %v1960_v11 }
  0x1b   : > { %529 = vrot.lane.b32.xlu1 %v386_v5, %s1855_s7  ;;  %393 = vrot.lane.b32.xlu0 %v386_v5, %s1854_s30 }
  0x1f   : > { %597 = vrot.lane.b32.xlu1 %v1923_v1, %s1856_s8  ;;  %595 = vrot.lane.b32.xlu0 %v454_v4, %s1856_s8 }
  0x23   : > { %697 = vrot.lane.b32.xlu1 %v689_v12, %s1857_s9  ;;  %695 = vrot.lane.b32.xlu0 %v1923_v1, %s1857_s9 }
  0x27   : > { %765 = vrot.lane.b32.xlu1 %v1925_v2, %s1858_s10  ;;  %763 = vrot.lane.b32.xlu0 %v386_v5, %s1858_s10 }
  0x2b   : > { %833 = vrot.lane.b32.xlu1 %v689_v12, %s1859_s11  ;;  %831 = vrot.lane.b32.xlu0 %v1923_v1, %s1859_s11 }
  0x2f   : > { %761 = vrot.lane.b32.xlu1 %v1923_v1, %s1858_s10  ;;  %693 = vrot.lane.b32.xlu0 %v454_v4, %s1857_s9 }
  0x33   : > { %395 = vrot.lane.b32.xlu1 %v1925_v2, %s1854_s30  ;;  %829 = vrot.lane.b32.xlu0 %v454_v4, %s1859_s11 }
  0x37   : > { %399 = vrot.lane.b32.xlu1 %v1927_v3, %s1854_s30  ;;  %397 = vrot.lane.b32.xlu0 %v1946_v8, %s1854_s30 }
  0x3b   : > { %463 = vrot.lane.b32.xlu1 %v689_v12, %s1853_s29  ;;  %401 = vrot.lane.b32.xlu0 %v1950_v9, %s1854_s30 }
  0x3f   : > { %467 = vrot.lane.b32.xlu1 %v456_v13, %s1853_s29  ;;  %465 = vrot.lane.b32.xlu0 %v1925_v2, %s1853_s29 }
  0x43   : > { %531 = vrot.lane.b32.xlu1 %v1925_v2, %s1855_s7  ;;  %469 = vrot.lane.b32.xlu0 %v1927_v3, %s1853_s29 }
  0x47   : > { %535 = vrot.lane.b32.xlu1 %v1927_v3, %s1855_s7  ;;  %533 = vrot.lane.b32.xlu0 %v1946_v8, %s1855_s7 }
  0x4b   : > { %599 = vrot.lane.b32.xlu1 %v689_v12, %s1856_s8  ;;  %537 = vrot.lane.b32.xlu0 %v1950_v9, %s1855_s7 }
  0x4f   : > { %603 = vrot.lane.b32.xlu1 %v456_v13, %s1856_s8  ;;  %601 = vrot.lane.b32.xlu0 %v1925_v2, %s1856_s8 }
  0x53   : > { %899 = vrot.lane.b32.xlu1 %v386_v5, %s1860_s12  ;;  %605 = vrot.lane.b32.xlu0 %v1927_v3, %s1856_s8 }
  0x57   : > { %897 = vrot.lane.b32.xlu1 %v1923_v1, %s1860_s12  ;;  %901 = vrot.lane.b32.xlu0 %v1925_v2, %s1860_s12 }
  0x5b   : > { %701 = vrot.lane.b32.xlu1 %v456_v13, %s1857_s9  ;;  %699 = vrot.lane.b32.xlu0 %v1925_v2, %s1857_s9 }
  0x5f   : > { %705 = vrot.lane.b32.xlu1 %v691_v14, %s1857_s9  ;;  %703 = vrot.lane.b32.xlu0 %v1927_v3, %s1857_s9 }
  0x63   : > { %769 = vrot.lane.b32.xlu1 %v1927_v3, %s1858_s10  ;;  %767 = vrot.lane.b32.xlu0 %v1946_v8, %s1858_s10 }
  0x67   : > { %773 = vrot.lane.b32.xlu1 %v1937_v6, %s1858_s10  ;;  %771 = vrot.lane.b32.xlu0 %v1950_v9, %s1858_s10 }
  0x6b   : > { %837 = vrot.lane.b32.xlu1 %v456_v13, %s1859_s11  ;;  %835 = vrot.lane.b32.xlu0 %v1925_v2, %s1859_s11  ;;  %v1861_v2 = vmov 0  }
  0x6c   : > { %1807 = vset.pattern.permute.xlu0 %v1861_v2 }
  0x6f   : > { %841 = vrot.lane.b32.xlu1 %v691_v14, %s1859_s11  ;;  %839 = vrot.lane.b32.xlu0 %v1927_v3, %s1859_s11 }
  0x73   : > { %405 = vrot.lane.b32.xlu1 %v1956_v10, %s1854_s30  ;;  %403 = vrot.lane.b32.xlu0 %v1937_v6, %s1854_s30 }
  0x77   : > { %409 = vrot.lane.b32.xlu1 %v1960_v11, %s1854_s30  ;;  %407 = vrot.lane.b32.xlu0 %v1939_v7, %s1854_s30  ;;  %s2315_s30 = scalar_lea.vmem %s2370_s5, %s1917_s25 }
  0x7b   : > { %473 = vrot.lane.b32.xlu1 %v1937_v6, %s1853_s29  ;;  %471 = vrot.lane.b32.xlu0 %v691_v14, %s1853_s29 }
  0x7f   : > { %477 = vrot.lane.b32.xlu1 %v1939_v7, %s1853_s29  ;;  %475 = vrot.lane.b32.xlu0 %v2059_v15, %s1853_s29 }
  0x83   : > { %541 = vrot.lane.b32.xlu1 %v1956_v10, %s1855_s7  ;;  %539 = vrot.lane.b32.xlu0 %v1937_v6, %s1855_s7 }
  0x85   : > { %v2069_v16 = vpop.permute.xlu1 %461  ;;  %v392_v17 = vpop.permute.xlu0 %391 }
  0x86   : > { %432 = vst.msk [vmem:[#allocation2] sm:$0xf] %vm431_vm0, %v392_v17  ;;  %vm1011_vm0 = vcmask 1043456  }
  0x87   : > { %443 = vst.msk [vmem:[#allocation2] sm:$0xf] %vm442_vm1, %v1852_v0  ;;  %545 = vrot.lane.b32.xlu1 %v1960_v11, %s1855_s7  ;;  %543 = vrot.lane.b32.xlu0 %v1939_v7, %s1855_s7  ;;  %vm1007_vm1 = vcmask 293888  }
  0x89   : > { %v460_v18 = vpop.permute.xlu1 %459  ;;  %v528_v19 = vpop.permute.xlu0 %527 }
  0x8a   : > { %v480_v20 = vsel %vm479_vm2, %v460_v18, %v2069_v16  ;;  %500 = vst.msk [vmem:[#allocation2] sm:$0xf0] %vm499_vm3, %v460_v18  ;;  %vm744_vm3 = vcmask 1048572  }
  0x8b   : > { %568 = vst.msk [vmem:[#allocation2 + $0x50] sm:$0xf] %vm567_vm4, %v528_v19  ;;  %501 = vst [vmem:[#allocation2 + $0x8] sm:$0xf0] %v480_v20  ;;  %609 = vrot.lane.b32.xlu1 %v1937_v6, %s1856_s8  ;;  %607 = vrot.lane.b32.xlu0 %v691_v14, %s1856_s8  ;;  %vm810_vm4 = vcmask 773120  }
  0x8c   : > { %511 = vst.msk [vmem:[#allocation2] sm:$0xf0] %vm510_vm5, %v1852_v0  ;;  %vm812_vm5 = vcmask 1044216  }
  0x8d   : > { %579 = vst.msk [vmem:[#allocation2 + $0x50] sm:$0xf] %vm578_vm6, %v1852_v0  ;;  %v2083_v21 = vpop.permute.xlu1 %529  ;;  %v394_v22 = vpop.permute.xlu0 %393  ;;  %vm878_vm6 = vcmask 769028  }
  0x8e   : > { %v548_v23 = vsel %vm547_vm7, %v528_v19, %v2083_v21  ;;  %v412_v24 = vsel %vm411_vm8, %v392_v17, %v394_v22 }
  0x8f   : > { %569 = vst [vmem:[#allocation2 + $0x58] sm:$0xf] %v548_v23  ;;  %433 = vst [vmem:[#allocation2 + $0x8] sm:$0xf] %v412_v24  ;;  %613 = vrot.lane.b32.xlu1 %v1939_v7, %s1856_s8  ;;  %611 = vrot.lane.b32.xlu0 %v2059_v15, %s1856_s8 }
  0x91   : > { %v2092_v25 = vpop.permute.xlu1 %597  ;;  %v596_v26 = vpop.permute.xlu0 %595 }
  0x92   : > { %v616_v27 = vsel %vm615_vm9, %v596_v26, %v2092_v25  ;;  %636 = vst.msk [vmem:[#allocation2 + $0x50] sm:$0xf0] %vm635_vm10, %v596_v26 }
  0x93   : > { %637 = vst [vmem:[#allocation2 + $0x58] sm:$0xf0] %v616_v27  ;;  %647 = vst.msk [vmem:[#allocation2 + $0x50] sm:$0xf0] %vm646_vm11, %v1852_v0  ;;  %905 = vrot.lane.b32.xlu1 %v1927_v3, %s1860_s12  ;;  %903 = vrot.lane.b32.xlu0 %v1946_v8, %s1860_s12  ;;  %v951_v31 = vld [vmem:[#allocation2] sm:$0xff] }
  0x94   : > { %v1001_v3 = vld [vmem:[%s2367_s2] sm:$0xf] }
  0x95   : > { %v2101_v28 = vpop.permute.xlu1 %697  ;;  %v696_v29 = vpop.permute.xlu0 %695 }
  0x96   : > { %v715_v30 = vsel %vm713_vm12, %v696_v29, %v2101_v28  ;;  %v952_v35 = vld [vmem:[#allocation2 + $0x8] sm:$0xff] }
  0x97   : > { %734 = vst [vmem:[#allocation2 + $0xa8] sm:$0xf0] %v715_v30  ;;  %909 = vrot.lane.b32.xlu1 %v1937_v6, %s1860_s12  ;;  %907 = vrot.lane.b32.xlu0 %v1950_v9, %s1860_s12 }
  0x99   : > { %v2109_v32 = vpop.permute.xlu1 %765  ;;  %v764_v33 = vpop.permute.xlu0 %763 }
  0x9a   : > { %v783_v34 = vsel %vm781_vm13, %v764_v33, %v2109_v32  ;;  %v962_v36 = vld [vmem:[#allocation2 + $0x58] sm:$0xff]  ;;  %v961_v37 = vld [vmem:[#allocation2 + $0x50] sm:$0xff] }
  0x9b   : > { %802 = vst [vmem:[#allocation2 + $0xf8] sm:$0xf] %v783_v34  ;;  %709 = vrot.lane.b32.xlu1 %v2059_v15, %s1857_s9  ;;  %707 = vrot.lane.b32.xlu0 %v1937_v6, %s1857_s9  ;;  %v1732_v38 = vpack.c.bf16 %v962_v36, %v952_v35  ;;  %v1734_v39 = vpack.c.bf16 %v961_v37, %v951_v31 }
  0x9d   : > { %v2117_v40 = vpop.permute.xlu1 %833  ;;  %1733 = vmatprep.subr.bf16.mxu0 %v1732_v38  ;;  %v832_v41 = vpop.permute.xlu0 %831 }
  0x9e   : > { %v851_v42 = vsel %vm849_vm14, %v832_v41, %v2117_v40  ;;  %1735 = vmatpush1.bf16.msra.mxu0 %v1734_v39  ;;  %v972_v51 = vld [vmem:[#allocation2 + $0xa8] sm:$0xff] }
  0x9f   : > { %870 = vst [vmem:[#allocation2 + $0xf8] sm:$0xf0] %v851_v42  ;;  %775 = vrot.lane.b32.xlu1 %v1956_v10, %s1858_s10  ;;  %711 = vrot.lane.b32.xlu0 %v1939_v7, %s1857_s9  ;;  %s2327_s9 = scalar_lea.vmem %s2371_s6, %s1917_s25 }
  0xa1   : > { %v762_v43 = vpop.permute.xlu1 %761  ;;  %v694_v44 = vpop.permute.xlu0 %693 }
  0xa2   : > { %v782_v45 = vsel %vm781_vm13, %v762_v43, %v764_v33  ;;  %v714_v46 = vsel %vm713_vm12, %v694_v44, %v696_v29 }
  0xa3   : > { %801 = vst [vmem:[#allocation2 + $0xf0] sm:$0xf] %v782_v45  ;;  %733 = vst [vmem:[#allocation2 + $0xa0] sm:$0xf0] %v714_v46  ;;  %779 = vrot.lane.b32.xlu1 %v1960_v11, %s1858_s10  ;;  %777 = vrot.lane.b32.xlu0 %v1939_v7, %s1858_s10 }
  0xa5   : > { %v396_v47 = vpop.permute.xlu1 %395  ;;  %v830_v48 = vpop.permute.xlu0 %829 }
  0xa6   : > { %v413_v49 = vsel %vm411_vm8, %v394_v22, %v396_v47  ;;  %v850_v50 = vsel %vm849_vm14, %v830_v48, %v832_v41  ;;  %v982_v52 = vld [vmem:[#allocation2 + $0xf8] sm:$0xff] }
  0xa7   : > { %434 = vst [vmem:[#allocation2 + $0x10] sm:$0xf] %v413_v49  ;;  %869 = vst [vmem:[#allocation2 + $0xf0] sm:$0xf0] %v850_v50  ;;  %845 = vrot.lane.b32.xlu1 %v2059_v15, %s1859_s11  ;;  %843 = vrot.lane.b32.xlu0 %v1937_v6, %s1859_s11  ;;  %v1736_v53 = vpack.c.bf16 %v982_v52, %v972_v51 }
  0xa9   : > { %v400_v54 = vpop.permute.xlu1 %399  ;;  %1737 = vmatprep.subr.bf16.mxu0 %v1736_v53  ;;  %v398_v55 = vpop.permute.xlu0 %397 }
  0xaa   : > { %v414_v56 = vsel %vm411_vm8, %v396_v47, %v398_v55  ;;  %v415_v57 = vsel %vm411_vm8, %v398_v55, %v400_v54  ;;  %v971_v62 = vld [vmem:[#allocation2 + $0xa0] sm:$0xff] }
  0xab   : > { %435 = vst [vmem:[#allocation2 + $0x18] sm:$0xf] %v414_v56  ;;  %436 = vst [vmem:[#allocation2 + $0x20] sm:$0xf] %v415_v57  ;;  %911 = vrot.lane.b32.xlu1 %v1956_v10, %s1860_s12  ;;  %847 = vrot.lane.b32.xlu0 %v1939_v7, %s1859_s11  ;;  %v2192_v47 = vld [vmem:[%s2366_s1] sm:$0xf] }
  0xad   : > { %v464_v58 = vpop.permute.xlu1 %463  ;;  %v2143_v59 = vpop.permute.xlu0 %401 }
  0xae   : > { %v481_v60 = vsel %vm479_vm2, %v2069_v16, %v464_v58  ;;  %v416_v61 = vsel %vm411_vm8, %v400_v54, %v2143_v59  ;;  %v981_v63 = vld [vmem:[#allocation2 + $0xf0] sm:$0xff] }
  0xaf   : > { %502 = vst [vmem:[#allocation2 + $0x10] sm:$0xf0] %v481_v60  ;;  %437 = vst [vmem:[#allocation2 + $0x28] sm:$0xf] %v416_v61  ;;  %913 = vrot.lane.b32.xlu0 %v1939_v7, %s1860_s12  ;;  %915 = vrot.lane.b32.xlu1 %v1960_v11, %s1860_s12  ;;  %v1738_v1 = vpack.c.bf16 %v981_v63, %v971_v62 }
  0xb1   : > { %v468_v4 = vpop.permute.xlu1 %467  ;;  %1739 = vmatpush1.bf16.msra.mxu0 %v1738_v1  ;;  %v466_v5 = vpop.permute.xlu0 %465 }
  0xb2   : > { %v482_v6 = vsel %vm479_vm2, %v464_v58, %v466_v5  ;;  %v483_v8 = vsel %vm479_vm2, %v466_v5, %v468_v4 }
  0xb3   : > { %503 = vst [vmem:[#allocation2 + $0x18] sm:$0xf0] %v482_v6  ;;  %504 = vst [vmem:[#allocation2 + $0x20] sm:$0xf0] %v483_v8  ;;  %1004 = vperm.xlu0 %1807, %v1001_v3  }
  0xb5   : > { %v532_v7 = vpop.permute.xlu1 %531  ;;  %v2159_v9 = vpop.permute.xlu0 %469 }
  0xb6   : > { %v549_v10 = vsel %vm547_vm7, %v2083_v21, %v532_v7  ;;  %v484_v11 = vsel %vm479_vm2, %v468_v4, %v2159_v9  ;;  %v953_v37 = vld [vmem:[#allocation2 + $0x10] sm:$0xff] }
  0xb7   : > { %570 = vst [vmem:[#allocation2 + $0x60] sm:$0xf] %v549_v10  ;;  %505 = vst [vmem:[#allocation2 + $0x28] sm:$0xf0] %v484_v11 }
  0xb9   : > { %v536_v12 = vpop.permute.xlu1 %535  ;;  %v534_v13 = vpop.permute.xlu0 %533 }
  0xba   : > { %v550_v14 = vsel %vm547_vm7, %v532_v7, %v534_v13  ;;  %v551_v15 = vsel %vm547_vm7, %v534_v13, %v536_v12  ;;  %v954_v34 = vld [vmem:[#allocation2 + $0x18] sm:$0xff]  ;;  %v955_v54 = vld [vmem:[#allocation2 + $0x20] sm:$0xff] }
  0xbb   : > { %571 = vst [vmem:[#allocation2 + $0x68] sm:$0xf] %v550_v14  ;;  %572 = vst [vmem:[#allocation2 + $0x70] sm:$0xf] %v551_v15 }
  0xbd   : > { %v600_v16 = vpop.permute.xlu1 %599  ;;  %v2167_v17 = vpop.permute.xlu0 %537 }
  0xbe   : > { %v617_v18 = vsel %vm615_vm9, %v2092_v25, %v600_v16  ;;  %v552_v19 = vsel %vm547_vm7, %v536_v12, %v2167_v17  ;;  %v956_v52 = vld [vmem:[#allocation2 + $0x28] sm:$0xff] }
  0xbf   : > { %638 = vst [vmem:[#allocation2 + $0x60] sm:$0xf0] %v617_v18  ;;  %573 = vst [vmem:[#allocation2 + $0x78] sm:$0xf] %v552_v19 }
  0xc1   : > { %v604_v20 = vpop.permute.xlu1 %603  ;;  %v602_v21 = vpop.permute.xlu0 %601 }
  0xc2   : > { %v618_v22 = vsel %vm615_vm9, %v600_v16, %v602_v21  ;;  %v619_v23 = vsel %vm615_vm9, %v602_v21, %v604_v20 }
  0xc3   : > { %639 = vst [vmem:[#allocation2 + $0x68] sm:$0xf0] %v618_v22  ;;  %640 = vst [vmem:[#allocation2 + $0x70] sm:$0xf0] %v619_v23 }
  0xc5   : > { %v900_v24 = vpop.permute.xlu1 %899  ;;  %v2175_v26 = vpop.permute.xlu0 %605 }
  0xc6   : > { %v620_v27 = vsel %vm615_vm9, %v604_v20, %v2175_v26  ;;  %v963_v30 = vld [vmem:[#allocation2 + $0x60] sm:$0xff] }
  0xc7   : > { %641 = vst [vmem:[#allocation2 + $0x78] sm:$0xf0] %v620_v27  ;;  %v1742_v38 = vpack.c.bf16 %v963_v30, %v953_v37 }
  0xc9   : > { %v898_v25 = vpop.permute.xlu1 %897  ;;  %v2179_v29 = vpop.permute.xlu0 %901 }
  0xca   : > { %v918_v31 = vsel %vm917_vm15, %v898_v25, %v900_v24  ;;  %v919_v33 = vsel %vm917_vm15, %v900_v24, %v2179_v29  ;;  %v964_v35 = vld [vmem:[#allocation2 + $0x68] sm:$0xff]  ;;  %v965_v48 = vld [vmem:[#allocation2 + $0x70] sm:$0xff] }
  0xcb   : > { %937 = vst [vmem:[#allocation2 + $0x140] sm:$0xf] %v918_v31  ;;  %938 = vst [vmem:[#allocation2 + $0x148] sm:$0xf] %v919_v33  ;;  %v1740_v36 = vpack.c.bf16 %v964_v35, %v954_v34  ;;  %v1750_v55 = vpack.c.bf16 %v965_v48, %v955_v54 }
  0xcd   : > { %v702_v39 = vpop.permute.xlu1 %701  ;;  %1741 = vmatprep.subr.bf16.mxu1 %v1740_v36  ;;  %v700_v41 = vpop.permute.xlu0 %699 }
  0xce   : > { %v716_v42 = vsel %vm713_vm12, %v2101_v28, %v700_v41  ;;  %v717_v43 = vsel %vm713_vm12, %v700_v41, %v702_v39  ;;  %1743 = vmatpush1.bf16.msra.mxu1 %v1742_v38  ;;  %v966_v44 = vld [vmem:[#allocation2 + $0x78] sm:$0xff] }
  0xcf   : > { %735 = vst [vmem:[#allocation2 + $0xb0] sm:$0xf0] %v716_v42  ;;  %736 = vst [vmem:[#allocation2 + $0xb8] sm:$0xf0] %v717_v43  ;;  %v1748_v53 = vpack.c.bf16 %v966_v44, %v956_v52 }
  0xd1   : > { %v2187_v45 = vpop.permute.xlu1 %705  ;;  %v704_v46 = vpop.permute.xlu0 %703 }
  0xd2   : > { %v718_v49 = vsel %vm713_vm12, %v702_v39, %v704_v46  ;;  %v719_v28 = vsel %vm713_vm12, %v704_v46, %v2187_v45  ;;  %v992_v50 = vld [vmem:[#allocation2 + $0x148] sm:$0xf]  ;;  %v991_v51 = vld [vmem:[#allocation2 + $0x140] sm:$0xf] }
  0xd3   : > { %737 = vst [vmem:[#allocation2 + $0xc0] sm:$0xf0] %v718_v49  ;;  %738 = vst [vmem:[#allocation2 + $0xc8] sm:$0xf0] %v719_v28  ;;  %1715 = vmatprep.subr.msk.mxu0 %vm1011_vm0, %v992_v50 }
  0xd4   : > { %1716 = vmatpush1.msk.msra.mxu0 %vm1011_vm0, %v991_v51 }
  0xd5   : > { %v770_v56 = vpop.permute.xlu1 %769  ;;  %1749 = vmatprep.subr.bf16.mxu0 %v1748_v53  ;;  %v768_v57 = vpop.permute.xlu0 %767  ;;  %1717 = vmatmul.mubr.msk.f32.vlgmr.msra.gmra.mrb[0].mxu0 %vm1007_vm1, %v2192_v47 }
  0xd6   : > { %v784_v58 = vsel %vm781_vm13, %v2109_v32, %v768_v57  ;;  %v785_v60 = vsel %vm781_vm13, %v768_v57, %v770_v56  ;;  %1751 = vmatpush1.bf16.msra.mxu0 %v1750_v55  ;;  %1248 = vmatprep.mubr.f32.mxu0 %v1852_v0  ;;  %v974_v13 = vld [vmem:[#allocation2 + $0xb8] sm:$0xff]  ;;  %v973_v16 = vld [vmem:[#allocation2 + $0xb0] sm:$0xff] }
  0xd7   : > { %803 = vst [vmem:[#allocation2 + $0x100] sm:$0xf] %v784_v58  ;;  %804 = vst [vmem:[#allocation2 + $0x108] sm:$0xf] %v785_v60 }
  0xd9   : > { %v2205_v61 = vpop.permute.xlu1 %773  ;;  %v772_v62 = vpop.permute.xlu0 %771 }
  0xda   : > { %v786_v63 = vsel %vm781_vm13, %v770_v56, %v772_v62  ;;  %v787_v1 = vsel %vm781_vm13, %v772_v62, %v2205_v61  ;;  %v976_v23 = vld [vmem:[#allocation2 + $0xc8] sm:$0xff] }
  0xdb   : > { %805 = vst [vmem:[#allocation2 + $0x110] sm:$0xf] %v786_v63  ;;  %806 = vst [vmem:[#allocation2 + $0x118] sm:$0xf] %v787_v1 }
  0xdd   : > { %v838_v3 = vpop.permute.xlu1 %837  ;;  %v836_v4 = vpop.permute.xlu0 %835 }
  0xde   : > { %v852_v32 = vsel %vm849_vm14, %v2117_v40, %v836_v4  ;;  %v853_v5 = vsel %vm849_vm14, %v836_v4, %v838_v3 }
  0xdf   : > { %871 = vst [vmem:[#allocation2 + $0x100] sm:$0xf0] %v852_v32  ;;  %872 = vst [vmem:[#allocation2 + $0x108] sm:$0xf0] %v853_v5 }
  0xe1   : > { %v2213_v6 = vpop.permute.xlu1 %841  ;;  %v840_v8 = vpop.permute.xlu0 %839 }
  0xe2   : > { %v854_v7 = vsel %vm849_vm14, %v838_v3, %v840_v8  ;;  %v855_v10 = vsel %vm849_vm14, %v840_v8, %v2213_v6 }
  0xe3   : > { %873 = vst [vmem:[#allocation2 + $0x110] sm:$0xf0] %v854_v7  ;;  %874 = vst [vmem:[#allocation2 + $0x118] sm:$0xf0] %v855_v10 }
  0xe5   : > { %v406_v11 = vpop.permute.xlu1 %405  ;;  %v404_v12 = vpop.permute.xlu0 %403 }
  0xe6   : > { %v417_v40 = vsel %vm411_vm8, %v2143_v59, %v404_v12  ;;  %v418_v14 = vsel %vm411_vm8, %v404_v12, %v406_v11  ;;  %v984_v15 = vld [vmem:[#allocation2 + $0x108] sm:$0xff]  ;;  %v983_v18 = vld [vmem:[#allocation2 + $0x100] sm:$0xff] }
  0xe7   : > { %438 = vst [vmem:[#allocation2 + $0x30] sm:$0xf] %v417_v40  ;;  %439 = vst [vmem:[#allocation2 + $0x38] sm:$0xf] %v418_v14  ;;  %v1744_v19 = vpack.c.bf16 %v984_v15, %v974_v13  ;;  %v1746_v20 = vpack.c.bf16 %v983_v18, %v973_v16  ;;  %v975_v59 = vld [vmem:[#allocation2 + $0xc0] sm:$0xff] }
  0xe9   : > { %v410_v21 = vpop.permute.xlu1 %409  ;;  %1745 = vmatprep.subr.bf16.mxu1 %v1744_v19  ;;  %v408_v22 = vpop.permute.xlu0 %407 }
  0xea   : > { %v419_v24 = vsel %vm411_vm8, %v406_v11, %v408_v22  ;;  %v420_v27 = vsel %vm411_vm8, %v408_v22, %v410_v21  ;;  %1747 = vmatpush1.bf16.msra.mxu1 %v1746_v20  ;;  %v986_v25 = vld [vmem:[#allocation2 + $0x118] sm:$0xff]  ;;  %v985_v30 = vld [vmem:[#allocation2 + $0x110] sm:$0xff]  ;;  %vm946_vm8 = vcmask 756736  }
  0xeb   : > { %440 = vst [vmem:[#allocation2 + $0x40] sm:$0xf] %v419_v24  ;;  %441 = vst [vmem:[#allocation2 + $0x48] sm:$0xf] %v420_v27  ;;  %v1752_v31 = vpack.c.bf16 %v986_v25, %v976_v23  ;;  %v1754_v33 = vpack.c.bf16 %v985_v30, %v975_v59 }
  0xed   : > { %v474_v34 = vpop.permute.xlu1 %473  ;;  %1753 = vmatprep.subr.bf16.mxu0 %v1752_v31  ;;  %v472_v35 = vpop.permute.xlu0 %471 }
  0xee   : > { %v485_v36 = vsel %vm479_vm2, %v2159_v9, %v472_v35  ;;  %v486_v37 = vsel %vm479_vm2, %v472_v35, %v474_v34  ;;  %1755 = vmatpush1.bf16.msra.mxu0 %v1754_v33 }
  0xef   : > { %506 = vst [vmem:[#allocation2 + $0x30] sm:$0xf0] %v485_v36  ;;  %507 = vst [vmem:[#allocation2 + $0x38] sm:$0xf0] %v486_v37 }
  0xf1   : > { %v478_v38 = vpop.permute.xlu1 %477  ;;  %v476_v39 = vpop.permute.xlu0 %475 }
  0xf2   : > { %v487_v41 = vsel %vm479_vm2, %v474_v34, %v476_v39  ;;  %v488_v42 = vsel %vm479_vm2, %v476_v39, %v478_v38  ;;  %vm742_vm2 = vcmask 1039364  }
  0xf3   : > { %508 = vst [vmem:[#allocation2 + $0x40] sm:$0xf0] %v487_v41  ;;  %509 = vst [vmem:[#allocation2 + $0x48] sm:$0xf0] %v488_v42 }
  0xf5   : > { %v542_v43 = vpop.permute.xlu1 %541  ;;  %v540_v44 = vpop.permute.xlu0 %539 }
  0xf6   : > { %v553_v46 = vsel %vm547_vm7, %v2167_v17, %v540_v44  ;;  %v554_v9 = vsel %vm547_vm7, %v540_v44, %v542_v43  ;;  %v958_v13 = vld [vmem:[#allocation2 + $0x38] sm:$0xff]  ;;  %v957_v14 = vld [vmem:[#allocation2 + $0x30] sm:$0xff] }
  0xf7   : > { %574 = vst [vmem:[#allocation2 + $0x80] sm:$0xf] %v553_v46  ;;  %575 = vst [vmem:[#allocation2 + $0x88] sm:$0xf] %v554_v9 }
  0xf9   : > { %v546_v48 = vpop.permute.xlu1 %545  ;;  %v544_v49 = vpop.permute.xlu0 %543 }
  0xfa   : > { %v555_v28 = vsel %vm547_vm7, %v542_v43, %v544_v49  ;;  %v556_v50 = vsel %vm547_vm7, %v544_v49, %v546_v48  ;;  %v960_v24 = vld [vmem:[#allocation2 + $0x48] sm:$0xff]  ;;  %v959_v25 = vld [vmem:[#allocation2 + $0x40] sm:$0xff]  ;;  %vm880_vm7 = vcmask 1048308  }
  0xfb   : > { %576 = vst [vmem:[#allocation2 + $0x90] sm:$0xf] %v555_v28  ;;  %577 = vst [vmem:[#allocation2 + $0x98] sm:$0xf] %v556_v50 }
  0xfd   : > { %v610_v51 = vpop.permute.xlu1 %609  ;;  %v608_v52 = vpop.permute.xlu0 %607 }
  0xfe   : > { %v621_v53 = vsel %vm615_vm9, %v2175_v26, %v608_v52  ;;  %v622_v54 = vsel %vm615_vm9, %v608_v52, %v610_v51 }
  0xff   : > { %642 = vst [vmem:[#allocation2 + $0x80] sm:$0xf0] %v621_v53  ;;  %643 = vst [vmem:[#allocation2 + $0x88] sm:$0xf0] %v622_v54 }
 0x101   : > { %v614_v17 = vpop.permute.xlu1 %613  ;;  %v612_v55 = vpop.permute.xlu0 %611 }
 0x102   : > { %v623_v56 = vsel %vm615_vm9, %v610_v51, %v612_v55  ;;  %v624_v57 = vsel %vm615_vm9, %v612_v55, %v614_v17  ;;  %vm948_vm9 = vcmask 1044200  }
 0x103   : > { %644 = vst [vmem:[#allocation2 + $0x90] sm:$0xf0] %v623_v56  ;;  %645 = vst [vmem:[#allocation2 + $0x98] sm:$0xf0] %v624_v57 }
 0x105   : > { %v906_v58 = vpop.permute.xlu1 %905  ;;  %v904_v60 = vpop.permute.xlu0 %903 }
 0x106   : > { %v920_v62 = vsel %vm917_vm15, %v2179_v29, %v904_v60  ;;  %v921_v63 = vsel %vm917_vm15, %v904_v60, %v906_v58  ;;  %v968_v32 = vld [vmem:[#allocation2 + $0x88] sm:$0xff]  ;;  %v967_v7 = vld [vmem:[#allocation2 + $0x80] sm:$0xff] }
 0x107   : > { %939 = vst [vmem:[#allocation2 + $0x150] sm:$0xf] %v920_v62  ;;  %940 = vst [vmem:[#allocation2 + $0x158] sm:$0xf] %v921_v63  ;;  %v1756_v40 = vpack.c.bf16 %v968_v32, %v958_v13  ;;  %v1758_v15 = vpack.c.bf16 %v967_v7, %v957_v14  ;;  %v1397_v62 = vld [vmem:[%s2368_s3] sm:$0xff]  ;;  %v1403_v63 = vlaneseq }
 0x108   : > { %vm1399_vm10 = vcmp.gt.f32.partialorder %v1397_v62, 0.5 }
 0x109   : > { %v2241_v26 = vpop.permute.xlu1 %909  ;;  %v908_v1 = vpop.permute.xlu0 %907 }
 0x10a   : > { %v922_v3 = vsel %vm917_vm15, %v906_v58, %v908_v1  ;;  %v923_v4 = vsel %vm917_vm15, %v908_v1, %v2241_v26  ;;  %v970_v16 = vld [vmem:[#allocation2 + $0x98] sm:$0xff]  ;;  %v969_v19 = vld [vmem:[#allocation2 + $0x90] sm:$0xff] }
 0x10b   : > { %941 = vst [vmem:[#allocation2 + $0x160] sm:$0xf] %v922_v3  ;;  %942 = vst [vmem:[#allocation2 + $0x168] sm:$0xf] %v923_v4  ;;  %v1764_v27 = vpack.c.bf16 %v970_v16, %v960_v24  ;;  %v1401_v3 = vsel %vm1399_vm10, 1, %v1861_v2 }
 0x10d   : > { %v710_v5 = vpop.permute.xlu1 %709  ;;  %v708_v8 = vpop.permute.xlu0 %707 }
 0x10e   : > { %v720_v29 = vsel %vm713_vm12, %v2187_v45, %v708_v8  ;;  %v721_v10 = vsel %vm713_vm12, %v708_v8, %v710_v5  ;;  %v994_v11 = vld [vmem:[#allocation2 + $0x158] sm:$0xf]  ;;  %v993_v12 = vld [vmem:[#allocation2 + $0x150] sm:$0xf] }
 0x10f   : > { %739 = vst [vmem:[#allocation2 + $0xd0] sm:$0xf0] %v720_v29  ;;  %740 = vst [vmem:[#allocation2 + $0xd8] sm:$0xf0] %v721_v10  ;;  %1718 = vmatprep.subr.msk.mxu1 %vm1011_vm0, %v994_v11 }
 0x110   : > { %1719 = vmatpush1.msk.msra.mxu1 %vm1011_vm0, %v993_v12 }
 0x111   : > { %v776_v18 = vpop.permute.xlu1 %775  ;;  %1757 = vmatprep.subr.bf16.mxu1 %v1756_v40  ;;  %v712_v45 = vpop.permute.xlu0 %711  ;;  %1720 = vmatmul.mubr.msk.f32.vlgmr.msra.gmra.mrb[0].mxu1 %vm1007_vm1, %v2192_v47 }
 0x112   : > { %v788_v20 = vsel %vm781_vm13, %v2205_v61, %v776_v18  ;;  %v722_v21 = vsel %vm713_vm12, %v710_v5, %v712_v45  ;;  %743 = vst.msk [vmem:[#allocation2 + $0xe8] sm:$0xf0] %vm742_vm2, %v712_v45  ;;  %1759 = vmatpush1.bf16.msra.mxu1 %v1758_v15  ;;  %v996_v22 = vld [vmem:[#allocation2 + $0x168] sm:$0xf]  ;;  %v995_v23 = vld [vmem:[#allocation2 + $0x160] sm:$0xf]  ;;  %1319 = vmatprep.mubr.f32.mxu1 %v1852_v0 }
 0x113   : > { %807 = vst [vmem:[#allocation2 + $0x120] sm:$0xf] %v788_v20  ;;  %741 = vst [vmem:[#allocation2 + $0xe0] sm:$0xf0] %v722_v21  ;;  %1721 = vmatprep.subr.msk.mxu0 %vm1011_vm0, %v996_v22  ;;  %v1766_v61 = vpack.c.bf16 %v969_v19, %v959_v25  ;;  %v1493_v19 = vld [vmem:[%s2315_s30] sm:$0xff] }
 0x114   : > { %745 = vst.msk [vmem:[#allocation2 + $0xe8] sm:$0xf0] %vm744_vm3, %v1852_v0  ;;  %1722 = vmatpush1.msk.msra.mxu0 %vm1011_vm0, %v995_v23 }
 0x115   : > { %v780_v59 = vpop.permute.xlu1 %779  ;;  %1765 = vmatprep.subr.bf16.mxu0 %v1764_v27  ;;  %v778_v30 = vpop.permute.xlu0 %777  ;;  %1723 = vmatmul.mubr.msk.f32.vlgmr.msra.gmra.mrb[2].mxu0 %vm1007_vm1, %v2192_v47  ;;  %v1503_v27 = vcombine.high %v1493_v19, %v1493_v19 }
 0x116   : > { %811 = vst.msk [vmem:[#allocation2 + $0x138] sm:$0xf] %vm810_vm4, %v780_v59  ;;  %v789_v31 = vsel %vm781_vm13, %v776_v18, %v778_v30  ;;  %v790_v33 = vsel %vm781_vm13, %v778_v30, %v780_v59  ;;  %1767 = vmatpush1.bf16.msra.mxu0 %v1766_v61  ;;  %1390 = vmatprep.mubr.f32.mxu0 %v1852_v0  ;;  %v978_v44 = vld [vmem:[#allocation2 + $0xd8] sm:$0xff]  ;;  %v977_v49 = vld [vmem:[#allocation2 + $0xd0] sm:$0xff]  ;;  %v1463_v18 = vld [vmem:[%s2309_s27] sm:$0xff] }
 0x117   : > { %813 = vst.msk [vmem:[#allocation2 + $0x138] sm:$0xf] %vm812_vm5, %v1852_v0  ;;  %808 = vst [vmem:[#allocation2 + $0x128] sm:$0xf] %v789_v31  ;;  %v1473_v22 = vcombine.high %v1463_v18, %v1463_v18 }
 0x118   : > { %809 = vst [vmem:[#allocation2 + $0x130] sm:$0xf] %v790_v33 }
 0x119   : > { %v846_v34 = vpop.permute.xlu1 %845  ;;  %v844_v35 = vpop.permute.xlu0 %843 }
 0x11a   : > { %v856_v36 = vsel %vm849_vm14, %v2213_v6, %v844_v35  ;;  %v857_v37 = vsel %vm849_vm14, %v844_v35, %v846_v34  ;;  %v979_v54 = vld [vmem:[#allocation2 + $0xe0] sm:$0xff] }
 0x11b   : > { %875 = vst [vmem:[#allocation2 + $0x120] sm:$0xf0] %v856_v36  ;;  %876 = vst [vmem:[#allocation2 + $0x128] sm:$0xf0] %v857_v37  ;;  %v980_v52 = vld [vmem:[#allocation2 + $0xe8] sm:$0xff] }
 0x11d   : > { %v912_v38 = vpop.permute.xlu1 %911  ;;  %v848_v39 = vpop.permute.xlu0 %847 }
 0x11e   : > { %v924_v41 = vsel %vm917_vm15, %v2241_v26, %v912_v38  ;;  %v858_v42 = vsel %vm849_vm14, %v846_v34, %v848_v39  ;;  %879 = vst.msk [vmem:[#allocation2 + $0x138] sm:$0xf0] %vm878_vm6, %v848_v39  ;;  %v1404_v26 = vshrl.u32 %v1403_v63, 7 }
 0x11f   : > { %943 = vst [vmem:[#allocation2 + $0x170] sm:$0xf] %v924_v41  ;;  %877 = vst [vmem:[#allocation2 + $0x130] sm:$0xf0] %v858_v42  ;;  %v1494_v41 = vld [vmem:[%s2315_s30 + $0x8] sm:$0xff] }
 0x120   : > { %881 = vst.msk [vmem:[#allocation2 + $0x138] sm:$0xf0] %vm880_vm7, %v1852_v0  ;;  %v1421_v1 = vsub.s32 4, %v1404_v26  ;;  %v1425_v32 = vsub.s32 5, %v1404_v26  ;;  %v1429_v7 = vsub.s32 6, %v1404_v26  ;;  %v1433_v29 = vsub.s32 7, %v1404_v26 }
 0x121   : > { %v914_v6 = vpop.permute.xlu0 %913  ;;  %v916_v43 = vpop.permute.xlu1 %915  ;;  %v1405_v10 = vsub.s32 0, %v1404_v26  ;;  %v1409_v11 = vsub.s32 1, %v1404_v26  ;;  %v1413_v34 = vsub.s32 2, %v1404_v26  ;;  %v1417_v35 = vsub.s32 3, %v1404_v26 }
 0x122   : > { %v925_v46 = vsel %vm917_vm15, %v912_v38, %v914_v6  ;;  %v926_v9 = vsel %vm917_vm15, %v914_v6, %v916_v43  ;;  %947 = vst.msk [vmem:[#allocation2 + $0x188] sm:$0xf] %vm946_vm8, %v916_v43  ;;  %v988_v48 = vld [vmem:[#allocation2 + $0x128] sm:$0xff]  ;;  %v987_v28 = vld [vmem:[#allocation2 + $0x120] sm:$0xff]  ;;  %v2289_v4 = vrot.slane %v1401_v3, %v1421_v1  ;;  %v2291_v5 = vrot.slane %v1401_v3, %v1425_v32  ;;  %v1466_v32 = vld [vmem:[%s2309_s27 + $0x18] sm:$0xff] }
 0x123   : > { %944 = vst [vmem:[#allocation2 + $0x178] sm:$0xf] %v925_v46  ;;  %945 = vst [vmem:[#allocation2 + $0x180] sm:$0xf] %v926_v9  ;;  %v1760_v50 = vpack.c.bf16 %v988_v48, %v978_v44  ;;  %v1762_v51 = vpack.c.bf16 %v987_v28, %v977_v49  ;;  %v2297_v12 = vrot.slane %v1401_v3, %v1429_v7  ;;  %v1464_v38 = vld [vmem:[%s2309_s27 + $0x8] sm:$0xff]  ;;  %v1465_v44 = vld [vmem:[%s2309_s27 + $0x10] sm:$0xff] }
 0x124   : > { %949 = vst.msk [vmem:[#allocation2 + $0x188] sm:$0xf] %vm948_vm9, %v1852_v0  ;;  %v2299_v13 = vrot.slane %v1401_v3, %v1433_v29  ;;  %v1406_v15 = vrot.slane %v1401_v3, %v1405_v10  ;;  %v1414_v36 = vrot.slane %v1401_v3, %v1413_v34  ;;  %v1418_v37 = vrot.slane %v1401_v3, %v1417_v35 }
 0x125   : > { %1761 = vmatprep.subr.bf16.mxu1 %v1760_v50  ;;  %v1474_v43 = vcombine.high %v1464_v38, %v1464_v38  ;;  %v1504_v48 = vcombine.high %v1494_v41, %v1494_v41  ;;  %v1495_v50 = vld [vmem:[%s2315_s30 + $0x10] sm:$0xff]  ;;  %vm1449_vm2 = vcmp.eq.s32.totalorder %v2297_v12, 1 }
 0x126   : > { %1763 = vmatpush1.bf16.msra.mxu1 %v1762_v51  ;;  %v989_v17 = vld [vmem:[#allocation2 + $0x130] sm:$0xff]  ;;  %vm1443_vm12 = vcmp.eq.s32.totalorder %v1406_v15, 1  ;;  %vm1445_vm14 = vcmp.eq.s32.totalorder %v1414_v36, 1  ;;  %vm1446_vm15 = vcmp.eq.s32.totalorder %v1418_v37, 1  ;;  %vm1450_vm3 = vcmp.eq.s32.totalorder %v2299_v13, 1 }
 0x127   : > { %v990_v53 = vld [vmem:[#allocation2 + $0x138] sm:$0xff]  ;;  %v1770_v56 = vpack.c.bf16 %v989_v17, %v979_v54  ;;  %v997_v60 = vld [vmem:[#allocation2 + $0x170] sm:$0xf]  ;;  %v1475_v17 = vcombine.high %v1465_v44, %v1465_v44 }
 0x128   : > { %v1768_v55 = vpack.c.bf16 %v990_v53, %v980_v52 }
 0x12a   : > { %1769 = vmatprep.subr.bf16.mxu0 %v1768_v55  ;;  %v998_v57 = vld [vmem:[#allocation2 + $0x178] sm:$0xf]  ;;  %v999_v0 = vld [vmem:[#allocation2 + $0x180] sm:$0xf] }
 0x12b   : > { %1771 = vmatpush1.bf16.msra.mxu0 %v1770_v56  ;;  %v1000_v58 = vld [vmem:[#allocation2 + $0x188] sm:$0xf]  ;;  %1724 = vmatprep.subr.msk.mxu1 %vm1011_vm0, %v998_v57 }
 0x12c   : > { %1727 = vmatprep.subr.msk.mxu0 %vm1011_vm0, %v1000_v58  ;;  %1725 = vmatpush1.msk.msra.mxu1 %vm1011_vm0, %v997_v60  ;;  %v1505_v60 = vcombine.high %v1495_v50, %v1495_v50 }
 0x12d   : > { %1726 = vmatmul.mubr.msk.f32.vlgmr.msra.gmra.mrb[2].mxu1 %vm1007_vm1, %v2192_v47 }
 0x12f   : > { %1728 = vmatpush1.msk.msra.mxu0 %vm1011_vm0, %v999_v0  ;;  %vm1447_vm0 = vcmp.eq.s32.totalorder %v2289_v4, 1 }
 0x130   : > { %1729 = vmatmul.mubr.msk.f32.vlgmr.msra.gmra.mrb[4].mxu0 %vm1007_vm1, %v2192_v47  ;;  %v1398_v47 = vld [vmem:[%s2368_s3 + $0x8] sm:$0x3]  ;;  %vm1448_vm1 = vcmp.eq.s32.totalorder %v2291_v5, 1 }
 0x131   : > { %vm1400_vm11 = vcmp.gt.f32.partialorder %v1398_v47, 0.5  ;;  %v1496_v47 = vld [vmem:[%s2315_s30 + $0x18] sm:$0xff] }
 0x132   : > { %v1402_v8 = vsel %vm1400_vm11, 1, %v1861_v2  ;;  %v1410_v2 = vrot.slane %v1401_v3, %v1409_v11  ;;  %v2317_v16 = vpop.permute.xlu0 %1004 }
 0x133   : > { %v2301_v40 = vrot.slane %v1402_v8, %v1405_v10  ;;  %v2303_v14 = vrot.slane %v1402_v8, %v1409_v11  ;;  %v1467_v8 = vld [vmem:[%s2309_s27 + $0x20] sm:$0xff]  ;;  %v1476_v10 = vcombine.high %v1466_v32, %v1466_v32 }
 0x134   : > { %vm1444_vm13 = vcmp.eq.s32.totalorder %v1410_v2, 1  ;;  %v1497_v2 = vld [vmem:[%s2315_s30 + $0x20] sm:$0xff] }
 0x135   : > { %vm1451_vm4 = vcmp.eq.s32.totalorder %v2301_v40, 1  ;;  %vm1452_vm5 = vcmp.eq.s32.totalorder %v2303_v14, 1 }
 0x1a8   : > { %v1108_v45 = vpop.f32.mrb[0].mxu0 }
 0x1a9   : > { %v1110_v20 = vpop.f32.mrb[1].mxu0  ;;  %v1109_v21 = vadd.f32 %v1108_v45, %v2317_v16  ;;  %v1506_v45 = vcombine.high %v1496_v47, %v1496_v47 }
 0x1aa   : > { %v1111_v23 = vadd.f32 %v1110_v20, %v2317_v16  ;;  %v1477_v20 = vcombine.high %v1467_v8, %v1467_v8 }
 0x1ab   : > { %v1453_v24 = vsel %vm1443_vm12, %v1109_v21, 0.0 }
 0x1ac   : > { %v1483_v25 = vmul.f32 %v1463_v18, %v1453_v24  ;;  %v1454_v61 = vsel %vm1444_vm13, %v1111_v23, 0.0 }
 0x1ad   : > { %v1484_v59 = vmul.f32 %v1473_v22, %v1454_v61 }
 0x1ae   : > { %v1513_v30 = vmul.f32 %v1493_v19, %v1483_v25 }
 0x1af   : > { %v1514_v31 = vmul.f32 %v1503_v27, %v1484_v59  ;;  %v1507_v27 = vcombine.high %v1497_v2, %v1497_v2 }
 0x1b1   : > { %v1533_v33 = vcombine.low %v1513_v30, %v1514_v31 }
 0x1b3   : > { %1543 = vst [vmem:[%s2327_s9] sm:$0xff] %v1533_v33 }
 0x1e4   : > { %v1179_v39 = vpop.f32.mrb[0].mxu1 }
 0x1e5   : > { %v1180_v42 = vadd.f32 %v1179_v39, %v2317_v16  ;;  %v1181_v6 = vpop.f32.mrb[1].mxu1 }
 0x1e6   : > { %v1182_v46 = vadd.f32 %v1181_v6, %v2317_v16 }
 0x1e7   : > { %v1455_v9 = vsel %vm1445_vm14, %v1180_v42, 0.0 }
 0x1e8   : > { %v1485_v49 = vmul.f32 %v1464_v38, %v1455_v9  ;;  %v1250_v28 = vpop.f32.mrb[2].mxu0  ;;  %v1456_v51 = vsel %vm1446_vm15, %v1182_v46, 0.0 }
 0x1e9   : > { %v1251_v52 = vadd.f32 %v1250_v28, %v2317_v16  ;;  %v1486_v53 = vmul.f32 %v1474_v43, %v1456_v51  ;;  %v1252_v54 = vpop.f32.mrb[3].mxu0 }
 0x1ea   : > { %v1515_v55 = vmul.f32 %v1494_v41, %v1485_v49  ;;  %v1253_v56 = vadd.f32 %v1252_v54, %v2317_v16 }
 0x1eb   : > { %v1457_v57 = vsel %vm1447_vm0, %v1251_v52, 0.0  ;;  %v1516_v58 = vmul.f32 %v1504_v48, %v1486_v53 }
 0x1ec   : > { %v1487_v0 = vmul.f32 %v1465_v44, %v1457_v57  ;;  %v1458_v62 = vsel %vm1448_vm1, %v1253_v56, 0.0 }
 0x1ed   : > { %v1534_v63 = vcombine.low %v1515_v55, %v1516_v58  ;;  %v1488_v26 = vmul.f32 %v1475_v17, %v1458_v62 }
 0x1ee   : > { %v1517_v1 = vmul.f32 %v1495_v50, %v1487_v0 }
 0x1ef   : > { %1544 = vst [vmem:[%s2327_s9 + $0x8] sm:$0xff] %v1534_v63  ;;  %v1518_v3 = vmul.f32 %v1505_v60, %v1488_v26 }
 0x1f1   : > { %v1535_v4 = vcombine.low %v1517_v1, %v1518_v3 }
 0x1f3   : > { %1545 = vst [vmem:[%s2327_s9 + $0x10] sm:$0xff] %v1535_v4 }
 0x200   : > { %v1321_v5 = vpop.f32.mrb[2].mxu1 }
 0x201   : > { %v1322_v7 = vadd.f32 %v1321_v5, %v2317_v16  ;;  %v1323_v29 = vpop.f32.mrb[3].mxu1 }
 0x202   : > { %v1324_v11 = vadd.f32 %v1323_v29, %v2317_v16 }
 0x203   : > { %v1392_v15 = vpop.f32.mrb[4].mxu0  ;;  %v1459_v18 = vsel %vm1449_vm2, %v1322_v7, 0.0 }
 0x204   : > { %v1393_v12 = vadd.f32 %v1392_v15, %v2317_v16  ;;  %v1394_v19 = vpop.f32.mrb[5].mxu0  ;;  %v1489_v21 = vmul.f32 %v1466_v32, %v1459_v18  ;;  %v1460_v22 = vsel %vm1450_vm3, %v1324_v11, 0.0 }
 0x205   : > { %v1395_v13 = vadd.f32 %v1394_v19, %v2317_v16  ;;  %v1490_v23 = vmul.f32 %v1476_v10, %v1460_v22 }
 0x206   : > { %v1461_v24 = vsel %vm1451_vm4, %v1393_v12, 0.0  ;;  %v1519_v25 = vmul.f32 %v1496_v47, %v1489_v21 }
 0x207   : > { %v1491_v40 = vmul.f32 %v1467_v8, %v1461_v24  ;;  %v1462_v61 = vsel %vm1452_vm5, %v1395_v13, 0.0  ;;  %v1520_v59 = vmul.f32 %v1506_v45, %v1490_v23 }
 0x208   : > { %v1492_v14 = vmul.f32 %v1477_v20, %v1462_v61 }
 0x209   : > { %v1521_v30 = vmul.f32 %v1497_v2, %v1491_v40  ;;  %v1536_v31 = vcombine.low %v1519_v25, %v1520_v59 }
 0x20a   : > { %v1522_v33 = vmul.f32 %v1507_v27, %v1492_v14 }
 0x20b   : > { %1546 = vst [vmem:[%s2327_s9 + $0x18] sm:$0xff] %v1536_v31 }
 0x20c   : > { %v1537_v34 = vcombine.low %v1521_v30, %v1522_v33 }
 0x20e   : > { %1547 = vst [vmem:[%s2327_s9 + $0x20] sm:$0xff] %v1537_v34 }
 0x20f PF: > { %s16_s23 = sadd.s32 1, %s1850_s23   ;;  %s2372_s21 = smov %s1846_s22 }
 0x210   : > { %p13_p5 = scmp.ge.s32.totalorder %s16_s23, 4   ;;  %s2373_s22 = smov %s2375_s24 }
 0x212   :  { %15 = sbr.rel (!%p13_p5) target bundleno = 2 (0x2), region = 86 }

// kernel: ncd_forward.14
= control target key start
LH: loop header
LB: loop body
LE: loop exit
PB: predicated region body
PF: predicated region fallthrough
CT: control target
= control target key end

     0   :  { %s2808_s18 = smov 0   ;;  %s2810_s19 = smov 0   ;;  %s3739_s0 = inlined_call_operand.vmem [shape: f32[2,4,1280], index: 0, kind: input, shape index: {}]   ;;  %s3740_s1 = inlined_call_operand.vmem [shape: f32[2,8,1280], index: 1, kind: input, shape index: {}]   ;;  %s3741_s2 = inlined_call_operand.vmem [shape: f32[12,108], index: 2, kind: input, shape index: {}]   ;;  %s3742_s3 = inlined_call_operand.vmem [shape: f32[12,1], index: 3, kind: input, shape index: {}]   ;;  %s3743_s4 = inlined_call_operand.vmem [shape: f32[1,1280], index: 4, kind: input, shape index: {}]   ;;  %s3744_s5 = inlined_call_operand.vmem [shape: f32[2,12,1280], index: 5, kind: output, shape index: {}]  }
   0x1   :  { %s2812_s20 = smov 0  }
   0x2 LB: > { %s27_s21 = sadd.s32 1, %s2761_s19  ;;  %p2500_p0 = scmp.ge.s32.totalorder %s2765_s20, 1  ;;  %s2765_s20 = sphi %s2812_s20, %s15_s20   ;;  %s2761_s19 = sphi %s2810_s19, %s3780_s19   ;;  %s2757_s18 = sphi %s2808_s18, %s3779_s18  }
   0x3   : > { %p29_p1 = scmp.ge.s32.totalorder %s27_s21, 2  ;;  %p233_p2 = scmp.lt.s32.totalorder %s2765_s20, 3 }
   0x5   : > { %s3782_s21 = smov (%p29_p1, %s27_s21), 0  ;;  %p234_p3 = pnand %p2500_p0, %p233_p2 }
   0x6   : > { %p281_p4 = scmp.lt.s32.totalorder (!%p234_p3), %s2757_s18, 1  ;;  %v2767_v0 = vmov (!%p234_p3), 0.0   ;;  %s2768_s30 = smov (!%p234_p3), 35   ;;  %vm369_vm0 = vcmask (!%p234_p3), 1043736   ;;  %vm380_vm1 = vcmask (!%p234_p3), 281600   ;;  %vm349_vm2 = vcmask (!%p234_p3), 285696  }
   0x7   : > { %237 = sbr.rel (%p234_p3) target bundleno = 695 (0x2b7), region = 40  ;;  %1948 = vmatprep.mubr.f32.mxu0 (!%p234_p3), %v2767_v0  ;;  %2025 = vmatprep.mubr.f32.mxu1 (!%p234_p3), %v2767_v0  ;;  %s2769_s6 = smov (!%p234_p3), 34   ;;  %vm417_vm3 = vcmask (!%p234_p3), 277504   ;;  %vm437_vm4 = vcmask (!%p234_p3), 1047828   ;;  %vm448_vm5 = vcmask (!%p234_p3), 277508   ;;  %vm485_vm6 = vcmask (!%p234_p3), 269312  }
   0x8   : > { %s2770_s7 = smov (!%p234_p3), 33   ;;  %s2771_s8 = smov (!%p234_p3), 1   ;;  %vm505_vm7 = vcmask (!%p234_p3), 1043720   ;;  %vm516_vm8 = vcmask (!%p234_p3), 265216   ;;  %vm553_vm9 = vcmask (!%p234_p3), 7168   ;;  %vm573_vm10 = vcmask (!%p234_p3), 1047564  }
   0x9   : > { %s2772_s9 = smov (!%p234_p3), 127   ;;  %s2773_s10 = smov (!%p234_p3), 95   ;;  %vm584_vm11 = vcmask (!%p234_p3), 7172   ;;  %vm651_vm12 = vcmask (!%p234_p3), 1039360   ;;  %vm3746_vm13 = vcmask (!%p234_p3), 777216   ;;  %vm3745_vm14 = vcmask (!%p234_p3), 769024  }
   0xa   : > { %s2774_s11 = smov (!%p234_p3), 94   ;;  %s2775_s12 = smov (!%p234_p3), 93   ;;  %vm855_vm15 = vcmask (!%p234_p3), 760832  }
   0xe   : > { %s3784_s18 = smov (!%p281_p4, %s2757_s18), 1 }
   0xf   : > { %s2690_s22 = smul.u32 40, %s3784_s18 }
  0x10   : > { %s2691_s23 = smul.u32 80, %s3784_s18 }
  0x11   : > { %s2835_s26 = scalar_lea.vmem %s3739_s0, %s2690_s22 }
  0x12   : > { %v315_v1 = vld [vmem:[%s2835_s26 + $0x8] sm:$0xff]  ;;  %v2839_v2 = vld [vmem:[%s2835_s26] sm:$0xff]  ;;  %s2844_s29 = scalar_lea.vmem %s3740_s1, %s2691_s23  ;;  %v2880_v11 = vld [vmem:[%s2835_s26 + $0x10] sm:$0xff] }
  0x13   : > { %333 = vrot.lane.b32.xlu1 %v315_v1, %s2768_s30  ;;  %v325_v3 = vcombine.high %v315_v1, %v315_v1  ;;  %329 = vrot.lane.b32.xlu0 %v2839_v2, %s2768_s30  ;;  %v324_v4 = vcombine.high %v2839_v2, %v2839_v2  ;;  %606 = vst [vmem:[#allocation2 + $0xa0] sm:$0xf] %v2839_v2  ;;  %608 = vst [vmem:[#allocation2 + $0xb0] sm:$0xf] %v315_v1  ;;  %v889_v5 = vld [vmem:[%s2844_s29 + $0x8] sm:$0xff]  ;;  %v891_v6 = vld [vmem:[%s2844_s29 + $0x18] sm:$0xff] }
  0x14   : > { %v2854_v7 = vrot.slane %v889_v5, 4  ;;  %v2856_v8 = vrot.slane %v891_v6, 4  ;;  %v392_v9 = vcombine.low %v2839_v2, %v2839_v2  ;;  %v393_v10 = vcombine.low %v315_v1, %v315_v1  ;;  %v888_v13 = vld [vmem:[%s2844_s29] sm:$0xff]  ;;  %v890_v15 = vld [vmem:[%s2844_s29 + $0x10] sm:$0xff]  ;;  %v3033_v48 = vld [vmem:[%s2835_s26 + $0x18] sm:$0xff] }
  0x15   : > { %607 = vst [vmem:[#allocation2 + $0xa8] sm:$0xf] %v324_v4  ;;  %609 = vst [vmem:[#allocation2 + $0xb8] sm:$0xf] %v325_v3  ;;  %v2887_v12 = vcombine.low %v2880_v11, %v2880_v11  ;;  %v2911_v14 = vrot.slane %v888_v13, 4  ;;  %v2918_v16 = vrot.slane %v890_v15, 4  ;;  %v3024_v47 = vcombine.high %v2880_v11, %v2880_v11 }
  0x16   : > { %1301 = vst [vmem:[#allocation2 + $0x2d8] ss:$-76 sps:$4 sm:$0xff] %v2854_v7   ;;  %1303 = vst [vmem:[#allocation2 + $0x2e8] ss:$-76 sps:$4 sm:$0xff] %v2856_v8   ;;  %v1262_v17 = vld [vmem:[%s2844_s29 + $0x10] sm:$0xff]  ;;  %v1260_v19 = vld [vmem:[%s2844_s29] sm:$0xff]  ;;  %v3046_v53 = vcombine.high %v3033_v48, %v3033_v48 }
  0x17   : > { %399 = vrot.lane.b32.xlu1 %v2839_v2, %s2769_s6  ;;  %331 = vrot.lane.b32.xlu0 %v324_v4, %s2768_s30  ;;  %v1282_v18 = vrot.slane %v1262_v17, 4  ;;  %v1280_v20 = vrot.slane %v1260_v19, 4  ;;  %v1324_v21 = vld [vmem:[%s2844_s29 + $0x20] sm:$0xff] }
  0x18   : > { %v2959_v22 = vrot.slane %v1324_v21, 4 }
  0x19   : > { %1302 = vst [vmem:[#allocation2 + $0x2e0] ss:$-76 sps:$4 sm:$0xff] %v1282_v18   ;;  %1300 = vst [vmem:[#allocation2 + $0x2d0] ss:$-76 sps:$4 sm:$0xff] %v1280_v20  }
  0x1b   : > { %335 = vrot.lane.b32.xlu1 %v325_v3, %s2768_s30  ;;  %397 = vrot.lane.b32.xlu0 %v392_v9, %s2769_s6 }
  0x1f   : > { %403 = vrot.lane.b32.xlu1 %v315_v1, %s2769_s6  ;;  %401 = vrot.lane.b32.xlu0 %v393_v10, %s2769_s6 }
  0x23   : > { %467 = vrot.lane.b32.xlu1 %v324_v4, %s2770_s7  ;;  %465 = vrot.lane.b32.xlu0 %v2839_v2, %s2770_s7 }
  0x27   : > { %471 = vrot.lane.b32.xlu1 %v325_v3, %s2770_s7  ;;  %469 = vrot.lane.b32.xlu0 %v315_v1, %s2770_s7 }
  0x2b   : > { %535 = vrot.lane.b32.xlu1 %v2839_v2, %s2771_s8  ;;  %533 = vrot.lane.b32.xlu0 %v392_v9, %s2771_s8 }
  0x2f   : > { %539 = vrot.lane.b32.xlu1 %v315_v1, %s2771_s8  ;;  %537 = vrot.lane.b32.xlu0 %v393_v10, %s2771_s8 }
  0x33   : > { %635 = vrot.lane.b32.xlu1 %v393_v10, %s2772_s9  ;;  %633 = vrot.lane.b32.xlu0 %v2839_v2, %s2772_s9 }
  0x37   : > { %639 = vrot.lane.b32.xlu1 %v2887_v12, %s2772_s9  ;;  %637 = vrot.lane.b32.xlu0 %v315_v1, %s2772_s9 }
  0x3b   : > { %703 = vrot.lane.b32.xlu1 %v315_v1, %s2773_s10  ;;  %701 = vrot.lane.b32.xlu0 %v324_v4, %s2773_s10 }
  0x3f   : > { %707 = vrot.lane.b32.xlu1 %v2880_v11, %s2773_s10  ;;  %705 = vrot.lane.b32.xlu0 %v325_v3, %s2773_s10 }
  0x43   : > { %771 = vrot.lane.b32.xlu1 %v393_v10, %s2774_s11  ;;  %769 = vrot.lane.b32.xlu0 %v2839_v2, %s2774_s11  ;;  %v3067_v10 = vcombine.low %v3033_v48, %v3033_v48 }
  0x47   : > { %775 = vrot.lane.b32.xlu1 %v2887_v12, %s2774_s11  ;;  %773 = vrot.lane.b32.xlu0 %v315_v1, %s2774_s11 }
  0x4b   : > { %699 = vrot.lane.b32.xlu1 %v2839_v2, %s2773_s10  ;;  %631 = vrot.lane.b32.xlu0 %v392_v9, %s2772_s9 }
  0x4f   : > { %837 = vrot.lane.b32.xlu1 %v324_v4, %s2775_s12  ;;  %767 = vrot.lane.b32.xlu0 %v392_v9, %s2774_s11 }
  0x53   : > { %841 = vrot.lane.b32.xlu1 %v325_v3, %s2775_s12  ;;  %839 = vrot.lane.b32.xlu0 %v315_v1, %s2775_s12 }
  0x57   : > { %918 = vrot.lane.b32.xlu1 %v2911_v14, %s2768_s30  ;;  %843 = vrot.lane.b32.xlu0 %v2880_v11, %s2775_s12 }
  0x5b   : > { %922 = vrot.lane.b32.xlu1 %v2918_v16, %s2768_s30  ;;  %920 = vrot.lane.b32.xlu0 %v2854_v7, %s2768_s30 }
  0x5f   : > { %1011 = vrot.lane.b32.xlu1 %v2911_v14, %s2769_s6  ;;  %924 = vrot.lane.b32.xlu0 %v2856_v8, %s2768_s30 }
  0x63   : > { %1015 = vrot.lane.b32.xlu1 %v2918_v16, %s2769_s6  ;;  %1013 = vrot.lane.b32.xlu0 %v2854_v7, %s2769_s6 }
  0x67   : > { %835 = vrot.lane.b32.xlu1 %v2839_v2, %s2775_s12  ;;  %1017 = vrot.lane.b32.xlu0 %v2856_v8, %s2769_s6 }
  0x6b   : > { %1106 = vrot.lane.b32.xlu1 %v2854_v7, %s2770_s7  ;;  %1104 = vrot.lane.b32.xlu0 %v2911_v14, %s2770_s7 }
  0x6f   : > { %1110 = vrot.lane.b32.xlu1 %v2856_v8, %s2770_s7  ;;  %1108 = vrot.lane.b32.xlu0 %v2918_v16, %s2770_s7 }
  0x73   : > { %1199 = vrot.lane.b32.xlu1 %v2854_v7, %s2771_s8  ;;  %1197 = vrot.lane.b32.xlu0 %v2911_v14, %s2771_s8 }
  0x77   : > { %1203 = vrot.lane.b32.xlu1 %v2856_v8, %s2771_s8  ;;  %1201 = vrot.lane.b32.xlu0 %v2918_v16, %s2771_s8 }
  0x7b   : > { %1354 = vrot.lane.b32.xlu1 %v2918_v16, %s2772_s9  ;;  %1352 = vrot.lane.b32.xlu0 %v2854_v7, %s2772_s9 }
  0x7f   : > { %1358 = vrot.lane.b32.xlu1 %v2959_v22, %s2772_s9  ;;  %1356 = vrot.lane.b32.xlu0 %v2856_v8, %s2772_s9 }
  0x83   : > { %1445 = vrot.lane.b32.xlu1 %v2854_v7, %s2773_s10  ;;  %1350 = vrot.lane.b32.xlu0 %v2911_v14, %s2772_s9 }
  0x85   : > { %v334_v23 = vpop.permute.xlu1 %333  ;;  %v330_v24 = vpop.permute.xlu0 %329 }
  0x86   : > { %370 = vst.msk [vmem:[#allocation2] sm:$0xf] %vm369_vm0, %v330_v24 }
  0x87   : > { %381 = vst.msk [vmem:[#allocation2] sm:$0xf] %vm380_vm1, %v2767_v0  ;;  %1449 = vrot.lane.b32.xlu1 %v2856_v8, %s2773_s10  ;;  %1447 = vrot.lane.b32.xlu0 %v2918_v16, %s2773_s10 }
  0x89   : > { %v400_v25 = vpop.permute.xlu1 %399  ;;  %v332_v26 = vpop.permute.xlu0 %331 }
  0x8a   : > { %v350_v27 = vsel %vm349_vm2, %v330_v24, %v332_v26  ;;  %v351_v28 = vsel %vm349_vm2, %v332_v26, %v334_v23 }
  0x8b   : > { %371 = vst [vmem:[#allocation2 + $0x8] sm:$0xf] %v350_v27  ;;  %372 = vst [vmem:[#allocation2 + $0x10] sm:$0xf] %v351_v28  ;;  %1538 = vrot.lane.b32.xlu1 %v2854_v7, %s2774_s11  ;;  %1451 = vrot.lane.b32.xlu0 %v2959_v22, %s2773_s10  ;;  %v897_v28 = vld [vmem:[%s2844_s29 + $0x48] sm:$0xff] }
  0x8d   : > { %v2982_v29 = vpop.permute.xlu1 %335  ;;  %v398_v30 = vpop.permute.xlu0 %397 }
  0x8e   : > { %v352_v31 = vsel %vm349_vm2, %v334_v23, %v2982_v29  ;;  %v418_v32 = vsel %vm417_vm3, %v398_v30, %v400_v25  ;;  %438 = vst.msk [vmem:[#allocation2] sm:$0xf0] %vm437_vm4, %v398_v30  ;;  %v588_v23 = vld [vmem:[%s2835_s26 + $0x10] sm:$0xff]  ;;  %v589_v30 = vld [vmem:[%s2835_s26 + $0x18] sm:$0xff] }
  0x8f   : > { %373 = vst [vmem:[#allocation2 + $0x18] sm:$0xf] %v352_v31  ;;  %439 = vst [vmem:[#allocation2 + $0x8] sm:$0xf0] %v418_v32  ;;  %1542 = vrot.lane.b32.xlu1 %v2856_v8, %s2774_s11  ;;  %1540 = vrot.lane.b32.xlu0 %v2918_v16, %s2774_s11 }
  0x90   : > { %449 = vst.msk [vmem:[#allocation2] sm:$0xf0] %vm448_vm5, %v2767_v0  ;;  %610 = vst [vmem:[#allocation2 + $0xc0] sm:$0xf] %v588_v23 }
  0x91   : > { %v2994_v33 = vpop.permute.xlu1 %403  ;;  %v402_v34 = vpop.permute.xlu0 %401  ;;  %612 = vst [vmem:[#allocation2 + $0xd0] sm:$0xf] %v589_v30 }
  0x92   : > { %v419_v35 = vsel %vm417_vm3, %v400_v25, %v402_v34  ;;  %v420_v36 = vsel %vm417_vm3, %v402_v34, %v2994_v33  ;;  %v598_v25 = vcombine.high %v588_v23, %v588_v23  ;;  %v3096_v34 = vrot.slane %v897_v28, 4 }
  0x93   : > { %440 = vst [vmem:[#allocation2 + $0x10] sm:$0xf0] %v419_v35  ;;  %441 = vst [vmem:[#allocation2 + $0x18] sm:$0xf0] %v420_v36  ;;  %1443 = vrot.lane.b32.xlu1 %v2911_v14, %s2773_s10  ;;  %1544 = vrot.lane.b32.xlu0 %v2959_v22, %s2774_s11  ;;  %v599_v35 = vcombine.high %v589_v30, %v589_v30 }
  0x94   : > { %611 = vst [vmem:[#allocation2 + $0xc8] sm:$0xf] %v598_v25  ;;  %1309 = vst [vmem:[#allocation2 + $0x318] ss:$-76 sps:$4 sm:$0xff] %v3096_v34  }
  0x95   : > { %v468_v37 = vpop.permute.xlu1 %467  ;;  %v466_v38 = vpop.permute.xlu0 %465  ;;  %613 = vst [vmem:[#allocation2 + $0xd8] sm:$0xf] %v599_v35  ;;  %v895_v35 = vld [vmem:[%s2844_s29 + $0x38] sm:$0xff] }
  0x96   : > { %v486_v39 = vsel %vm485_vm6, %v466_v38, %v468_v37  ;;  %506 = vst.msk [vmem:[#allocation2 + $0x50] sm:$0xf] %vm505_vm7, %v466_v38  ;;  %v1695_v58 = vld [vmem:[#allocation2 + $0x8] sm:$0xff] }
  0x97   : > { %507 = vst [vmem:[#allocation2 + $0x58] sm:$0xf] %v486_v39  ;;  %517 = vst.msk [vmem:[#allocation2 + $0x50] sm:$0xf] %vm516_vm8, %v2767_v0  ;;  %1631 = vrot.lane.b32.xlu1 %v2854_v7, %s2775_s12  ;;  %1536 = vrot.lane.b32.xlu0 %v2911_v14, %s2774_s11  ;;  %v1694_v54 = vld [vmem:[#allocation2] sm:$0xff] }
  0x99   : > { %v3011_v40 = vpop.permute.xlu1 %471  ;;  %v470_v41 = vpop.permute.xlu0 %469 }
  0x9a   : > { %v487_v42 = vsel %vm485_vm6, %v468_v37, %v470_v41  ;;  %v488_v43 = vsel %vm485_vm6, %v470_v41, %v3011_v40  ;;  %v1697_v2 = vld [vmem:[#allocation2 + $0x18] sm:$0xff]  ;;  %v1696_v6 = vld [vmem:[#allocation2 + $0x10] sm:$0xff] }
  0x9b   : > { %508 = vst [vmem:[#allocation2 + $0x60] sm:$0xf] %v487_v42  ;;  %509 = vst [vmem:[#allocation2 + $0x68] sm:$0xf] %v488_v43  ;;  %1635 = vrot.lane.b32.xlu1 %v2856_v8, %s2775_s12  ;;  %1633 = vrot.lane.b32.xlu0 %v2918_v16, %s2775_s12  ;;  %v3111_v43 = vld [vmem:[%s2835_s26 + $0x20] sm:$0xff] }
  0x9d   : > { %v536_v44 = vpop.permute.xlu1 %535  ;;  %v534_v45 = vpop.permute.xlu0 %533 }
  0x9e   : > { %v554_v46 = vsel %vm553_vm9, %v534_v45, %v536_v44  ;;  %574 = vst.msk [vmem:[#allocation2 + $0x50] sm:$0xf0] %vm573_vm10, %v534_v45 }
  0x9f   : > { %575 = vst [vmem:[#allocation2 + $0x58] sm:$0xf0] %v554_v46  ;;  %585 = vst.msk [vmem:[#allocation2 + $0x50] sm:$0xf0] %vm584_vm11, %v2767_v0  ;;  %1629 = vrot.lane.b32.xlu1 %v2911_v14, %s2775_s12  ;;  %1637 = vrot.lane.b32.xlu0 %v2959_v22, %s2775_s12 }
  0xa1   : > { %v3035_v49 = vpop.permute.xlu1 %539  ;;  %v538_v50 = vpop.permute.xlu0 %537 }
  0xa2   : > { %v555_v51 = vsel %vm553_vm9, %v536_v44, %v538_v50  ;;  %v556_v52 = vsel %vm553_vm9, %v538_v50, %v3035_v49 }
  0xa3   : > { %576 = vst [vmem:[#allocation2 + $0x60] sm:$0xf0] %v555_v51  ;;  %577 = vst [vmem:[#allocation2 + $0x68] sm:$0xf0] %v556_v52  ;;  %339 = vrot.lane.b32.xlu1 %v3024_v47, %s2768_s30  ;;  %337 = vrot.lane.b32.xlu0 %v2880_v11, %s2768_s30 }
  0xa5   : > { %v636_v55 = vpop.permute.xlu1 %635  ;;  %v3048_v56 = vpop.permute.xlu0 %633 }
  0xa6   : > { %v653_v57 = vsel %vm651_vm12, %v3048_v56, %v636_v55  ;;  %v1705_v59 = vld [vmem:[#allocation2 + $0x58] sm:$0xff]  ;;  %v1704_v60 = vld [vmem:[#allocation2 + $0x50] sm:$0xff] }
  0xa7   : > { %672 = vst [vmem:[#allocation2 + $0xa8] sm:$0xf0] %v653_v57  ;;  %343 = vrot.lane.b32.xlu1 %v3046_v53, %s2768_s30  ;;  %341 = vrot.lane.b32.xlu0 %v3033_v48, %s2768_s30  ;;  %v2526_v61 = vpack.c.bf16 %v1705_v59, %v1695_v58  ;;  %v2528_v62 = vpack.c.bf16 %v1704_v60, %v1694_v54 }
  0xa8   : > { %v3122_v57 = vcombine.low %v3111_v43, %v3111_v43 }
  0xa9   : > { %v3056_v63 = vpop.permute.xlu1 %639  ;;  %2527 = vmatprep.subr.bf16.mxu0 %v2526_v61  ;;  %v638_v1 = vpop.permute.xlu0 %637 }
  0xaa   : > { %v654_v3 = vsel %vm651_vm12, %v636_v55, %v638_v1  ;;  %v655_v4 = vsel %vm651_vm12, %v638_v1, %v3056_v63  ;;  %v1707_v5 = vld [vmem:[#allocation2 + $0x68] sm:$0xff]  ;;  %v1706_v7 = vld [vmem:[#allocation2 + $0x60] sm:$0xff]  ;;  %2529 = vmatpush1.bf16.msra.mxu0 %v2528_v62 }
  0xab   : > { %673 = vst [vmem:[#allocation2 + $0xb0] sm:$0xf0] %v654_v3  ;;  %674 = vst [vmem:[#allocation2 + $0xb8] sm:$0xf0] %v655_v4  ;;  %407 = vrot.lane.b32.xlu1 %v2880_v11, %s2769_s6  ;;  %405 = vrot.lane.b32.xlu0 %v2887_v12, %s2769_s6  ;;  %v2556_v8 = vpack.c.bf16 %v1707_v5, %v1697_v2  ;;  %v2558_v9 = vpack.c.bf16 %v1706_v7, %v1696_v6 }
  0xad   : > { %v704_v13 = vpop.permute.xlu1 %703  ;;  %2557 = vmatprep.subr.bf16.mxu1 %v2556_v8  ;;  %v702_v14 = vpop.permute.xlu0 %701 }
  0xae   : > { %v721_v15 = vsel %vm3746_vm13, %v702_v14, %v704_v13  ;;  %2559 = vmatpush1.bf16.msra.mxu1 %v2558_v9  ;;  %v1715_v41 = vld [vmem:[#allocation2 + $0xa8] sm:$0xff] }
  0xaf   : > { %740 = vst [vmem:[#allocation2 + $0xf8] sm:$0xf] %v721_v15  ;;  %411 = vrot.lane.b32.xlu1 %v3033_v48, %s2769_s6  ;;  %409 = vrot.lane.b32.xlu0 %v3067_v10, %s2769_s6 }
  0xb1   : > { %v3074_v16 = vpop.permute.xlu1 %707  ;;  %v706_v17 = vpop.permute.xlu0 %705 }
  0xb2   : > { %v722_v18 = vsel %vm3746_vm13, %v704_v13, %v706_v17  ;;  %v723_v19 = vsel %vm3746_vm13, %v706_v17, %v3074_v16  ;;  %v1717_v46 = vld [vmem:[#allocation2 + $0xb8] sm:$0xff]  ;;  %v1716_v52 = vld [vmem:[#allocation2 + $0xb0] sm:$0xff] }
  0xb3   : > { %741 = vst [vmem:[#allocation2 + $0x100] sm:$0xf] %v722_v18  ;;  %742 = vst [vmem:[#allocation2 + $0x108] sm:$0xf] %v723_v19  ;;  %475 = vrot.lane.b32.xlu1 %v3024_v47, %s2770_s7  ;;  %473 = vrot.lane.b32.xlu0 %v2880_v11, %s2770_s7 }
  0xb5   : > { %v772_v20 = vpop.permute.xlu1 %771  ;;  %v770_v21 = vpop.permute.xlu0 %769 }
  0xb6   : > { %v789_v24 = vsel %vm3745_vm14, %v770_v21, %v772_v20 }
  0xb7   : > { %808 = vst [vmem:[#allocation2 + $0xf8] sm:$0xf0] %v789_v24  ;;  %479 = vrot.lane.b32.xlu1 %v3046_v53, %s2770_s7  ;;  %477 = vrot.lane.b32.xlu0 %v3033_v48, %s2770_s7  ;;  %v893_v24 = vld [vmem:[%s2844_s29 + $0x28] sm:$0xff] }
  0xb9   : > { %v3089_v26 = vpop.permute.xlu1 %775  ;;  %v774_v27 = vpop.permute.xlu0 %773 }
  0xba   : > { %v790_v31 = vsel %vm3745_vm14, %v772_v20, %v774_v27  ;;  %v791_v32 = vsel %vm3745_vm14, %v774_v27, %v3089_v26 }
  0xbb   : > { %809 = vst [vmem:[#allocation2 + $0x100] sm:$0xf0] %v790_v31  ;;  %810 = vst [vmem:[#allocation2 + $0x108] sm:$0xf0] %v791_v32  ;;  %543 = vrot.lane.b32.xlu1 %v2880_v11, %s2771_s8  ;;  %541 = vrot.lane.b32.xlu0 %v2887_v12, %s2771_s8 }
  0xbd   : > { %v700_v36 = vpop.permute.xlu1 %699  ;;  %v632_v37 = vpop.permute.xlu0 %631 }
  0xbe   : > { %v720_v38 = vsel %vm3746_vm13, %v700_v36, %v702_v14  ;;  %v652_v39 = vsel %vm651_vm12, %v632_v37, %v3048_v56  ;;  %v1725_v42 = vld [vmem:[#allocation2 + $0xf8] sm:$0xff]  ;;  %vm978_vm13 = vcmask 285700   ;;  %v894_v36 = vld [vmem:[%s2844_s29 + $0x30] sm:$0xff] }
  0xbf   : > { %739 = vst [vmem:[#allocation2 + $0xf0] sm:$0xf] %v720_v38  ;;  %671 = vst [vmem:[#allocation2 + $0xa0] sm:$0xf0] %v652_v39  ;;  %547 = vrot.lane.b32.xlu1 %v3033_v48, %s2771_s8  ;;  %545 = vrot.lane.b32.xlu0 %v3067_v10, %s2771_s8  ;;  %v2530_v12 = vpack.c.bf16 %v1725_v42, %v1715_v41 }
  0xc1   : > { %v3113_v44 = vpop.permute.xlu1 %837  ;;  %2531 = vmatprep.subr.bf16.mxu0 %v2530_v12  ;;  %v768_v45 = vpop.permute.xlu0 %767 }
  0xc2   : > { %v788_v50 = vsel %vm3745_vm14, %v768_v45, %v770_v21  ;;  %v1727_v51 = vld [vmem:[#allocation2 + $0x108] sm:$0xff]  ;;  %v1726_v54 = vld [vmem:[#allocation2 + $0x100] sm:$0xff]  ;;  %vm957_vm14 = vcmask 1047836  }
  0xc3   : > { %807 = vst [vmem:[#allocation2 + $0xf0] sm:$0xf0] %v788_v50  ;;  %643 = vrot.lane.b32.xlu1 %v3067_v10, %s2772_s9  ;;  %641 = vrot.lane.b32.xlu0 %v2880_v11, %s2772_s9  ;;  %v2560_v55 = vpack.c.bf16 %v1727_v51, %v1717_v46  ;;  %v2562_v56 = vpack.c.bf16 %v1726_v54, %v1716_v52  ;;  %v3200_v51 = vrot.slane %v895_v35, 4  ;;  %v3202_v52 = vrot.slane %v894_v36, 4 }
  0xc5   : > { %v842_v58 = vpop.permute.xlu1 %841  ;;  %2561 = vmatprep.subr.bf16.mxu1 %v2560_v55  ;;  %v840_v59 = vpop.permute.xlu0 %839 }
  0xc6   : > { %v857_v60 = vsel %vm855_vm15, %v3113_v44, %v840_v59  ;;  %v858_v61 = vsel %vm855_vm15, %v840_v59, %v842_v58  ;;  %2563 = vmatpush1.bf16.msra.mxu1 %v2562_v56  ;;  %v1714_v3 = vld [vmem:[#allocation2 + $0xa0] sm:$0xff] }
  0xc7   : > { %876 = vst [vmem:[#allocation2 + $0x148] sm:$0xf] %v857_v60  ;;  %877 = vst [vmem:[#allocation2 + $0x150] sm:$0xf] %v858_v61  ;;  %647 = vrot.lane.b32.xlu1 %v3122_v57, %s2772_s9  ;;  %645 = vrot.lane.b32.xlu0 %v3033_v48, %s2772_s9 }
  0xc9   : > { %v919_v62 = vpop.permute.xlu1 %918  ;;  %v3131_v1 = vpop.permute.xlu0 %843 }
  0xca   : > { %958 = vst.msk [vmem:[#allocation2 + $0x140] sm:$0xf0] %vm957_vm14, %v919_v62  ;;  %v859_v2 = vsel %vm855_vm15, %v842_v58, %v3131_v1  ;;  %v1724_v4 = vld [vmem:[#allocation2 + $0xf0] sm:$0xff]  ;;  %vm3752_vm14 = vcmask 769024  }
  0xcb   : > { %968 = vst.msk [vmem:[#allocation2 + $0x190] sm:$0xf] %vm369_vm0, %v919_v62  ;;  %878 = vst [vmem:[#allocation2 + $0x158] sm:$0xf] %v859_v2  ;;  %711 = vrot.lane.b32.xlu1 %v3033_v48, %s2773_s10  ;;  %709 = vrot.lane.b32.xlu0 %v3024_v47, %s2773_s10  ;;  %v2532_v5 = vpack.c.bf16 %v1724_v4, %v1714_v3  ;;  %vm1060_vm0 = vcmask 1043728  }
  0xcc   : > { %979 = vst.msk [vmem:[#allocation2 + $0x140] sm:$0xf0] %vm978_vm13, %v2767_v0 }
  0xcd   : > { %980 = vst.msk [vmem:[#allocation2 + $0x190] sm:$0xf] %vm380_vm1, %v2767_v0  ;;  %v923_v6 = vpop.permute.xlu1 %922  ;;  %2533 = vmatpush1.bf16.msra.mxu0 %v2532_v5  ;;  %v921_v7 = vpop.permute.xlu0 %920  ;;  %vm1072_vm1 = vcmask 273408   ;;  %v1265_v5 = vld [vmem:[%s2844_s29 + $0x28] sm:$0xff] }
  0xce   : > { %v938_v8 = vsel %vm349_vm2, %v919_v62, %v921_v7  ;;  %v939_v9 = vsel %vm349_vm2, %v921_v7, %v923_v6 }
  0xcf   : > { %959 = vst [vmem:[#allocation2 + $0x198] ss:$-76 sps:$4 sm:$0xff] %v938_v8   ;;  %960 = vst [vmem:[#allocation2 + $0x1a0] ss:$-76 sps:$4 sm:$0xff] %v939_v9   ;;  %715 = vrot.lane.b32.xlu1 %v3111_v43, %s2773_s10  ;;  %713 = vrot.lane.b32.xlu0 %v3046_v53, %s2773_s10 }
  0xd1   : > { %v1012_v13 = vpop.permute.xlu1 %1011  ;;  %v3149_v14 = vpop.permute.xlu0 %924 }
  0xd2   : > { %1050 = vst.msk [vmem:[#allocation2 + $0x190] sm:$0xf0] %vm437_vm4, %v1012_v13  ;;  %v940_v15 = vsel %vm349_vm2, %v923_v6, %v3149_v14  ;;  %vm1143_vm4 = vcmask 1047820   ;;  %v1264_v6 = vld [vmem:[%s2844_s29 + $0x20] sm:$0xff] }
  0xd3   : > { %1061 = vst.msk [vmem:[#allocation2 + $0x1e0] sm:$0xf] %vm1060_vm0, %v1012_v13  ;;  %961 = vst [vmem:[#allocation2 + $0x1a8] ss:$-76 sps:$4 sm:$0xff] %v940_v15   ;;  %779 = vrot.lane.b32.xlu1 %v3067_v10, %s2774_s11  ;;  %777 = vrot.lane.b32.xlu0 %v2880_v11, %s2774_s11  ;;  %v1285_v15 = vrot.slane %v1265_v5, 4 }
  0xd4   : > { %1071 = vst.msk [vmem:[#allocation2 + $0x190] sm:$0xf0] %vm448_vm5, %v2767_v0  ;;  %vm1164_vm5 = vcmask 269316   ;;  %vm3753_vm0 = vmmov %vm3752_vm14 }
  0xd5   : > { %1073 = vst.msk [vmem:[#allocation2 + $0x1e0] sm:$0xf] %vm1072_vm1, %v2767_v0  ;;  %v1016_v17 = vpop.permute.xlu1 %1015  ;;  %v1014_v18 = vpop.permute.xlu0 %1013  ;;  %1305 = vst [vmem:[#allocation2 + $0x2f8] ss:$-76 sps:$4 sm:$0xff] %v1285_v15  }
  0xd6   : > { %v1031_v19 = vsel %vm417_vm3, %v1012_v13, %v1014_v18  ;;  %v1032_v20 = vsel %vm417_vm3, %v1014_v18, %v1016_v17  ;;  %v1735_v30 = vld [vmem:[#allocation2 + $0x148] sm:$0xff]  ;;  %v1736_v50 = vld [vmem:[#allocation2 + $0x150] sm:$0xff] }
  0xd7   : > { %1051 = vst [vmem:[#allocation2 + $0x1e8] ss:$-76 sps:$4 sm:$0xff] %v1031_v19   ;;  %1052 = vst [vmem:[#allocation2 + $0x1f0] ss:$-76 sps:$4 sm:$0xff] %v1032_v20   ;;  %783 = vrot.lane.b32.xlu1 %v3122_v57, %s2774_s11  ;;  %781 = vrot.lane.b32.xlu0 %v3033_v48, %s2774_s11 }
  0xd9   : > { %v836_v21 = vpop.permute.xlu1 %835  ;;  %v3167_v10 = vpop.permute.xlu0 %1017 }
  0xda   : > { %v856_v11 = vsel %vm855_vm15, %v836_v21, %v3113_v44  ;;  %v1033_v23 = vsel %vm417_vm3, %v1016_v17, %v3167_v10  ;;  %v1737_v44 = vld [vmem:[#allocation2 + $0x158] sm:$0xff]  ;;  %v1284_v17 = vrot.slane %v1264_v6, 4  ;;  %v1328_v6 = vld [vmem:[%s2844_s29 + $0x40] sm:$0xff] }
  0xdb   : > { %875 = vst [vmem:[#allocation2 + $0x140] sm:$0xf] %v856_v11  ;;  %1053 = vst [vmem:[#allocation2 + $0x1f8] ss:$-76 sps:$4 sm:$0xff] %v1033_v23   ;;  %847 = vrot.lane.b32.xlu1 %v3033_v48, %s2775_s12  ;;  %845 = vrot.lane.b32.xlu0 %v3024_v47, %s2775_s12  ;;  %v3187_v48 = vrot.slane %v893_v24, 4  ;;  %v1744_v32 = vld [vmem:[#allocation2 + $0x190] sm:$0xff] }
  0xdc   : > { %1304 = vst [vmem:[#allocation2 + $0x2f0] ss:$-76 sps:$4 sm:$0xff] %v1284_v17   ;;  %v1267_v23 = vld [vmem:[%s2844_s29 + $0x38] sm:$0xff]  ;;  %v1266_v24 = vld [vmem:[%s2844_s29 + $0x30] sm:$0xff]  ;;  %v3267_v15 = vrot.slane %v1328_v6, 4 }
  0xdd   : > { %v1107_v25 = vpop.permute.xlu1 %1106  ;;  %v1105_v27 = vpop.permute.xlu0 %1104 }
  0xde   : > { %v1124_v28 = vsel %vm485_vm6, %v1105_v27, %v1107_v25  ;;  %1144 = vst.msk [vmem:[#allocation2 + $0x1e0] sm:$0xf0] %vm1143_vm4, %v1105_v27  ;;  %v1745_v31 = vld [vmem:[#allocation2 + $0x198] sm:$0xff]  ;;  %v1746_v39 = vld [vmem:[#allocation2 + $0x1a0] sm:$0xff]  ;;  %vm3755_vm4 = vmmov %vm3753_vm0 }
  0xdf   : > { %1154 = vst.msk [vmem:[#allocation2 + $0x230] sm:$0xf] %vm505_vm7, %v1105_v27  ;;  %1145 = vst [vmem:[#allocation2 + $0x238] ss:$-76 sps:$4 sm:$0xff] %v1124_v28   ;;  %851 = vrot.lane.b32.xlu1 %v3111_v43, %s2775_s12  ;;  %849 = vrot.lane.b32.xlu0 %v3046_v53, %s2775_s12  ;;  %v2534_v47 = vpack.c.bf16 %v1745_v31, %v1735_v30  ;;  %vm1246_vm7 = vcmask 1043464   ;;  %v2566_v54 = vpack.c.bf16 %v1746_v39, %v1736_v50 }
  0xe0   : > { %1165 = vst.msk [vmem:[#allocation2 + $0x1e0] sm:$0xf0] %vm1164_vm5, %v2767_v0  ;;  %vm3756_vm5 = vmmov %vm3753_vm0 }
  0xe1   : > { %1166 = vst.msk [vmem:[#allocation2 + $0x230] sm:$0xf] %vm516_vm8, %v2767_v0  ;;  %v3191_v37 = vpop.permute.xlu1 %1110  ;;  %2535 = vmatprep.subr.bf16.mxu0 %v2534_v47  ;;  %v1109_v38 = vpop.permute.xlu0 %1108  ;;  %vm1258_vm8 = vcmask 3072   ;;  %v1287_v47 = vrot.slane %v1267_v23, 4 }
  0xe2   : > { %v1125_v41 = vsel %vm485_vm6, %v1107_v25, %v1109_v38  ;;  %v1126_v42 = vsel %vm485_vm6, %v1109_v38, %v3191_v37  ;;  %v1734_v12 = vld [vmem:[#allocation2 + $0x140] sm:$0xff]  ;;  %v1747_v45 = vld [vmem:[#allocation2 + $0x1a8] sm:$0xff] }
  0xe3   : > { %1146 = vst [vmem:[#allocation2 + $0x240] ss:$-76 sps:$4 sm:$0xff] %v1125_v41   ;;  %1147 = vst [vmem:[#allocation2 + $0x248] ss:$-76 sps:$4 sm:$0xff] %v1126_v42   ;;  %928 = vrot.lane.b32.xlu1 %v3187_v48, %s2768_s30  ;;  %926 = vrot.lane.b32.xlu0 %v2959_v22, %s2768_s30  ;;  %v2536_v53 = vpack.c.bf16 %v1744_v32, %v1734_v12  ;;  %v2564_v46 = vpack.c.bf16 %v1747_v45, %v1737_v44  ;;  %v1286_v32 = vrot.slane %v1266_v24, 4 }
  0xe4   : > { %1307 = vst [vmem:[#allocation2 + $0x308] ss:$-76 sps:$4 sm:$0xff] %v1287_v47  }
  0xe5   : > { %v1200_v55 = vpop.permute.xlu1 %1199  ;;  %2537 = vmatpush1.bf16.msra.mxu0 %v2536_v53  ;;  %2565 = vmatprep.subr.bf16.mxu1 %v2564_v46  ;;  %v1198_v56 = vpop.permute.xlu0 %1197  ;;  %1306 = vst [vmem:[#allocation2 + $0x300] ss:$-76 sps:$4 sm:$0xff] %v1286_v32  }
  0xe6   : > { %v1217_v58 = vsel %vm553_vm9, %v1198_v56, %v1200_v55  ;;  %1236 = vst.msk [vmem:[#allocation2 + $0x230] sm:$0xf0] %vm573_vm10, %v1198_v56  ;;  %2567 = vmatpush1.bf16.msra.mxu1 %v2566_v54  ;;  %v1755_v8 = vld [vmem:[#allocation2 + $0x1e8] sm:$0xff]  ;;  %vm3749_vm10 = vcmask 777216  }
  0xe7   : > { %1247 = vst.msk [vmem:[#allocation2 + $0x280] sm:$0xf] %vm1246_vm7, %v1198_v56  ;;  %1237 = vst [vmem:[#allocation2 + $0x288] ss:$-76 sps:$4 sm:$0xff] %v1217_v58   ;;  %932 = vrot.lane.b32.xlu1 %v3200_v51, %s2768_s30  ;;  %930 = vrot.lane.b32.xlu0 %v3202_v52, %s2768_s30  ;;  %v1754_v2 = vld [vmem:[#allocation2 + $0x1e0] sm:$0xff]  ;;  %vm1853_vm7 = vcmask 1043456  }
  0xe8   : > { %1257 = vst.msk [vmem:[#allocation2 + $0x230] sm:$0xf0] %vm584_vm11, %v2767_v0  ;;  %vm3750_vm11 = vmmov %vm3749_vm10 }
  0xe9   : > { %1259 = vst.msk [vmem:[#allocation2 + $0x280] sm:$0xf] %vm1258_vm8, %v2767_v0  ;;  %v3214_v59 = vpop.permute.xlu1 %1203  ;;  %v1202_v60 = vpop.permute.xlu0 %1201  ;;  %vm3751_vm13 = vmmov %vm3749_vm10  ;;  %vm2776_vm8 = vmmov 1  }
  0xea   : > { %v1218_v61 = vsel %vm553_vm9, %v1200_v55, %v1202_v60  ;;  %v1219_v62 = vsel %vm553_vm9, %v1202_v60, %v3214_v59  ;;  %v1757_v11 = vld [vmem:[#allocation2 + $0x1f8] sm:$0xff]  ;;  %v1756_v30 = vld [vmem:[#allocation2 + $0x1f0] sm:$0xff]  ;;  %vm3754_vm1 = vmmov %vm3749_vm10 }
  0xeb   : > { %1238 = vst [vmem:[#allocation2 + $0x290] ss:$-76 sps:$4 sm:$0xff] %v1218_v61   ;;  %1239 = vst [vmem:[#allocation2 + $0x298] ss:$-76 sps:$4 sm:$0xff] %v1219_v62   ;;  %1021 = vrot.lane.b32.xlu1 %v3187_v48, %s2769_s6  ;;  %1019 = vrot.lane.b32.xlu0 %v2959_v22, %s2769_s6 }
  0xed   : > { %v1355_v3 = vpop.permute.xlu1 %1354  ;;  %v1353_v4 = vpop.permute.xlu0 %1352 }
  0xee   : > { %v1371_v7 = vsel %vm651_vm12, %v1353_v4, %v1355_v3  ;;  %v1765_v9 = vld [vmem:[#allocation2 + $0x238] sm:$0xff]  ;;  %v1775_v42 = vld [vmem:[#allocation2 + $0x288] sm:$0xff] }
  0xef   : > { %v1764_v13 = vld [vmem:[#allocation2 + $0x230] sm:$0xff]  ;;  %1390 = vst [vmem:[#allocation2 + $0x328] ss:$-76 sps:$4 sm:$0xff] %v1371_v7   ;;  %1025 = vrot.lane.b32.xlu1 %v3200_v51, %s2769_s6  ;;  %1023 = vrot.lane.b32.xlu0 %v3202_v52, %s2769_s6  ;;  %v2538_v18 = vpack.c.bf16 %v1765_v9, %v1755_v8 }
  0xf0   : > { %v2540_v19 = vpack.c.bf16 %v1764_v13, %v1754_v2  ;;  %v1774_v62 = vld [vmem:[#allocation2 + $0x280] sm:$0xff] }
  0xf1   : > { %v3230_v20 = vpop.permute.xlu1 %1358  ;;  %2539 = vmatprep.subr.bf16.mxu0 %v2538_v18  ;;  %v1357_v21 = vpop.permute.xlu0 %1356 }
  0xf2   : > { %v1372_v25 = vsel %vm651_vm12, %v1355_v3, %v1357_v21  ;;  %v1373_v27 = vsel %vm651_vm12, %v1357_v21, %v3230_v20  ;;  %v1767_v28 = vld [vmem:[#allocation2 + $0x248] sm:$0xff]  ;;  %v1766_v31 = vld [vmem:[#allocation2 + $0x240] sm:$0xff]  ;;  %2541 = vmatpush1.bf16.msra.mxu0 %v2540_v19  ;;  %v1777_v46 = vld [vmem:[#allocation2 + $0x298] sm:$0xff] }
  0xf3   : > { %1391 = vst [vmem:[#allocation2 + $0x330] ss:$-76 sps:$4 sm:$0xff] %v1372_v25   ;;  %1392 = vst [vmem:[#allocation2 + $0x338] ss:$-76 sps:$4 sm:$0xff] %v1373_v27   ;;  %1114 = vrot.lane.b32.xlu1 %v3187_v48, %s2770_s7  ;;  %1112 = vrot.lane.b32.xlu0 %v2959_v22, %s2770_s7  ;;  %v2568_v35 = vpack.c.bf16 %v1767_v28, %v1757_v11  ;;  %v2570_v36 = vpack.c.bf16 %v1766_v31, %v1756_v30  ;;  %v1776_v56 = vld [vmem:[#allocation2 + $0x290] sm:$0xff] }
  0xf5   : > { %v1446_v38 = vpop.permute.xlu1 %1445  ;;  %2569 = vmatprep.subr.bf16.mxu1 %v2568_v35  ;;  %v1351_v39 = vpop.permute.xlu0 %1350 }
  0xf6   : > { %v1370_v41 = vsel %vm651_vm12, %v1351_v39, %v1353_v4  ;;  %2571 = vmatpush1.bf16.msra.mxu1 %v2570_v36  ;;  %v1785_v12 = vld [vmem:[#allocation2 + $0x2d8] sm:$0xff] }
  0xf7   : > { %1389 = vst [vmem:[#allocation2 + $0x320] ss:$-76 sps:$4 sm:$0xff] %v1370_v41   ;;  %1118 = vrot.lane.b32.xlu1 %v3200_v51, %s2770_s7  ;;  %1116 = vrot.lane.b32.xlu0 %v3202_v52, %s2770_s7  ;;  %v2542_v44 = vpack.c.bf16 %v1785_v12, %v1775_v42 }
  0xf9   : > { %v1450_v45 = vpop.permute.xlu1 %1449  ;;  %2543 = vmatprep.subr.bf16.mxu0 %v2542_v44  ;;  %v1448_v53 = vpop.permute.xlu0 %1447 }
  0xfa   : > { %v1464_v50 = vsel %vm3749_vm10, %v1446_v38, %v1448_v53  ;;  %v1465_v54 = vsel %vm3750_vm11, %v1448_v53, %v1450_v45  ;;  %v1787_v55 = vld [vmem:[#allocation2 + $0x2e8] sm:$0xff]  ;;  %v1786_v58 = vld [vmem:[#allocation2 + $0x2e0] sm:$0xff]  ;;  %vm3301_vm10 = vmpackc.low %vm1853_vm7, %vm2776_vm8  ;;  %vm3747_vm11 = vcmask 883712  }
  0xfb   : > { %1483 = vst [vmem:[#allocation2 + $0x378] ss:$-76 sps:$4 sm:$0xff] %v1464_v50   ;;  %1484 = vst [vmem:[#allocation2 + $0x380] ss:$-76 sps:$4 sm:$0xff] %v1465_v54   ;;  %1207 = vrot.lane.b32.xlu1 %v3187_v48, %s2771_s8  ;;  %1205 = vrot.lane.b32.xlu0 %v2959_v22, %s2771_s8  ;;  %v2572_v60 = vpack.c.bf16 %v1787_v55, %v1777_v46  ;;  %v2574_v61 = vpack.c.bf16 %v1786_v58, %v1776_v56 }
  0xfc   : > { %vm3764_vm7 = vmmov %vm3755_vm4 }
  0xfd   : > { %v1539_v2 = vpop.permute.xlu1 %1538  ;;  %2573 = vmatprep.subr.bf16.mxu1 %v2572_v60  ;;  %v3252_v3 = vpop.permute.xlu0 %1451  ;;  %vm3765_vm8 = vmmov %vm3755_vm4 }
  0xfe   : > { %v1466_v4 = vsel %vm3751_vm13, %v1450_v45, %v3252_v3  ;;  %2575 = vmatpush1.bf16.msra.mxu1 %v2574_v61  ;;  %v1784_v5 = vld [vmem:[#allocation2 + $0x2d0] sm:$0xff]  ;;  %vm3759_vm13 = vmmov %vm3754_vm1 }
  0xff   : > { %1485 = vst [vmem:[#allocation2 + $0x388] ss:$-76 sps:$4 sm:$0xff] %v1466_v4   ;;  %1211 = vrot.lane.b32.xlu1 %v3200_v51, %s2771_s8  ;;  %1209 = vrot.lane.b32.xlu0 %v3202_v52, %s2771_s8  ;;  %v2544_v22 = vpack.c.bf16 %v1784_v5, %v1774_v62 }
 0x101   : > { %v1543_v7 = vpop.permute.xlu1 %1542  ;;  %2545 = vmatpush1.bf16.msra.mxu0 %v2544_v22  ;;  %v1541_v8 = vpop.permute.xlu0 %1540 }
 0x102   : > { %v1557_v9 = vsel %vm3752_vm14, %v1539_v2, %v1541_v8  ;;  %v1558_v13 = vsel %vm3753_vm0, %v1541_v8, %v1543_v7  ;;  %v1795_v25 = vld [vmem:[#allocation2 + $0x328] sm:$0xff]  ;;  %v1796_v41 = vld [vmem:[#allocation2 + $0x330] sm:$0xff]  ;;  %vm3760_vm14 = vmmov %vm3754_vm1 }
 0x103   : > { %1576 = vst [vmem:[#allocation2 + $0x3c8] ss:$-76 sps:$4 sm:$0xff] %v1557_v9   ;;  %1577 = vst [vmem:[#allocation2 + $0x3d0] ss:$-76 sps:$4 sm:$0xff] %v1558_v13   ;;  %1362 = vrot.lane.b32.xlu1 %v3202_v52, %s2772_s9  ;;  %1360 = vrot.lane.b32.xlu0 %v3187_v48, %s2772_s9 }
 0x104   : > { %vm3761_vm0 = vmmov %vm3754_vm1 }
 0x105   : > { %v1444_v17 = vpop.permute.xlu1 %1443  ;;  %v3269_v18 = vpop.permute.xlu0 %1544 }
 0x106   : > { %v1463_v19 = vsel %vm3754_vm1, %v1444_v17, %v1446_v38  ;;  %v1559_v21 = vsel %vm3755_vm4, %v1543_v7, %v3269_v18  ;;  %v1797_v36 = vld [vmem:[#allocation2 + $0x338] sm:$0xff]  ;;  %vm3762_vm1 = vmmov %vm3761_vm0 }
 0x107   : > { %1482 = vst [vmem:[#allocation2 + $0x370] ss:$-76 sps:$4 sm:$0xff] %v1463_v19   ;;  %1578 = vst [vmem:[#allocation2 + $0x3d8] ss:$-76 sps:$4 sm:$0xff] %v1559_v21   ;;  %1366 = vrot.lane.b32.xlu1 %v3267_v15, %s2772_s9  ;;  %1364 = vrot.lane.b32.xlu0 %v3200_v51, %s2772_s9 }
 0x109   : > { %v1632_v11 = vpop.permute.xlu1 %1631  ;;  %v1537_v23 = vpop.permute.xlu0 %1536 }
 0x10a   : > { %v1556_v24 = vsel %vm3756_vm5, %v1537_v23, %v1539_v2  ;;  %v1805_v27 = vld [vmem:[#allocation2 + $0x378] sm:$0xff]  ;;  %v1806_v47 = vld [vmem:[#allocation2 + $0x380] sm:$0xff]  ;;  %vm3763_vm5 = vmmov %vm3755_vm4 }
 0x10b   : > { %1575 = vst [vmem:[#allocation2 + $0x3c0] ss:$-76 sps:$4 sm:$0xff] %v1556_v24   ;;  %1455 = vrot.lane.b32.xlu1 %v3202_v52, %s2773_s10  ;;  %1453 = vrot.lane.b32.xlu0 %v3187_v48, %s2773_s10  ;;  %v2546_v28 = vpack.c.bf16 %v1805_v27, %v1795_v25  ;;  %v2578_v42 = vpack.c.bf16 %v1806_v47, %v1796_v41  ;;  %v3325_v27 = vld [vmem:[%s3741_s2] sm:$0xff] }
 0x10d   : > { %v1636_v30 = vpop.permute.xlu1 %1635  ;;  %2547 = vmatprep.subr.bf16.mxu0 %v2546_v28  ;;  %v1634_v31 = vpop.permute.xlu0 %1633  ;;  %v3334_v28 = vcombine.high %v3111_v43, %v3111_v43 }
 0x10e   : > { %v1650_v32 = vsel %vm855_vm15, %v1632_v11, %v1634_v31  ;;  %v1651_v35 = vsel %vm855_vm15, %v1634_v31, %v1636_v30  ;;  %v1807_v38 = vld [vmem:[#allocation2 + $0x388] sm:$0xff]  ;;  %v1794_v46 = vld [vmem:[#allocation2 + $0x320] sm:$0xff] }
 0x10f   : > { %1669 = vst [vmem:[#allocation2 + $0x418] ss:$-76 sps:$4 sm:$0xff] %v1650_v32   ;;  %1670 = vst [vmem:[#allocation2 + $0x420] ss:$-76 sps:$4 sm:$0xff] %v1651_v35   ;;  %1459 = vrot.lane.b32.xlu1 %v3267_v15, %s2773_s10  ;;  %1457 = vrot.lane.b32.xlu0 %v3200_v51, %s2773_s10  ;;  %v2576_v39 = vpack.c.bf16 %v1807_v38, %v1797_v36  ;;  %v590_v38 = vld [vmem:[%s2835_s26 + $0x20] sm:$0xff] }
 0x110   : > { %614 = vst [vmem:[#allocation2 + $0xe0] sm:$0xf] %v590_v38 }
 0x111   : > { %v1630_v12 = vpop.permute.xlu1 %1629  ;;  %2577 = vmatprep.subr.bf16.mxu1 %v2576_v39  ;;  %v3289_v44 = vpop.permute.xlu0 %1637 }
 0x112   : > { %v1649_v45 = vsel %vm855_vm15, %v1630_v12, %v1632_v11  ;;  %v1652_v53 = vsel %vm855_vm15, %v1636_v30, %v3289_v44  ;;  %2579 = vmatpush1.bf16.msra.mxu1 %v2578_v42  ;;  %v1804_v50 = vld [vmem:[#allocation2 + $0x370] sm:$0xff]  ;;  %v3375_v12 = vld [vmem:[%s3741_s2 + $0x8] sm:$0xf] }
 0x113   : > { %1668 = vst [vmem:[#allocation2 + $0x410] ss:$-76 sps:$4 sm:$0xff] %v1649_v45   ;;  %1671 = vst [vmem:[#allocation2 + $0x428] ss:$-76 sps:$4 sm:$0xff] %v1652_v53   ;;  %1548 = vrot.lane.b32.xlu1 %v3202_v52, %s2774_s11  ;;  %1546 = vrot.lane.b32.xlu0 %v3187_v48, %s2774_s11  ;;  %v2548_v54 = vpack.c.bf16 %v1804_v50, %v1794_v46  ;;  %v600_v45 = vcombine.high %v590_v38, %v590_v38 }
 0x115   : > { %v340_v55 = vpop.permute.xlu1 %339  ;;  %2549 = vmatpush1.bf16.msra.mxu0 %v2548_v54  ;;  %v338_v56 = vpop.permute.xlu0 %337  ;;  %615 = vst [vmem:[#allocation2 + $0xe8] sm:$0xf] %v600_v45 }
 0x116   : > { %v353_v58 = vsel %vm349_vm2, %v2982_v29, %v338_v56  ;;  %v354_v60 = vsel %vm349_vm2, %v338_v56, %v340_v55  ;;  %v1815_v61 = vld [vmem:[#allocation2 + $0x3c8] sm:$0xff]  ;;  %v1825_v62 = vld [vmem:[#allocation2 + $0x418] sm:$0xf]  ;;  %v1816_v22 = vld [vmem:[#allocation2 + $0x3d0] sm:$0xff] }
 0x117   : > { %374 = vst [vmem:[#allocation2 + $0x20] sm:$0xf] %v353_v58  ;;  %375 = vst [vmem:[#allocation2 + $0x28] sm:$0xf] %v354_v60  ;;  %1552 = vrot.lane.b32.xlu1 %v3267_v15, %s2774_s11  ;;  %1550 = vrot.lane.b32.xlu0 %v3200_v51, %s2774_s11  ;;  %v2550_v4 = vpack.c.bf16 %v1825_v62, %v1815_v61  ;;  %v1826_v6 = vld [vmem:[#allocation2 + $0x420] sm:$0xf] }
 0x118   : > { %v2583_v25 = vpack.c.bf16 %v1826_v6, %v1816_v22 }
 0x119   : > { %v3309_v5 = vpop.permute.xlu1 %343  ;;  %2552 = vmatprep.subr.msk.bf16.mxu0 %vm3301_vm10, %v2550_v4  ;;  %v342_v29 = vpop.permute.xlu0 %341 }
 0x11a   : > { %v355_v7 = vsel %vm349_vm2, %v340_v55, %v342_v29  ;;  %v356_v8 = vsel %vm349_vm2, %v342_v29, %v3309_v5  ;;  %v1814_v9 = vld [vmem:[#allocation2 + $0x3c0] sm:$0xff]  ;;  %v1824_v13 = vld [vmem:[#allocation2 + $0x410] sm:$0xf]  ;;  %v1817_v17 = vld [vmem:[#allocation2 + $0x3d8] sm:$0xff] }
 0x11b   : > { %376 = vst [vmem:[#allocation2 + $0x30] sm:$0xf] %v355_v7  ;;  %377 = vst [vmem:[#allocation2 + $0x38] sm:$0xf] %v356_v8  ;;  %1641 = vrot.lane.b32.xlu1 %v3202_v52, %s2775_s12  ;;  %1639 = vrot.lane.b32.xlu0 %v3187_v48, %s2775_s12  ;;  %v2553_v19 = vpack.c.bf16 %v1824_v13, %v1814_v9  ;;  %v1827_v21 = vld [vmem:[#allocation2 + $0x428] sm:$0xf] }
 0x11c   : > { %v2580_v11 = vpack.c.bf16 %v1827_v21, %v1817_v17 }
 0x11d   : > { %v408_v23 = vpop.permute.xlu1 %407  ;;  %2555 = vmatpush1.bf16.msk.msra.mxu0 %vm3301_vm10, %v2553_v19  ;;  %v406_v24 = vpop.permute.xlu0 %405 }
 0x11e   : > { %2582 = vmatprep.subr.msk.bf16.mxu1 %vm3301_vm10, %v2580_v11  ;;  %v421_v48 = vsel %vm417_vm3, %v2994_v33, %v406_v24  ;;  %v422_v52 = vsel %vm417_vm3, %v406_v24, %v408_v23  ;;  %v1268_v24 = vld [vmem:[%s2844_s29 + $0x40] sm:$0xff]  ;;  %s2692_s29 = smul.u32 160, %s3784_s18 }
 0x11f   : > { %442 = vst [vmem:[#allocation2 + $0x20] sm:$0xf0] %v421_v48  ;;  %443 = vst [vmem:[#allocation2 + $0x28] sm:$0xf0] %v422_v52  ;;  %2585 = vmatpush1.bf16.msk.msra.mxu1 %vm3301_vm10, %v2583_v25  ;;  %1645 = vrot.lane.b32.xlu1 %v3267_v15, %s2775_s12  ;;  %v1288_v48 = vrot.slane %v1268_v24, 4 }
 0x120   : > { %1643 = vrot.lane.b32.xlu0 %v3200_v51, %s2775_s12  ;;  %2506 = vmatmul.mubr.msk.f32.vlgmr.msra.gmra.mrb[0].mxu0 %vm3747_vm11, %v3325_v27 }
 0x121   : > { %v3344_v33 = vpop.permute.xlu1 %411  ;;  %v410_v30 = vpop.permute.xlu0 %409  ;;  %1954 = vmatprep.mubr.f32.mxu0 %v2767_v0  ;;  %1308 = vst [vmem:[#allocation2 + $0x310] ss:$-76 sps:$4 sm:$0xff] %v1288_v48  }
 0x122   : > { %v423_v31 = vsel %vm417_vm3, %v408_v23, %v410_v30  ;;  %v424_v47 = vsel %vm417_vm3, %v410_v30, %v3344_v33  ;;  %2510 = vmatmul.mubr.msk.f32.vlgmr.msra.gmra.mrb[0].mxu1 %vm3747_vm11, %v3325_v27 }
 0x123   : > { %444 = vst [vmem:[#allocation2 + $0x30] sm:$0xf0] %v423_v31  ;;  %445 = vst [vmem:[#allocation2 + $0x38] sm:$0xf0] %v424_v47  ;;  %347 = vrot.lane.b32.xlu1 %v3334_v28, %s2768_s30  ;;  %2031 = vmatprep.mubr.f32.mxu1 %v2767_v0 }
 0x124   : > { %345 = vrot.lane.b32.xlu0 %v3111_v43, %s2768_s30  ;;  %2507 = vmatmul.mubr.msk.f32.gmra.mrb[2].mxu0 %vm3747_vm11, %v3375_v12 }
 0x125   : > { %v476_v51 = vpop.permute.xlu1 %475  ;;  %v474_v32 = vpop.permute.xlu0 %473  ;;  %2102 = vmatprep.mubr.f32.mxu0 %v2767_v0 }
 0x126   : > { %v489_v35 = vsel %vm485_vm6, %v3011_v40, %v474_v32  ;;  %v490_v36 = vsel %vm485_vm6, %v474_v32, %v476_v51  ;;  %2511 = vmatmul.mubr.msk.f32.gmra.mrb[2].mxu1 %vm3747_vm11, %v3375_v12  ;;  %v1699_v62 = vld [vmem:[#allocation2 + $0x28] sm:$0xff]  ;;  %v1698_v22 = vld [vmem:[#allocation2 + $0x20] sm:$0xff] }
 0x127   : > { %510 = vst [vmem:[#allocation2 + $0x70] sm:$0xf] %v489_v35  ;;  %511 = vst [vmem:[#allocation2 + $0x78] sm:$0xf] %v490_v36  ;;  %415 = vrot.lane.b32.xlu1 %v3111_v43, %s2769_s6  ;;  %2179 = vmatprep.mubr.f32.mxu1 %v2767_v0 }
 0x128   : > { %413 = vrot.lane.b32.xlu0 %v3122_v57, %s2769_s6 }
 0x129   : > { %v3365_v39 = vpop.permute.xlu1 %479  ;;  %v478_v41 = vpop.permute.xlu0 %477 }
 0x12a   : > { %v491_v42 = vsel %vm485_vm6, %v476_v51, %v478_v41  ;;  %v492_v40 = vsel %vm485_vm6, %v478_v41, %v3365_v39  ;;  %v1701_v13 = vld [vmem:[#allocation2 + $0x38] sm:$0xff]  ;;  %v1700_v17 = vld [vmem:[#allocation2 + $0x30] sm:$0xff] }
 0x12b   : > { %512 = vst [vmem:[#allocation2 + $0x80] sm:$0xf] %v491_v42  ;;  %513 = vst [vmem:[#allocation2 + $0x88] sm:$0xf] %v492_v40  ;;  %483 = vrot.lane.b32.xlu1 %v3334_v28, %s2770_s7 }
 0x12c   : > { %481 = vrot.lane.b32.xlu0 %v3111_v43, %s2770_s7 }
 0x12d   : > { %v544_v53 = vpop.permute.xlu1 %543  ;;  %v542_v46 = vpop.permute.xlu0 %541 }
 0x12e   : > { %v557_v50 = vsel %vm553_vm9, %v3035_v49, %v542_v46  ;;  %v558_v54 = vsel %vm553_vm9, %v542_v46, %v544_v53 }
 0x12f   : > { %578 = vst [vmem:[#allocation2 + $0x70] sm:$0xf0] %v557_v50  ;;  %579 = vst [vmem:[#allocation2 + $0x78] sm:$0xf0] %v558_v54  ;;  %551 = vrot.lane.b32.xlu1 %v3111_v43, %s2771_s8 }
 0x130   : > { %549 = vrot.lane.b32.xlu0 %v3122_v57, %s2771_s8 }
 0x131   : > { %v3392_v55 = vpop.permute.xlu1 %547  ;;  %v546_v56 = vpop.permute.xlu0 %545 }
 0x132   : > { %v559_v58 = vsel %vm553_vm9, %v544_v53, %v546_v56  ;;  %v560_v49 = vsel %vm553_vm9, %v546_v56, %v3392_v55 }
 0x133   : > { %580 = vst [vmem:[#allocation2 + $0x80] sm:$0xf0] %v559_v58  ;;  %581 = vst [vmem:[#allocation2 + $0x88] sm:$0xf0] %v560_v49  ;;  %717 = vrot.lane.b32.xlu1 %v3334_v28, %s2773_s10 }
 0x134   : > { %649 = vrot.lane.b32.xlu0 %v3111_v43, %s2772_s9 }
 0x135   : > { %v644_v60 = vpop.permute.xlu1 %643  ;;  %v642_v61 = vpop.permute.xlu0 %641 }
 0x136   : > { %v656_v57 = vsel %vm651_vm12, %v3056_v63, %v642_v61  ;;  %v657_v4 = vsel %vm651_vm12, %v642_v61, %v644_v60  ;;  %v1709_v29 = vld [vmem:[#allocation2 + $0x78] sm:$0xff]  ;;  %v1708_v6 = vld [vmem:[#allocation2 + $0x70] sm:$0xff] }
 0x137   : > { %675 = vst [vmem:[#allocation2 + $0xc0] sm:$0xf0] %v656_v57  ;;  %676 = vst [vmem:[#allocation2 + $0xc8] sm:$0xf0] %v657_v4  ;;  %853 = vrot.lane.b32.xlu1 %v3334_v28, %s2775_s12  ;;  %v2586_v7 = vpack.c.bf16 %v1709_v29, %v1699_v62  ;;  %v2588_v8 = vpack.c.bf16 %v1708_v6, %v1698_v22 }
 0x138   : > { %785 = vrot.lane.b32.xlu0 %v3111_v43, %s2774_s11 }
 0x139   : > { %v3408_v9 = vpop.permute.xlu1 %647  ;;  %2587 = vmatprep.subr.bf16.mxu0 %v2586_v7  ;;  %v646_v63 = vpop.permute.xlu0 %645 }
 0x13a   : > { %v658_v19 = vsel %vm651_vm12, %v644_v60, %v646_v63  ;;  %v659_v21 = vsel %vm651_vm12, %v646_v63, %v3408_v9  ;;  %2589 = vmatpush1.bf16.msra.mxu0 %v2588_v8  ;;  %v1711_v11 = vld [vmem:[#allocation2 + $0x88] sm:$0xff]  ;;  %v1710_v23 = vld [vmem:[#allocation2 + $0x80] sm:$0xff] }
 0x13b   : > { %677 = vst [vmem:[#allocation2 + $0xd0] sm:$0xf0] %v658_v19  ;;  %678 = vst [vmem:[#allocation2 + $0xd8] sm:$0xf0] %v659_v21  ;;  %936 = vrot.lane.b32.xlu1 %v3096_v34, %s2768_s30  ;;  %v2616_v43 = vpack.c.bf16 %v1711_v11, %v1701_v13  ;;  %v2618_v25 = vpack.c.bf16 %v1710_v23, %v1700_v17  ;;  %v1834_v21 = vld [vmem:[%s3742_s3] sm:$0xff]  ;;  %v2777_v23 = vmov 0  }
 0x13c   : > { %934 = vrot.lane.b32.xlu0 %v3267_v15, %s2768_s30  ;;  %v1835_v11 = vld [vmem:[%s3742_s3 + $0x8] sm:$0xf]  ;;  %2729 = vset.pattern.permute.xlu1 %v2777_v23 }
 0x13d   : > { %v712_v52 = vpop.permute.xlu1 %711  ;;  %2617 = vmatprep.subr.bf16.mxu1 %v2616_v43  ;;  %v710_v28 = vpop.permute.xlu0 %709  ;;  %2728 = vset.pattern.permute.xlu0 %v2777_v23 }
 0x13e   : > { %v724_v30 = vsel %vm3759_vm13, %v3074_v16, %v710_v28  ;;  %v725_v31 = vsel %vm3760_vm14, %v710_v28, %v712_v52  ;;  %2619 = vmatpush1.bf16.msra.mxu1 %v2618_v25  ;;  %v1719_v50 = vld [vmem:[#allocation2 + $0xc8] sm:$0xff]  ;;  %v1718_v58 = vld [vmem:[#allocation2 + $0xc0] sm:$0xff]  ;;  %vm3766_vm13 = vmmov %vm3761_vm0 }
 0x13f   : > { %743 = vst [vmem:[#allocation2 + $0x110] sm:$0xf] %v724_v30  ;;  %744 = vst [vmem:[#allocation2 + $0x118] sm:$0xf] %v725_v31  ;;  %1029 = vrot.lane.b32.xlu1 %v3096_v34, %s2769_s6 }
 0x140   : > { %1027 = vrot.lane.b32.xlu0 %v3267_v15, %s2769_s6  ;;  %vm3767_vm14 = vmmov %vm3761_vm0 }
 0x141   : > { %v3425_v47 = vpop.permute.xlu1 %715  ;;  %v714_v51 = vpop.permute.xlu0 %713 }
 0x142   : > { %v726_v32 = vsel %vm3761_vm0, %v712_v52, %v714_v51  ;;  %v727_v35 = vsel %vm3762_vm1, %v714_v51, %v3425_v47  ;;  %v1720_v6 = vld [vmem:[#allocation2 + $0xd0] sm:$0xff]  ;;  %vm3768_vm1 = vmmov %vm3761_vm0 }
 0x143   : > { %745 = vst [vmem:[#allocation2 + $0x120] sm:$0xf] %v726_v32  ;;  %746 = vst [vmem:[#allocation2 + $0x128] sm:$0xf] %v727_v35  ;;  %1122 = vrot.lane.b32.xlu1 %v3096_v34, %s2770_s7 }
 0x144   : > { %1120 = vrot.lane.b32.xlu0 %v3267_v15, %s2770_s7  ;;  %s3658_s7 = scalar_lea.vmem %s3744_s5, %s2692_s29 }
 0x145   : > { %v780_v16 = vpop.permute.xlu1 %779  ;;  %v778_v36 = vpop.permute.xlu0 %777 }
 0x146   : > { %v792_v38 = vsel %vm3755_vm4, %v3089_v26, %v778_v36  ;;  %v793_v41 = vsel %vm3763_vm5, %v778_v36, %v780_v16  ;;  %vm3769_vm5 = vmmov %vm3755_vm4 }
 0x147   : > { %811 = vst [vmem:[#allocation2 + $0x110] sm:$0xf0] %v792_v38  ;;  %812 = vst [vmem:[#allocation2 + $0x118] sm:$0xf0] %v793_v41  ;;  %1215 = vrot.lane.b32.xlu1 %v3096_v34, %s2771_s8 }
 0x148   : > { %1213 = vrot.lane.b32.xlu0 %v3267_v15, %s2771_s8 }
 0x149   : > { %v3441_v42 = vpop.permute.xlu1 %783  ;;  %v782_v40 = vpop.permute.xlu0 %781 }
 0x14a   : > { %v794_v45 = vsel %vm3764_vm7, %v780_v16, %v782_v40  ;;  %v795_v53 = vsel %vm3765_vm8, %v782_v40, %v3441_v42  ;;  %vm3770_vm7 = vmmov %vm3755_vm4 }
 0x14b   : > { %813 = vst [vmem:[#allocation2 + $0x120] sm:$0xf0] %v794_v45  ;;  %814 = vst [vmem:[#allocation2 + $0x128] sm:$0xf0] %v795_v53  ;;  %1461 = vrot.lane.b32.xlu1 %v3096_v34, %s2773_s10 }
 0x14c   : > { %1368 = vrot.lane.b32.xlu0 %v3096_v34, %s2772_s9  ;;  %vm3771_vm8 = vmmov %vm3755_vm4 }
 0x14d   : > { %v848_v26 = vpop.permute.xlu1 %847  ;;  %v846_v46 = vpop.permute.xlu0 %845 }
 0x14e   : > { %v860_v15 = vsel %vm855_vm15, %v3131_v1, %v846_v46  ;;  %v861_v54 = vsel %vm855_vm15, %v846_v46, %v848_v26  ;;  %v1729_v56 = vld [vmem:[#allocation2 + $0x118] sm:$0xff]  ;;  %v1728_v49 = vld [vmem:[#allocation2 + $0x110] sm:$0xff] }
 0x14f   : > { %879 = vst [vmem:[#allocation2 + $0x160] sm:$0xf] %v860_v15  ;;  %880 = vst [vmem:[#allocation2 + $0x168] sm:$0xf] %v861_v54  ;;  %1647 = vrot.lane.b32.xlu1 %v3096_v34, %s2775_s12  ;;  %v2590_v60 = vpack.c.bf16 %v1729_v56, %v1719_v50  ;;  %v2592_v61 = vpack.c.bf16 %v1728_v49, %v1718_v58  ;;  %v1721_v1 = vld [vmem:[#allocation2 + $0xd8] sm:$0xff] }
 0x150   : > { %1554 = vrot.lane.b32.xlu0 %v3096_v34, %s2774_s11 }
 0x151   : > { %v3457_v62 = vpop.permute.xlu1 %851  ;;  %2591 = vmatprep.subr.bf16.mxu0 %v2590_v60  ;;  %v850_v57 = vpop.permute.xlu0 %849 }
 0x152   : > { %v862_v4 = vsel %vm855_vm15, %v848_v26, %v850_v57  ;;  %v863_v29 = vsel %vm855_vm15, %v850_v57, %v3457_v62  ;;  %2593 = vmatpush1.bf16.msra.mxu0 %v2592_v61  ;;  %v1731_v22 = vld [vmem:[#allocation2 + $0x128] sm:$0xff]  ;;  %v1730_v7 = vld [vmem:[#allocation2 + $0x120] sm:$0xff] }
 0x153   : > { %881 = vst [vmem:[#allocation2 + $0x170] sm:$0xf] %v862_v4  ;;  %882 = vst [vmem:[#allocation2 + $0x178] sm:$0xf] %v863_v29  ;;  %v2620_v8 = vpack.c.bf16 %v1731_v22, %v1721_v1  ;;  %v2622_v63 = vpack.c.bf16 %v1730_v7, %v1720_v6  ;;  %1843 = vperm.xlu1 %2729, %v1835_v11  }
 0x154   : > { %1838 = vperm.xlu0 %2728, %v1834_v21  }
 0x155   : > { %v929_v13 = vpop.permute.xlu1 %928  ;;  %2621 = vmatprep.subr.bf16.mxu1 %v2620_v8  ;;  %v927_v34 = vpop.permute.xlu0 %926 }
 0x156   : > { %v941_v17 = vsel %vm349_vm2, %v3149_v14, %v927_v34  ;;  %v942_v19 = vsel %vm349_vm2, %v927_v34, %v929_v13  ;;  %2623 = vmatpush1.bf16.msra.mxu1 %v2622_v63 }
 0x157   : > { %962 = vst [vmem:[#allocation2 + $0x1b0] ss:$-76 sps:$4 sm:$0xff] %v941_v17   ;;  %963 = vst [vmem:[#allocation2 + $0x1b8] ss:$-76 sps:$4 sm:$0xff] %v942_v19  }
 0x159   : > { %v3473_v14 = vpop.permute.xlu1 %932  ;;  %v931_v24 = vpop.permute.xlu0 %930 }
 0x15a   : > { %v943_v43 = vsel %vm349_vm2, %v929_v13, %v931_v24  ;;  %v944_v25 = vsel %vm349_vm2, %v931_v24, %v3473_v14 }
 0x15b   : > { %964 = vst [vmem:[#allocation2 + $0x1c0] ss:$-76 sps:$4 sm:$0xff] %v943_v43   ;;  %965 = vst [vmem:[#allocation2 + $0x1c8] ss:$-76 sps:$4 sm:$0xff] %v944_v25  }
 0x15d   : > { %v1022_v48 = vpop.permute.xlu1 %1021  ;;  %v1020_v52 = vpop.permute.xlu0 %1019 }
 0x15e   : > { %v1034_v28 = vsel %vm417_vm3, %v3167_v10, %v1020_v52  ;;  %v1035_v30 = vsel %vm417_vm3, %v1020_v52, %v1022_v48  ;;  %v1739_v38 = vld [vmem:[#allocation2 + $0x168] sm:$0xff]  ;;  %v1738_v45 = vld [vmem:[#allocation2 + $0x160] sm:$0xff] }
 0x15f   : > { %1054 = vst [vmem:[#allocation2 + $0x200] ss:$-76 sps:$4 sm:$0xff] %v1034_v28   ;;  %1055 = vst [vmem:[#allocation2 + $0x208] ss:$-76 sps:$4 sm:$0xff] %v1035_v30  }
 0x161   : > { %v3481_v31 = vpop.permute.xlu1 %1025  ;;  %v1024_v51 = vpop.permute.xlu0 %1023 }
 0x162   : > { %v1036_v32 = vsel %vm417_vm3, %v1022_v48, %v1024_v51  ;;  %v1037_v35 = vsel %vm417_vm3, %v1024_v51, %v3481_v31  ;;  %v1741_v54 = vld [vmem:[#allocation2 + $0x178] sm:$0xff]  ;;  %v1740_v49 = vld [vmem:[#allocation2 + $0x170] sm:$0xff] }
 0x163   : > { %1056 = vst [vmem:[#allocation2 + $0x210] ss:$-76 sps:$4 sm:$0xff] %v1036_v32   ;;  %1057 = vst [vmem:[#allocation2 + $0x218] ss:$-76 sps:$4 sm:$0xff] %v1037_v35  }
 0x165   : > { %v1115_v16 = vpop.permute.xlu1 %1114  ;;  %v1113_v36 = vpop.permute.xlu0 %1112 }
 0x166   : > { %v1127_v10 = vsel %vm485_vm6, %v3191_v37, %v1113_v36  ;;  %v1128_v41 = vsel %vm485_vm6, %v1113_v36, %v1115_v16  ;;  %v1749_v40 = vld [vmem:[#allocation2 + $0x1b8] sm:$0xff]  ;;  %v1748_v53 = vld [vmem:[#allocation2 + $0x1b0] sm:$0xff] }
 0x167   : > { %1148 = vst [vmem:[#allocation2 + $0x250] ss:$-76 sps:$4 sm:$0xff] %v1127_v10   ;;  %1149 = vst [vmem:[#allocation2 + $0x258] ss:$-76 sps:$4 sm:$0xff] %v1128_v41   ;;  %v2594_v26 = vpack.c.bf16 %v1749_v40, %v1739_v38  ;;  %v2596_v46 = vpack.c.bf16 %v1748_v53, %v1738_v45 }
 0x169   : > { %v3489_v50 = vpop.permute.xlu1 %1118  ;;  %2595 = vmatprep.subr.bf16.mxu0 %v2594_v26  ;;  %v1117_v15 = vpop.permute.xlu0 %1116 }
 0x16a   : > { %v1129_v56 = vsel %vm485_vm6, %v1115_v16, %v1117_v15  ;;  %v1130_v58 = vsel %vm485_vm6, %v1117_v15, %v3489_v50  ;;  %2597 = vmatpush1.bf16.msra.mxu0 %v2596_v46  ;;  %v1751_v37 = vld [vmem:[#allocation2 + $0x1c8] sm:$0xff]  ;;  %v1750_v60 = vld [vmem:[#allocation2 + $0x1c0] sm:$0xff] }
 0x16b   : > { %1150 = vst [vmem:[#allocation2 + $0x260] ss:$-76 sps:$4 sm:$0xff] %v1129_v56   ;;  %1151 = vst [vmem:[#allocation2 + $0x268] ss:$-76 sps:$4 sm:$0xff] %v1130_v58   ;;  %v2624_v61 = vpack.c.bf16 %v1751_v37, %v1741_v54  ;;  %v2626_v57 = vpack.c.bf16 %v1750_v60, %v1740_v49 }
 0x16d   : > { %v1208_v1 = vpop.permute.xlu1 %1207  ;;  %2625 = vmatprep.subr.bf16.mxu1 %v2624_v61  ;;  %v1206_v4 = vpop.permute.xlu0 %1205 }
 0x16e   : > { %v1220_v29 = vsel %vm553_vm9, %v3214_v59, %v1206_v4  ;;  %v1221_v22 = vsel %vm553_vm9, %v1206_v4, %v1208_v1  ;;  %2627 = vmatpush1.bf16.msra.mxu1 %v2626_v57  ;;  %v1759_v17 = vld [vmem:[#allocation2 + $0x208] sm:$0xff]  ;;  %v1758_v11 = vld [vmem:[#allocation2 + $0x200] sm:$0xff] }
 0x16f   : > { %1240 = vst [vmem:[#allocation2 + $0x2a0] ss:$-76 sps:$4 sm:$0xff] %v1220_v29   ;;  %1241 = vst [vmem:[#allocation2 + $0x2a8] ss:$-76 sps:$4 sm:$0xff] %v1221_v22  }
 0x171   : > { %v3497_v6 = vpop.permute.xlu1 %1211  ;;  %v1210_v7 = vpop.permute.xlu0 %1209 }
 0x172   : > { %v1222_v8 = vsel %vm553_vm9, %v1208_v1, %v1210_v7  ;;  %v1223_v63 = vsel %vm553_vm9, %v1210_v7, %v3497_v6  ;;  %v1761_v28 = vld [vmem:[#allocation2 + $0x218] sm:$0xff]  ;;  %v1760_v32 = vld [vmem:[#allocation2 + $0x210] sm:$0xff] }
 0x173   : > { %1242 = vst [vmem:[#allocation2 + $0x2b0] ss:$-76 sps:$4 sm:$0xff] %v1222_v8   ;;  %1243 = vst [vmem:[#allocation2 + $0x2b8] ss:$-76 sps:$4 sm:$0xff] %v1223_v63  }
 0x175   : > { %v1363_v13 = vpop.permute.xlu1 %1362  ;;  %v1361_v34 = vpop.permute.xlu0 %1360 }
 0x176   : > { %v1374_v59 = vsel %vm651_vm12, %v3230_v20, %v1361_v34  ;;  %v1375_v19 = vsel %vm651_vm12, %v1361_v34, %v1363_v13  ;;  %v1769_v21 = vld [vmem:[#allocation2 + $0x258] sm:$0xff]  ;;  %v1768_v24 = vld [vmem:[#allocation2 + $0x250] sm:$0xff]  ;;  %v1779_v41 = vld [vmem:[#allocation2 + $0x2a8] sm:$0xff] }
 0x177   : > { %1393 = vst [vmem:[#allocation2 + $0x340] ss:$-76 sps:$4 sm:$0xff] %v1374_v59   ;;  %1394 = vst [vmem:[#allocation2 + $0x348] ss:$-76 sps:$4 sm:$0xff] %v1375_v19   ;;  %v2598_v43 = vpack.c.bf16 %v1769_v21, %v1759_v17  ;;  %v2600_v25 = vpack.c.bf16 %v1768_v24, %v1758_v11  ;;  %v1778_v26 = vld [vmem:[#allocation2 + $0x2a0] sm:$0xff] }
 0x179   : > { %v3505_v48 = vpop.permute.xlu1 %1366  ;;  %2599 = vmatprep.subr.bf16.mxu0 %v2598_v43  ;;  %v1365_v52 = vpop.permute.xlu0 %1364 }
 0x17a   : > { %v1376_v30 = vsel %vm651_vm12, %v1363_v13, %v1365_v52  ;;  %v1377_v51 = vsel %vm651_vm12, %v1365_v52, %v3505_v48  ;;  %2601 = vmatpush1.bf16.msra.mxu0 %v2600_v25  ;;  %v1771_v20 = vld [vmem:[#allocation2 + $0x268] sm:$0xff]  ;;  %v1770_v35 = vld [vmem:[#allocation2 + $0x260] sm:$0xff]  ;;  %v1781_v37 = vld [vmem:[#allocation2 + $0x2b8] sm:$0xff] }
 0x17b   : > { %1395 = vst [vmem:[#allocation2 + $0x350] ss:$-76 sps:$4 sm:$0xff] %v1376_v30   ;;  %1396 = vst [vmem:[#allocation2 + $0x358] ss:$-76 sps:$4 sm:$0xff] %v1377_v51   ;;  %v2628_v16 = vpack.c.bf16 %v1771_v20, %v1761_v28  ;;  %v2630_v36 = vpack.c.bf16 %v1770_v35, %v1760_v32  ;;  %v1780_v61 = vld [vmem:[#allocation2 + $0x2b0] sm:$0xff] }
 0x17d   : > { %v1456_v38 = vpop.permute.xlu1 %1455  ;;  %2629 = vmatprep.subr.bf16.mxu1 %v2628_v16  ;;  %v1454_v10 = vpop.permute.xlu0 %1453 }
 0x17e   : > { %v1467_v40 = vsel %vm3766_vm13, %v3252_v3, %v1454_v10  ;;  %v1468_v45 = vsel %vm3767_vm14, %v1454_v10, %v1456_v38  ;;  %2631 = vmatpush1.bf16.msra.mxu1 %v2630_v36  ;;  %v1789_v53 = vld [vmem:[#allocation2 + $0x2f8] sm:$0xff]  ;;  %v1788_v46 = vld [vmem:[#allocation2 + $0x2f0] sm:$0xff]  ;;  %vm748_vm13 = vcmask 773120   ;;  %vm750_vm14 = vcmask 1044216  }
 0x17f   : > { %1486 = vst [vmem:[#allocation2 + $0x390] ss:$-76 sps:$4 sm:$0xff] %v1467_v40   ;;  %1487 = vst [vmem:[#allocation2 + $0x398] ss:$-76 sps:$4 sm:$0xff] %v1468_v45   ;;  %v2602_v15 = vpack.c.bf16 %v1789_v53, %v1779_v41  ;;  %v2604_v54 = vpack.c.bf16 %v1788_v46, %v1778_v26 }
 0x181   : > { %v3513_v56 = vpop.permute.xlu1 %1459  ;;  %2603 = vmatprep.subr.bf16.mxu0 %v2602_v15  ;;  %v1458_v58 = vpop.permute.xlu0 %1457 }
 0x182   : > { %v1469_v49 = vsel %vm3761_vm0, %v1456_v38, %v1458_v58  ;;  %v1470_v3 = vsel %vm3768_vm1, %v1458_v58, %v3513_v56  ;;  %2605 = vmatpush1.bf16.msra.mxu0 %v2604_v54  ;;  %v1791_v60 = vld [vmem:[#allocation2 + $0x308] sm:$0xff]  ;;  %v1790_v57 = vld [vmem:[#allocation2 + $0x300] sm:$0xff]  ;;  %vm680_vm0 = vcmask 1039364   ;;  %vm682_vm1 = vcmask 1048572  }
 0x183   : > { %1488 = vst [vmem:[#allocation2 + $0x3a0] ss:$-76 sps:$4 sm:$0xff] %v1469_v49   ;;  %1489 = vst [vmem:[#allocation2 + $0x3a8] ss:$-76 sps:$4 sm:$0xff] %v1470_v3   ;;  %v2632_v1 = vpack.c.bf16 %v1791_v60, %v1781_v37  ;;  %v2634_v4 = vpack.c.bf16 %v1790_v57, %v1780_v61 }
 0x185   : > { %v1549_v29 = vpop.permute.xlu1 %1548  ;;  %2633 = vmatprep.subr.bf16.mxu1 %v2632_v1  ;;  %v1547_v22 = vpop.permute.xlu0 %1546 }
 0x186   : > { %v1560_v7 = vsel %vm3755_vm4, %v3269_v18, %v1547_v22  ;;  %v1561_v8 = vsel %vm3769_vm5, %v1547_v22, %v1549_v29  ;;  %2635 = vmatpush1.bf16.msra.mxu1 %v2634_v4  ;;  %v1799_v21 = vld [vmem:[#allocation2 + $0x348] sm:$0xff]  ;;  %v1798_v43 = vld [vmem:[#allocation2 + $0x340] sm:$0xff]  ;;  %vm3772_vm4 = vcmask 777216   ;;  %vm884_vm5 = vcmask 756736  }
 0x187   : > { %1579 = vst [vmem:[#allocation2 + $0x3e0] ss:$-76 sps:$4 sm:$0xff] %v1560_v7   ;;  %1580 = vst [vmem:[#allocation2 + $0x3e8] ss:$-76 sps:$4 sm:$0xff] %v1561_v8  }
 0x189   : > { %v3521_v63 = vpop.permute.xlu1 %1552  ;;  %v1551_v13 = vpop.permute.xlu0 %1550 }
 0x18a   : > { %v1562_v34 = vsel %vm3770_vm7, %v1549_v29, %v1551_v13  ;;  %v1563_v17 = vsel %vm3771_vm8, %v1551_v13, %v3521_v63  ;;  %v1801_v51 = vld [vmem:[#allocation2 + $0x358] sm:$0xff]  ;;  %v1800_v35 = vld [vmem:[#allocation2 + $0x350] sm:$0xff]  ;;  %vm886_vm7 = vcmask 1044200   ;;  %vm816_vm8 = vcmask 769028  }
 0x18b   : > { %1581 = vst [vmem:[#allocation2 + $0x3f0] ss:$-76 sps:$4 sm:$0xff] %v1562_v34   ;;  %1582 = vst [vmem:[#allocation2 + $0x3f8] ss:$-76 sps:$4 sm:$0xff] %v1563_v17  }
 0x18d   : > { %v1642_v59 = vpop.permute.xlu1 %1641  ;;  %v1640_v19 = vpop.permute.xlu0 %1639 }
 0x18e   : > { %v1653_v18 = vsel %vm855_vm15, %v3289_v44, %v1640_v19  ;;  %v1654_v11 = vsel %vm855_vm15, %v1640_v19, %v1642_v59  ;;  %v1809_v24 = vld [vmem:[#allocation2 + $0x398] sm:$0xff]  ;;  %v1808_v25 = vld [vmem:[#allocation2 + $0x390] sm:$0xff] }
 0x18f   : > { %1672 = vst [vmem:[#allocation2 + $0x430] ss:$-76 sps:$4 sm:$0xff] %v1653_v18   ;;  %1673 = vst [vmem:[#allocation2 + $0x438] ss:$-76 sps:$4 sm:$0xff] %v1654_v11   ;;  %v2606_v52 = vpack.c.bf16 %v1809_v24, %v1799_v21  ;;  %v2608_v28 = vpack.c.bf16 %v1808_v25, %v1798_v43 }
 0x191   : > { %v3529_v30 = vpop.permute.xlu1 %1645  ;;  %2607 = vmatprep.subr.bf16.mxu0 %v2606_v52 }
 0x192   : > { %v1644_v20 = vpop.permute.xlu0 %1643  ;;  %2609 = vmatpush1.bf16.msra.mxu0 %v2608_v28  ;;  %v1811_v32 = vld [vmem:[#allocation2 + $0x3a8] sm:$0xff]  ;;  %v1810_v16 = vld [vmem:[#allocation2 + $0x3a0] sm:$0xff] }
 0x193   : > { %v1655_v44 = vsel %vm855_vm15, %v1642_v59, %v1644_v20  ;;  %v1656_v36 = vsel %vm855_vm15, %v1644_v20, %v3529_v30  ;;  %v2636_v38 = vpack.c.bf16 %v1811_v32, %v1801_v51  ;;  %v2638_v10 = vpack.c.bf16 %v1810_v16, %v1800_v35 }
 0x194   : > { %1674 = vst [vmem:[#allocation2 + $0x440] ss:$-76 sps:$4 sm:$0xff] %v1655_v44   ;;  %1675 = vst [vmem:[#allocation2 + $0x448] ss:$-76 sps:$4 sm:$0xff] %v1656_v36  }
 0x195   : > { %v348_v41 = vpop.permute.xlu1 %347  ;;  %2637 = vmatprep.subr.bf16.mxu1 %v2636_v38 }
 0x196   : > { %v346_v40 = vpop.permute.xlu0 %345  ;;  %2639 = vmatpush1.bf16.msra.mxu1 %v2638_v10  ;;  %v1819_v45 = vld [vmem:[#allocation2 + $0x3e8] sm:$0xff]  ;;  %v1829_v53 = vld [vmem:[#allocation2 + $0x438] sm:$0xf]  ;;  %v1818_v26 = vld [vmem:[#allocation2 + $0x3e0] sm:$0xff] }
 0x197   : > { %v357_v46 = vsel %vm349_vm2, %v3309_v5, %v346_v40  ;;  %v358_v15 = vsel %vm349_vm2, %v346_v40, %v348_v41  ;;  %v2610_v54 = vpack.c.bf16 %v1829_v53, %v1819_v45  ;;  %v1828_v58 = vld [vmem:[#allocation2 + $0x430] sm:$0xf] }
 0x198   : > { %378 = vst [vmem:[#allocation2 + $0x40] sm:$0xf] %v357_v46  ;;  %379 = vst [vmem:[#allocation2 + $0x48] sm:$0xf] %v358_v15  ;;  %v2613_v37 = vpack.c.bf16 %v1828_v58, %v1818_v26 }
 0x199   : > { %v416_v49 = vpop.permute.xlu1 %415  ;;  %2612 = vmatprep.subr.msk.bf16.mxu0 %vm3301_vm10, %v2610_v54 }
 0x19a   : > { %v414_v3 = vpop.permute.xlu0 %413  ;;  %2615 = vmatpush1.bf16.msk.msra.mxu0 %vm3301_vm10, %v2613_v37 }
 0x19b   : > { %v425_v60 = vsel %vm417_vm3, %v3344_v33, %v414_v3  ;;  %v426_v5 = vsel %vm417_vm3, %v414_v3, %v416_v49  ;;  %v1821_v61 = vld [vmem:[#allocation2 + $0x3f8] sm:$0xff]  ;;  %v1831_v57 = vld [vmem:[#allocation2 + $0x448] sm:$0xf]  ;;  %v1820_v1 = vld [vmem:[#allocation2 + $0x3f0] sm:$0xff] }
 0x19c   : > { %446 = vst [vmem:[#allocation2 + $0x40] sm:$0xf0] %v425_v60  ;;  %447 = vst [vmem:[#allocation2 + $0x48] sm:$0xf0] %v426_v5  ;;  %v2640_v4 = vpack.c.bf16 %v1831_v57, %v1821_v61  ;;  %v1830_v29 = vld [vmem:[#allocation2 + $0x440] sm:$0xf] }
 0x19d   : > { %v484_v22 = vpop.permute.xlu1 %483  ;;  %v2643_v7 = vpack.c.bf16 %v1830_v29, %v1820_v1  ;;  %2514 = vmatmul.mubr.msk.f32.vlgmr.msra.gmra.mrb[4].mxu0 %vm3747_vm11, %v3325_v27 }
 0x19e   : > { %2642 = vmatprep.subr.msk.bf16.mxu1 %vm3301_vm10, %v2640_v4  ;;  %v482_v8 = vpop.permute.xlu0 %481  ;;  %2108 = vmatprep.mubr.f32.mxu0 %v2767_v0 }
 0x19f   : > { %v493_v33 = vsel %vm485_vm6, %v3365_v39, %v482_v8  ;;  %v494_v13 = vsel %vm485_vm6, %v482_v8, %v484_v22  ;;  %2645 = vmatpush1.bf16.msk.msra.mxu1 %vm3301_vm10, %v2643_v7 }
 0x1a0   : > { %514 = vst [vmem:[#allocation2 + $0x90] sm:$0xf] %v493_v33  ;;  %515 = vst [vmem:[#allocation2 + $0x98] sm:$0xf] %v494_v13 }
 0x1a1   : > { %v552_v34 = vpop.permute.xlu1 %551  ;;  %2515 = vmatmul.mubr.msk.f32.gmra.mrb[6].mxu0 %vm3747_vm11, %v3375_v12 }
 0x1a2   : > { %v550_v17 = vpop.permute.xlu0 %549  ;;  %2518 = vmatmul.mubr.msk.f32.vlgmr.msra.gmra.mrb[4].mxu1 %vm3747_vm11, %v3325_v27  ;;  %2256 = vmatprep.mubr.f32.mxu0 %v2767_v0 }
 0x1a3   : > { %v561_v39 = vsel %vm553_vm9, %v3392_v55, %v550_v17  ;;  %v562_v59 = vsel %vm553_vm9, %v550_v17, %v552_v34  ;;  %2185 = vmatprep.mubr.f32.mxu1 %v2767_v0  ;;  %v1702_v25 = vld [vmem:[#allocation2 + $0x40] sm:$0xff] }
 0x1a4   : > { %582 = vst [vmem:[#allocation2 + $0x90] sm:$0xf0] %v561_v39  ;;  %583 = vst [vmem:[#allocation2 + $0x98] sm:$0xf0] %v562_v59 }
 0x1a5   : > { %v718_v19 = vpop.permute.xlu1 %717 }
 0x1a6   : > { %v728_v21 = vsel %vm3772_vm4, %v3425_v47, %v718_v19  ;;  %749 = vst.msk [vmem:[#allocation2 + $0x138] sm:$0xf] %vm748_vm13, %v718_v19  ;;  %v650_v27 = vpop.permute.xlu0 %649  ;;  %2519 = vmatmul.mubr.msk.f32.gmra.mrb[6].mxu1 %vm3747_vm11, %v3375_v12  ;;  %vm3748_vm4 = vcmask 1048308   ;;  %vm3773_vm11 = vcmask 769024  }
 0x1a7   : > { %747 = vst [vmem:[#allocation2 + $0x130] sm:$0xf] %v728_v21  ;;  %751 = vst.msk [vmem:[#allocation2 + $0x138] sm:$0xf] %vm750_vm14, %v2767_v0  ;;  %v660_v55 = vsel %vm651_vm12, %v3408_v9, %v650_v27  ;;  %2262 = vmatprep.mubr.f32.mxu1 %v2767_v0  ;;  %v1703_v9 = vld [vmem:[#allocation2 + $0x48] sm:$0xff] }
 0x1a8   : > { %681 = vst.msk [vmem:[#allocation2 + $0xe8] sm:$0xf0] %vm680_vm0, %v650_v27  ;;  %679 = vst [vmem:[#allocation2 + $0xe0] sm:$0xf0] %v660_v55 }
 0x1a9   : > { %683 = vst.msk [vmem:[#allocation2 + $0xe8] sm:$0xf0] %vm682_vm1, %v2767_v0  ;;  %v854_v47 = vpop.permute.xlu1 %853 }
 0x1aa   : > { %v864_v18 = vsel %vm855_vm15, %v3457_v62, %v854_v47  ;;  %885 = vst.msk [vmem:[#allocation2 + $0x188] sm:$0xf] %vm884_vm5, %v854_v47  ;;  %v786_v11 = vpop.permute.xlu0 %785 }
 0x1ab   : > { %883 = vst [vmem:[#allocation2 + $0x180] sm:$0xf] %v864_v18  ;;  %887 = vst.msk [vmem:[#allocation2 + $0x188] sm:$0xf] %vm886_vm7, %v2767_v0  ;;  %v796_v24 = vsel %vm3773_vm11, %v3441_v42, %v786_v11  ;;  %v1713_v43 = vld [vmem:[#allocation2 + $0x98] sm:$0xff]  ;;  %v1712_v52 = vld [vmem:[#allocation2 + $0x90] sm:$0xff] }
 0x1ac   : > { %817 = vst.msk [vmem:[#allocation2 + $0x138] sm:$0xf0] %vm816_vm8, %v786_v11  ;;  %815 = vst [vmem:[#allocation2 + $0x130] sm:$0xf0] %v796_v24  ;;  %v2646_v62 = vpack.c.bf16 %v1713_v43, %v1703_v9  ;;  %v2648_v28 = vpack.c.bf16 %v1712_v52, %v1702_v25  ;;  %vm1411_vm11 = vcmask 1044472  }
 0x1ad   : > { %819 = vst.msk [vmem:[#allocation2 + $0x138] sm:$0xf0] %vm3748_vm4, %v2767_v0  ;;  %v937_v51 = vpop.permute.xlu1 %936  ;;  %vm3774_vm4 = vcmask 777216  }
 0x1ae   : > { %2647 = vmatprep.subr.bf16.mxu0 %v2646_v62  ;;  %2676 = vmatprep.subr.bf16.mxu1 %v2646_v62  ;;  %v935_v20 = vpop.permute.xlu0 %934 }
 0x1af   : > { %v945_v32 = vsel %vm349_vm2, %v3473_v14, %v935_v20  ;;  %v946_v42 = vsel %vm349_vm2, %v935_v20, %v937_v51  ;;  %2649 = vmatpush1.bf16.msra.mxu0 %v2648_v28  ;;  %2683 = vmatpush1.bf16.msra.mxu1 %v2648_v28  ;;  %v1722_v41 = vld [vmem:[#allocation2 + $0xe0] sm:$0xff]  ;;  %vm1491_vm2 = vcmask 777220   ;;  %v2275_v51 = vlaneseq }
 0x1b0   : > { %966 = vst [vmem:[#allocation2 + $0x1d0] ss:$-76 sps:$4 sm:$0xff] %v945_v32   ;;  %967 = vst [vmem:[#allocation2 + $0x1d8] ss:$-76 sps:$4 sm:$0xff] %v946_v42   ;;  %v1723_v16 = vld [vmem:[#allocation2 + $0xe8] sm:$0xff]  ;;  %v2742_v28 = vld [vmem:[%s3741_s2] sm:$0xff] }
 0x1b1   : > { %v1030_v35 = vpop.permute.xlu1 %1029  ;;  %v2269_v20 = vld [vmem:[%s3743_s4] sm:$0xff]  ;;  %v3641_v32 = vshrl.u32 %v2275_v51, 7 }
 0x1b2   : > { %v1028_v44 = vpop.permute.xlu0 %1027 }
 0x1b3   : > { %v1038_v36 = vsel %vm417_vm3, %v3481_v31, %v1028_v44  ;;  %v1039_v38 = vsel %vm417_vm3, %v1028_v44, %v1030_v35  ;;  %v1732_v40 = vld [vmem:[#allocation2 + $0x130] sm:$0xff]  ;;  %vm1503_vm3 = vcmask 1048316   ;;  %v2281_v2 = vsub.s32 1, %v3641_v32 }
 0x1b4   : > { %v1733_v10 = vld [vmem:[#allocation2 + $0x138] sm:$0xff]  ;;  %1058 = vst [vmem:[#allocation2 + $0x220] ss:$-76 sps:$4 sm:$0xff] %v1038_v36   ;;  %1059 = vst [vmem:[#allocation2 + $0x228] ss:$-76 sps:$4 sm:$0xff] %v1039_v38   ;;  %v2652_v45 = vpack.c.bf16 %v1732_v40, %v1722_v41  ;;  %v2285_v42 = vsub.s32 2, %v3641_v32 }
 0x1b5   : > { %v2650_v14 = vpack.c.bf16 %v1733_v10, %v1723_v16  ;;  %v1123_v53 = vpop.permute.xlu1 %1122  ;;  %v2289_v16 = vsub.s32 3, %v3641_v32  ;;  %v2277_v38 = vsub.s32 0, %v3641_v32 }
 0x1b6   : > { %v1121_v26 = vpop.permute.xlu0 %1120 }
 0x1b7   : > { %2651 = vmatprep.subr.bf16.mxu0 %v2650_v14  ;;  %2677 = vmatprep.subr.bf16.mxu1 %v2650_v14  ;;  %v1131_v46 = vsel %vm485_vm6, %v3489_v50, %v1121_v26  ;;  %v1132_v15 = vsel %vm485_vm6, %v1121_v26, %v1123_v53  ;;  %v1743_v58 = vld [vmem:[#allocation2 + $0x188] sm:$0xff]  ;;  %v1742_v60 = vld [vmem:[#allocation2 + $0x180] sm:$0xff]  ;;  %vm1408_vm6 = vcmask 1035264  }
 0x1b8   : > { %2653 = vmatpush1.bf16.msra.mxu0 %v2652_v45  ;;  %2684 = vmatpush1.bf16.msra.mxu1 %v2652_v45  ;;  %1152 = vst [vmem:[#allocation2 + $0x270] ss:$-76 sps:$4 sm:$0xff] %v1131_v46   ;;  %1153 = vst [vmem:[#allocation2 + $0x278] ss:$-76 sps:$4 sm:$0xff] %v1132_v15  }
 0x1b9   : > { %v1216_v31 = vpop.permute.xlu1 %1215 }
 0x1ba   : > { %v1214_v54 = vpop.permute.xlu0 %1213 }
 0x1bb   : > { %v1224_v37 = vsel %vm553_vm9, %v3497_v6, %v1214_v54  ;;  %v1225_v49 = vsel %vm553_vm9, %v1214_v54, %v1216_v31  ;;  %v1753_v3 = vld [vmem:[#allocation2 + $0x1d8] sm:$0xff]  ;;  %v1752_v5 = vld [vmem:[#allocation2 + $0x1d0] sm:$0xff]  ;;  %vm1677_vm9 = vcmask 760836  }
 0x1bc   : > { %1244 = vst [vmem:[#allocation2 + $0x2c0] ss:$-76 sps:$4 sm:$0xff] %v1224_v37   ;;  %1245 = vst [vmem:[#allocation2 + $0x2c8] ss:$-76 sps:$4 sm:$0xff] %v1225_v49   ;;  %v2654_v50 = vpack.c.bf16 %v1753_v3, %v1743_v58  ;;  %v2656_v61 = vpack.c.bf16 %v1752_v5, %v1742_v60 }
 0x1bd   : > { %v1462_v57 = vpop.permute.xlu1 %1461 }
 0x1be   : > { %v1471_v1 = vsel %vm3774_vm4, %v3513_v56, %v1462_v57  ;;  %1492 = vst.msk [vmem:[#allocation2 + $0x368] sm:$0xf0] %vm1491_vm2, %v1462_v57  ;;  %2655 = vmatprep.subr.bf16.mxu0 %v2654_v50  ;;  %2678 = vmatprep.subr.bf16.mxu1 %v2654_v50  ;;  %v1369_v6 = vpop.permute.xlu0 %1368  ;;  %vm1594_vm4 = vcmask 764928  }
 0x1bf   : > { %1502 = vst.msk [vmem:[#allocation2 + $0x3b8] sm:$0xf] %vm748_vm13, %v1462_v57  ;;  %1490 = vst [vmem:[#allocation2 + $0x3b0] ss:$-76 sps:$4 sm:$0xff] %v1471_v1   ;;  %v1378_v4 = vsel %vm651_vm12, %v3505_v48, %v1369_v6  ;;  %2657 = vmatpush1.bf16.msra.mxu0 %v2656_v61  ;;  %2685 = vmatpush1.bf16.msra.mxu1 %v2656_v61  ;;  %vm1689_vm13 = vcmask 1048300   ;;  %v1763_v22 = vld [vmem:[#allocation2 + $0x228] sm:$0xff] }
 0x1c0   : > { %1504 = vst.msk [vmem:[#allocation2 + $0x368] sm:$0xf0] %vm1503_vm3, %v2767_v0  ;;  %1397 = vst [vmem:[#allocation2 + $0x360] ss:$-76 sps:$4 sm:$0xff] %v1378_v4   ;;  %vm3775_vm12 = vcmask 769024   ;;  %v1762_v33 = vld [vmem:[#allocation2 + $0x220] sm:$0xff] }
 0x1c1   : > { %1505 = vst.msk [vmem:[#allocation2 + $0x3b8] sm:$0xf] %vm750_vm14, %v2767_v0  ;;  %v1648_v56 = vpop.permute.xlu1 %1647  ;;  %vm1597_vm14 = vcmask 1044208  }
 0x1c2   : > { %1398 = vst.msk [vmem:[#allocation2 + $0x318] sm:$0xf0] %vm680_vm0, %v1369_v6  ;;  %v1657_v48 = vsel %vm855_vm15, %v3529_v30, %v1648_v56  ;;  %v1555_v29 = vpop.permute.xlu0 %1554  ;;  %vm3776_vm15 = vcmask 1048308   ;;  %vm3777_vm0 = vcmask 883712  }
 0x1c3   : > { %1409 = vst.msk [vmem:[#allocation2 + $0x368] sm:$0xf] %vm1408_vm6, %v1369_v6  ;;  %1676 = vst [vmem:[#allocation2 + $0x450] ss:$-76 sps:$4 sm:$0xff] %v1657_v48   ;;  %v1564_v7 = vsel %vm3775_vm12, %v3521_v63, %v1555_v29  ;;  %v1773_v8 = vld [vmem:[#allocation2 + $0x278] sm:$0xff]  ;;  %v1772_v30 = vld [vmem:[#allocation2 + $0x270] sm:$0xff] }
 0x1c4   : > { %1410 = vst.msk [vmem:[#allocation2 + $0x318] sm:$0xf0] %vm682_vm1, %v2767_v0  ;;  %1583 = vst [vmem:[#allocation2 + $0x400] ss:$-76 sps:$4 sm:$0xff] %v1564_v7   ;;  %v2658_v13 = vpack.c.bf16 %v1773_v8, %v1763_v22  ;;  %v2660_v34 = vpack.c.bf16 %v1772_v30, %v1762_v33  ;;  %v1783_v17 = vld [vmem:[#allocation2 + $0x2c8] sm:$0xff]  ;;  %v1782_v39 = vld [vmem:[#allocation2 + $0x2c0] sm:$0xff] }
 0x1c5   : > { %1412 = vst.msk [vmem:[#allocation2 + $0x368] sm:$0xf] %vm1411_vm11, %v2767_v0  ;;  %vm3778_vm1 = vmmov %vm3777_vm0  ;;  %v2293_v7 = vsub.s32 4, %v3641_v32  ;;  %v2297_v8 = vsub.s32 5, %v3641_v32  ;;  %v2301_v30 = vsub.s32 6, %v3641_v32 }
 0x1c6   : > { %1678 = vst.msk [vmem:[#allocation2 + $0x408] sm:$0xf0] %vm1677_vm9, %v1648_v56  ;;  %2659 = vmatprep.subr.bf16.mxu0 %v2658_v13  ;;  %2679 = vmatprep.subr.bf16.mxu1 %v2658_v13 }
 0x1c7   : > { %1688 = vst.msk [vmem:[#allocation2 + $0x458] sm:$0xf] %vm884_vm5, %v1648_v56  ;;  %2661 = vmatpush1.bf16.msra.mxu0 %v2660_v34  ;;  %2686 = vmatpush1.bf16.msra.mxu1 %v2660_v34  ;;  %v1792_v59 = vld [vmem:[#allocation2 + $0x310] sm:$0xff]  ;;  %v1802_v55 = vld [vmem:[#allocation2 + $0x360] sm:$0xff]  ;;  %vm2271_vm5 = vcmp.gt.f32.partialorder %v2269_v20, 0.5  ;;  %v2305_v34 = vsub.s32 7, %v3641_v32 }
 0x1c8   : > { %1690 = vst.msk [vmem:[#allocation2 + $0x408] sm:$0xf0] %vm1689_vm13, %v2767_v0  ;;  %v2664_v21 = vpack.c.bf16 %v1792_v59, %v1782_v39  ;;  %v2273_v35 = vsel %vm2271_vm5, 1, %v2777_v23 }
 0x1c9   : > { %1691 = vst.msk [vmem:[#allocation2 + $0x458] sm:$0xf] %vm886_vm7, %v2767_v0  ;;  %v2286_v44 = vrot.slane %v2273_v35, %v2285_v42  ;;  %v2290_v10 = vrot.slane %v2273_v35, %v2289_v16  ;;  %v2278_v40 = vrot.slane %v2273_v35, %v2277_v38  ;;  %v2294_v33 = vrot.slane %v2273_v35, %v2293_v7 }
 0x1ca   : > { %1584 = vst.msk [vmem:[#allocation2 + $0x3b8] sm:$0xf0] %vm816_vm8, %v1555_v29  ;;  %v1832_v52 = vld [vmem:[#allocation2 + $0x450] sm:$0xf]  ;;  %v2298_v13 = vrot.slane %v2273_v35, %v2297_v8  ;;  %v2302_v39 = vrot.slane %v2273_v35, %v2301_v30 }
 0x1cb   : > { %1595 = vst.msk [vmem:[#allocation2 + $0x408] sm:$0xf] %vm1594_vm4, %v1555_v29  ;;  %v1793_v63 = vld [vmem:[#allocation2 + $0x318] sm:$0xff]  ;;  %v1812_v18 = vld [vmem:[#allocation2 + $0x3b0] sm:$0xff]  ;;  %v1822_v25 = vld [vmem:[#allocation2 + $0x400] sm:$0xff]  ;;  %vm2317_vm7 = vcmp.eq.s32.totalorder %v2286_v44, 1 }
 0x1cc   : > { %1596 = vst.msk [vmem:[#allocation2 + $0x3b8] sm:$0xf0] %vm3776_vm15, %v2767_v0  ;;  %v2662_v19 = vpack.c.bf16 %v1793_v63, %v1783_v17  ;;  %v1803_v27 = vld [vmem:[#allocation2 + $0x368] sm:$0xff]  ;;  %v2668_v24 = vpack.c.bf16 %v1812_v18, %v1802_v55  ;;  %v2673_v62 = vpack.c.bf16 %v1832_v52, %v1822_v25  ;;  %vm2315_vm8 = vcmp.eq.s32.totalorder %v2278_v40, 1 }
 0x1cd   : > { %1598 = vst.msk [vmem:[#allocation2 + $0x408] sm:$0xf] %vm1597_vm14, %v2767_v0  ;;  %vm2318_vm2 = vcmp.eq.s32.totalorder %v2290_v10, 1  ;;  %vm2319_vm3 = vcmp.eq.s32.totalorder %v2294_v33, 1  ;;  %vm2320_vm6 = vcmp.eq.s32.totalorder %v2298_v13, 1  ;;  %vm2321_vm11 = vcmp.eq.s32.totalorder %v2302_v39, 1 }
 0x1ce   : > { %2663 = vmatprep.subr.bf16.mxu0 %v2662_v19  ;;  %2680 = vmatprep.subr.bf16.mxu1 %v2662_v19  ;;  %v2270_v10 = vld [vmem:[%s3743_s4 + $0x8] sm:$0x3] }
 0x1cf   : > { %2665 = vmatpush1.bf16.msra.mxu0 %v2664_v21  ;;  %2687 = vmatpush1.bf16.msra.mxu1 %v2664_v21  ;;  %v2306_v21 = vrot.slane %v2273_v35, %v2305_v34  ;;  %vm2272_vm13 = vcmp.gt.f32.partialorder %v2270_v10, 0.5 }
 0x1d0   : > { %v1833_v47 = vld [vmem:[#allocation2 + $0x458] sm:$0xf] }
 0x1d1   : > { %vm2322_vm9 = vcmp.eq.s32.totalorder %v2306_v21, 1 }
 0x1d2   : > { %v3672_v3 = vpop.permute.xlu1 %1843 }
 0x1d3   : > { %v1813_v0 = vld [vmem:[#allocation2 + $0x3b8] sm:$0xff]  ;;  %v3650_v36 = vpop.permute.xlu0 %1838 }
 0x1d4   : > { %v1823_v11 = vld [vmem:[#allocation2 + $0x408] sm:$0xff]  ;;  %v2666_v9 = vpack.c.bf16 %v1813_v0, %v1803_v27 }
 0x1d5   : > { %v2670_v43 = vpack.c.bf16 %v1833_v47, %v1823_v11 }
 0x1d6   : > { %2667 = vmatprep.subr.bf16.mxu0 %v2666_v9  ;;  %2681 = vmatprep.subr.bf16.mxu1 %v2666_v9 }
 0x1d7   : > { %2669 = vmatpush1.bf16.msra.mxu0 %v2668_v24  ;;  %2688 = vmatpush1.bf16.msra.mxu1 %v2668_v24 }
 0x1d8   : > { %2672 = vmatprep.subr.msk.bf16.mxu0 %vm3301_vm10, %v2670_v43  ;;  %2682 = vmatprep.subr.msk.bf16.mxu1 %vm3301_vm10, %v2670_v43 }
 0x1db   : > { %2675 = vmatpush1.bf16.msk.msra.mxu0 %vm3301_vm10, %v2673_v62  ;;  %2689 = vmatpush1.bf16.msk.msra.mxu1 %vm3301_vm10, %v2673_v62 }
 0x1de   : > { %2522 = vmatmul.mubr.msk.f32.vlgmr.msra.gmra.mrb[8].mxu0 %vm3777_vm0, %v2742_v28  ;;  %2523 = vmatmul.mubr.msk.f32.vlgmr.msra.gmra.mrb[8].mxu1 %vm3778_vm1, %v3375_v12  ;;  %v2282_v12 = vrot.slane %v2273_v35, %v2281_v2 }
 0x1e0   : > { %vm2316_vm10 = vcmp.eq.s32.totalorder %v2282_v12, 1 }
 0x1f3   : > { %v1950_v41 = vpop.f32.mrb[0].mxu0 }
 0x1f4   : > { %v1952_v14 = vpop.f32.mrb[1].mxu0  ;;  %v1951_v45 = vadd.f32 %v1950_v41, %v3650_v36  ;;  %v2274_v41 = vsel %vm2272_vm13, 1, %v2777_v23 }
 0x1f5   : > { %v2027_v53 = vpop.f32.mrb[0].mxu1  ;;  %v1953_v26 = vadd.f32 %v1952_v14, %v3650_v36  ;;  %v2310_v40 = vrot.slane %v2274_v41, %v2277_v38  ;;  %v2314_v14 = vrot.slane %v2274_v41, %v2281_v2 }
 0x1f6   : > { %v2029_v46 = vpop.f32.mrb[1].mxu1  ;;  %v2028_v15 = vadd.f32 %v2027_v53, %v3650_v36  ;;  %v2325_v31 = vsel %vm2315_vm8, %v1951_v45, 0.0 }
 0x1f7   : > { %v2326_v54 = vsel %vm2316_vm10, %v1953_v26, 0.0  ;;  %v2030_v58 = vadd.f32 %v2029_v46, %v3650_v36  ;;  %2345 = vst [vmem:[%s3658_s7] sm:$0xff] %v2325_v31  ;;  %v1956_v60 = vpop.f32.mrb[2].mxu0  ;;  %vm2323_vm4 = vcmp.eq.s32.totalorder %v2310_v40, 1  ;;  %vm2324_vm14 = vcmp.eq.s32.totalorder %v2314_v14, 1 }
 0x1f8   : > { %v2327_v37 = vsel %vm2317_vm7, %v2028_v15, 0.0  ;;  %2346 = vst [vmem:[%s3658_s7 + $0x8] sm:$0xff] %v2326_v54  ;;  %v1958_v50 = vpop.f32.mrb[3].mxu0  ;;  %v1957_v29 = vadd.f32 %v1956_v60, %v3672_v3 }
 0x1f9   : > { %2347 = vst [vmem:[%s3658_s7 + $0x10] sm:$0xff] %v2327_v37  ;;  %v2328_v49 = vsel %vm2318_vm2, %v2030_v58, 0.0  ;;  %v2033_v5 = vpop.f32.mrb[2].mxu1  ;;  %v1959_v57 = vadd.f32 %v1958_v50, %v3672_v3 }
 0x1fa   : > { %2348 = vst [vmem:[%s3658_s7 + $0x18] sm:$0xff] %v2328_v49  ;;  %v2034_v61 = vadd.f32 %v2033_v5, %v3672_v3  ;;  %v2035_v1 = vpop.f32.mrb[3].mxu1  ;;  %v2335_v22 = vsel %vm2315_vm8, %v1957_v29, 0.0 }
 0x1fb   : > { %v2036_v6 = vadd.f32 %v2035_v1, %v3672_v3  ;;  %v2336_v56 = vsel %vm2316_vm10, %v1959_v57, 0.0  ;;  %2355 = vst [vmem:[%s3658_s7 + $0x50] sm:$0xf] %v2335_v22 }
 0x1fc   : > { %v2337_v4 = vsel %vm2317_vm7, %v2034_v61, 0.0  ;;  %2356 = vst [vmem:[%s3658_s7 + $0x58] sm:$0xf] %v2336_v56 }
 0x1fd   : > { %2357 = vst [vmem:[%s3658_s7 + $0x60] sm:$0xf] %v2337_v4  ;;  %v2338_v48 = vsel %vm2318_vm2, %v2036_v6, 0.0 }
 0x1fe   : > { %2358 = vst [vmem:[%s3658_s7 + $0x68] sm:$0xf] %v2338_v48 }
 0x270   : > { %v2104_v17 = vpop.f32.mrb[4].mxu0 }
 0x271   : > { %v2105_v63 = vadd.f32 %v2104_v17, %v3650_v36  ;;  %v2106_v59 = vpop.f32.mrb[5].mxu0 }
 0x272   : > { %v2107_v19 = vadd.f32 %v2106_v59, %v3650_v36 }
 0x273   : > { %v2329_v27 = vsel %vm2319_vm3, %v2105_v63, 0.0 }
 0x274   : > { %2349 = vst [vmem:[%s3658_s7 + $0x20] sm:$0xff] %v2329_v27  ;;  %v2330_v55 = vsel %vm2320_vm6, %v2107_v19, 0.0  ;;  %v2110_v47 = vpop.f32.mrb[6].mxu0 }
 0x275   : > { %v2181_v0 = vpop.f32.mrb[4].mxu1  ;;  %2350 = vst [vmem:[%s3658_s7 + $0x28] sm:$0xff] %v2330_v55  ;;  %v2111_v18 = vadd.f32 %v2110_v47, %v3672_v3  ;;  %v2112_v11 = vpop.f32.mrb[7].mxu0 }
 0x276   : > { %v2182_v9 = vadd.f32 %v2181_v0, %v3650_v36  ;;  %v2183_v24 = vpop.f32.mrb[5].mxu1  ;;  %v2113_v43 = vadd.f32 %v2112_v11, %v3672_v3 }
 0x277   : > { %v2184_v25 = vadd.f32 %v2183_v24, %v3650_v36  ;;  %v2339_v52 = vsel %vm2319_vm3, %v2111_v18, 0.0 }
 0x278   : > { %v2331_v62 = vsel %vm2321_vm11, %v2182_v9, 0.0  ;;  %2359 = vst [vmem:[%s3658_s7 + $0x70] sm:$0xf] %v2339_v52  ;;  %v2340_v28 = vsel %vm2320_vm6, %v2113_v43, 0.0 }
 0x279   : > { %2351 = vst [vmem:[%s3658_s7 + $0x30] sm:$0xff] %v2331_v62  ;;  %v2332_v51 = vsel %vm2322_vm9, %v2184_v25, 0.0  ;;  %v2187_v20 = vpop.f32.mrb[6].mxu1  ;;  %2360 = vst [vmem:[%s3658_s7 + $0x78] sm:$0xf] %v2340_v28 }
 0x27a   : > { %2352 = vst [vmem:[%s3658_s7 + $0x38] sm:$0xff] %v2332_v51  ;;  %v2188_v42 = vadd.f32 %v2187_v20, %v3672_v3  ;;  %v2189_v35 = vpop.f32.mrb[7].mxu1 }
 0x27b   : > { %v2190_v16 = vadd.f32 %v2189_v35, %v3672_v3 }
 0x27c   : > { %v2341_v12 = vsel %vm2321_vm11, %v2188_v42, 0.0 }
 0x27d   : > { %2361 = vst [vmem:[%s3658_s7 + $0x80] sm:$0xf] %v2341_v12  ;;  %v2342_v44 = vsel %vm2322_vm9, %v2190_v16, 0.0 }
 0x27e   : > { %2362 = vst [vmem:[%s3658_s7 + $0x88] sm:$0xf] %v2342_v44 }
 0x2b1   : > { %v2258_v45 = vpop.f32.mrb[8].mxu0  ;;  %v2264_v53 = vpop.f32.mrb[8].mxu1 }
 0x2b2   : > { %v2259_v26 = vadd.f32 %v2258_v45, %v3650_v36  ;;  %v2265_v46 = vadd.f32 %v2264_v53, %v3672_v3  ;;  %v2260_v15 = vpop.f32.mrb[9].mxu0  ;;  %v2266_v31 = vpop.f32.mrb[9].mxu1 }
 0x2b3   : > { %v2261_v23 = vadd.f32 %v2260_v15, %v3650_v36  ;;  %v2267_v54 = vadd.f32 %v2266_v31, %v3672_v3 }
 0x2b4   : > { %v2333_v38 = vsel %vm2323_vm4, %v2259_v26, 0.0  ;;  %v2343_v58 = vsel %vm2323_vm4, %v2265_v46, 0.0 }
 0x2b5   : > { %2353 = vst [vmem:[%s3658_s7 + $0x40] sm:$0xff] %v2333_v38  ;;  %2363 = vst [vmem:[%s3658_s7 + $0x90] sm:$0xf] %v2343_v58  ;;  %v2334_v32 = vsel %vm2324_vm14, %v2261_v23, 0.0  ;;  %v2344_v2 = vsel %vm2324_vm14, %v2267_v54, 0.0 }
 0x2b6   : > { %2354 = vst [vmem:[%s3658_s7 + $0x48] sm:$0xff] %v2334_v32  ;;  %2364 = vst [vmem:[%s3658_s7 + $0x98] sm:$0xf] %v2344_v2 }
 0x2b7 PF: > { %s15_s20 = sadd.s32 1, %s2765_s20   ;;  %s3779_s18 = smov %s2761_s19 }
 0x2b8   : > { %p12_p5 = scmp.ge.s32.totalorder %s15_s20, 4   ;;  %s3780_s19 = smov %s3782_s21 }
 0x2ba   :  { %14 = sbr.rel (!%p12_p5) target bundleno = 2 (0x2), region = 79 }

// kernel: ncd_forward.15
= control target key start
LH: loop header
LB: loop body
LE: loop exit
PB: predicated region body
PF: predicated region fallthrough
CT: control target
= control target key end

     0   :  { %s2570_s17 = smov 0   ;;  %s2572_s18 = smov 0   ;;  %s3473_s0 = inlined_call_operand.vmem [shape: f32[2,12,1280], index: 0, kind: input, shape index: {}]   ;;  %s3474_s1 = inlined_call_operand.vmem [shape: f32[1,108], index: 1, kind: input, shape index: {}]   ;;  %s3475_s2 = inlined_call_operand.<no memory space> [shape: f32[1,1], index: 2, kind: input, shape index: {}]   ;;  %s3476_s3 = inlined_call_operand.vmem [shape: f32[1,1280], index: 3, kind: input, shape index: {}]   ;;  %s3477_s4 = inlined_call_operand.vmem [shape: f32[2,1,1280], index: 4, kind: output, shape index: {}]  }
   0x1   :  { %v9_v0 = vstv %s3475_s2  ;;  %s2574_s19 = smov 0  }
   0x2   :  { %10 = vst [vmem:[#allocation3] sm:$0x1] %v9_v0 }
   0x3 LB: > { %s28_s2 = sadd.s32 1, %s2524_s18  ;;  %p2297_p0 = scmp.ge.s32.totalorder %s2528_s19, 1  ;;  %s2528_s19 = sphi %s2574_s19, %s16_s19   ;;  %s2524_s18 = sphi %s2572_s18, %s3481_s18   ;;  %s2520_s17 = sphi %s2570_s17, %s3480_s17  }
   0x4   : > { %p30_p1 = scmp.ge.s32.totalorder %s28_s2, 2  ;;  %p194_p2 = scmp.lt.s32.totalorder %s2528_s19, 3 }
   0x6   : > { %s3483_s2 = smov (%p30_p1, %s28_s2), 0  ;;  %p195_p3 = pnand %p2297_p0, %p194_p2 }
   0x7   : > { %p229_p4 = scmp.lt.s32.totalorder (!%p195_p3), %s2520_s17, 1  ;;  %v2530_v1 = vmov (!%p195_p3), 0.0   ;;  %s2531_s24 = smov (!%p195_p3), 35   ;;  %vm432_vm0 = vcmask (!%p195_p3), 1043456   ;;  %vm378_vm1 = vcmask (!%p195_p3), 1043736   ;;  %vm367_vm2 = vcmask (!%p195_p3), 1047832  }
   0x8   : > { %198 = sbr.rel (%p195_p3) target bundleno = 691 (0x2b3), region = 36  ;;  %1810 = vmatprep.mubr.f32.mxu0 (!%p195_p3), %v2530_v1  ;;  %1881 = vmatprep.mubr.f32.mxu1 (!%p195_p3), %v2530_v1  ;;  %s2532_s25 = smov (!%p195_p3), 34   ;;  %vm390_vm3 = vcmask (!%p195_p3), 281600   ;;  %vm328_vm4 = vcmask (!%p195_p3), 285696   ;;  %vm503_vm5 = vcmask (!%p195_p3), 277504   ;;  %vm542_vm6 = vcmask (!%p195_p3), 1047828  }
   0x9   : > { %s2533_s26 = smov (!%p195_p3), 33   ;;  %s2534_s27 = smov (!%p195_p3), 1   ;;  %vm564_vm7 = vcmask (!%p195_p3), 277508   ;;  %vm553_vm8 = vcmask (!%p195_p3), 1047824   ;;  %vm647_vm9 = vcmask (!%p195_p3), 269312   ;;  %vm686_vm10 = vcmask (!%p195_p3), 1047816  }
   0xa   : > { %s2535_s28 = smov (!%p195_p3), 127   ;;  %s2536_s29 = smov (!%p195_p3), 95   ;;  %vm697_vm11 = vcmask (!%p195_p3), 1043720   ;;  %vm709_vm12 = vcmask (!%p195_p3), 265216   ;;  %vm821_vm13 = vcmask (!%p195_p3), 7168   ;;  %vm860_vm14 = vcmask (!%p195_p3), 1047564  }
   0xb   : > { %s2537_s30 = smov (!%p195_p3), 94   ;;  %s2538_s5 = smov (!%p195_p3), 93   ;;  %vm882_vm15 = vcmask (!%p195_p3), 7172  }
   0xf   : > { %s3485_s17 = smov (!%p229_p4, %s2520_s17), 1 }
  0x10   : > { %s2466_s20 = smul.u32 160, %s3485_s17 }
  0x11   : > { %s2467_s12 = smul.u32 10, %s3485_s17 }
  0x12   : > { %s2596_s23 = scalar_lea.vmem %s3473_s0, %s2466_s20 }
  0x13   : > { %v258_v2 = vld [vmem:[%s2596_s23 + $0x50] sm:$0xf]  ;;  %v2600_v3 = vld [vmem:[%s2596_s23] sm:$0xff]  ;;  %v2606_v4 = vld [vmem:[%s2596_s23 + $0x8] sm:$0xff]  ;;  %s247_s20 = scalar_lea.vmem %s3477_s4, %s2467_s12 }
  0x14   : > { %308 = vrot.lane.b32.xlu1 %v258_v2, %s2531_s24  ;;  %288 = vrot.lane.b32.xlu0 %v2600_v3, %s2531_s24  ;;  %v259_v5 = vld [vmem:[%s2596_s23 + $0x58] sm:$0xf]  ;;  %v402_v7 = vld [vmem:[%s2596_s23 + $0x50] sm:$0xf]  ;;  %v2615_v8 = vrot.slane %v2606_v4, 4  ;;  %v2618_v9 = vrot.slane %v2600_v3, 4 }
  0x15   : > { %v403_v6 = vld [vmem:[%s2596_s23 + $0x58] sm:$0xf]  ;;  %v443_v11 = vrot.slane %v402_v7, 4  ;;  %v577_v15 = vld [vmem:[%s2596_s23 + $0x50] sm:$0xf]  ;;  %v2737_v54 = vld [vmem:[%s2596_s23 + $0x28] sm:$0xff] }
  0x16   : > { %v445_v10 = vrot.slane %v403_v6, 4  ;;  %v578_v14 = vld [vmem:[%s2596_s23 + $0x58] sm:$0xf]  ;;  %v721_v17 = vld [vmem:[%s2596_s23 + $0x50] sm:$0xf]  ;;  %v2740_v55 = vld [vmem:[%s2596_s23 + $0x20] sm:$0xff] }
  0x17   : > { %v444_v13 = vsel %vm432_vm0, %v2618_v9, %v443_v11  ;;  %v722_v16 = vld [vmem:[%s2596_s23 + $0x58] sm:$0xf]  ;;  %v761_v20 = vrot.slane %v721_v17, 4  ;;  %v895_v21 = vld [vmem:[%s2596_s23 + $0x50] sm:$0xf]  ;;  %v2753_v60 = vrot.slane %v2737_v54, 4 }
  0x18   : > { %310 = vrot.lane.b32.xlu1 %v259_v5, %s2531_s24  ;;  %290 = vrot.lane.b32.xlu0 %v2606_v4, %s2531_s24  ;;  %v446_v12 = vsel %vm432_vm0, %v2615_v8, %v445_v10  ;;  %v896_v18 = vld [vmem:[%s2596_s23 + $0x58] sm:$0xf]  ;;  %v763_v19 = vrot.slane %v722_v16, 4  ;;  %v2651_v24 = vld [vmem:[%s2596_s23 + $0x10] sm:$0xff]  ;;  %915 = vst [vmem:[#allocation2 + $0x230] sm:$0xf] %v895_v21 }
  0x19   : > { %916 = vst [vmem:[#allocation2 + $0x238] sm:$0xf] %v896_v18  ;;  %v762_v23 = vsel %vm432_vm0, %v2618_v9, %v761_v20  ;;  %v936_v25 = vld [vmem:[%s2596_s23 + $0x58] sm:$0xf]  ;;  %v2657_v26 = vrot.slane %v2651_v24, 4  ;;  %v2756_v61 = vrot.slane %v2740_v55, 4 }
  0x1a   : > { %v764_v22 = vsel %vm432_vm0, %v2615_v8, %v763_v19  ;;  %v977_v27 = vrot.slane %v936_v25, 4  ;;  %v937_v28 = vld [vmem:[%s2596_s23 + $0x60] sm:$0xf]  ;;  %v935_v31 = vld [vmem:[%s2596_s23 + $0x50] sm:$0xf]  ;;  %v2707_v47 = vld [vmem:[%s2596_s23 + $0x18] sm:$0xff] }
  0x1b   : > { %v979_v30 = vrot.slane %v937_v28, 4  ;;  %v975_v33 = vrot.slane %v935_v31, 4  ;;  %v1110_v35 = vld [vmem:[%s2596_s23 + $0x58] sm:$0xf]  ;;  %v1111_v37 = vld [vmem:[%s2596_s23 + $0x60] sm:$0xf] }
  0x1c   : > { %465 = vrot.lane.b32.xlu1 %v2615_v8, %s2532_s25  ;;  %463 = vrot.lane.b32.xlu0 %v2618_v9, %s2532_s25  ;;  %v978_v29 = vsel %vm432_vm0, %v2615_v8, %v977_v27  ;;  %v1254_v36 = vld [vmem:[%s2596_s23 + $0x58] sm:$0xf]  ;;  %v1255_v39 = vld [vmem:[%s2596_s23 + $0x60] sm:$0xf]  ;;  %v2718_v50 = vrot.slane %v2707_v47, 4 }
  0x1d   : > { %v980_v32 = vsel %vm432_vm0, %v2657_v26, %v979_v30  ;;  %v976_v34 = vsel %vm432_vm0, %v2618_v9, %v975_v33  ;;  %v1295_v38 = vrot.slane %v1254_v36, 4  ;;  %v1297_v41 = vrot.slane %v1255_v39, 4  ;;  %v1253_v42 = vld [vmem:[%s2596_s23 + $0x50] sm:$0xf]  ;;  %v261_v48 = vld [vmem:[%s2596_s23 + $0x68] sm:$0xf] }
  0x1e   : > { %v1109_v43 = vld [vmem:[%s2596_s23 + $0x50] sm:$0xf]  ;;  %v1293_v45 = vrot.slane %v1253_v42, 4  ;;  %v260_v49 = vld [vmem:[%s2596_s23 + $0x60] sm:$0xf] }
  0x1f   : > { %v1296_v40 = vsel %vm432_vm0, %v2615_v8, %v1295_v38  ;;  %v1298_v44 = vsel %vm432_vm0, %v2657_v26, %v1297_v41  ;;  %v1429_v51 = vld [vmem:[%s2596_s23 + $0x60] sm:$0xf]  ;;  %v1428_v52 = vld [vmem:[%s2596_s23 + $0x58] sm:$0xf]  ;;  %v1427_v53 = vld [vmem:[%s2596_s23 + $0x50] sm:$0xf] }
  0x20   : > { %485 = vrot.lane.b32.xlu1 %v446_v12, %s2532_s25  ;;  %483 = vrot.lane.b32.xlu0 %v444_v13, %s2532_s25  ;;  %v1294_v46 = vsel %vm432_vm0, %v2618_v9, %v1293_v45  ;;  %v263_v56 = vld [vmem:[%s2596_s23 + $0x78] sm:$0xf]  ;;  %v262_v57 = vld [vmem:[%s2596_s23 + $0x70] sm:$0xf] }
  0x21   : > { %v405_v58 = vld [vmem:[%s2596_s23 + $0x68] sm:$0xf]  ;;  %v404_v59 = vld [vmem:[%s2596_s23 + $0x60] sm:$0xf]  ;;  %v407_v5 = vld [vmem:[%s2596_s23 + $0x78] sm:$0xf] }
  0x22   : > { %v449_v62 = vrot.slane %v405_v58, 4  ;;  %v447_v63 = vrot.slane %v404_v59, 4  ;;  %v406_v6 = vld [vmem:[%s2596_s23 + $0x70] sm:$0xf]  ;;  %v453_v7 = vrot.slane %v407_v5, 4 }
  0x23   : > { %v580_v13 = vld [vmem:[%s2596_s23 + $0x68] sm:$0xf]  ;;  %v723_v18 = vld [vmem:[%s2596_s23 + $0x60] sm:$0xf]  ;;  %v581_v33 = vld [vmem:[%s2596_s23 + $0x70] sm:$0xf] }
  0x24   : > { %609 = vrot.lane.b32.xlu1 %v2606_v4, %s2533_s26  ;;  %607 = vrot.lane.b32.xlu0 %v2600_v3, %s2533_s26  ;;  %v450_v0 = vsel %vm432_vm0, %v2718_v50, %v449_v62  ;;  %v448_v2 = vsel %vm432_vm0, %v2657_v26, %v447_v63  ;;  %v724_v17 = vld [vmem:[%s2596_s23 + $0x68] sm:$0xf]  ;;  %v726_v36 = vld [vmem:[%s2596_s23 + $0x78] sm:$0xf] }
  0x25   : > { %v767_v21 = vrot.slane %v724_v17, 4  ;;  %v898_v45 = vld [vmem:[%s2596_s23 + $0x68] sm:$0xf] }
  0x26   : > { %918 = vst [vmem:[#allocation2 + $0x248] sm:$0xf] %v898_v45  ;;  %v2884_v17 = vld [vmem:[%s2596_s23 + $0x28] sm:$0xff] }
  0x27   : > { %v768_v27 = vsel %vm432_vm0, %v2718_v50, %v767_v21 }
  0x28   : > { %629 = vrot.lane.b32.xlu1 %v578_v14, %s2533_s26  ;;  %627 = vrot.lane.b32.xlu0 %v577_v15, %s2533_s26  ;;  %v579_v14 = vld [vmem:[%s2596_s23 + $0x60] sm:$0xf] }
  0x2c   : > { %783 = vrot.lane.b32.xlu1 %v2615_v8, %s2534_s27  ;;  %781 = vrot.lane.b32.xlu0 %v2618_v9, %s2534_s27 }
  0x30   : > { %803 = vrot.lane.b32.xlu1 %v764_v22, %s2534_s27  ;;  %801 = vrot.lane.b32.xlu0 %v762_v23, %s2534_s27  ;;  %v765_v22 = vrot.slane %v723_v18, 4  ;;  %v2887_v18 = vld [vmem:[%s2596_s23 + $0x20] sm:$0xff] }
  0x32   : > { %v766_v28 = vsel %vm432_vm0, %v2657_v26, %v765_v22 }
  0x34   : > { %999 = vrot.lane.b32.xlu1 %v2657_v26, %s2535_s28  ;;  %997 = vrot.lane.b32.xlu0 %v2615_v8, %s2535_s28 }
  0x38   : > { %1017 = vrot.lane.b32.xlu1 %v978_v29, %s2535_s28  ;;  %995 = vrot.lane.b32.xlu0 %v2618_v9, %s2535_s28 }
  0x3c   : > { %1141 = vrot.lane.b32.xlu1 %v2606_v4, %s2536_s29  ;;  %1019 = vrot.lane.b32.xlu0 %v980_v32, %s2535_s28  ;;  %v582_v32 = vld [vmem:[%s2596_s23 + $0x78] sm:$0xf] }
  0x40   : > { %1015 = vrot.lane.b32.xlu1 %v976_v34, %s2535_s28  ;;  %1143 = vrot.lane.b32.xlu0 %v2651_v24, %s2536_s29 }
  0x44   : > { %1161 = vrot.lane.b32.xlu1 %v1110_v35, %s2536_s29  ;;  %1139 = vrot.lane.b32.xlu0 %v2600_v3, %s2536_s29 }
  0x48   : > { %1315 = vrot.lane.b32.xlu1 %v2615_v8, %s2537_s30  ;;  %1163 = vrot.lane.b32.xlu0 %v1111_v37, %s2536_s29  ;;  %v451_v8 = vrot.slane %v406_v6, 4  ;;  %v725_v37 = vld [vmem:[%s2596_s23 + $0x70] sm:$0xf]  ;;  %v2860_v6 = vld [vmem:[%s2596_s23 + $0x18] sm:$0xff] }
  0x4a   : > { %v452_v10 = vsel %vm432_vm0, %v2756_v61, %v451_v8  ;;  %v2866_v8 = vld [vmem:[%s2596_s23 + $0x30] sm:$0xff] }
  0x4c   : > { %1335 = vrot.lane.b32.xlu1 %v1296_v40, %s2537_s30  ;;  %1317 = vrot.lane.b32.xlu0 %v2657_v26, %s2537_s30 }
  0x50   : > { %1159 = vrot.lane.b32.xlu1 %v1109_v43, %s2536_s29  ;;  %1337 = vrot.lane.b32.xlu0 %v1298_v44, %s2537_s30  ;;  %v771_v43 = vrot.slane %v726_v36, 4  ;;  %v769_v44 = vrot.slane %v725_v37, 4 }
  0x52   : > { %v770_v58 = vsel %vm432_vm0, %v2756_v61, %v769_v44 }
  0x54   : > { %1333 = vrot.lane.b32.xlu1 %v1294_v46, %s2537_s30  ;;  %1313 = vrot.lane.b32.xlu0 %v2618_v9, %s2537_s30  ;;  %v454_v9 = vsel %vm432_vm0, %v2753_v60, %v453_v7  ;;  %v897_v46 = vld [vmem:[%s2596_s23 + $0x60] sm:$0xf]  ;;  %v2863_v7 = vld [vmem:[%s2596_s23 + $0x10] sm:$0xff] }
  0x55   : > { %917 = vst [vmem:[#allocation2 + $0x240] sm:$0xf] %v897_v46 }
  0x58   : > { %294 = vrot.lane.b32.xlu1 %v2707_v47, %s2531_s24  ;;  %292 = vrot.lane.b32.xlu0 %v2651_v24, %s2531_s24 }
  0x5c   : > { %314 = vrot.lane.b32.xlu1 %v261_v48, %s2531_s24  ;;  %312 = vrot.lane.b32.xlu0 %v260_v49, %s2531_s24 }
  0x60   : > { %469 = vrot.lane.b32.xlu1 %v2718_v50, %s2532_s25  ;;  %467 = vrot.lane.b32.xlu0 %v2657_v26, %s2532_s25 }
  0x64   : > { %1461 = vrot.lane.b32.xlu1 %v2651_v24, %s2538_s5  ;;  %1459 = vrot.lane.b32.xlu0 %v2606_v4, %s2538_s5 }
  0x68   : > { %1481 = vrot.lane.b32.xlu1 %v1429_v51, %s2538_s5  ;;  %1479 = vrot.lane.b32.xlu0 %v1428_v52, %s2538_s5 }
  0x6c   : > { %1477 = vrot.lane.b32.xlu1 %v1427_v53, %s2538_s5  ;;  %1457 = vrot.lane.b32.xlu0 %v2600_v3, %s2538_s5  ;;  %v900_v53 = vld [vmem:[%s2596_s23 + $0x78] sm:$0xf] }
  0x6d   : > { %920 = vst [vmem:[#allocation2 + $0x258] sm:$0xf] %v900_v53 }
  0x70   : > { %298 = vrot.lane.b32.xlu1 %v2737_v54, %s2531_s24  ;;  %296 = vrot.lane.b32.xlu0 %v2740_v55, %s2531_s24 }
  0x74   : > { %318 = vrot.lane.b32.xlu1 %v263_v56, %s2531_s24  ;;  %316 = vrot.lane.b32.xlu0 %v262_v57, %s2531_s24  ;;  %v899_v56 = vld [vmem:[%s2596_s23 + $0x70] sm:$0xf]  ;;  %v772_v57 = vsel %vm432_vm0, %v2753_v60, %v771_v43 }
  0x75   : > { %919 = vst [vmem:[#allocation2 + $0x250] sm:$0xf] %v899_v56 }
  0x78   : > { %473 = vrot.lane.b32.xlu1 %v2753_v60, %s2532_s25  ;;  %471 = vrot.lane.b32.xlu0 %v2756_v61, %s2532_s25 }
  0x7c   : > { %489 = vrot.lane.b32.xlu1 %v450_v0, %s2532_s25  ;;  %487 = vrot.lane.b32.xlu0 %v448_v2, %s2532_s25 }
  0x80   : > { %613 = vrot.lane.b32.xlu1 %v2707_v47, %s2533_s26  ;;  %611 = vrot.lane.b32.xlu0 %v2651_v24, %s2533_s26 }
  0x84   : > { %493 = vrot.lane.b32.xlu1 %v454_v9, %s2532_s25  ;;  %491 = vrot.lane.b32.xlu0 %v452_v10, %s2532_s25 }
  0x86   : > { %v309_v11 = vpop.permute.xlu1 %308  ;;  %v289_v12 = vpop.permute.xlu0 %288 }
  0x87   : > { %379 = vst.msk [vmem:[#allocation2 + $0x50] sm:$0xf] %vm378_vm1, %v309_v11  ;;  %vm871_vm1 = vcmask 1047560  }
  0x88   : > { %368 = vst.msk [vmem:[#allocation2] sm:$0xff] %vm367_vm2, %v289_v12  ;;  %617 = vrot.lane.b32.xlu1 %v2737_v54, %s2533_s26  ;;  %615 = vrot.lane.b32.xlu0 %v2740_v55, %s2533_s26  ;;  %vm1035_vm2 = vcmask 1039360  }
  0x89   : > { %391 = vst.msk [vmem:[#allocation2 + $0x50] sm:$0xf] %vm390_vm3, %v2530_v1  ;;  %vm1179_vm3 = vcmask 777216  }
  0x8a   : > { %389 = vst.msk [vmem:[#allocation2] sm:$0xff] %vm328_vm4, %v2530_v1  ;;  %v2789_v15 = vpop.permute.xlu1 %310  ;;  %v2791_v16 = vpop.permute.xlu0 %290 }
  0x8b   : > { %v338_v19 = vsel %vm328_vm4, %v309_v11, %v2789_v15  ;;  %v329_v20 = vsel %vm328_vm4, %v289_v12, %v2791_v16  ;;  %v939_v11 = vld [vmem:[%s2596_s23 + $0x70] sm:$0xf]  ;;  %v938_v12 = vld [vmem:[%s2596_s23 + $0x68] sm:$0xf] }
  0x8c   : > { %380 = vst [vmem:[#allocation2 + $0x58] sm:$0xf] %v338_v19  ;;  %633 = vrot.lane.b32.xlu1 %v580_v13, %s2533_s26  ;;  %631 = vrot.lane.b32.xlu0 %v579_v14, %s2533_s26  ;;  %v2881_v14 = vrot.slane %v2866_v8, 4  ;;  %v983_v19 = vrot.slane %v939_v11, 4 }
  0x8e   : > { %v2801_v23 = vpop.permute.xlu1 %465  ;;  %v464_v24 = vpop.permute.xlu0 %463 }
  0x8f   : > { %v504_v25 = vsel %vm503_vm5, %v464_v24, %v2801_v23  ;;  %543 = vst.msk [vmem:[#allocation2 + $0x50] sm:$0xf0] %vm542_vm6, %v464_v24  ;;  %vm1353_vm6 = vcmask 769024  }
  0x90   : > { %544 = vst [vmem:[#allocation2 + $0x58] sm:$0xf0] %v504_v25  ;;  %565 = vst.msk [vmem:[#allocation2 + $0x50] sm:$0xf0] %vm564_vm7, %v2530_v1  ;;  %787 = vrot.lane.b32.xlu1 %v2718_v50, %s2534_s27  ;;  %785 = vrot.lane.b32.xlu0 %v2657_v26, %s2534_s27  ;;  %vm1497_vm7 = vcmask 760832  }
  0x91   : > { %v1562_v26 = vld [vmem:[#allocation2] sm:$0xff] }
  0x92   : > { %v2814_v29 = vpop.permute.xlu1 %485  ;;  %v484_v30 = vpop.permute.xlu0 %483 }
  0x93   : > { %v513_v31 = vsel %vm503_vm5, %v484_v30, %v2814_v29  ;;  %554 = vst.msk [vmem:[#allocation2 + $0xa0] sm:$0xff] %vm553_vm8, %v484_v30  ;;  %vm2539_vm8 = vmmov 1  }
  0x94   : > { %566 = vst.msk [vmem:[#allocation2 + $0xa0] sm:$0xff] %vm503_vm5, %v2530_v1  ;;  %807 = vrot.lane.b32.xlu1 %v768_v27, %s2534_s27  ;;  %805 = vrot.lane.b32.xlu0 %v766_v28, %s2534_s27  ;;  %v984_v28 = vsel %vm432_vm0, %v2756_v61, %v983_v19 }
  0x96   : > { %v2824_v34 = vpop.permute.xlu1 %609  ;;  %v608_v35 = vpop.permute.xlu0 %607 }
  0x97   : > { %v648_v38 = vsel %vm647_vm9, %v608_v35, %v2824_v34  ;;  %687 = vst.msk [vmem:[#allocation2 + $0xf0] sm:$0xff] %vm686_vm10, %v608_v35  ;;  %v1573_v39 = vld [vmem:[#allocation2 + $0x58] sm:$0xff]  ;;  %v1572_v40 = vld [vmem:[#allocation2 + $0x50] sm:$0xff]  ;;  %vm3034_vm10 = vmpackc.low %vm432_vm0, %vm2539_vm8 }
  0x98   : > { %708 = vst.msk [vmem:[#allocation2 + $0xf0] sm:$0xff] %vm647_vm9, %v2530_v1  ;;  %637 = vrot.lane.b32.xlu1 %v582_v32, %s2533_s26  ;;  %635 = vrot.lane.b32.xlu0 %v581_v33, %s2533_s26  ;;  %v2316_v41 = vpack.c.bf16 %v1573_v39, %v329_v20  ;;  %v2318_v42 = vpack.c.bf16 %v1572_v40, %v1562_v26  ;;  %v981_v20 = vrot.slane %v938_v12, 4  ;;  %v941_v26 = vld [vmem:[%s2596_s23 + $0x80] sm:$0xf]  ;;  %v940_v35 = vld [vmem:[%s2596_s23 + $0x78] sm:$0xf] }
  0x99   : > { %v2320_v52 = vpack.c.bf16 %v648_v38, %v513_v31  ;;  %v987_v39 = vrot.slane %v941_v26, 4  ;;  %v985_v40 = vrot.slane %v940_v35, 4  ;;  %v1115_v35 = vld [vmem:[%s2596_s23 + $0x80] sm:$0xf] }
  0x9a   : > { %v2836_v48 = vpop.permute.xlu1 %629  ;;  %2317 = vmatprep.subr.bf16.mxu0 %v2316_v41  ;;  %v628_v49 = vpop.permute.xlu0 %627  ;;  %v982_v30 = vsel %vm432_vm0, %v2718_v50, %v981_v20 }
  0x9b   : > { %v657_v51 = vsel %vm647_vm9, %v628_v49, %v2836_v48  ;;  %698 = vst.msk [vmem:[#allocation2 + $0x140] sm:$0xf] %vm697_vm11, %v628_v49  ;;  %2319 = vmatpush1.bf16.msra.mxu0 %v2318_v42  ;;  %v1582_v59 = vld [vmem:[#allocation2 + $0xa0] sm:$0xff]  ;;  %v988_v46 = vsel %vm432_vm0, %v2881_v14, %v987_v39  ;;  %v986_v49 = vsel %vm432_vm0, %v2753_v60, %v985_v40  ;;  %v1258_v39 = vld [vmem:[%s2596_s23 + $0x78] sm:$0xf]  ;;  %vm1712_vm11 = vcmask 883712  }
  0x9c   : > { %699 = vst [vmem:[#allocation2 + $0x148] sm:$0xf] %v657_v51  ;;  %710 = vst.msk [vmem:[#allocation2 + $0x140] sm:$0xf] %vm709_vm12, %v2530_v1  ;;  %791 = vrot.lane.b32.xlu1 %v2753_v60, %s2534_s27  ;;  %789 = vrot.lane.b32.xlu0 %v2756_v61, %s2534_s27  ;;  %vm1237_vm12 = vcmask 773120  }
  0x9d   : > { %2321 = vmatprep.subr.bf16.mxu0 %v2320_v52 }
  0x9e   : > { %v2852_v62 = vpop.permute.xlu1 %783  ;;  %v782_v63 = vpop.permute.xlu0 %781 }
  0x9f   : > { %v822_v0 = vsel %vm821_vm13, %v782_v63, %v2852_v62  ;;  %861 = vst.msk [vmem:[#allocation2 + $0x140] sm:$0xf0] %vm860_vm14, %v782_v63  ;;  %v1592_v2 = vld [vmem:[#allocation2 + $0xf0] sm:$0xff]  ;;  %vm1401_vm14 = vcmask 769028  }
  0xa0   : > { %862 = vst [vmem:[#allocation2 + $0x148] sm:$0xf0] %v822_v0  ;;  %883 = vst.msk [vmem:[#allocation2 + $0x140] sm:$0xf0] %vm882_vm15, %v2530_v1  ;;  %811 = vrot.lane.b32.xlu1 %v772_v57, %s2534_s27  ;;  %809 = vrot.lane.b32.xlu0 %v770_v58, %s2534_s27  ;;  %v2322_v5 = vpack.c.bf16 %v1592_v2, %v1582_v59  ;;  %vm1415_vm15 = vcmask 1048304  }
  0xa2   : > { %v2868_v9 = vpop.permute.xlu1 %803  ;;  %v802_v10 = vpop.permute.xlu0 %801  ;;  %2323 = vmatpush1.bf16.msra.mxu0 %v2322_v5  ;;  %v1113_v5 = vld [vmem:[%s2596_s23 + $0x70] sm:$0xf] }
  0xa3   : > { %v831_v13 = vsel %vm821_vm13, %v802_v10, %v2868_v9  ;;  %872 = vst.msk [vmem:[#allocation2 + $0x190] sm:$0xff] %vm871_vm1, %v802_v10  ;;  %v1112_v10 = vld [vmem:[%s2596_s23 + $0x68] sm:$0xf]  ;;  %vm1413_vm1 = vcmask 1048308  }
  0xa4   : > { %884 = vst.msk [vmem:[#allocation2 + $0x190] sm:$0xff] %vm821_vm13, %v2530_v1  ;;  %1003 = vrot.lane.b32.xlu1 %v2756_v61, %s2535_s28  ;;  %1001 = vrot.lane.b32.xlu0 %v2718_v50, %s2535_s28 }
  0xa6   : > { %v2889_v21 = vpop.permute.xlu1 %999  ;;  %v998_v22 = vpop.permute.xlu0 %997 }
  0xa7   : > { %v1037_v24 = vsel %vm1035_vm2, %v998_v22, %v2889_v21  ;;  %v1603_v25 = vld [vmem:[#allocation2 + $0x148] sm:$0xff]  ;;  %v1602_v31 = vld [vmem:[#allocation2 + $0x140] sm:$0xff] }
  0xa8   : > { %1075 = vst [vmem:[#allocation2 + $0x238] sm:$0xf0] %v1037_v24  ;;  %1007 = vrot.lane.b32.xlu1 %v2881_v14, %s2535_s28  ;;  %1005 = vrot.lane.b32.xlu0 %v2753_v60, %s2535_s28  ;;  %v2324_v27 = vpack.c.bf16 %v831_v13, %v1603_v25  ;;  %v1256_v13 = vld [vmem:[%s2596_s23 + $0x68] sm:$0xf] }
  0xaa   : > { %v1018_v32 = vpop.permute.xlu1 %1017  ;;  %v996_v33 = vpop.permute.xlu0 %995  ;;  %2325 = vmatprep.subr.bf16.mxu0 %v2324_v27 }
  0xab   : > { %v1036_v36 = vsel %vm1035_vm2, %v996_v33, %v998_v22  ;;  %v1612_v37 = vld [vmem:[#allocation2 + $0x190] sm:$0xff]  ;;  %v1299_v22 = vrot.slane %v1256_v13, 4 }
  0xac   : > { %1074 = vst [vmem:[#allocation2 + $0x230] sm:$0xf0] %v1036_v36  ;;  %1023 = vrot.lane.b32.xlu1 %v984_v28, %s2535_s28  ;;  %1021 = vrot.lane.b32.xlu0 %v982_v30, %s2535_s28  ;;  %v2326_v38 = vpack.c.bf16 %v1612_v37, %v1602_v31  ;;  %v1114_v36 = vld [vmem:[%s2596_s23 + $0x78] sm:$0xf] }
  0xad   : > { %v1300_v30 = vsel %vm432_vm0, %v2718_v50, %v1299_v22 }
  0xae   : > { %v1142_v41 = vpop.permute.xlu1 %1141  ;;  %v2906_v42 = vpop.permute.xlu0 %1019  ;;  %2327 = vmatpush1.bf16.msra.mxu0 %v2326_v38  ;;  %v1259_v38 = vld [vmem:[%s2596_s23 + $0x80] sm:$0xf] }
  0xaf   : > { %v1046_v43 = vsel %vm1035_vm2, %v1018_v32, %v2906_v42  ;;  %v1633_v44 = vld [vmem:[#allocation2 + $0x238] sm:$0xff] }
  0xb0   : > { %1147 = vrot.lane.b32.xlu1 %v2740_v55, %s2536_s29  ;;  %1145 = vrot.lane.b32.xlu0 %v2707_v47, %s2536_s29  ;;  %v2328_v45 = vpack.c.bf16 %v1633_v44, %v2606_v4  ;;  %v1305_v44 = vrot.slane %v1259_v38, 4 }
  0xb2   : > { %v1016_v51 = vpop.permute.xlu1 %1015  ;;  %2329 = vmatprep.subr.bf16.mxu0 %v2328_v45  ;;  %v2919_v52 = vpop.permute.xlu0 %1143  ;;  %v1303_v45 = vrot.slane %v1258_v39, 4 }
  0xb3   : > { %v1045_v53 = vsel %vm1035_vm2, %v1016_v51, %v1018_v32  ;;  %v1181_v56 = vsel %vm1179_vm3, %v1142_v41, %v2919_v52  ;;  %v1632_v57 = vld [vmem:[#allocation2 + $0x230] sm:$0xff] }
  0xb4   : > { %1027 = vrot.lane.b32.xlu1 %v988_v46, %s2535_s28  ;;  %1025 = vrot.lane.b32.xlu0 %v986_v49, %s2535_s28  ;;  %v2330_v4 = vpack.c.bf16 %v1632_v57, %v2600_v3  ;;  %v2332_v58 = vpack.c.bf16 %v1181_v56, %v1046_v43  ;;  %v1257_v3 = vld [vmem:[%s2596_s23 + $0x70] sm:$0xf]  ;;  %v1306_v56 = vsel %vm432_vm0, %v2881_v14, %v1305_v44 }
  0xb5   : > { %v1301_v20 = vrot.slane %v1257_v3, 4  ;;  %v1304_v57 = vsel %vm432_vm0, %v2753_v60, %v1303_v45 }
  0xb6   : > { %v1162_v59 = vpop.permute.xlu1 %1161  ;;  %2331 = vmatpush1.bf16.msra.mxu0 %v2330_v4  ;;  %v1140_v63 = vpop.permute.xlu0 %1139 }
  0xb7   : > { %v1180_v0 = vsel %vm1179_vm3, %v1140_v63, %v1142_v41  ;;  %2333 = vmatprep.subr.bf16.mxu0 %v2332_v58  ;;  %v1302_v28 = vsel %vm432_vm0, %v2756_v61, %v1301_v20 }
  0xb8   : > { %1151 = vrot.lane.b32.xlu1 %v2866_v8, %s2536_s29  ;;  %1149 = vrot.lane.b32.xlu0 %v2737_v54, %s2536_s29  ;;  %v2334_v2 = vpack.c.bf16 %v1180_v0, %v1045_v53 }
  0xba   : > { %v1316_v11 = vpop.permute.xlu1 %1315  ;;  %v2934_v12 = vpop.permute.xlu0 %1163  ;;  %2335 = vmatpush1.bf16.msra.mxu0 %v2334_v2 }
  0xbb   : > { %v1190_v19 = vsel %vm1179_vm3, %v1162_v59, %v2934_v12 }
  0xbc   : > { %1229 = vst [vmem:[#allocation2 + $0x328] sm:$0xf] %v1190_v19  ;;  %1167 = vrot.lane.b32.xlu1 %v1113_v5, %s2536_s29  ;;  %1165 = vrot.lane.b32.xlu0 %v1112_v10, %s2536_s29  ;;  %v1431_v10 = vld [vmem:[%s2596_s23 + $0x70] sm:$0xf]  ;;  %v3007_v19 = vld [vmem:[%s2596_s23 + $0x38] sm:$0xff] }
  0xbe   : > { %v1336_v24 = vpop.permute.xlu1 %1335  ;;  %v2942_v25 = vpop.permute.xlu0 %1317 }
  0xbf   : > { %v1355_v27 = vsel %vm1353_vm6, %v1316_v11, %v2942_v25 }
  0xc0   : > { %1393 = vst [vmem:[#allocation2 + $0x328] sm:$0xf0] %v1355_v27  ;;  %1321 = vrot.lane.b32.xlu1 %v2756_v61, %s2537_s30  ;;  %1319 = vrot.lane.b32.xlu0 %v2718_v50, %s2537_s30 }
  0xc2   : > { %v1160_v31 = vpop.permute.xlu1 %1159  ;;  %v2954_v32 = vpop.permute.xlu0 %1337 }
  0xc3   : > { %v1189_v33 = vsel %vm1179_vm3, %v1160_v31, %v1162_v59  ;;  %v1364_v26 = vsel %vm1353_vm6, %v1336_v24, %v2954_v32  ;;  %v264_v31 = vld [vmem:[%s2596_s23 + $0x80] sm:$0xf] }
  0xc4   : > { %1228 = vst [vmem:[#allocation2 + $0x320] sm:$0xf] %v1189_v33  ;;  %1341 = vrot.lane.b32.xlu1 %v1302_v28, %s2537_s30  ;;  %1339 = vrot.lane.b32.xlu0 %v1300_v30, %s2537_s30  ;;  %v265_v30 = vld [vmem:[%s2596_s23 + $0x88] sm:$0xf] }
  0xc6   : > { %v1334_v37 = vpop.permute.xlu1 %1333  ;;  %v1314_v61 = vpop.permute.xlu0 %1313 }
  0xc7   : > { %v1363_v50 = vsel %vm1353_vm6, %v1334_v37, %v1336_v24  ;;  %v1354_v40 = vsel %vm1353_vm6, %v1314_v61, %v1316_v11  ;;  %v1663_v41 = vld [vmem:[#allocation2 + $0x328] sm:$0xff]  ;;  %v3024_v37 = vrot.slane %v3007_v19, 4 }
  0xc8   : > { %1392 = vst [vmem:[#allocation2 + $0x320] sm:$0xf0] %v1354_v40  ;;  %1171 = vrot.lane.b32.xlu1 %v1115_v35, %s2536_s29  ;;  %1169 = vrot.lane.b32.xlu0 %v1114_v36, %s2536_s29  ;;  %v2336_v43 = vpack.c.bf16 %v1364_v26, %v1663_v41  ;;  %v1430_v11 = vld [vmem:[%s2596_s23 + $0x68] sm:$0xf] }
  0xca   : > { %v295_v46 = vpop.permute.xlu1 %294  ;;  %v293_v49 = vpop.permute.xlu0 %292  ;;  %2337 = vmatprep.subr.bf16.mxu0 %v2336_v43 }
  0xcb   : > { %v330_v51 = vsel %vm328_vm4, %v2791_v16, %v293_v49  ;;  %v331_v53 = vsel %vm328_vm4, %v293_v49, %v295_v46 }
  0xcc   : > { %1325 = vrot.lane.b32.xlu1 %v2881_v14, %s2537_s30  ;;  %1323 = vrot.lane.b32.xlu0 %v2753_v60, %s2537_s30 }
  0xce   : > { %v2980_v4 = vpop.permute.xlu1 %314  ;;  %v313_v58 = vpop.permute.xlu0 %312 }
  0xcf   : > { %v339_v16 = vsel %vm328_vm4, %v2789_v15, %v313_v58  ;;  %v340_v59 = vsel %vm328_vm4, %v313_v58, %v2980_v4  ;;  %v1662_v63 = vld [vmem:[#allocation2 + $0x320] sm:$0xff] }
  0xd0   : > { %381 = vst [vmem:[#allocation2 + $0x60] sm:$0xf] %v339_v16  ;;  %382 = vst [vmem:[#allocation2 + $0x68] sm:$0xf] %v340_v59  ;;  %1345 = vrot.lane.b32.xlu1 %v1306_v56, %s2537_s30  ;;  %1343 = vrot.lane.b32.xlu0 %v1304_v57, %s2537_s30  ;;  %v2338_v0 = vpack.c.bf16 %v1363_v50, %v1662_v63  ;;  %v1433_v56 = vld [vmem:[%s2596_s23 + $0x80] sm:$0xf] }
  0xd1   : > { %v1432_v57 = vld [vmem:[%s2596_s23 + $0x78] sm:$0xf]  ;;  %v3063_v16 = vld [vmem:[%s3474_s1] sm:$0x1]  ;;  %v3072_v63 = vld [vmem:[%s2596_s23 + $0x48] sm:$0xff] }
  0xd2   : > { %v2988_v60 = vpop.permute.xlu1 %469  ;;  %2339 = vmatpush1.bf16.msra.mxu0 %v2338_v0  ;;  %v468_v2 = vpop.permute.xlu0 %467  ;;  %v3075_v0 = vld [vmem:[%s2596_s23 + $0x40] sm:$0xff] }
  0xd3   : > { %v505_v15 = vsel %vm503_vm5, %v2801_v23, %v468_v2  ;;  %v506_v5 = vsel %vm503_vm5, %v468_v2, %v2988_v60 }
  0xd4   : > { %545 = vst [vmem:[#allocation2 + $0x60] sm:$0xf0] %v505_v15  ;;  %546 = vst [vmem:[#allocation2 + $0x68] sm:$0xf0] %v506_v5  ;;  %1465 = vrot.lane.b32.xlu1 %v2740_v55, %s2538_s5  ;;  %1463 = vrot.lane.b32.xlu0 %v2707_v47, %s2538_s5 }
  0xd6   : > { %v3000_v3 = vpop.permute.xlu1 %1461  ;;  %v1460_v13 = vpop.permute.xlu0 %1459 }
  0xd7   : > { %v1499_v23 = vsel %vm1497_vm7, %v1460_v13, %v3000_v3 }
  0xd8   : > { %1485 = vrot.lane.b32.xlu1 %v1431_v10, %s2538_s5  ;;  %1483 = vrot.lane.b32.xlu0 %v1430_v11, %s2538_s5  ;;  %v267_v10 = vld [vmem:[%s2596_s23 + $0x98] sm:$0xf]  ;;  %v266_v11 = vld [vmem:[%s2596_s23 + $0x90] sm:$0xf] }
  0xda   : > { %v3009_v55 = vpop.permute.xlu1 %1481  ;;  %v1480_v47 = vpop.permute.xlu0 %1479 }
  0xdb   : > { %v1508_v20 = vsel %vm1497_vm7, %v1480_v47, %v3009_v55  ;;  %v1575_v22 = vld [vmem:[#allocation2 + $0x68] sm:$0xff]  ;;  %v1574_v24 = vld [vmem:[#allocation2 + $0x60] sm:$0xff] }
  0xdc   : > { %1547 = vst [vmem:[#allocation2 + $0x418] sm:$0xf] %v1508_v20  ;;  %302 = vrot.lane.b32.xlu1 %v3007_v19, %s2531_s24  ;;  %300 = vrot.lane.b32.xlu0 %v2866_v8, %s2531_s24  ;;  %v2346_v27 = vpack.c.bf16 %v1575_v22, %v331_v53  ;;  %v2348_v28 = vpack.c.bf16 %v1574_v24, %v330_v51  ;;  %v408_v20 = vld [vmem:[%s2596_s23 + $0x80] sm:$0xf] }
  0xde   : > { %v1478_v33 = vpop.permute.xlu1 %1477  ;;  %2347 = vmatprep.subr.bf16.mxu1 %v2346_v27  ;;  %v1458_v26 = vpop.permute.xlu0 %1457 }
  0xdf   : > { %v1507_v35 = vsel %vm1497_vm7, %v1478_v33, %v1480_v47  ;;  %v1498_v36 = vsel %vm1497_vm7, %v1458_v26, %v1460_v13  ;;  %2349 = vmatpush1.bf16.msra.mxu1 %v2348_v28  ;;  %v409_v47 = vld [vmem:[%s2596_s23 + $0x88] sm:$0xf]  ;;  %v3095_v28 = vrot.slane %v3072_v63, 4  ;;  %v3101_v33 = vrot.slane %v3075_v0, 4 }
  0xe0   : > { %1546 = vst [vmem:[#allocation2 + $0x410] sm:$0xf] %v1507_v35  ;;  %322 = vrot.lane.b32.xlu1 %v265_v30, %s2531_s24  ;;  %320 = vrot.lane.b32.xlu0 %v264_v31, %s2531_s24  ;;  %v457_v35 = vrot.slane %v409_v47, 4 }
  0xe2   : > { %v3026_v61 = vpop.permute.xlu1 %298  ;;  %v297_v38 = vpop.permute.xlu0 %296 }
  0xe3   : > { %v3029_v39 = vsel %vm328_vm4, %v295_v46, %v297_v38  ;;  %v333_v50 = vsel %vm328_vm4, %v297_v38, %v3026_v61  ;;  %v1693_v40 = vld [vmem:[#allocation2 + $0x418] sm:$0xf] }
  0xe4   : > { %477 = vrot.lane.b32.xlu1 %v3024_v37, %s2532_s25  ;;  %475 = vrot.lane.b32.xlu0 %v2881_v14, %s2532_s25  ;;  %v2340_v43 = vpack.c.bf16 %v1693_v40, %v1499_v23 }
  0xe6   : > { %v3042_v44 = vpop.permute.xlu1 %318  ;;  %2342 = vmatprep.subr.msk.bf16.mxu0 %vm3034_vm10, %v2340_v43  ;;  %v317_v45 = vpop.permute.xlu0 %316 }
  0xe7   : > { %v341_v46 = vsel %vm328_vm4, %v2980_v4, %v317_v45  ;;  %v342_v49 = vsel %vm328_vm4, %v317_v45, %v3042_v44  ;;  %v1692_v51 = vld [vmem:[#allocation2 + $0x410] sm:$0xf] }
  0xe8   : > { %383 = vst [vmem:[#allocation2 + $0x70] sm:$0xf] %v341_v46  ;;  %384 = vst [vmem:[#allocation2 + $0x78] sm:$0xf] %v342_v49  ;;  %1469 = vrot.lane.b32.xlu1 %v2866_v8, %s2538_s5  ;;  %1467 = vrot.lane.b32.xlu0 %v2737_v54, %s2538_s5  ;;  %v2343_v53 = vpack.c.bf16 %v1692_v51, %v1498_v36  ;;  %v411_v51 = vld [vmem:[%s2596_s23 + $0x98] sm:$0xf] }
  0xea   : > { %v3056_v58 = vpop.permute.xlu1 %473  ;;  %2345 = vmatpush1.bf16.msk.msra.mxu0 %vm3034_vm10, %v2343_v53  ;;  %v472_v4 = vpop.permute.xlu0 %471  ;;  %v410_v53 = vld [vmem:[%s2596_s23 + $0x90] sm:$0xf] }
  0xeb   : > { %v507_v59 = vsel %vm503_vm5, %v2988_v60, %v472_v4  ;;  %v508_v54 = vsel %vm503_vm5, %v472_v4, %v3056_v58 }
  0xec   : > { %547 = vst [vmem:[#allocation2 + $0x70] sm:$0xf0] %v507_v59  ;;  %548 = vst [vmem:[#allocation2 + $0x78] sm:$0xf0] %v508_v54  ;;  %1489 = vrot.lane.b32.xlu1 %v1433_v56, %s2538_s5  ;;  %1487 = vrot.lane.b32.xlu0 %v1432_v57, %s2538_s5  ;;  %v461_v54 = vrot.slane %v411_v51, 4 }
  0xed   : > { %2301 = vmatmul.mubr.msk.f32.vlgmr.msra.gmra.mrb[0].mxu0 %vm1712_vm11, %v3063_v16 }
  0xee   : > { %v490_v60 = vpop.permute.xlu1 %489  ;;  %v488_v2 = vpop.permute.xlu0 %487  ;;  %1952 = vmatprep.mubr.f32.mxu0 %v2530_v1 }
  0xef   : > { %v514_v15 = vsel %vm503_vm5, %v2814_v29, %v488_v2  ;;  %v515_v5 = vsel %vm503_vm5, %v488_v2, %v490_v60 }
  0xf0   : > { %306 = vrot.lane.b32.xlu1 %v3072_v63, %s2531_s24  ;;  %304 = vrot.lane.b32.xlu0 %v3075_v0, %s2531_s24 }
  0xf2   : > { %v614_v13 = vpop.permute.xlu1 %613  ;;  %v612_v23 = vpop.permute.xlu0 %611 }
  0xf3   : > { %v649_v22 = vsel %vm647_vm9, %v2824_v34, %v612_v23  ;;  %v650_v24 = vsel %vm647_vm9, %v612_v23, %v614_v13  ;;  %v1577_v29 = vld [vmem:[#allocation2 + $0x78] sm:$0xff]  ;;  %v1576_v27 = vld [vmem:[#allocation2 + $0x70] sm:$0xff]  ;;  %v455_v34 = vrot.slane %v408_v20, 4 }
  0xf4   : > { %326 = vrot.lane.b32.xlu1 %v267_v10, %s2531_s24  ;;  %324 = vrot.lane.b32.xlu0 %v266_v11, %s2531_s24  ;;  %v2376_v30 = vpack.c.bf16 %v1577_v29, %v333_v50  ;;  %v2378_v31 = vpack.c.bf16 %v1576_v27, %v3029_v39  ;;  %v2350_v26 = vpack.c.bf16 %v650_v24, %v515_v5  ;;  %v583_v27 = vld [vmem:[%s2596_s23 + $0x80] sm:$0xf] }
  0xf5   : > { %v2352_v36 = vpack.c.bf16 %v649_v22, %v514_v15  ;;  %v458_v39 = vsel %vm432_vm0, %v3024_v37, %v457_v35  ;;  %v456_v45 = vsel %vm432_vm0, %v2881_v14, %v455_v34  ;;  %v462_v11 = vsel %vm432_vm0, %v3095_v28, %v461_v54  ;;  %v727_v35 = vld [vmem:[%s2596_s23 + $0x80] sm:$0xf] }
  0xf6   : > { %v3103_v38 = vpop.permute.xlu1 %493  ;;  %2377 = vmatprep.subr.bf16.mxu0 %v2376_v30  ;;  %v492_v40 = vpop.permute.xlu0 %491  ;;  %2351 = vmatprep.subr.bf16.mxu1 %v2350_v26  ;;  %v728_v26 = vld [vmem:[%s2596_s23 + $0x88] sm:$0xf] }
  0xf7   : > { %v516_v43 = vsel %vm503_vm5, %v490_v60, %v492_v40  ;;  %v517_v50 = vsel %vm503_vm5, %v492_v40, %v3103_v38  ;;  %2379 = vmatpush1.bf16.msra.mxu0 %v2378_v31  ;;  %2353 = vmatpush1.bf16.msra.mxu1 %v2352_v36  ;;  %v459_v60 = vrot.slane %v410_v53, 4 }
  0xf8   : > { %481 = vrot.lane.b32.xlu1 %v3095_v28, %s2532_s25  ;;  %479 = vrot.lane.b32.xlu0 %v3101_v33, %s2532_s25 }
  0xfa   : > { %v3116_v46 = vpop.permute.xlu1 %617  ;;  %v616_v49 = vpop.permute.xlu0 %615 }
  0xfb   : > { %v651_v56 = vsel %vm647_vm9, %v614_v13, %v616_v49  ;;  %v652_v57 = vsel %vm647_vm9, %v616_v49, %v3116_v46  ;;  %v460_v13 = vsel %vm432_vm0, %v3101_v33, %v459_v60 }
  0xfc   : > { %497 = vrot.lane.b32.xlu1 %v458_v39, %s2532_s25  ;;  %495 = vrot.lane.b32.xlu0 %v456_v45, %s2532_s25  ;;  %v2380_v4 = vpack.c.bf16 %v652_v57, %v517_v50  ;;  %v2382_v59 = vpack.c.bf16 %v651_v56, %v516_v43  ;;  %v775_v39 = vrot.slane %v728_v26, 4  ;;  %v773_v45 = vrot.slane %v727_v35, 4 }
  0xfe   : > { %v634_v2 = vpop.permute.xlu1 %633  ;;  %v632_v15 = vpop.permute.xlu0 %631  ;;  %2381 = vmatprep.subr.bf16.mxu0 %v2380_v4  ;;  %v776_v57 = vsel %vm432_vm0, %v3024_v37, %v775_v39  ;;  %v774_v4 = vsel %vm432_vm0, %v2881_v14, %v773_v45  ;;  %v942_v39 = vld [vmem:[%s2596_s23 + $0x88] sm:$0xf] }
  0xff   : > { %v658_v5 = vsel %vm647_vm9, %v2836_v48, %v632_v15  ;;  %v659_v10 = vsel %vm647_vm9, %v632_v15, %v634_v2  ;;  %2383 = vmatpush1.bf16.msra.mxu0 %v2382_v59  ;;  %v586_v15 = vld [vmem:[%s2596_s23 + $0x98] sm:$0xf] }
 0x100   : > { %700 = vst [vmem:[#allocation2 + $0x150] sm:$0xf] %v658_v5  ;;  %701 = vst [vmem:[#allocation2 + $0x158] sm:$0xf] %v659_v10  ;;  %621 = vrot.lane.b32.xlu1 %v3007_v19, %s2533_s26  ;;  %619 = vrot.lane.b32.xlu0 %v2866_v8, %s2533_s26  ;;  %v585_v5 = vld [vmem:[%s2596_s23 + $0x90] sm:$0xf] }
 0x102   : > { %v788_v48 = vpop.permute.xlu1 %787  ;;  %v786_v23 = vpop.permute.xlu0 %785 }
 0x103   : > { %v823_v47 = vsel %vm821_vm13, %v2852_v62, %v786_v23  ;;  %v824_v20 = vsel %vm821_vm13, %v786_v23, %v788_v48  ;;  %v584_v62 = vld [vmem:[%s2596_s23 + $0x88] sm:$0xf] }
 0x104   : > { %863 = vst [vmem:[#allocation2 + $0x150] sm:$0xf0] %v823_v47  ;;  %864 = vst [vmem:[#allocation2 + $0x158] sm:$0xf0] %v824_v20  ;;  %501 = vrot.lane.b32.xlu1 %v462_v11, %s2532_s25  ;;  %499 = vrot.lane.b32.xlu0 %v460_v13, %s2532_s25  ;;  %v730_v13 = vld [vmem:[%s2596_s23 + $0x98] sm:$0xf] }
 0x106   : > { %v808_v8 = vpop.permute.xlu1 %807  ;;  %v806_v22 = vpop.permute.xlu0 %805 }
 0x107   : > { %v832_v24 = vsel %vm821_vm13, %v2868_v9, %v806_v22  ;;  %v833_v29 = vsel %vm821_vm13, %v806_v22, %v808_v8 }
 0x108   : > { %625 = vrot.lane.b32.xlu1 %v3072_v63, %s2533_s26  ;;  %623 = vrot.lane.b32.xlu0 %v3075_v0, %s2533_s26 }
 0x10a   : > { %v3150_v30 = vpop.permute.xlu1 %637  ;;  %v636_v31 = vpop.permute.xlu0 %635 }
 0x10b   : > { %v660_v34 = vsel %vm647_vm9, %v634_v2, %v636_v31  ;;  %v661_v9 = vsel %vm647_vm9, %v636_v31, %v3150_v30  ;;  %v1605_v36 = vld [vmem:[#allocation2 + $0x158] sm:$0xff]  ;;  %v1604_v40 = vld [vmem:[#allocation2 + $0x150] sm:$0xff] }
 0x10c   : > { %702 = vst [vmem:[#allocation2 + $0x160] sm:$0xf] %v660_v34  ;;  %703 = vst [vmem:[#allocation2 + $0x168] sm:$0xf] %v661_v9  ;;  %641 = vrot.lane.b32.xlu1 %v584_v62, %s2533_s26  ;;  %639 = vrot.lane.b32.xlu0 %v583_v27, %s2533_s26  ;;  %v2354_v43 = vpack.c.bf16 %v833_v29, %v1605_v36  ;;  %v2356_v50 = vpack.c.bf16 %v832_v24, %v1604_v40  ;;  %v902_v24 = vld [vmem:[%s2596_s23 + $0x88] sm:$0xf] }
 0x10d   : > { %v901_v29 = vld [vmem:[%s2596_s23 + $0x80] sm:$0xf]  ;;  %v779_v62 = vrot.slane %v730_v13, 4  ;;  %922 = vst [vmem:[#allocation2 + $0x268] sm:$0xf] %v902_v24 }
 0x10e   : > { %v3159_v49 = vpop.permute.xlu1 %791  ;;  %v790_v51 = vpop.permute.xlu0 %789  ;;  %2355 = vmatprep.subr.bf16.mxu1 %v2354_v43  ;;  %921 = vst [vmem:[#allocation2 + $0x260] sm:$0xf] %v901_v29  ;;  %v904_v34 = vld [vmem:[%s2596_s23 + $0x98] sm:$0xf]  ;;  %v903_v9 = vld [vmem:[%s2596_s23 + $0x90] sm:$0xf] }
 0x10f   : > { %v825_v53 = vsel %vm821_vm13, %v788_v48, %v790_v51  ;;  %v826_v56 = vsel %vm821_vm13, %v790_v51, %v3159_v49  ;;  %2357 = vmatpush1.bf16.msra.mxu1 %v2356_v50  ;;  %v780_v36 = vsel %vm432_vm0, %v3095_v28, %v779_v62  ;;  %924 = vst [vmem:[#allocation2 + $0x278] sm:$0xf] %v904_v34  ;;  %923 = vst [vmem:[#allocation2 + $0x270] sm:$0xf] %v903_v9  ;;  %v944_v29 = vld [vmem:[%s2596_s23 + $0x98] sm:$0xf] }
 0x110   : > { %865 = vst [vmem:[#allocation2 + $0x160] sm:$0xf0] %v825_v53  ;;  %866 = vst [vmem:[#allocation2 + $0x168] sm:$0xf0] %v826_v56  ;;  %795 = vrot.lane.b32.xlu1 %v3024_v37, %s2534_s27  ;;  %793 = vrot.lane.b32.xlu0 %v2881_v14, %s2534_s27  ;;  %v729_v14 = vld [vmem:[%s2596_s23 + $0x90] sm:$0xf] }
 0x111   : > { %v777_v27 = vrot.slane %v729_v14, 4 }
 0x112   : > { %v3172_v59 = vpop.permute.xlu1 %811  ;;  %v810_v54 = vpop.permute.xlu0 %809 }
 0x113   : > { %v834_v60 = vsel %vm821_vm13, %v808_v8, %v810_v54  ;;  %v835_v2 = vsel %vm821_vm13, %v810_v54, %v3172_v59  ;;  %v778_v40 = vsel %vm432_vm0, %v3101_v33, %v777_v27  ;;  %v3214_v54 = vld [vmem:[%s2596_s23 + $0x38] sm:$0xff]  ;;  %v993_v27 = vrot.slane %v944_v29, 4 }
 0x114   : > { %815 = vrot.lane.b32.xlu1 %v776_v57, %s2534_s27  ;;  %813 = vrot.lane.b32.xlu0 %v774_v4, %s2534_s27  ;;  %v1118_v29 = vld [vmem:[%s2596_s23 + $0x98] sm:$0xf] }
 0x116   : > { %v1004_v10 = vpop.permute.xlu1 %1003  ;;  %v1002_v11 = vpop.permute.xlu0 %1001 }
 0x117   : > { %v1038_v48 = vsel %vm1035_vm2, %v2889_v21, %v1002_v11  ;;  %v1039_v23 = vsel %vm1035_vm2, %v1002_v11, %v1004_v10  ;;  %v1607_v47 = vld [vmem:[#allocation2 + $0x168] sm:$0xff]  ;;  %v1606_v20 = vld [vmem:[#allocation2 + $0x160] sm:$0xff] }
 0x118   : > { %1076 = vst [vmem:[#allocation2 + $0x240] sm:$0xf0] %v1038_v48  ;;  %1077 = vst [vmem:[#allocation2 + $0x248] sm:$0xf0] %v1039_v23  ;;  %645 = vrot.lane.b32.xlu1 %v586_v15, %s2533_s26  ;;  %643 = vrot.lane.b32.xlu0 %v585_v5, %s2533_s26  ;;  %v2384_v8 = vpack.c.bf16 %v835_v2, %v1607_v47  ;;  %v2386_v22 = vpack.c.bf16 %v834_v60, %v1606_v20  ;;  %v3217_v60 = vld [vmem:[%s2596_s23 + $0x30] sm:$0xff]  ;;  %v989_v2 = vrot.slane %v942_v39, 4 }
 0x119   : > { %v943_v5 = vld [vmem:[%s2596_s23 + $0x90] sm:$0xf]  ;;  %v3230_v23 = vld [vmem:[%s2596_s23 + $0x48] sm:$0xff] }
 0x11a   : > { %v3190_v21 = vpop.permute.xlu1 %1007  ;;  %v1006_v31 = vpop.permute.xlu0 %1005  ;;  %2385 = vmatprep.subr.bf16.mxu0 %v2384_v8  ;;  %v990_v47 = vsel %vm432_vm0, %v3024_v37, %v989_v2  ;;  %v991_v20 = vrot.slane %v943_v5, 4  ;;  %v1117_v2 = vld [vmem:[%s2596_s23 + $0x90] sm:$0xf] }
 0x11b   : > { %v1040_v26 = vsel %vm1035_vm2, %v1004_v10, %v1006_v31  ;;  %v1041_v35 = vsel %vm1035_vm2, %v1006_v31, %v3190_v21  ;;  %2387 = vmatpush1.bf16.msra.mxu0 %v2386_v22 }
 0x11c   : > { %1078 = vst [vmem:[#allocation2 + $0x250] sm:$0xf0] %v1040_v26  ;;  %1079 = vst [vmem:[#allocation2 + $0x258] sm:$0xf0] %v1041_v35  ;;  %799 = vrot.lane.b32.xlu1 %v3095_v28, %s2534_s27  ;;  %797 = vrot.lane.b32.xlu0 %v3101_v33, %s2534_s27  ;;  %v992_v62 = vsel %vm432_vm0, %v3101_v33, %v991_v20 }
 0x11e   : > { %v1024_v43 = vpop.permute.xlu1 %1023  ;;  %v1022_v50 = vpop.permute.xlu0 %1021 }
 0x11f   : > { %v1047_v45 = vsel %vm1035_vm2, %v2906_v42, %v1022_v50  ;;  %v1048_v51 = vsel %vm1035_vm2, %v1022_v50, %v1024_v43  ;;  %v1635_v53 = vld [vmem:[#allocation2 + $0x248] sm:$0xff]  ;;  %v1634_v56 = vld [vmem:[#allocation2 + $0x240] sm:$0xff] }
 0x120   : > { %819 = vrot.lane.b32.xlu1 %v780_v36, %s2534_s27  ;;  %817 = vrot.lane.b32.xlu0 %v778_v40, %s2534_s27  ;;  %v2358_v57 = vpack.c.bf16 %v1635_v53, %v2860_v6  ;;  %v2360_v4 = vpack.c.bf16 %v1634_v56, %v2863_v7  ;;  %v994_v40 = vsel %vm432_vm0, %v3095_v28, %v993_v27 }
 0x122   : > { %v1148_v42 = vpop.permute.xlu1 %1147  ;;  %2359 = vmatprep.subr.bf16.mxu1 %v2358_v57  ;;  %v1146_v15 = vpop.permute.xlu0 %1145  ;;  %v1260_v57 = vld [vmem:[%s2596_s23 + $0x88] sm:$0xf] }
 0x123   : > { %v1182_v10 = vsel %vm1179_vm3, %v2919_v52, %v1146_v15  ;;  %v1183_v11 = vsel %vm1179_vm3, %v1146_v15, %v1148_v42  ;;  %2361 = vmatpush1.bf16.msra.mxu1 %v2360_v4  ;;  %v1637_v6 = vld [vmem:[#allocation2 + $0x258] sm:$0xff]  ;;  %v1636_v7 = vld [vmem:[#allocation2 + $0x250] sm:$0xff]  ;;  %v3233_v52 = vld [vmem:[%s2596_s23 + $0x40] sm:$0xff] }
 0x124   : > { %1011 = vrot.lane.b32.xlu1 %v3101_v33, %s2535_s28  ;;  %1009 = vrot.lane.b32.xlu0 %v3024_v37, %s2535_s28  ;;  %v2388_v13 = vpack.c.bf16 %v1637_v6, %v2884_v17  ;;  %v2390_v14 = vpack.c.bf16 %v1636_v7, %v2887_v18  ;;  %v2362_v48 = vpack.c.bf16 %v1183_v11, %v1048_v51  ;;  %v1116_v51 = vld [vmem:[%s2596_s23 + $0x88] sm:$0xf] }
 0x125   : > { %v2364_v8 = vpack.c.bf16 %v1182_v10, %v1047_v45  ;;  %v1261_v10 = vld [vmem:[%s2596_s23 + $0x90] sm:$0xf] }
 0x126   : > { %v3237_v22 = vpop.permute.xlu1 %1027  ;;  %2389 = vmatprep.subr.bf16.mxu0 %v2388_v13  ;;  %v1026_v24 = vpop.permute.xlu0 %1025  ;;  %2363 = vmatprep.subr.bf16.mxu1 %v2362_v48  ;;  %v1309_v7 = vrot.slane %v1261_v10, 4  ;;  %v1262_v48 = vld [vmem:[%s2596_s23 + $0x98] sm:$0xf] }
 0x127   : > { %v1049_v17 = vsel %vm1035_vm2, %v1024_v43, %v1026_v24  ;;  %v1050_v18 = vsel %vm1035_vm2, %v1026_v24, %v3237_v22  ;;  %2391 = vmatpush1.bf16.msra.mxu0 %v2390_v14  ;;  %2365 = vmatpush1.bf16.msra.mxu1 %v2364_v8 }
 0x128   : > { %1029 = vrot.lane.b32.xlu1 %v990_v47, %s2535_s28  ;;  %1013 = vrot.lane.b32.xlu0 %v3095_v28, %s2535_s28 }
 0x12a   : > { %v3248_v31 = vpop.permute.xlu1 %1151  ;;  %v1150_v26 = vpop.permute.xlu0 %1149 }
 0x12b   : > { %v1184_v35 = vsel %vm1179_vm3, %v1148_v42, %v1150_v26  ;;  %v1185_v34 = vsel %vm1179_vm3, %v1150_v26, %v3248_v31  ;;  %v1307_v42 = vrot.slane %v1260_v57, 4 }
 0x12c   : > { %1153 = vrot.lane.b32.xlu1 %v3007_v19, %s2536_s29  ;;  %1031 = vrot.lane.b32.xlu0 %v992_v62, %s2535_s28  ;;  %v2392_v9 = vpack.c.bf16 %v1185_v34, %v1050_v18  ;;  %v2394_v36 = vpack.c.bf16 %v1184_v35, %v1049_v17  ;;  %v1310_v17 = vsel %vm432_vm0, %v3101_v33, %v1309_v7  ;;  %v1311_v18 = vrot.slane %v1262_v48, 4 }
 0x12d   : > { %v1308_v6 = vsel %vm432_vm0, %v3024_v37, %v1307_v42 }
 0x12e   : > { %v1168_v43 = vpop.permute.xlu1 %1167  ;;  %v1166_v50 = vpop.permute.xlu0 %1165  ;;  %2393 = vmatprep.subr.bf16.mxu0 %v2392_v9 }
 0x12f   : > { %v1191_v39 = vsel %vm1179_vm3, %v2934_v12, %v1166_v50  ;;  %v1192_v45 = vsel %vm1179_vm3, %v1166_v50, %v1168_v43  ;;  %2395 = vmatpush1.bf16.msra.mxu0 %v2394_v36 }
 0x130   : > { %1230 = vst [vmem:[#allocation2 + $0x330] sm:$0xf] %v1191_v39  ;;  %1231 = vst [vmem:[#allocation2 + $0x338] sm:$0xf] %v1192_v45  ;;  %1033 = vrot.lane.b32.xlu1 %v994_v40, %s2535_s28  ;;  %1155 = vrot.lane.b32.xlu0 %v3075_v0, %s2536_s29 }
 0x132   : > { %v1322_v53 = vpop.permute.xlu1 %1321  ;;  %v1320_v56 = vpop.permute.xlu0 %1319 }
 0x133   : > { %v1356_v4 = vsel %vm1353_vm6, %v2942_v25, %v1320_v56  ;;  %v1357_v12 = vsel %vm1353_vm6, %v1320_v56, %v1322_v53 }
 0x134   : > { %1394 = vst [vmem:[#allocation2 + $0x330] sm:$0xf0] %v1356_v4  ;;  %1395 = vst [vmem:[#allocation2 + $0x338] sm:$0xf0] %v1357_v12  ;;  %1173 = vrot.lane.b32.xlu1 %v1116_v51, %s2536_s29  ;;  %1157 = vrot.lane.b32.xlu0 %v3072_v63, %s2536_s29  ;;  %v1435_v4 = vld [vmem:[%s2596_s23 + $0x90] sm:$0xf] }
 0x136   : > { %v1342_v15 = vpop.permute.xlu1 %1341  ;;  %v1340_v5 = vpop.permute.xlu0 %1339 }
 0x137   : > { %v1365_v11 = vsel %vm1353_vm6, %v2954_v32, %v1340_v5  ;;  %v1366_v25 = vsel %vm1353_vm6, %v1340_v5, %v1342_v15 }
 0x138   : > { %1327 = vrot.lane.b32.xlu1 %v3024_v37, %s2537_s30  ;;  %1175 = vrot.lane.b32.xlu0 %v1117_v2, %s2536_s29 }
 0x13a   : > { %v3282_v13 = vpop.permute.xlu1 %1171  ;;  %v1170_v14 = vpop.permute.xlu0 %1169 }
 0x13b   : > { %v1193_v47 = vsel %vm1179_vm3, %v1168_v43, %v1170_v14  ;;  %v1194_v32 = vsel %vm1179_vm3, %v1170_v14, %v3282_v13  ;;  %v1665_v20 = vld [vmem:[#allocation2 + $0x338] sm:$0xff]  ;;  %v1664_v8 = vld [vmem:[#allocation2 + $0x330] sm:$0xff] }
 0x13c   : > { %1232 = vst [vmem:[#allocation2 + $0x340] sm:$0xf] %v1193_v47  ;;  %1233 = vst [vmem:[#allocation2 + $0x348] sm:$0xf] %v1194_v32  ;;  %1347 = vrot.lane.b32.xlu1 %v1308_v6, %s2537_s30  ;;  %1329 = vrot.lane.b32.xlu0 %v3101_v33, %s2537_s30  ;;  %v2366_v37 = vpack.c.bf16 %v1366_v25, %v1665_v20  ;;  %v2368_v24 = vpack.c.bf16 %v1365_v11, %v1664_v8  ;;  %v1702_v25 = vld [vmem:[#allocation3] sm:$0x1] }
 0x13d   : > { %v1312_v33 = vsel %vm432_vm0, %v3095_v28, %v1311_v18  ;;  %v2540_v47 = vmov 0   ;;  %vm1083_vm0 = vcmask 1039364  }
 0x13e   : > { %v3294_v62 = vpop.permute.xlu1 %1325  ;;  %v1324_v27 = vpop.permute.xlu0 %1323  ;;  %2367 = vmatprep.subr.bf16.mxu1 %v2366_v37  ;;  %2504 = vset.pattern.permute.xlu0 %v2540_v47 }
 0x13f   : > { %v1358_v26 = vsel %vm1353_vm6, %v1322_v53, %v1324_v27  ;;  %v1359_v35 = vsel %vm1353_vm6, %v1324_v27, %v3294_v62  ;;  %2369 = vmatpush1.bf16.msra.mxu1 %v2368_v24 }
 0x140   : > { %1396 = vst [vmem:[#allocation2 + $0x340] sm:$0xf0] %v1358_v26  ;;  %1397 = vst [vmem:[#allocation2 + $0x348] sm:$0xf0] %v1359_v35  ;;  %1177 = vrot.lane.b32.xlu1 %v1118_v29, %s2536_s29  ;;  %1349 = vrot.lane.b32.xlu0 %v1310_v17, %s2537_s30 }
 0x142   : > { %v3303_v34 = vpop.permute.xlu1 %1345  ;;  %v1344_v9 = vpop.permute.xlu0 %1343 }
 0x143   : > { %v1367_v36 = vsel %vm1353_vm6, %v1342_v15, %v1344_v9  ;;  %v1368_v40 = vsel %vm1353_vm6, %v1344_v9, %v3303_v34 }
 0x144   : > { %1351 = vrot.lane.b32.xlu1 %v1312_v33, %s2537_s30  ;;  %1331 = vrot.lane.b32.xlu0 %v3095_v28, %s2537_s30  ;;  %v1434_v28 = vld [vmem:[%s2596_s23 + $0x88] sm:$0xf] }
 0x146   : > { %v1466_v43 = vpop.permute.xlu1 %1465  ;;  %v1464_v50 = vpop.permute.xlu0 %1463 }
 0x147   : > { %v1500_v39 = vsel %vm1497_vm7, %v3000_v3, %v1464_v50  ;;  %v1501_v45 = vsel %vm1497_vm7, %v1464_v50, %v1466_v43  ;;  %v1667_v51 = vld [vmem:[#allocation2 + $0x348] sm:$0xff]  ;;  %v1666_v53 = vld [vmem:[#allocation2 + $0x340] sm:$0xff] }
 0x148   : > { %1473 = vrot.lane.b32.xlu1 %v3075_v0, %s2538_s5  ;;  %1471 = vrot.lane.b32.xlu0 %v3007_v19, %s2538_s5  ;;  %v2396_v56 = vpack.c.bf16 %v1368_v40, %v1667_v51  ;;  %v2398_v57 = vpack.c.bf16 %v1367_v36, %v1666_v53  ;;  %v1436_v19 = vld [vmem:[%s2596_s23 + $0x98] sm:$0xf] }
 0x14a   : > { %v1486_v12 = vpop.permute.xlu1 %1485  ;;  %v1484_v2 = vpop.permute.xlu0 %1483  ;;  %2397 = vmatprep.subr.bf16.mxu0 %v2396_v56 }
 0x14b   : > { %v1509_v3 = vsel %vm1497_vm7, %v3009_v55, %v1484_v2  ;;  %v1510_v42 = vsel %vm1497_vm7, %v1484_v2, %v1486_v12  ;;  %2399 = vmatpush1.bf16.msra.mxu0 %v2398_v57 }
 0x14c   : > { %1548 = vst [vmem:[#allocation2 + $0x420] sm:$0xf] %v1509_v3  ;;  %1549 = vst [vmem:[#allocation2 + $0x428] sm:$0xf] %v1510_v42  ;;  %1493 = vrot.lane.b32.xlu1 %v1435_v4, %s2538_s5  ;;  %1491 = vrot.lane.b32.xlu0 %v1434_v28, %s2538_s5 }
 0x14e   : > { %v303_v0 = vpop.permute.xlu1 %302  ;;  %v301_v15 = vpop.permute.xlu0 %300 }
 0x14f   : > { %v334_v5 = vsel %vm328_vm4, %v3026_v61, %v301_v15  ;;  %v335_v10 = vsel %vm328_vm4, %v301_v15, %v303_v0 }
 0x150   : > { %1495 = vrot.lane.b32.xlu1 %v1436_v19, %s2538_s5  ;;  %1475 = vrot.lane.b32.xlu0 %v3072_v63, %s2538_s5 }
 0x152   : > { %v323_v55 = vpop.permute.xlu1 %322  ;;  %v321_v11 = vpop.permute.xlu0 %320 }
 0x153   : > { %v343_v6 = vsel %vm328_vm4, %v3042_v44, %v321_v11  ;;  %v344_v7 = vsel %vm328_vm4, %v321_v11, %v323_v55  ;;  %v1695_v14 = vld [vmem:[#allocation2 + $0x428] sm:$0xf]  ;;  %v1694_v48 = vld [vmem:[#allocation2 + $0x420] sm:$0xf] }
 0x154   : > { %385 = vst [vmem:[#allocation2 + $0x80] sm:$0xf] %v343_v6  ;;  %386 = vst [vmem:[#allocation2 + $0x88] sm:$0xf] %v344_v7  ;;  %v2370_v61 = vpack.c.bf16 %v1695_v14, %v1501_v45  ;;  %v2373_v32 = vpack.c.bf16 %v1694_v48, %v1500_v39  ;;  %1705 = vperm.xlu0 %2504, %v1702_v25  }
 0x156   : > { %v478_v20 = vpop.permute.xlu1 %477  ;;  %2372 = vmatprep.subr.msk.bf16.mxu1 %vm3034_vm10, %v2370_v61  ;;  %v476_v63 = vpop.permute.xlu0 %475 }
 0x157   : > { %v509_v8 = vsel %vm503_vm5, %v3056_v58, %v476_v63  ;;  %v510_v44 = vsel %vm503_vm5, %v476_v63, %v478_v20  ;;  %2375 = vmatpush1.bf16.msk.msra.mxu1 %vm3034_vm10, %v2373_v32 }
 0x158   : > { %549 = vst [vmem:[#allocation2 + $0x80] sm:$0xf0] %v509_v8  ;;  %550 = vst [vmem:[#allocation2 + $0x88] sm:$0xf0] %v510_v44 }
 0x15a   : > { %v3342_v37 = vpop.permute.xlu1 %1469  ;;  %v1468_v24 = vpop.permute.xlu0 %1467  ;;  %2304 = vmatmul.mubr.msk.f32.vlgmr.msra.gmra.mrb[0].mxu1 %vm1712_vm11, %v3063_v16 }
 0x15b   : > { %v1502_v29 = vsel %vm1497_vm7, %v1466_v43, %v1468_v24  ;;  %v1503_v17 = vsel %vm1497_vm7, %v1468_v24, %v3342_v37  ;;  %2023 = vmatprep.mubr.f32.mxu1 %v2530_v1 }
 0x15e   : > { %v3350_v58 = vpop.permute.xlu1 %1489  ;;  %v1488_v18 = vpop.permute.xlu0 %1487 }
 0x15f   : > { %v1511_v27 = vsel %vm1497_vm7, %v1486_v12, %v1488_v18  ;;  %v1512_v26 = vsel %vm1497_vm7, %v1488_v18, %v3350_v58  ;;  %v1579_v35 = vld [vmem:[#allocation2 + $0x88] sm:$0xff]  ;;  %v1578_v33 = vld [vmem:[#allocation2 + $0x80] sm:$0xff] }
 0x160   : > { %1550 = vst [vmem:[#allocation2 + $0x430] sm:$0xf] %v1511_v27  ;;  %1551 = vst [vmem:[#allocation2 + $0x438] sm:$0xf] %v1512_v26  ;;  %v2406_v9 = vpack.c.bf16 %v1579_v35, %v335_v10  ;;  %v2408_v36 = vpack.c.bf16 %v1578_v33, %v334_v5 }
 0x162   : > { %v307_v40 = vpop.permute.xlu1 %306  ;;  %2407 = vmatprep.subr.bf16.mxu1 %v2406_v9  ;;  %v305_v43 = vpop.permute.xlu0 %304 }
 0x163   : > { %v336_v50 = vsel %vm328_vm4, %v303_v0, %v305_v43  ;;  %v337_v39 = vsel %vm328_vm4, %v305_v43, %v307_v40  ;;  %2409 = vmatpush1.bf16.msra.mxu1 %v2408_v36 }
 0x166   : > { %v327_v45 = vpop.permute.xlu1 %326  ;;  %v325_v51 = vpop.permute.xlu0 %324 }
 0x167   : > { %v345_v53 = vsel %vm328_vm4, %v323_v55, %v325_v51  ;;  %v346_v56 = vsel %vm328_vm4, %v325_v51, %v327_v45  ;;  %v1697_v57 = vld [vmem:[#allocation2 + $0x438] sm:$0xf]  ;;  %v1696_v4 = vld [vmem:[#allocation2 + $0x430] sm:$0xf]  ;;  %vm1095_vm4 = vcmask 1048572  }
 0x168   : > { %387 = vst [vmem:[#allocation2 + $0x90] sm:$0xf] %v345_v53  ;;  %388 = vst [vmem:[#allocation2 + $0x98] sm:$0xf] %v346_v56  ;;  %v2400_v28 = vpack.c.bf16 %v1697_v57, %v1503_v17  ;;  %v2403_v12 = vpack.c.bf16 %v1696_v4, %v1502_v29 }
 0x16a   : > { %v482_v2 = vpop.permute.xlu1 %481  ;;  %2402 = vmatprep.subr.msk.bf16.mxu0 %vm3034_vm10, %v2400_v28  ;;  %v480_v3 = vpop.permute.xlu0 %479 }
 0x16b   : > { %v511_v42 = vsel %vm503_vm5, %v478_v20, %v480_v3  ;;  %v512_v19 = vsel %vm503_vm5, %v480_v3, %v482_v2  ;;  %2405 = vmatpush1.bf16.msk.msra.mxu0 %vm3034_vm10, %v2403_v12 }
 0x16c   : > { %551 = vst [vmem:[#allocation2 + $0x90] sm:$0xf0] %v511_v42  ;;  %552 = vst [vmem:[#allocation2 + $0x98] sm:$0xf0] %v512_v19 }
 0x16e   : > { %v498_v0 = vpop.permute.xlu1 %497  ;;  %v496_v15 = vpop.permute.xlu0 %495  ;;  %2307 = vmatmul.mubr.msk.f32.vlgmr.msra.gmra.mrb[2].mxu0 %vm1712_vm11, %v3063_v16 }
 0x16f   : > { %v518_v5 = vsel %vm503_vm5, %v3103_v38, %v496_v15  ;;  %v519_v10 = vsel %vm503_vm5, %v496_v15, %v498_v0  ;;  %2094 = vmatprep.mubr.f32.mxu0 %v2530_v1 }
 0x172   : > { %v622_v55 = vpop.permute.xlu1 %621  ;;  %v620_v11 = vpop.permute.xlu0 %619 }
 0x173   : > { %v653_v25 = vsel %vm647_vm9, %v3116_v46, %v620_v11  ;;  %v654_v6 = vsel %vm647_vm9, %v620_v11, %v622_v55  ;;  %v1581_v7 = vld [vmem:[#allocation2 + $0x98] sm:$0xff]  ;;  %v1580_v14 = vld [vmem:[#allocation2 + $0x90] sm:$0xff] }
 0x174   : > { %v2436_v48 = vpack.c.bf16 %v1581_v7, %v337_v39  ;;  %v2438_v47 = vpack.c.bf16 %v1580_v14, %v336_v50  ;;  %v2410_v61 = vpack.c.bf16 %v654_v6, %v519_v10  ;;  %v2412_v16 = vpack.c.bf16 %v653_v25, %v518_v5 }
 0x176   : > { %v502_v32 = vpop.permute.xlu1 %501  ;;  %2437 = vmatprep.subr.bf16.mxu0 %v2436_v48  ;;  %v500_v38 = vpop.permute.xlu0 %499  ;;  %2411 = vmatprep.subr.bf16.mxu1 %v2410_v61 }
 0x177   : > { %v520_v20 = vsel %vm503_vm5, %v498_v0, %v500_v38  ;;  %v521_v63 = vsel %vm503_vm5, %v500_v38, %v502_v32  ;;  %2439 = vmatpush1.bf16.msra.mxu0 %v2438_v47  ;;  %2413 = vmatpush1.bf16.msra.mxu1 %v2412_v16  ;;  %vm1097_vm5 = vcmask 1048568  }
 0x17a   : > { %v626_v8 = vpop.permute.xlu1 %625  ;;  %v624_v46 = vpop.permute.xlu0 %623 }
 0x17b   : > { %v655_v44 = vsel %vm647_vm9, %v622_v55, %v624_v46  ;;  %v656_v24 = vsel %vm647_vm9, %v624_v46, %v626_v8 }
 0x17c   : > { %v2440_v29 = vpack.c.bf16 %v656_v24, %v521_v63  ;;  %v2442_v17 = vpack.c.bf16 %v655_v44, %v520_v20 }
 0x17e   : > { %v642_v18 = vpop.permute.xlu1 %641  ;;  %v640_v27 = vpop.permute.xlu0 %639  ;;  %2441 = vmatprep.subr.bf16.mxu0 %v2440_v29 }
 0x17f   : > { %v662_v26 = vsel %vm647_vm9, %v3150_v30, %v640_v27  ;;  %v663_v35 = vsel %vm647_vm9, %v640_v27, %v642_v18  ;;  %2443 = vmatpush1.bf16.msra.mxu0 %v2442_v17 }
 0x180   : > { %704 = vst [vmem:[#allocation2 + $0x170] sm:$0xf] %v662_v26  ;;  %705 = vst [vmem:[#allocation2 + $0x178] sm:$0xf] %v663_v35 }
 0x182   : > { %v796_v33 = vpop.permute.xlu1 %795  ;;  %v794_v9 = vpop.permute.xlu0 %793 }
 0x183   : > { %v827_v36 = vsel %vm821_vm13, %v3159_v49, %v794_v9  ;;  %v828_v40 = vsel %vm821_vm13, %v794_v9, %v796_v33 }
 0x184   : > { %867 = vst [vmem:[#allocation2 + $0x170] sm:$0xf0] %v827_v36  ;;  %868 = vst [vmem:[#allocation2 + $0x178] sm:$0xf0] %v828_v40 }
 0x186   : > { %v816_v43 = vpop.permute.xlu1 %815  ;;  %v814_v50 = vpop.permute.xlu0 %813 }
 0x187   : > { %v836_v39 = vsel %vm821_vm13, %v3172_v59, %v814_v50  ;;  %v837_v30 = vsel %vm821_vm13, %v814_v50, %v816_v43 }
 0x18a   : > { %v646_v45 = vpop.permute.xlu1 %645  ;;  %v644_v51 = vpop.permute.xlu0 %643 }
 0x18b   : > { %v664_v53 = vsel %vm647_vm9, %v642_v18, %v644_v51  ;;  %v665_v56 = vsel %vm647_vm9, %v644_v51, %v646_v45  ;;  %v1609_v57 = vld [vmem:[#allocation2 + $0x178] sm:$0xff]  ;;  %v1608_v4 = vld [vmem:[#allocation2 + $0x170] sm:$0xff]  ;;  %vm1239_vm9 = vcmask 1048312  }
 0x18c   : > { %706 = vst [vmem:[#allocation2 + $0x180] sm:$0xf] %v664_v53  ;;  %707 = vst [vmem:[#allocation2 + $0x188] sm:$0xf] %v665_v56  ;;  %v2414_v49 = vpack.c.bf16 %v837_v30, %v1609_v57  ;;  %v2416_v28 = vpack.c.bf16 %v836_v39, %v1608_v4 }
 0x18e   : > { %v800_v12 = vpop.permute.xlu1 %799  ;;  %v798_v2 = vpop.permute.xlu0 %797  ;;  %2415 = vmatprep.subr.bf16.mxu1 %v2414_v49 }
 0x18f   : > { %v829_v3 = vsel %vm821_vm13, %v796_v33, %v798_v2  ;;  %v830_v59 = vsel %vm821_vm13, %v798_v2, %v800_v12  ;;  %2417 = vmatpush1.bf16.msra.mxu1 %v2416_v28 }
 0x190   : > { %869 = vst [vmem:[#allocation2 + $0x180] sm:$0xf0] %v829_v3  ;;  %870 = vst [vmem:[#allocation2 + $0x188] sm:$0xf0] %v830_v59 }
 0x192   : > { %v820_v42 = vpop.permute.xlu1 %819  ;;  %v818_v19 = vpop.permute.xlu0 %817 }
 0x193   : > { %v838_v0 = vsel %vm821_vm13, %v816_v43, %v818_v19  ;;  %v839_v15 = vsel %vm821_vm13, %v818_v19, %v820_v42  ;;  %vm1241_vm13 = vcmask 1044216  }
 0x196   : > { %v1012_v5 = vpop.permute.xlu1 %1011  ;;  %v1010_v10 = vpop.permute.xlu0 %1009 }
 0x197   : > { %v1042_v55 = vsel %vm1035_vm2, %v3190_v21, %v1010_v10  ;;  %v1043_v11 = vsel %vm1035_vm2, %v1010_v10, %v1012_v5  ;;  %v1611_v25 = vld [vmem:[#allocation2 + $0x188] sm:$0xff]  ;;  %v1610_v6 = vld [vmem:[#allocation2 + $0x180] sm:$0xff] }
 0x198   : > { %1080 = vst [vmem:[#allocation2 + $0x260] sm:$0xf0] %v1042_v55  ;;  %1081 = vst [vmem:[#allocation2 + $0x268] sm:$0xf0] %v1043_v11  ;;  %v2444_v7 = vpack.c.bf16 %v839_v15, %v1611_v25  ;;  %v2446_v14 = vpack.c.bf16 %v838_v0, %v1610_v6 }
 0x19a   : > { %v1030_v48 = vpop.permute.xlu1 %1029  ;;  %v1014_v47 = vpop.permute.xlu0 %1013  ;;  %2445 = vmatprep.subr.bf16.mxu0 %v2444_v7 }
 0x19b   : > { %v1051_v61 = vsel %vm1035_vm2, %v3237_v22, %v1030_v48  ;;  %v1044_v16 = vsel %vm1035_vm2, %v1012_v5, %v1014_v47  ;;  %1084 = vst.msk [vmem:[#allocation2 + $0x278] sm:$0xf0] %vm1083_vm0, %v1014_v47  ;;  %2447 = vmatpush1.bf16.msra.mxu0 %v2446_v14 }
 0x19c   : > { %1082 = vst [vmem:[#allocation2 + $0x270] sm:$0xf0] %v1044_v16  ;;  %1096 = vst.msk [vmem:[#allocation2 + $0x278] sm:$0xf0] %vm1095_vm4, %v2530_v1 }
 0x19e   : > { %v1154_v21 = vpop.permute.xlu1 %1153  ;;  %v1032_v32 = vpop.permute.xlu0 %1031 }
 0x19f   : > { %v1186_v38 = vsel %vm1179_vm3, %v3248_v31, %v1154_v21  ;;  %v1052_v20 = vsel %vm1035_vm2, %v1030_v48, %v1032_v32  ;;  %v1639_v63 = vld [vmem:[#allocation2 + $0x268] sm:$0xff]  ;;  %v1638_v8 = vld [vmem:[#allocation2 + $0x260] sm:$0xff] }
 0x1a0   : > { %v2418_v46 = vpack.c.bf16 %v1639_v63, %v3214_v54  ;;  %v2420_v22 = vpack.c.bf16 %v1638_v8, %v3217_v60  ;;  %v2424_v26 = vpack.c.bf16 %v1186_v38, %v1051_v61 }
 0x1a2   : > { %v1034_v44 = vpop.permute.xlu1 %1033  ;;  %2419 = vmatprep.subr.bf16.mxu1 %v2418_v46  ;;  %v1156_v24 = vpop.permute.xlu0 %1155 }
 0x1a3   : > { %v1053_v29 = vsel %vm1035_vm2, %v1032_v32, %v1034_v44  ;;  %1094 = vst.msk [vmem:[#allocation2 + $0x2c8] sm:$0xff] %vm1035_vm2, %v1034_v44  ;;  %v1187_v17 = vsel %vm1179_vm3, %v1154_v21, %v1156_v24  ;;  %2421 = vmatpush1.bf16.msra.mxu1 %v2420_v22  ;;  %v1641_v31 = vld [vmem:[#allocation2 + $0x278] sm:$0xff]  ;;  %v1640_v18 = vld [vmem:[#allocation2 + $0x270] sm:$0xff]  ;;  %vm1555_vm2 = vcmask 756736   ;;  %v1708_v22 = vlaneseq }
 0x1a4   : > { %1098 = vst.msk [vmem:[#allocation2 + $0x2c8] sm:$0xff] %vm1097_vm5, %v2530_v1  ;;  %v2448_v27 = vpack.c.bf16 %v1641_v31, %v3230_v23  ;;  %v2450_v54 = vpack.c.bf16 %v1640_v18, %v3233_v52  ;;  %v2422_v60 = vpack.c.bf16 %v1187_v17, %v1052_v20 }
 0x1a5   : > { %v1709_v18 = vshrl.u32 %v1708_v22, 7 }
 0x1a6   : > { %v1174_v35 = vpop.permute.xlu1 %1173  ;;  %2449 = vmatprep.subr.bf16.mxu0 %v2448_v27  ;;  %v1158_v33 = vpop.permute.xlu0 %1157  ;;  %2423 = vmatprep.subr.bf16.mxu1 %v2422_v60 }
 0x1a7   : > { %v1195_v9 = vsel %vm1179_vm3, %v3282_v13, %v1174_v35  ;;  %v1188_v36 = vsel %vm1179_vm3, %v1156_v24, %v1158_v33  ;;  %1227 = vst.msk [vmem:[#allocation2 + $0x318] sm:$0xff] %vm1179_vm3, %v1158_v33  ;;  %2451 = vmatpush1.bf16.msra.mxu0 %v2450_v54  ;;  %2425 = vmatpush1.bf16.msra.mxu1 %v2424_v26  ;;  %v1710_v27 = vsub.s32 0, %v1709_v18 }
 0x1a8   : > { %1234 = vst [vmem:[#allocation2 + $0x350] sm:$0xf] %v1195_v9  ;;  %1240 = vst.msk [vmem:[#allocation2 + $0x318] sm:$0xff] %vm1239_vm9, %v2530_v1  ;;  %v2454_v56 = vpack.c.bf16 %v1188_v36, %v1053_v29  ;;  %v2541_v9 = vmov 1966171168  }
 0x1a9   : > { %v2120_v36 = vunpack.c.l.s4 %v2541_v9 }
 0x1aa   : > { %v1328_v23 = vpop.permute.xlu1 %1327  ;;  %v1176_v52 = vpop.permute.xlu0 %1175 }
 0x1ab   : > { %v1360_v40 = vsel %vm1353_vm6, %v3294_v62, %v1328_v23  ;;  %v1196_v43 = vsel %vm1179_vm3, %v1174_v35, %v1176_v52  ;;  %v1651_v50 = vld [vmem:[#allocation2 + $0x2c8] sm:$0xff] }
 0x1ac   : > { %1398 = vst [vmem:[#allocation2 + $0x350] sm:$0xf0] %v1360_v40  ;;  %1235 = vst [vmem:[#allocation2 + $0x358] sm:$0xf] %v1196_v43 }
 0x1ae   : > { %v1348_v13 = vpop.permute.xlu1 %1347  ;;  %v1330_v39 = vpop.permute.xlu0 %1329 }
 0x1af   : > { %v1369_v30 = vsel %vm1353_vm6, %v3303_v34, %v1348_v13  ;;  %v1361_v45 = vsel %vm1353_vm6, %v1328_v23, %v1330_v39  ;;  %v1661_v51 = vld [vmem:[#allocation2 + $0x318] sm:$0xff]  ;;  %v2121_v23 = vunpack.c.0.s8 %v2120_v36 }
 0x1b0   : > { %1399 = vst [vmem:[#allocation2 + $0x358] sm:$0xf0] %v1361_v45  ;;  %v2452_v53 = vpack.c.bf16 %v1661_v51, %v1651_v50 }
 0x1b2   : > { %v1178_v57 = vpop.permute.xlu1 %1177  ;;  %2453 = vmatprep.subr.bf16.mxu0 %v2452_v53  ;;  %v1350_v62 = vpop.permute.xlu0 %1349 }
 0x1b3   : > { %v1197_v4 = vsel %vm1179_vm3, %v1176_v52, %v1178_v57  ;;  %1238 = vst.msk [vmem:[#allocation2 + $0x368] sm:$0xf] %vm1237_vm12, %v1178_v57  ;;  %v1370_v49 = vsel %vm1353_vm6, %v1348_v13, %v1350_v62  ;;  %2455 = vmatpush1.bf16.msra.mxu0 %v2454_v56  ;;  %v1668_v12 = vld [vmem:[#allocation2 + $0x350] sm:$0xff]  ;;  %vm1559_vm3 = vcmask 1044200   ;;  %v2124_v52 = vsub.s32 %v2121_v23, %v1709_v18 }
 0x1b4   : > { %1236 = vst [vmem:[#allocation2 + $0x360] sm:$0xf] %v1197_v4  ;;  %1242 = vst.msk [vmem:[#allocation2 + $0x368] sm:$0xf] %vm1241_vm13, %v2530_v1  ;;  %v2428_v19 = vpack.c.bf16 %v1369_v30, %v1668_v12 }
 0x1b6   : > { %v1352_v34 = vpop.permute.xlu1 %1351  ;;  %v1332_v28 = vpop.permute.xlu0 %1331 }
 0x1b7   : > { %v1371_v2 = vsel %vm1353_vm6, %v1350_v62, %v1352_v34  ;;  %1412 = vst.msk [vmem:[#allocation2 + $0x3b8] sm:$0xff] %vm1353_vm6, %v1352_v34  ;;  %v1362_v3 = vsel %vm1353_vm6, %v1330_v39, %v1332_v28  ;;  %v1669_v59 = vld [vmem:[#allocation2 + $0x358] sm:$0xff]  ;;  %vm1557_vm6 = vcmask 1048296  }
 0x1b8   : > { %1402 = vst.msk [vmem:[#allocation2 + $0x368] sm:$0xf0] %vm1401_vm14, %v1332_v28  ;;  %1400 = vst [vmem:[#allocation2 + $0x360] sm:$0xf0] %v1362_v3  ;;  %v2426_v42 = vpack.c.bf16 %v1370_v49, %v1669_v59 }
 0x1b9   : > { %1416 = vst.msk [vmem:[#allocation2 + $0x3b8] sm:$0xff] %vm1415_vm15, %v2530_v1 }
 0x1ba   : > { %1414 = vst.msk [vmem:[#allocation2 + $0x368] sm:$0xf0] %vm1413_vm1, %v2530_v1  ;;  %v1474_v0 = vpop.permute.xlu1 %1473  ;;  %v1472_v15 = vpop.permute.xlu0 %1471  ;;  %2427 = vmatprep.subr.bf16.mxu1 %v2426_v42 }
 0x1bb   : > { %v1504_v5 = vsel %vm1497_vm7, %v3342_v37, %v1472_v15  ;;  %v1505_v10 = vsel %vm1497_vm7, %v1472_v15, %v1474_v0  ;;  %2429 = vmatpush1.bf16.msra.mxu1 %v2428_v19  ;;  %v2101_v15 = vld [vmem:[%s3476_s3] sm:$0xff] }
 0x1be   : > { %v1494_v55 = vpop.permute.xlu1 %1493  ;;  %v1492_v11 = vpop.permute.xlu0 %1491 }
 0x1bf   : > { %v1513_v25 = vsel %vm1497_vm7, %v3350_v58, %v1492_v11  ;;  %v1514_v6 = vsel %vm1497_vm7, %v1492_v11, %v1494_v55  ;;  %v1670_v48 = vld [vmem:[#allocation2 + $0x360] sm:$0xff] }
 0x1c0   : > { %v1681_v14 = vld [vmem:[#allocation2 + $0x3b8] sm:$0xff]  ;;  %1552 = vst [vmem:[#allocation2 + $0x440] sm:$0xf] %v1513_v25  ;;  %1553 = vst [vmem:[#allocation2 + $0x448] sm:$0xf] %v1514_v6  ;;  %v2458_v61 = vpack.c.bf16 %v1371_v2, %v1670_v48  ;;  %v1812_v16 = vpop.f32.mrb[0].mxu0 }
 0x1c1   : > { %v1671_v7 = vld [vmem:[#allocation2 + $0x368] sm:$0xff]  ;;  %v1814_v37 = vpop.f32.mrb[1].mxu0 }
 0x1c2   : > { %v2456_v47 = vpack.c.bf16 %v1681_v14, %v1671_v7  ;;  %v1496_v21 = vpop.permute.xlu1 %1495  ;;  %v1476_v32 = vpop.permute.xlu0 %1475 }
 0x1c3   : > { %v1515_v38 = vsel %vm1497_vm7, %v1494_v55, %v1496_v21  ;;  %1556 = vst.msk [vmem:[#allocation2 + $0x458] sm:$0xf] %vm1555_vm2, %v1496_v21  ;;  %v1506_v58 = vsel %vm1497_vm7, %v1474_v0, %v1476_v32 }
 0x1c4   : > { %2457 = vmatprep.subr.bf16.mxu0 %v2456_v47  ;;  %1545 = vst.msk [vmem:[#allocation2 + $0x408] sm:$0xff] %vm1497_vm7, %v1476_v32  ;;  %1554 = vst [vmem:[#allocation2 + $0x450] sm:$0xf] %v1515_v38  ;;  %vm2103_vm7 = vcmp.gt.f32.partialorder %v2101_v15, 0.5 }
 0x1c5   : > { %2459 = vmatpush1.bf16.msra.mxu0 %v2458_v61  ;;  %1560 = vst.msk [vmem:[#allocation2 + $0x458] sm:$0xf] %vm1559_vm3, %v2530_v1 }
 0x1c6   : > { %1558 = vst.msk [vmem:[#allocation2 + $0x408] sm:$0xff] %vm1557_vm6, %v2530_v1  ;;  %v2505_v1 = vld [vmem:[%s3474_s1] sm:$0x1] }
 0x1c7   : > { %v1699_v20 = vld [vmem:[#allocation2 + $0x448] sm:$0xf]  ;;  %v1698_v63 = vld [vmem:[#allocation2 + $0x440] sm:$0xf] }
 0x1c8   : > { %v2430_v8 = vpack.c.bf16 %v1699_v20, %v1505_v10  ;;  %v2433_v46 = vpack.c.bf16 %v1698_v63, %v1504_v5  ;;  %v2102_v10 = vld [vmem:[%s3476_s3 + $0x8] sm:$0x3] }
 0x1c9   : > { %vm2104_vm8 = vcmp.gt.f32.partialorder %v2102_v10, 0.5 }
 0x1ca   : > { %2432 = vmatprep.subr.msk.bf16.mxu1 %vm3034_vm10, %v2430_v8 }
 0x1cb   : > { %2435 = vmatpush1.bf16.msk.msra.mxu1 %vm3034_vm10, %v2433_v46  ;;  %v1700_v29 = vld [vmem:[#allocation2 + $0x450] sm:$0xf] }
 0x1cc   : > { %v1701_v24 = vld [vmem:[#allocation2 + $0x458] sm:$0xf]  ;;  %v2463_v31 = vpack.c.bf16 %v1700_v29, %v1506_v58 }
 0x1cd   : > { %v1691_v44 = vld [vmem:[#allocation2 + $0x408] sm:$0xff] }
 0x1ce   : > { %v2460_v17 = vpack.c.bf16 %v1701_v24, %v1691_v44  ;;  %2310 = vmatmul.mubr.msk.f32.vlgmr.msra.gmra.mrb[2].mxu1 %vm1712_vm11, %v2505_v1 }
 0x1d0   : > { %2462 = vmatprep.subr.msk.bf16.mxu0 %vm3034_vm10, %v2460_v17 }
 0x1d1   : > { %2465 = vmatpush1.bf16.msk.msra.mxu0 %vm3034_vm10, %v2463_v31  ;;  %vm2186_vm10 = vcmp.lt.s32.totalorder %v1708_v22, 256 }
 0x1d3   : > { %v1706_v54 = vpop.permute.xlu0 %1705 }
 0x1d4   : > { %2313 = vmatmul.mubr.msk.f32.vlgmr.msra.gmra.mrb[4].mxu0 %vm1712_vm11, %v2505_v1  ;;  %v1711_v60 = vrot.slane %v1706_v54, %v1710_v27 }
 0x1d6   : > { %v1813_v26 = vadd.f32 %v1812_v16, %v1711_v60  ;;  %v1815_v35 = vadd.f32 %v1814_v37, %v1711_v60 }
 0x1d8   : > { %v2115_v33 = vcombine.low %v1813_v26, %v1815_v35 }
 0x1da   : > { %v2125_v39 = vrot.slane %v2115_v33, %v2124_v52 }
 0x22d   : > { %v1883_v40 = vpop.f32.mrb[0].mxu1 }
 0x22e   : > { %v1884_v43 = vadd.f32 %v1883_v40, %v1711_v60  ;;  %v1885_v50 = vpop.f32.mrb[1].mxu1 }
 0x22f   : > { %v1886_v13 = vadd.f32 %v1885_v50, %v1711_v60 }
 0x231   : > { %v2116_v30 = vcombine.low %v1884_v43, %v1886_v13 }
 0x233   : > { %v2132_v41 = vrot.slane %v2116_v30, %v2124_v52 }
 0x235   : > { %v2147_v45 = vcombine.low %v2125_v39, %v2132_v41 }
 0x237   : > { %v2155_v11 = vrot.slane %v2147_v45, %v2124_v52 }
 0x241   : > { %v1954_v51 = vpop.f32.mrb[2].mxu0 }
 0x242   : > { %v1955_v53 = vadd.f32 %v1954_v51, %v1711_v60  ;;  %v1956_v56 = vpop.f32.mrb[3].mxu0 }
 0x243   : > { %v1957_v57 = vadd.f32 %v1956_v56, %v1711_v60 }
 0x245   : > { %v2117_v62 = vcombine.low %v1955_v53, %v1957_v57 }
 0x247   : > { %v2139_v42 = vrot.slane %v2117_v62, %v2124_v52 }
 0x2a1   : > { %v2025_v4 = vpop.f32.mrb[2].mxu1 }
 0x2a2   : > { %v2026_v49 = vadd.f32 %v2025_v4, %v1711_v60  ;;  %v2027_v34 = vpop.f32.mrb[3].mxu1 }
 0x2a3   : > { %v2028_v28 = vadd.f32 %v2027_v34, %v1711_v60 }
 0x2a5   : > { %v2118_v12 = vcombine.low %v2026_v49, %v2028_v28 }
 0x2a7   : > { %v2096_v2 = vpop.f32.mrb[4].mxu0  ;;  %v2146_v19 = vrot.slane %v2118_v12, %v2124_v52 }
 0x2a8   : > { %v2097_v3 = vadd.f32 %v2096_v2, %v1711_v60  ;;  %v2098_v59 = vpop.f32.mrb[5].mxu0 }
 0x2a9   : > { %v2099_v0 = vadd.f32 %v2098_v59, %v1711_v60  ;;  %v2148_v5 = vcombine.low %v2139_v42, %v2146_v19 }
 0x2ab   : > { %v2164_v55 = vcombine.low %v2097_v3, %v2099_v0  ;;  %v2162_v25 = vrot.slane %v2148_v5, %v2124_v52 }
 0x2ad   : > { %v2171_v6 = vrot.slane %v2164_v55, %v2124_v52  ;;  %v2163_v7 = vcombine.low %v2155_v11, %v2162_v25 }
 0x2af   : > { %v2178_v14 = vrot.slane %v2171_v6, %v2124_v52  ;;  %v2181_v48 = vsel %vm2103_vm7, %v2163_v7, 0.0 }
 0x2b0   : > { %2183 = vst [vmem:[%s247_s20] sm:$0xff] %v2181_v48 }
 0x2b1   : > { %v2182_v47 = vsel %vm2104_vm8, %v2178_v14, 0.0 }
 0x2b2   : > { %2188 = vst.msk [vmem:[%s247_s20 + $0x8] sm:$0x3] %vm2186_vm10, %v2182_v47 }
 0x2b3 PF: > { %s16_s19 = sadd.s32 1, %s2528_s19   ;;  %s3480_s17 = smov %s2524_s18 }
 0x2b4   : > { %p13_p5 = scmp.ge.s32.totalorder %s16_s19, 4   ;;  %s3481_s18 = smov %s3483_s2 }
 0x2b6   :  { %15 = sbr.rel (!%p13_p5) target bundleno = 3 (0x3), region = 72 }

</bundles_post_ra>
